<compile_context>
chip_gen: v7x
topology: tpu7x:2x2x1
jax: 0.10.0
libtpu: 0.0.40
codegen_flags: <defaults>
</compile_context>

<pallas_src>
import functools

import jax
import jax.numpy as jnp
from jax import lax
from jax.experimental import pallas as pl
from jax.experimental.pallas import tpu as pltpu

EPS = 1e-5
LANE = 128      # all output-channel / feature dims padded to one MXU lane tile
KS = 5          # conv kernel size
K1_PAD = 128    # conv1 K: 5*5*3 = 75  -> 128
K2_PAD = 256    # conv2 K: 5*5*6 = 150 -> 256
KFC_PAD = 512   # fc1   K: 5*5*16 = 400 -> 512

_CPARAMS = pltpu.CompilerParams(
    dimension_semantics=("arbitrary",),
    vmem_limit_bytes=32 * 1024 * 1024,
)


# ----------------------------------------------------------------------------
# Pallas kernels
# ----------------------------------------------------------------------------
def _matmul_bn_relu_kernel(x_ref, w_ref, g_ref, b_ref, o_ref, *, inv_n):
    """y = relu(batchnorm(x @ w)) over the row (batch*spatial) axis.

    x_ref: [M, K]   bf16   im2col patches (only valid conv-output rows)
    w_ref: [K, 128] bf16   conv weight, rows ordered (kh, kw, cin)
    g/b  : [1, 128] f32    BN gamma / beta (zero-padded columns)
    o_ref: [M, 128] bf16   fused conv -> BN(train) -> ReLU output
    """
    y = jnp.dot(x_ref[...], w_ref[...], preferred_element_type=jnp.float32)
    mean = jnp.sum(y, axis=0, keepdims=True) * inv_n
    cen = y - mean
    var = jnp.sum(cen * cen, axis=0, keepdims=True) * inv_n        # biased, like PyTorch
    scale = lax.rsqrt(var + EPS) * g_ref[...]
    shift = b_ref[...] - mean * scale
    o_ref[...] = jnp.maximum(y * scale + shift, 0.0).astype(o_ref.dtype)


def _fc_block_kernel(x_ref, w1_ref, g1_ref, b1_ref, w2_ref, g2_ref, b2_ref,
                     w3_ref, b3_ref, o_ref, *, inv_b):
    """fc1 + bn3 + relu -> fc2 + bn4 + relu -> fc3 (+bias), all inside one kernel."""

    def bn_relu(y, g, b):
        mean = jnp.sum(y, axis=0, keepdims=True) * inv_b
        cen = y - mean
        var = jnp.sum(cen * cen, axis=0, keepdims=True) * inv_b
        scale = lax.rsqrt(var + EPS) * g
        return jnp.maximum(y * scale + (b - mean * scale), 0.0)

    x = x_ref[...]                                                  # already bf16
    y1 = bn_relu(jnp.dot(x, w1_ref[...], preferred_element_type=jnp.float32),
                 g1_ref[...], b1_ref[...])
    y2 = bn_relu(jnp.dot(y1.astype(jnp.bfloat16), w2_ref[...],
                         preferred_element_type=jnp.float32),
                 g2_ref[...], b2_ref[...])
    o_ref[...] = (jnp.dot(y2.astype(jnp.bfloat16), w3_ref[...],
                          preferred_element_type=jnp.float32) + b3_ref[...])


# ----------------------------------------------------------------------------
# pallas_call wrappers
# ----------------------------------------------------------------------------
def _full_spec(shape):
    return pl.BlockSpec(shape, lambda i: (0,) * len(shape))


def matmul_bn_relu(x, w, gamma, beta):
    M, K = x.shape
    kern = functools.partial(_matmul_bn_relu_kernel, inv_n=1.0 / M)
    # TODO(synk): with grid=(1,) double-buffering of the big blocks is wasted; use
    #             pipeline_mode=pl.Buffered(1) / batch tiling when scaling batch on v7x.
    return pl.pallas_call(
        kern,
        out_shape=jax.ShapeDtypeStruct((M, LANE), jnp.bfloat16),
        grid=(1,),
        in_specs=[_full_spec((M, K)),
                  _full_spec((K, LANE)),
                  _full_spec((1, LANE)),
                  _full_spec((1, LANE))],
        out_specs=_full_spec((M, LANE)),
        compiler_params=_CPARAMS,
    )(x, w, gamma, beta)


def fc_block(h, w1, g1, b1, w2, g2, b2, w3, b3):
    B, K = h.shape
    kern = functools.partial(_fc_block_kernel, inv_b=1.0 / B)
    return pl.pallas_call(
        kern,
        out_shape=jax.ShapeDtypeStruct((B, LANE), jnp.float32),
        grid=(1,),
        in_specs=[_full_spec((B, K)),
                  _full_spec((K, LANE)), _full_spec((1, LANE)), _full_spec((1, LANE)),
                  _full_spec((LANE, LANE)), _full_spec((1, LANE)), _full_spec((1, LANE)),
                  _full_spec((LANE, LANE)), _full_spec((1, LANE))],
        out_specs=_full_spec((B, LANE)),
        compiler_params=_CPARAMS,
    )(h, w1, g1, b1, w2, g2, b2, w3, b3)


# ----------------------------------------------------------------------------
# Glue: layout helpers, parameters, forward
# ----------------------------------------------------------------------------
def _pad2(x, rows, cols):
    return jnp.pad(x, ((0, rows - x.shape[0]), (0, cols - x.shape[1])))


def _im2col_nhwc(x, ho, wo, k_pad):
    """[B,H,W,C] -> bf16 [B*ho*wo, k_pad]; patch channel order (kh, kw, c)."""
    B, _, _, C = x.shape
    cols = [x[:, kh:kh + ho, kw:kw + wo, :] for kh in range(KS) for kw in range(KS)]
    patches = jnp.concatenate(cols, axis=-1).reshape(B * ho * wo, KS * KS * C)
    return jnp.pad(patches, ((0, 0), (0, k_pad - KS * KS * C)))


def _pool2x2(x):
    """2x2 max-pool, stride 2, on [B,H,W,C] (wrapper-side jnp fallback)."""
    B, H, W, C = x.shape
    return x.reshape(B, H // 2, 2, W // 2, 2, C).max(axis=(2, 4))


def init_raw_params(key):
    """Deterministic parameters in PyTorch layouts."""
    ks = iter(jax.random.split(key, 16))
    u = lambda k, shape, s: jax.random.uniform(k, shape, jnp.float32, -s, s)
    n = lambda k, shape, s: s * jax.random.normal(k, shape, jnp.float32)
    p = {}
    p["conv1_w"] = u(next(ks), (6, 3, 5, 5), 0.1)
    p["conv2_w"] = u(next(ks), (16, 6, 5, 5), 0.1)
    p["fc1_w"] = u(next(ks), (120, 400), 0.05)      # PyTorch Linear: [out, in]
    p["fc2_w"] = u(next(ks), (84, 120), 0.05)
    p["fc3_w"] = u(next(ks), (10, 84), 0.05)
    p["fc3_b"] = u(next(ks), (10,), 0.05)
    for i, c in zip((1, 2, 3, 4), (6, 16, 120, 84)):
        p[f"bn{i}_g"] = 1.0 + n(next(ks), (c,), 0.1)
        p[f"bn{i}_b"] = n(next(ks), (c,), 0.1)
    # conv1/conv2/fc1/fc2 biases intentionally omitted: the train-mode BatchNorm that
    # immediately follows each of them cancels a per-channel bias exactly.
    return p


def prepare_params(raw):
    """One-time (outside jit) transpose / pad / bf16 cast of all weights."""
    p = {}
    # conv weights -> rows ordered (kh, kw, cin) to match the im2col packing
    w1 = jnp.transpose(raw["conv1_w"], (2, 3, 1, 0)).reshape(KS * KS * 3, 6)
    p["conv1_w"] = _pad2(w1, K1_PAD, LANE).astype(jnp.bfloat16)
    w2 = jnp.transpose(raw["conv2_w"], (2, 3, 1, 0)).reshape(KS * KS * 6, 16)
    p["conv2_w"] = _pad2(w2, K2_PAD, LANE).astype(jnp.bfloat16)
    # fc1: rows re-ordered to the (h, w, c) flatten order used by the wrapper; K = 400->512
    f1 = jnp.transpose(raw["fc1_w"].reshape(120, 16, 5, 5), (2, 3, 1, 0)).reshape(400, 120)
    p["fc1_w"] = _pad2(f1, KFC_PAD, LANE).astype(jnp.bfloat16)
    p["fc2_w"] = _pad2(raw["fc2_w"].T, LANE, LANE).astype(jnp.bfloat16)
    p["fc3_w"] = _pad2(raw["fc3_w"].T, LANE, LANE).astype(jnp.bfloat16)
    p["fc3_b"] = _pad2(raw["fc3_b"].reshape(1, -1), 1, LANE)
    for i in (1, 2, 3, 4):
        p[f"bn{i}_g"] = _pad2(raw[f"bn{i}_g"].reshape(1, -1), 1, LANE)
        p[f"bn{i}_b"] = _pad2(raw[f"bn{i}_b"].reshape(1, -1), 1, LANE)
    return p


def net_forward(p, x_nchw):
    B = x_nchw.shape[0]

    # NCHW (PyTorch) -> NHWC, single bf16 cast for all MXU operands downstream.
    x = jnp.transpose(x_nchw, (0, 2, 3, 1)).astype(jnp.bfloat16)          # [B,32,32,3]

    # conv1 + bn1 + relu as ONE fused matmul kernel (K = 75 -> 128), then 2x2 pool.
    x1 = _im2col_nhwc(x, 28, 28, K1_PAD)                                  # [B*784,128] bf16
    y1 = matmul_bn_relu(x1, p["conv1_w"], p["bn1_g"], p["bn1_b"])         # [B*784,128] bf16
    y1 = _pool2x2(y1.reshape(B, 28, 28, LANE)[..., :6])                   # [B,14,14,6]

    # conv2 + bn2 + relu as ONE fused matmul kernel (K = 150 -> 256), then 2x2 pool.
    x2 = _im2col_nhwc(y1, 10, 10, K2_PAD)                                 # [B*100,256] bf16
    y2 = matmul_bn_relu(x2, p["conv2_w"], p["bn2_g"], p["bn2_b"])         # [B*100,128] bf16
    y2 = _pool2x2(y2.reshape(B, 10, 10, LANE)[..., :16])                  # [B,5,5,16]

    # flatten in (h, w, c) order (fc1_w rows pre-permuted to match); K = 400 -> 512.
    h = jnp.pad(y2.reshape(B, 400), ((0, 0), (0, KFC_PAD - 400)))         # [B,512] bf16

    # fc1+bn3+relu, fc2+bn4+relu, fc3(+bias) fused into a single kernel.
    out = fc_block(h, p["fc1_w"], p["bn3_g"], p["bn3_b"],
                   p["fc2_w"], p["bn4_g"], p["bn4_b"],
                   p["fc3_w"], p["fc3_b"])                                # [B,128] f32
    return out[:, :10]                                                    # [B,10]


if __name__ == "__main__":
    key = jax.random.PRNGKey(0)
    k_param, k_x = jax.random.split(key)
    raw = init_raw_params(k_param)
    params = prepare_params(raw)                     # pre-pad/transpose/bf16, outside jit
    x = jax.random.normal(k_x, (2, 3, 32, 32), jnp.float32)   # NCHW, like PyTorch

    out = jax.jit(net_forward)(params, x)
    out = jax.block_until_ready(out)
    assert out.shape == (2, 10) and out.dtype == jnp.float32
    assert bool(jnp.all(jnp.isfinite(out)))
    print("KERNEL_OK")
</pallas_src>

<mosaic_0001>
module attributes {stable_mosaic.version = 11 : i64} {
  func.func @_matmul_bn_relu_kernel(%arg0: i32, %arg1: memref<1568x128xbf16, #tpu.memory_space<vmem>>, %arg2: memref<128x128xbf16, #tpu.memory_space<vmem>>, %arg3: memref<1x128xf32, #tpu.memory_space<vmem>>, %arg4: memref<1x128xf32, #tpu.memory_space<vmem>>, %arg5: memref<1568x128xbf16, #tpu.memory_space<vmem>>) attributes {dimension_semantics = [#tpu.dimension_semantics<arbitrary>], iteration_bounds = array<i64: 1>, scalar_prefetch = 0 : i64, scratch_operands = 0 : i64, tpu.core_type = #tpu.core_type<tc>, window_params = [{pipeline_mode = #tpu.pipeline_mode<synchronous>, transform_indices = @transform_0, window_bounds = array<i64: 1568, 128>}, {pipeline_mode = #tpu.pipeline_mode<synchronous>, transform_indices = @transform_1, window_bounds = array<i64: 128, 128>}, {pipeline_mode = #tpu.pipeline_mode<synchronous>, transform_indices = @transform_2, window_bounds = array<i64: 1, 128>}, {pipeline_mode = #tpu.pipeline_mode<synchronous>, transform_indices = @transform_3, window_bounds = array<i64: 1, 128>}, {pipeline_mode = #tpu.pipeline_mode<synchronous>, transform_indices = @transform_4, window_bounds = array<i64: 1568, 128>}]} {
    %c0 = arith.constant 0 : index
    %c0_0 = arith.constant 0 : index
    %0 = vector.load %arg1[%c0, %c0_0] : memref<1568x128xbf16, #tpu.memory_space<vmem>>, vector<1568x128xbf16>
    %c0_1 = arith.constant 0 : index
    %c0_2 = arith.constant 0 : index
    %1 = vector.load %arg2[%c0_1, %c0_2] : memref<128x128xbf16, #tpu.memory_space<vmem>>, vector<128x128xbf16>
    %cst = arith.constant dense<0.000000e+00> : vector<1568x128xf32>
    %2 = tpu.matmul %0, %1, %cst {dimension_numbers = #tpu.dot_dimension_numbers<[1], [0], [0], [1], [0, 0, 1, 1], [], []>} : vector<1568x128xbf16>, vector<128x128xbf16>, vector<1568x128xf32> -> vector<1568x128xf32>
    %cst_3 = arith.constant dense<0.000000e+00> : vector<128xf32>
    %3 = vector.multi_reduction <add>, %2, %cst_3 [0] : vector<1568x128xf32> to vector<128xf32>
    %4 = vector.shape_cast %3 : vector<128xf32> to vector<1x128xf32>
    %cst_4 = arith.constant 6.37755089E-4 : f32
    %5 = vector.broadcast %cst_4 : f32 to vector<1x128xf32>
    %6 = arith.mulf %4, %5 : vector<1x128xf32>
    %7 = vector.broadcast %6 : vector<1x128xf32> to vector<1568x128xf32>
    %8 = arith.subf %2, %7 : vector<1568x128xf32>
    %9 = arith.mulf %8, %8 : vector<1568x128xf32>
    %cst_5 = arith.constant dense<0.000000e+00> : vector<128xf32>
    %10 = vector.multi_reduction <add>, %9, %cst_5 [0] : vector<1568x128xf32> to vector<128xf32>
    %11 = vector.shape_cast %10 : vector<128xf32> to vector<1x128xf32>
    %cst_6 = arith.constant 6.37755089E-4 : f32
    %12 = vector.broadcast %cst_6 : f32 to vector<1x128xf32>
    %13 = arith.mulf %11, %12 : vector<1x128xf32>
    %cst_7 = arith.constant 9.99999974E-6 : f32
    %14 = vector.broadcast %cst_7 : f32 to vector<1x128xf32>
    %15 = arith.addf %13, %14 : vector<1x128xf32>
    %16 = math.rsqrt %15 : vector<1x128xf32>
    %c0_8 = arith.constant 0 : index
    %c0_9 = arith.constant 0 : index
    %17 = vector.load %arg3[%c0_8, %c0_9] : memref<1x128xf32, #tpu.memory_space<vmem>>, vector<1x128xf32>
    %18 = arith.mulf %16, %17 : vector<1x128xf32>
    %c0_10 = arith.constant 0 : index
    %c0_11 = arith.constant 0 : index
    %19 = vector.load %arg4[%c0_10, %c0_11] : memref<1x128xf32, #tpu.memory_space<vmem>>, vector<1x128xf32>
    %20 = arith.mulf %6, %18 : vector<1x128xf32>
    %21 = arith.subf %19, %20 : vector<1x128xf32>
    %22 = vector.broadcast %18 : vector<1x128xf32> to vector<1568x128xf32>
    %23 = arith.mulf %2, %22 : vector<1568x128xf32>
    %24 = vector.broadcast %21 : vector<1x128xf32> to vector<1568x128xf32>
    %25 = arith.addf %23, %24 : vector<1568x128xf32>
    %cst_12 = arith.constant 0.000000e+00 : f32
    %26 = vector.broadcast %cst_12 : f32 to vector<1568x128xf32>
    %27 = arith.maximumf %25, %26 : vector<1568x128xf32>
    %28 = arith.truncf %27 : vector<1568x128xf32> to vector<1568x128xbf16>
    %c0_13 = arith.constant 0 : index
    %c0_14 = arith.constant 0 : index
    %29 = vector.load %arg5[%c0_13, %c0_14] : memref<1568x128xbf16, #tpu.memory_space<vmem>>, vector<1568x128xbf16>
    tpu.vector_store %arg5[%c0_13, %c0_14], %28 {strides = array<i32>} : memref<1568x128xbf16, #tpu.memory_space<vmem>>, vector<1568x128xbf16>,
    return
  }
  func.func @transform_0(%arg0: i32) -> (i32, i32) {
    %c0_i32 = arith.constant 0 : i32
    %c0_i32_0 = arith.constant 0 : i32
    %c0_i32_1 = arith.constant 0 : i32
    return %c0_i32, %c0_i32_0 : i32, i32
  }
  func.func @transform_1(%arg0: i32) -> (i32, i32) {
    %c0_i32 = arith.constant 0 : i32
    %c0_i32_0 = arith.constant 0 : i32
    %c0_i32_1 = arith.constant 0 : i32
    return %c0_i32, %c0_i32_0 : i32, i32
  }
  func.func @transform_2(%arg0: i32) -> (i32, i32) {
    %c0_i32 = arith.constant 0 : i32
    %c0_i32_0 = arith.constant 0 : i32
    %c0_i32_1 = arith.constant 0 : i32
    return %c0_i32, %c0_i32_0 : i32, i32
  }
  func.func @transform_3(%arg0: i32) -> (i32, i32) {
    %c0_i32 = arith.constant 0 : i32
    %c0_i32_0 = arith.constant 0 : i32
    %c0_i32_1 = arith.constant 0 : i32
    return %c0_i32, %c0_i32_0 : i32, i32
  }
  func.func @transform_4(%arg0: i32) -> (i32, i32) {
    %c0_i32 = arith.constant 0 : i32
    %c0_i32_0 = arith.constant 0 : i32
    %c0_i32_1 = arith.constant 0 : i32
    return %c0_i32, %c0_i32_0 : i32, i32
  }
}

module attributes {stable_mosaic.version = 11 : i64} {
  func.func @_matmul_bn_relu_kernel(%arg0: i32, %arg1: memref<200x256xbf16, #tpu.memory_space<vmem>>, %arg2: memref<256x128xbf16, #tpu.memory_space<vmem>>, %arg3: memref<1x128xf32, #tpu.memory_space<vmem>>, %arg4: memref<1x128xf32, #tpu.memory_space<vmem>>, %arg5: memref<200x128xbf16, #tpu.memory_space<vmem>>) attributes {dimension_semantics = [#tpu.dimension_semantics<arbitrary>], iteration_bounds = array<i64: 1>, scalar_prefetch = 0 : i64, scratch_operands = 0 : i64, tpu.core_type = #tpu.core_type<tc>, window_params = [{pipeline_mode = #tpu.pipeline_mode<synchronous>, transform_indices = @transform_0, window_bounds = array<i64: 200, 256>}, {pipeline_mode = #tpu.pipeline_mode<synchronous>, transform_indices = @transform_1, window_bounds = array<i64: 256, 128>}, {pipeline_mode = #tpu.pipeline_mode<synchronous>, transform_indices = @transform_2, window_bounds = array<i64: 1, 128>}, {pipeline_mode = #tpu.pipeline_mode<synchronous>, transform_indices = @transform_3, window_bounds = array<i64: 1, 128>}, {pipeline_mode = #tpu.pipeline_mode<synchronous>, transform_indices = @transform_4, window_bounds = array<i64: 200, 128>}]} {
    %c0 = arith.constant 0 : index
    %c0_0 = arith.constant 0 : index
    %0 = vector.load %arg1[%c0, %c0_0] : memref<200x256xbf16, #tpu.memory_space<vmem>>, vector<200x256xbf16>
    %c0_1 = arith.constant 0 : index
    %c0_2 = arith.constant 0 : index
    %1 = vector.load %arg2[%c0_1, %c0_2] : memref<256x128xbf16, #tpu.memory_space<vmem>>, vector<256x128xbf16>
    %cst = arith.constant dense<0.000000e+00> : vector<200x128xf32>
    %2 = tpu.matmul %0, %1, %cst {dimension_numbers = #tpu.dot_dimension_numbers<[1], [0], [0], [1], [0, 0, 1, 1], [], []>} : vector<200x256xbf16>, vector<256x128xbf16>, vector<200x128xf32> -> vector<200x128xf32>
    %cst_3 = arith.constant dense<0.000000e+00> : vector<128xf32>
    %3 = vector.multi_reduction <add>, %2, %cst_3 [0] : vector<200x128xf32> to vector<128xf32>
    %4 = vector.shape_cast %3 : vector<128xf32> to vector<1x128xf32>
    %cst_4 = arith.constant 5.000000e-03 : f32
    %5 = vector.broadcast %cst_4 : f32 to vector<1x128xf32>
    %6 = arith.mulf %4, %5 : vector<1x128xf32>
    %7 = vector.broadcast %6 : vector<1x128xf32> to vector<200x128xf32>
    %8 = arith.subf %2, %7 : vector<200x128xf32>
    %9 = arith.mulf %8, %8 : vector<200x128xf32>
    %cst_5 = arith.constant dense<0.000000e+00> : vector<128xf32>
    %10 = vector.multi_reduction <add>, %9, %cst_5 [0] : vector<200x128xf32> to vector<128xf32>
    %11 = vector.shape_cast %10 : vector<128xf32> to vector<1x128xf32>
    %cst_6 = arith.constant 5.000000e-03 : f32
    %12 = vector.broadcast %cst_6 : f32 to vector<1x128xf32>
    %13 = arith.mulf %11, %12 : vector<1x128xf32>
    %cst_7 = arith.constant 9.99999974E-6 : f32
    %14 = vector.broadcast %cst_7 : f32 to vector<1x128xf32>
    %15 = arith.addf %13, %14 : vector<1x128xf32>
    %16 = math.rsqrt %15 : vector<1x128xf32>
    %c0_8 = arith.constant 0 : index
    %c0_9 = arith.constant 0 : index
    %17 = vector.load %arg3[%c0_8, %c0_9] : memref<1x128xf32, #tpu.memory_space<vmem>>, vector<1x128xf32>
    %18 = arith.mulf %16, %17 : vector<1x128xf32>
    %c0_10 = arith.constant 0 : index
    %c0_11 = arith.constant 0 : index
    %19 = vector.load %arg4[%c0_10, %c0_11] : memref<1x128xf32, #tpu.memory_space<vmem>>, vector<1x128xf32>
    %20 = arith.mulf %6, %18 : vector<1x128xf32>
    %21 = arith.subf %19, %20 : vector<1x128xf32>
    %22 = vector.broadcast %18 : vector<1x128xf32> to vector<200x128xf32>
    %23 = arith.mulf %2, %22 : vector<200x128xf32>
    %24 = vector.broadcast %21 : vector<1x128xf32> to vector<200x128xf32>
    %25 = arith.addf %23, %24 : vector<200x128xf32>
    %cst_12 = arith.constant 0.000000e+00 : f32
    %26 = vector.broadcast %cst_12 : f32 to vector<200x128xf32>
    %27 = arith.maximumf %25, %26 : vector<200x128xf32>
    %28 = arith.truncf %27 : vector<200x128xf32> to vector<200x128xbf16>
    %c0_13 = arith.constant 0 : index
    %c0_14 = arith.constant 0 : index
    %29 = vector.load %arg5[%c0_13, %c0_14] : memref<200x128xbf16, #tpu.memory_space<vmem>>, vector<200x128xbf16>
    tpu.vector_store %arg5[%c0_13, %c0_14], %28 {strides = array<i32>} : memref<200x128xbf16, #tpu.memory_space<vmem>>, vector<200x128xbf16>,
    return
  }
  func.func @transform_0(%arg0: i32) -> (i32, i32) {
    %c0_i32 = arith.constant 0 : i32
    %c0_i32_0 = arith.constant 0 : i32
    %c0_i32_1 = arith.constant 0 : i32
    return %c0_i32, %c0_i32_0 : i32, i32
  }
  func.func @transform_1(%arg0: i32) -> (i32, i32) {
    %c0_i32 = arith.constant 0 : i32
    %c0_i32_0 = arith.constant 0 : i32
    %c0_i32_1 = arith.constant 0 : i32
    return %c0_i32, %c0_i32_0 : i32, i32
  }
  func.func @transform_2(%arg0: i32) -> (i32, i32) {
    %c0_i32 = arith.constant 0 : i32
    %c0_i32_0 = arith.constant 0 : i32
    %c0_i32_1 = arith.constant 0 : i32
    return %c0_i32, %c0_i32_0 : i32, i32
  }
  func.func @transform_3(%arg0: i32) -> (i32, i32) {
    %c0_i32 = arith.constant 0 : i32
    %c0_i32_0 = arith.constant 0 : i32
    %c0_i32_1 = arith.constant 0 : i32
    return %c0_i32, %c0_i32_0 : i32, i32
  }
  func.func @transform_4(%arg0: i32) -> (i32, i32) {
    %c0_i32 = arith.constant 0 : i32
    %c0_i32_0 = arith.constant 0 : i32
    %c0_i32_1 = arith.constant 0 : i32
    return %c0_i32, %c0_i32_0 : i32, i32
  }
}

module attributes {stable_mosaic.version = 11 : i64} {
  func.func @_fc_block_kernel(%arg0: i32, %arg1: memref<2x512xbf16, #tpu.memory_space<vmem>>, %arg2: memref<512x128xbf16, #tpu.memory_space<vmem>>, %arg3: memref<1x128xf32, #tpu.memory_space<vmem>>, %arg4: memref<1x128xf32, #tpu.memory_space<vmem>>, %arg5: memref<128x128xbf16, #tpu.memory_space<vmem>>, %arg6: memref<1x128xf32, #tpu.memory_space<vmem>>, %arg7: memref<1x128xf32, #tpu.memory_space<vmem>>, %arg8: memref<128x128xbf16, #tpu.memory_space<vmem>>, %arg9: memref<1x128xf32, #tpu.memory_space<vmem>>, %arg10: memref<2x128xf32, #tpu.memory_space<vmem>>) attributes {dimension_semantics = [#tpu.dimension_semantics<arbitrary>], iteration_bounds = array<i64: 1>, scalar_prefetch = 0 : i64, scratch_operands = 0 : i64, tpu.core_type = #tpu.core_type<tc>, window_params = [{pipeline_mode = #tpu.pipeline_mode<synchronous>, transform_indices = @transform_0, window_bounds = array<i64: 2, 512>}, {pipeline_mode = #tpu.pipeline_mode<synchronous>, transform_indices = @transform_1, window_bounds = array<i64: 512, 128>}, {pipeline_mode = #tpu.pipeline_mode<synchronous>, transform_indices = @transform_2, window_bounds = array<i64: 1, 128>}, {pipeline_mode = #tpu.pipeline_mode<synchronous>, transform_indices = @transform_3, window_bounds = array<i64: 1, 128>}, {pipeline_mode = #tpu.pipeline_mode<synchronous>, transform_indices = @transform_4, window_bounds = array<i64: 128, 128>}, {pipeline_mode = #tpu.pipeline_mode<synchronous>, transform_indices = @transform_5, window_bounds = array<i64: 1, 128>}, {pipeline_mode = #tpu.pipeline_mode<synchronous>, transform_indices = @transform_6, window_bounds = array<i64: 1, 128>}, {pipeline_mode = #tpu.pipeline_mode<synchronous>, transform_indices = @transform_7, window_bounds = array<i64: 128, 128>}, {pipeline_mode = #tpu.pipeline_mode<synchronous>, transform_indices = @transform_8, window_bounds = array<i64: 1, 128>}, {pipeline_mode = #tpu.pipeline_mode<synchronous>, transform_indices = @transform_9, window_bounds = array<i64: 2, 128>}]} {
    %c0 = arith.constant 0 : index
    %c0_0 = arith.constant 0 : index
    %0 = vector.load %arg1[%c0, %c0_0] : memref<2x512xbf16, #tpu.memory_space<vmem>>, vector<2x512xbf16>
    %c0_1 = arith.constant 0 : index
    %c0_2 = arith.constant 0 : index
    %1 = vector.load %arg2[%c0_1, %c0_2] : memref<512x128xbf16, #tpu.memory_space<vmem>>, vector<512x128xbf16>
    %cst = arith.constant dense<0.000000e+00> : vector<2x128xf32>
    %2 = tpu.matmul %0, %1, %cst {dimension_numbers = #tpu.dot_dimension_numbers<[1], [0], [0], [1], [0, 0, 1, 1], [], []>} : vector<2x512xbf16>, vector<512x128xbf16>, vector<2x128xf32> -> vector<2x128xf32>
    %c0_3 = arith.constant 0 : index
    %c0_4 = arith.constant 0 : index
    %3 = vector.load %arg3[%c0_3, %c0_4] : memref<1x128xf32, #tpu.memory_space<vmem>>, vector<1x128xf32>
    %c0_5 = arith.constant 0 : index
    %c0_6 = arith.constant 0 : index
    %4 = vector.load %arg4[%c0_5, %c0_6] : memref<1x128xf32, #tpu.memory_space<vmem>>, vector<1x128xf32>
    %cst_7 = arith.constant dense<0.000000e+00> : vector<128xf32>
    %5 = vector.multi_reduction <add>, %2, %cst_7 [0] : vector<2x128xf32> to vector<128xf32>
    %6 = vector.shape_cast %5 : vector<128xf32> to vector<1x128xf32>
    %cst_8 = arith.constant 5.000000e-01 : f32
    %7 = vector.broadcast %cst_8 : f32 to vector<1x128xf32>
    %8 = arith.mulf %6, %7 : vector<1x128xf32>
    %9 = vector.broadcast %8 : vector<1x128xf32> to vector<2x128xf32>
    %10 = arith.subf %2, %9 : vector<2x128xf32>
    %11 = arith.mulf %10, %10 : vector<2x128xf32>
    %cst_9 = arith.constant dense<0.000000e+00> : vector<128xf32>
    %12 = vector.multi_reduction <add>, %11, %cst_9 [0] : vector<2x128xf32> to vector<128xf32>
    %13 = vector.shape_cast %12 : vector<128xf32> to vector<1x128xf32>
    %cst_10 = arith.constant 5.000000e-01 : f32
    %14 = vector.broadcast %cst_10 : f32 to vector<1x128xf32>
    %15 = arith.mulf %13, %14 : vector<1x128xf32>
    %cst_11 = arith.constant 9.99999974E-6 : f32
    %16 = vector.broadcast %cst_11 : f32 to vector<1x128xf32>
    %17 = arith.addf %15, %16 : vector<1x128xf32>
    %18 = math.rsqrt %17 : vector<1x128xf32>
    %19 = arith.mulf %18, %3 : vector<1x128xf32>
    %20 = vector.broadcast %19 : vector<1x128xf32> to vector<2x128xf32>
    %21 = arith.mulf %2, %20 : vector<2x128xf32>
    %22 = arith.mulf %8, %19 : vector<1x128xf32>
    %23 = arith.subf %4, %22 : vector<1x128xf32>
    %24 = vector.broadcast %23 : vector<1x128xf32> to vector<2x128xf32>
    %25 = arith.addf %21, %24 : vector<2x128xf32>
    %cst_12 = arith.constant 0.000000e+00 : f32
    %26 = vector.broadcast %cst_12 : f32 to vector<2x128xf32>
    %27 = arith.maximumf %25, %26 : vector<2x128xf32>
    %28 = arith.truncf %27 : vector<2x128xf32> to vector<2x128xbf16>
    %c0_13 = arith.constant 0 : index
    %c0_14 = arith.constant 0 : index
    %29 = vector.load %arg5[%c0_13, %c0_14] : memref<128x128xbf16, #tpu.memory_space<vmem>>, vector<128x128xbf16>
    %cst_15 = arith.constant dense<0.000000e+00> : vector<2x128xf32>
    %30 = tpu.matmul %28, %29, %cst_15 {dimension_numbers = #tpu.dot_dimension_numbers<[1], [0], [0], [1], [0, 0, 1, 1], [], []>} : vector<2x128xbf16>, vector<128x128xbf16>, vector<2x128xf32> -> vector<2x128xf32>
    %c0_16 = arith.constant 0 : index
    %c0_17 = arith.constant 0 : index
    %31 = vector.load %arg6[%c0_16, %c0_17] : memref<1x128xf32, #tpu.memory_space<vmem>>, vector<1x128xf32>
    %c0_18 = arith.constant 0 : index
    %c0_19 = arith.constant 0 : index
    %32 = vector.load %arg7[%c0_18, %c0_19] : memref<1x128xf32, #tpu.memory_space<vmem>>, vector<1x128xf32>
    %cst_20 = arith.constant dense<0.000000e+00> : vector<128xf32>
    %33 = vector.multi_reduction <add>, %30, %cst_20 [0] : vector<2x128xf32> to vector<128xf32>
    %34 = vector.shape_cast %33 : vector<128xf32> to vector<1x128xf32>
    %cst_21 = arith.constant 5.000000e-01 : f32
    %35 = vector.broadcast %cst_21 : f32 to vector<1x128xf32>
    %36 = arith.mulf %34, %35 : vector<1x128xf32>
    %37 = vector.broadcast %36 : vector<1x128xf32> to vector<2x128xf32>
    %38 = arith.subf %30, %37 : vector<2x128xf32>
    %39 = arith.mulf %38, %38 : vector<2x128xf32>
    %cst_22 = arith.constant dense<0.000000e+00> : vector<128xf32>
    %40 = vector.multi_reduction <add>, %39, %cst_22 [0] : vector<2x128xf32> to vector<128xf32>
    %41 = vector.shape_cast %40 : vector<128xf32> to vector<1x128xf32>
    %cst_23 = arith.constant 5.000000e-01 : f32
    %42 = vector.broadcast %cst_23 : f32 to vector<1x128xf32>
    %43 = arith.mulf %41, %42 : vector<1x128xf32>
    %cst_24 = arith.constant 9.99999974E-6 : f32
    %44 = vector.broadcast %cst_24 : f32 to vector<1x128xf32>
    %45 = arith.addf %43, %44 : vector<1x128xf32>
    %46 = math.rsqrt %45 : vector<1x128xf32>
    %47 = arith.mulf %46, %31 : vector<1x128xf32>
    %48 = vector.broadcast %47 : vector<1x128xf32> to vector<2x128xf32>
    %49 = arith.mulf %30, %48 : vector<2x128xf32>
    %50 = arith.mulf %36, %47 : vector<1x128xf32>
    %51 = arith.subf %32, %50 : vector<1x128xf32>
    %52 = vector.broadcast %51 : vector<1x128xf32> to vector<2x128xf32>
    %53 = arith.addf %49, %52 : vector<2x128xf32>
    %cst_25 = arith.constant 0.000000e+00 : f32
    %54 = vector.broadcast %cst_25 : f32 to vector<2x128xf32>
    %55 = arith.maximumf %53, %54 : vector<2x128xf32>
    %56 = arith.truncf %55 : vector<2x128xf32> to vector<2x128xbf16>
    %c0_26 = arith.constant 0 : index
    %c0_27 = arith.constant 0 : index
    %57 = vector.load %arg8[%c0_26, %c0_27] : memref<128x128xbf16, #tpu.memory_space<vmem>>, vector<128x128xbf16>
    %cst_28 = arith.constant dense<0.000000e+00> : vector<2x128xf32>
    %58 = tpu.matmul %56, %57, %cst_28 {dimension_numbers = #tpu.dot_dimension_numbers<[1], [0], [0], [1], [0, 0, 1, 1], [], []>} : vector<2x128xbf16>, vector<128x128xbf16>, vector<2x128xf32> -> vector<2x128xf32>
    %c0_29 = arith.constant 0 : index
    %c0_30 = arith.constant 0 : index
    %59 = vector.load %arg9[%c0_29, %c0_30] : memref<1x128xf32, #tpu.memory_space<vmem>>, vector<1x128xf32>
    %60 = vector.broadcast %59 : vector<1x128xf32> to vector<2x128xf32>
    %61 = arith.addf %58, %60 : vector<2x128xf32>
    %c0_31 = arith.constant 0 : index
    %c0_32 = arith.constant 0 : index
    %62 = vector.load %arg10[%c0_31, %c0_32] : memref<2x128xf32, #tpu.memory_space<vmem>>, vector<2x128xf32>
    tpu.vector_store %arg10[%c0_31, %c0_32], %61 {strides = array<i32>} : memref<2x128xf32, #tpu.memory_space<vmem>>, vector<2x128xf32>,
    return
  }
  func.func @transform_0(%arg0: i32) -> (i32, i32) {
    %c0_i32 = arith.constant 0 : i32
    %c0_i32_0 = arith.constant 0 : i32
    %c0_i32_1 = arith.constant 0 : i32
    return %c0_i32, %c0_i32_0 : i32, i32
  }
  func.func @transform_1(%arg0: i32) -> (i32, i32) {
    %c0_i32 = arith.constant 0 : i32
    %c0_i32_0 = arith.constant 0 : i32
    %c0_i32_1 = arith.constant 0 : i32
    return %c0_i32, %c0_i32_0 : i32, i32
  }
  func.func @transform_2(%arg0: i32) -> (i32, i32) {
    %c0_i32 = arith.constant 0 : i32
    %c0_i32_0 = arith.constant 0 : i32
    %c0_i32_1 = arith.constant 0 : i32
    return %c0_i32, %c0_i32_0 : i32, i32
  }
  func.func @transform_3(%arg0: i32) -> (i32, i32) {
    %c0_i32 = arith.constant 0 : i32
    %c0_i32_0 = arith.constant 0 : i32
    %c0_i32_1 = arith.constant 0 : i32
    return %c0_i32, %c0_i32_0 : i32, i32
  }
  func.func @transform_4(%arg0: i32) -> (i32, i32) {
    %c0_i32 = arith.constant 0 : i32
    %c0_i32_0 = arith.constant 0 : i32
    %c0_i32_1 = arith.constant 0 : i32
    return %c0_i32, %c0_i32_0 : i32, i32
  }
  func.func @transform_5(%arg0: i32) -> (i32, i32) {
    %c0_i32 = arith.constant 0 : i32
    %c0_i32_0 = arith.constant 0 : i32
    %c0_i32_1 = arith.constant 0 : i32
    return %c0_i32, %c0_i32_0 : i32, i32
  }
  func.func @transform_6(%arg0: i32) -> (i32, i32) {
    %c0_i32 = arith.constant 0 : i32
    %c0_i32_0 = arith.constant 0 : i32
    %c0_i32_1 = arith.constant 0 : i32
    return %c0_i32, %c0_i32_0 : i32, i32
  }
  func.func @transform_7(%arg0: i32) -> (i32, i32) {
    %c0_i32 = arith.constant 0 : i32
    %c0_i32_0 = arith.constant 0 : i32
    %c0_i32_1 = arith.constant 0 : i32
    return %c0_i32, %c0_i32_0 : i32, i32
  }
  func.func @transform_8(%arg0: i32) -> (i32, i32) {
    %c0_i32 = arith.constant 0 : i32
    %c0_i32_0 = arith.constant 0 : i32
    %c0_i32_1 = arith.constant 0 : i32
    return %c0_i32, %c0_i32_0 : i32, i32
  }
  func.func @transform_9(%arg0: i32) -> (i32, i32) {
    %c0_i32 = arith.constant 0 : i32
    %c0_i32_0 = arith.constant 0 : i32
    %c0_i32_1 = arith.constant 0 : i32
    return %c0_i32, %c0_i32_0 : i32, i32
  }
}

</mosaic_0001>

<bundles_post_ra>
// kernel: net_forward.3
= control target key start
LH: loop header
LB: loop body
LE: loop exit
PB: predicated region body
PF: predicated region fallthrough
CT: control target
= control target key end

     0   :  { %s9397_s1 = inlined_call_operand.vmem [shape: bf16[128,128], index: 1, kind: input, shape index: {}]   ;;  %s9398_s0 = inlined_call_operand.vmem [shape: bf16[1568,128], index: 0, kind: input, shape index: {}]   ;;  %s9399_s2 = inlined_call_operand.vmem [shape: f32[1,128], index: 2, kind: input, shape index: {}]   ;;  %s9400_s3 = inlined_call_operand.vmem [shape: f32[1,128], index: 3, kind: input, shape index: {}]   ;;  %s9401_s4 = inlined_call_operand.vmem [shape: bf16[1568,128], index: 4, kind: output, shape index: {}]  }
   0x1   :  { %v5487_v0 = vld [vmem:[%s9397_s1] sm:$0xff]   ;;  %v5488_v1 = vld [vmem:[%s9397_s1 + $0x8] sm:$0xff]   ;;  %v5489_v2 = vld [vmem:[%s9397_s1 + $0x10] sm:$0xff]  }
   0x2   :  { %5259 = vmatprep.subr.bf16.mxu0 %v5487_v0  ;;  %5471 = vmatprep.subr.bf16.mxu1 %v5487_v0  ;;  %v5490_v3 = vld [vmem:[%s9397_s1 + $0x18] sm:$0xff]   ;;  %v5495_v4 = vld [vmem:[%s9398_s0] sm:$0xff]   ;;  %v5492_v6 = vld [vmem:[%s9397_s1 + $0x28] sm:$0xff]  }
   0x3   :  { %5260 = vmatpush3.bf16.msra.mxu0 %v5487_v0  ;;  %5479 = vmatpush3.bf16.msra.mxu1 %v5487_v0  ;;  %v5491_v5 = vld [vmem:[%s9397_s1 + $0x20] sm:$0xff]   ;;  %v5493_v7 = vld [vmem:[%s9397_s1 + $0x30] sm:$0xff]   ;;  %v5494_v8 = vld [vmem:[%s9397_s1 + $0x38] sm:$0xff]  }
   0x4   :  { %5261 = vmatprep.subr.bf16.mxu0 %v5488_v1  ;;  %5472 = vmatprep.subr.bf16.mxu1 %v5488_v1  ;;  %v5496_v9 = vld [vmem:[%s9398_s0 + $0x8] sm:$0xff]   ;;  %v5497_v10 = vld [vmem:[%s9398_s0 + $0x10] sm:$0xff]   ;;  %v5498_v11 = vld [vmem:[%s9398_s0 + $0x18] sm:$0xff]  }
   0x5   :  { %5275 = vmatprep.mubr.bf16.mxu0 %v5495_v4  ;;  %v5499_v12 = vld [vmem:[%s9398_s0 + $0x20] sm:$0xff]   ;;  %v5500_v13 = vld [vmem:[%s9398_s0 + $0x28] sm:$0xff]   ;;  %v5501_v14 = vld [vmem:[%s9398_s0 + $0x30] sm:$0xff]  }
   0x6   :  { %v5502_v15 = vld [vmem:[%s9398_s0 + $0x38] sm:$0xff]   ;;  %v5503_v16 = vld [vmem:[%s9398_s0 + $0x40] sm:$0xff]   ;;  %v5504_v17 = vld [vmem:[%s9398_s0 + $0x48] sm:$0xff]  }
   0x7   :  { %5262 = vmatpush3.bf16.msra.mxu0 %v5488_v1  ;;  %5480 = vmatpush3.bf16.msra.mxu1 %v5488_v1  ;;  %v5505_v18 = vld [vmem:[%s9398_s0 + $0x50] sm:$0xff]   ;;  %v5506_v19 = vld [vmem:[%s9398_s0 + $0x58] sm:$0xff]   ;;  %v5507_v20 = vld [vmem:[%s9398_s0 + $0x60] sm:$0xff]  }
   0x8   :  { %5263 = vmatprep.subr.bf16.mxu0 %v5489_v2  ;;  %5473 = vmatprep.subr.bf16.mxu1 %v5489_v2  ;;  %v5508_v21 = vld [vmem:[%s9398_s0 + $0x68] sm:$0xff]   ;;  %v5509_v22 = vld [vmem:[%s9398_s0 + $0x70] sm:$0xff]   ;;  %v5510_v23 = vld [vmem:[%s9398_s0 + $0x78] sm:$0xff]  }
   0x9   :  { %v5511_v24 = vld [vmem:[%s9398_s0 + $0x80] sm:$0xff]   ;;  %v5512_v25 = vld [vmem:[%s9398_s0 + $0x88] sm:$0xff]   ;;  %v5513_v26 = vld [vmem:[%s9398_s0 + $0x90] sm:$0xff]  }
   0xa   :  { %v5545_v27 = vld [vmem:[%s9398_s0 + $0x190] sm:$0xff]   ;;  %v5546_v28 = vld [vmem:[%s9398_s0 + $0x198] sm:$0xff]   ;;  %v5547_v29 = vld [vmem:[%s9398_s0 + $0x1a0] sm:$0xff]  }
   0xb   :  { %5264 = vmatpush3.bf16.msra.mxu0 %v5489_v2  ;;  %5481 = vmatpush3.bf16.msra.mxu1 %v5489_v2  ;;  %v5514_v30 = vld [vmem:[%s9398_s0 + $0x98] sm:$0xff]   ;;  %v5515_v31 = vld [vmem:[%s9398_s0 + $0xa0] sm:$0xff]   ;;  %v5548_v32 = vld [vmem:[%s9398_s0 + $0x1a8] sm:$0xff]  }
   0xc   :  { %5265 = vmatprep.subr.bf16.mxu0 %v5490_v3  ;;  %5474 = vmatprep.subr.bf16.mxu1 %v5490_v3  ;;  %v5516_v33 = vld [vmem:[%s9398_s0 + $0xa8] sm:$0xff]   ;;  %v5517_v34 = vld [vmem:[%s9398_s0 + $0xb0] sm:$0xff]   ;;  %v5550_v36 = vld [vmem:[%s9398_s0 + $0x1b8] sm:$0xff]  }
   0xd   :  { %5375 = vmatprep.mubr.bf16.mxu1 %v5545_v27  ;;  %v5549_v35 = vld [vmem:[%s9398_s0 + $0x1b0] sm:$0xff]   ;;  %v5518_v37 = vld [vmem:[%s9398_s0 + $0xb8] sm:$0xff]   ;;  %v5519_v38 = vld [vmem:[%s9398_s0 + $0xc0] sm:$0xff]  }
   0xe   :  { %v5551_v39 = vld [vmem:[%s9398_s0 + $0x1c0] sm:$0xff]   ;;  %v5552_v40 = vld [vmem:[%s9398_s0 + $0x1c8] sm:$0xff]   ;;  %v5521_v42 = vld [vmem:[%s9398_s0 + $0xd0] sm:$0xff]  }
   0xf   :  { %5266 = vmatpush3.bf16.msra.mxu0 %v5490_v3  ;;  %5482 = vmatpush3.bf16.msra.mxu1 %v5490_v3  ;;  %v5520_v41 = vld [vmem:[%s9398_s0 + $0xc8] sm:$0xff]   ;;  %v5553_v43 = vld [vmem:[%s9398_s0 + $0x1d0] sm:$0xff]   ;;  %v5554_v44 = vld [vmem:[%s9398_s0 + $0x1d8] sm:$0xff]  }
  0x10   :  { %5267 = vmatprep.subr.bf16.mxu0 %v5491_v5  ;;  %5475 = vmatprep.subr.bf16.mxu1 %v5491_v5  ;;  %v5522_v45 = vld [vmem:[%s9398_s0 + $0xd8] sm:$0xff]   ;;  %v5523_v46 = vld [vmem:[%s9398_s0 + $0xe0] sm:$0xff]   ;;  %v5556_v48 = vld [vmem:[%s9398_s0 + $0x1e8] sm:$0xff]  }
  0x11   :  { %v5555_v47 = vld [vmem:[%s9398_s0 + $0x1e0] sm:$0xff]   ;;  %v5524_v49 = vld [vmem:[%s9398_s0 + $0xe8] sm:$0xff]   ;;  %v5525_v50 = vld [vmem:[%s9398_s0 + $0xf0] sm:$0xff]  }
  0x12   :  { %v5557_v51 = vld [vmem:[%s9398_s0 + $0x1f0] sm:$0xff]   ;;  %v5558_v52 = vld [vmem:[%s9398_s0 + $0x1f8] sm:$0xff]   ;;  %v5527_v54 = vld [vmem:[%s9398_s0 + $0x100] sm:$0xff]  }
  0x13   :  { %5268 = vmatpush3.bf16.msra.mxu0 %v5491_v5  ;;  %5483 = vmatpush3.bf16.msra.mxu1 %v5491_v5  ;;  %v5526_v53 = vld [vmem:[%s9398_s0 + $0xf8] sm:$0xff]   ;;  %v5559_v55 = vld [vmem:[%s9398_s0 + $0x200] sm:$0xff]   ;;  %v5560_v56 = vld [vmem:[%s9398_s0 + $0x208] sm:$0xff]  }
  0x14   :  { %5269 = vmatprep.subr.bf16.mxu0 %v5492_v6  ;;  %5476 = vmatprep.subr.bf16.mxu1 %v5492_v6  ;;  %v5528_v57 = vld [vmem:[%s9398_s0 + $0x108] sm:$0xff]   ;;  %v5529_v58 = vld [vmem:[%s9398_s0 + $0x110] sm:$0xff]   ;;  %v5562_v60 = vld [vmem:[%s9398_s0 + $0x218] sm:$0xff]  }
  0x15   :  { %v5561_v59 = vld [vmem:[%s9398_s0 + $0x210] sm:$0xff]   ;;  %v5530_v61 = vld [vmem:[%s9398_s0 + $0x118] sm:$0xff]   ;;  %v5531_v62 = vld [vmem:[%s9398_s0 + $0x120] sm:$0xff]  }
  0x16   :  { %v5563_v63 = vld [vmem:[%s9398_s0 + $0x220] sm:$0xff]   ;;  %v5564_v0 = vld [vmem:[%s9398_s0 + $0x228] sm:$0xff]   ;;  %v5533_v2 = vld [vmem:[%s9398_s0 + $0x130] sm:$0xff]  }
  0x17   :  { %5270 = vmatpush3.bf16.msra.mxu0 %v5492_v6  ;;  %5484 = vmatpush3.bf16.msra.mxu1 %v5492_v6  ;;  %v5532_v1 = vld [vmem:[%s9398_s0 + $0x128] sm:$0xff]   ;;  %v5565_v3 = vld [vmem:[%s9398_s0 + $0x230] sm:$0xff]   ;;  %v5566_v4 = vld [vmem:[%s9398_s0 + $0x238] sm:$0xff]  }
  0x18   :  { %5271 = vmatprep.subr.bf16.mxu0 %v5493_v7  ;;  %5477 = vmatprep.subr.bf16.mxu1 %v5493_v7  ;;  %v5534_v5 = vld [vmem:[%s9398_s0 + $0x138] sm:$0xff]   ;;  %v5535_v6 = vld [vmem:[%s9398_s0 + $0x140] sm:$0xff]  }
  0x19   :  { %v5578_v27 = vld [vmem:[%s9398_s0 + $0x298] sm:$0xff]  }
  0x1b   :  { %5272 = vmatpush3.bf16.msra.mxu0 %v5493_v7  ;;  %5485 = vmatpush3.bf16.msra.mxu1 %v5493_v7  ;;  %v5567_v7 = vld [vmem:[%s9398_s0 + $0x240] sm:$0xff]  }
  0x1c   :  { %5273 = vmatprep.subr.bf16.mxu0 %v5494_v8  ;;  %5478 = vmatprep.subr.bf16.mxu1 %v5494_v8 }
  0x1f   :  { %5274 = vmatpush3.bf16.msra.mxu0 %v5494_v8  ;;  %5486 = vmatpush3.bf16.msra.mxu1 %v5494_v8  ;;  %v5568_v8 = vld [vmem:[%s9398_s0 + $0x248] sm:$0xff]  }
  0x22   :  { %5276 = vmatmul.mubr.bf16.vlgmr.msra.gmra.mrb[0].mxu0 %v5496_v9  ;;  %5376 = vmatmul.mubr.bf16.vlgmr.msra.gmra.mrb[0].mxu1 %v5546_v28  ;;  %v5536_v9 = vld [vmem:[%s9398_s0 + $0x148] sm:$0xff]   ;;  %v5579_v28 = vld [vmem:[%s9398_s0 + $0x2a0] sm:$0xff]  }
  0x23   :  { %5279 = vmatprep.mubr.bf16.mxu0 %v5497_v10  ;;  %5379 = vmatprep.mubr.bf16.mxu1 %v5547_v29  ;;  %v5537_v10 = vld [vmem:[%s9398_s0 + $0x150] sm:$0xff]   ;;  %v5580_v29 = vld [vmem:[%s9398_s0 + $0x2a8] sm:$0xff]  }
  0x2a   :  { %5280 = vmatmul.mubr.bf16.gmra.mrb[4].mxu0 %v5498_v11  ;;  %5380 = vmatmul.mubr.bf16.gmra.mrb[4].mxu1 %v5548_v32  ;;  %v5569_v11 = vld [vmem:[%s9398_s0 + $0x250] sm:$0xff]   ;;  %v5582_v32 = vld [vmem:[%s9398_s0 + $0x2b8] sm:$0xff]  }
  0x2b   :  { %5283 = vmatprep.mubr.bf16.mxu0 %v5499_v12  ;;  %5383 = vmatprep.mubr.bf16.mxu1 %v5549_v35  ;;  %v5570_v12 = vld [vmem:[%s9398_s0 + $0x258] sm:$0xff]  }
  0x32   :  { %5284 = vmatmul.mubr.bf16.gmra.mrb[8].mxu0 %v5500_v13  ;;  %5384 = vmatmul.mubr.bf16.gmra.mrb[8].mxu1 %v5550_v36  ;;  %v5538_v13 = vld [vmem:[%s9398_s0 + $0x158] sm:$0xff]  }
  0x33   :  { %5287 = vmatprep.mubr.bf16.mxu0 %v5501_v14  ;;  %5387 = vmatprep.mubr.bf16.mxu1 %v5551_v39  ;;  %v5539_v14 = vld [vmem:[%s9398_s0 + $0x160] sm:$0xff]  }
  0x3a   :  { %5288 = vmatmul.mubr.bf16.gmra.mrb[12].mxu0 %v5502_v15  ;;  %5388 = vmatmul.mubr.bf16.gmra.mrb[12].mxu1 %v5552_v40  ;;  %v5571_v15 = vld [vmem:[%s9398_s0 + $0x260] sm:$0xff]  }
  0x3b   :  { %5291 = vmatprep.mubr.bf16.mxu0 %v5503_v16  ;;  %5391 = vmatprep.mubr.bf16.mxu1 %v5553_v43  ;;  %v5572_v16 = vld [vmem:[%s9398_s0 + $0x268] sm:$0xff]  }
  0x42   :  { %5292 = vmatmul.mubr.bf16.gmra.mrb[16].mxu0 %v5504_v17  ;;  %5392 = vmatmul.mubr.bf16.gmra.mrb[16].mxu1 %v5554_v44  ;;  %v5540_v17 = vld [vmem:[%s9398_s0 + $0x168] sm:$0xff]  }
  0x43   :  { %5295 = vmatprep.mubr.bf16.mxu0 %v5505_v18  ;;  %5395 = vmatprep.mubr.bf16.mxu1 %v5555_v47  ;;  %v5541_v18 = vld [vmem:[%s9398_s0 + $0x170] sm:$0xff]  }
  0x4a   :  { %5296 = vmatmul.mubr.bf16.gmra.mrb[20].mxu0 %v5506_v19  ;;  %5396 = vmatmul.mubr.bf16.gmra.mrb[20].mxu1 %v5556_v48  ;;  %v5573_v19 = vld [vmem:[%s9398_s0 + $0x270] sm:$0xff]  }
  0x4b   :  { %5299 = vmatprep.mubr.bf16.mxu0 %v5507_v20  ;;  %5399 = vmatprep.mubr.bf16.mxu1 %v5557_v51  ;;  %v5574_v20 = vld [vmem:[%s9398_s0 + $0x278] sm:$0xff]   ;;  %v5585_v48 = vld [vmem:[%s9398_s0 + $0x2d0] sm:$0xff]  }
  0x4c   :  { %v5586_v51 = vld [vmem:[%s9398_s0 + $0x2d8] sm:$0xff]  }
  0x52   :  { %5300 = vmatmul.mubr.bf16.gmra.mrb[24].mxu0 %v5508_v21  ;;  %5400 = vmatmul.mubr.bf16.gmra.mrb[24].mxu1 %v5558_v52  ;;  %v5542_v21 = vld [vmem:[%s9398_s0 + $0x178] sm:$0xff]  }
  0x53   :  { %5303 = vmatprep.mubr.bf16.mxu0 %v5509_v22  ;;  %5403 = vmatprep.mubr.bf16.mxu1 %v5559_v55  ;;  %v5543_v22 = vld [vmem:[%s9398_s0 + $0x180] sm:$0xff]  }
  0x5a   :  { %5304 = vmatmul.mubr.bf16.gmra.mrb[28].mxu0 %v5510_v23  ;;  %5404 = vmatmul.mubr.bf16.gmra.mrb[28].mxu1 %v5560_v56  ;;  %v5575_v23 = vld [vmem:[%s9398_s0 + $0x280] sm:$0xff]  }
  0x5b   :  { %5307 = vmatprep.mubr.bf16.mxu0 %v5511_v24  ;;  %5407 = vmatprep.mubr.bf16.mxu1 %v5561_v59  ;;  %v5576_v24 = vld [vmem:[%s9398_s0 + $0x288] sm:$0xff]  }
  0x62   :  { %5308 = vmatmul.mubr.bf16.gmra.mrb[32].mxu0 %v5512_v25  ;;  %5408 = vmatmul.mubr.bf16.gmra.mrb[32].mxu1 %v5562_v60  ;;  %v5544_v25 = vld [vmem:[%s9398_s0 + $0x188] sm:$0xff]  }
  0x63   :  { %5311 = vmatprep.mubr.bf16.mxu0 %v5513_v26  ;;  %5411 = vmatprep.mubr.bf16.mxu1 %v5563_v63  ;;  %v5577_v26 = vld [vmem:[%s9398_s0 + $0x290] sm:$0xff]  }
  0x6a   :  { %5312 = vmatmul.mubr.bf16.gmra.mrb[36].mxu0 %v5514_v30  ;;  %5412 = vmatmul.mubr.bf16.gmra.mrb[36].mxu1 %v5564_v0  ;;  %v5581_v30 = vld [vmem:[%s9398_s0 + $0x2b0] sm:$0xff]  }
  0x6b   :  { %5315 = vmatprep.mubr.bf16.mxu0 %v5515_v31  ;;  %5415 = vmatprep.mubr.bf16.mxu1 %v5565_v3 }
  0x72   :  { %5316 = vmatmul.mubr.bf16.gmra.mrb[40].mxu0 %v5516_v33  ;;  %5416 = vmatmul.mubr.bf16.gmra.mrb[40].mxu1 %v5566_v4  ;;  %v5589_v4 = vld [vmem:[%s9398_s0 + $0x2f0] sm:$0xff]  }
  0x73   :  { %5319 = vmatprep.mubr.bf16.mxu0 %v5517_v34  ;;  %5419 = vmatprep.mubr.bf16.mxu1 %v5567_v7  ;;  %v5590_v7 = vld [vmem:[%s9398_s0 + $0x2f8] sm:$0xff]  }
  0x7a   :  { %5320 = vmatmul.mubr.bf16.gmra.mrb[44].mxu0 %v5518_v37  ;;  %5420 = vmatmul.mubr.bf16.gmra.mrb[44].mxu1 %v5568_v8 }
  0x7b   :  { %5323 = vmatprep.mubr.bf16.mxu0 %v5519_v38  ;;  %5423 = vmatprep.mubr.bf16.mxu1 %v5569_v11  ;;  %v5583_v38 = vld [vmem:[%s9398_s0 + $0x2c0] sm:$0xff]  }
  0x82   :  { %5324 = vmatmul.mubr.bf16.gmra.mrb[48].mxu0 %v5520_v41  ;;  %5424 = vmatmul.mubr.bf16.gmra.mrb[48].mxu1 %v5570_v12  ;;  %v5584_v41 = vld [vmem:[%s9398_s0 + $0x2c8] sm:$0xff]  }
  0x83   :  { %5327 = vmatprep.mubr.bf16.mxu0 %v5521_v42  ;;  %5427 = vmatprep.mubr.bf16.mxu1 %v5571_v15 }
  0x8a   :  { %5328 = vmatmul.mubr.bf16.gmra.mrb[52].mxu0 %v5522_v45  ;;  %5428 = vmatmul.mubr.bf16.gmra.mrb[52].mxu1 %v5572_v16 }
  0x8b   :  { %5331 = vmatprep.mubr.bf16.mxu0 %v5523_v46  ;;  %5431 = vmatprep.mubr.bf16.mxu1 %v5573_v19 }
  0x92   :  { %5332 = vmatmul.mubr.bf16.gmra.mrb[56].mxu0 %v5524_v49  ;;  %5432 = vmatmul.mubr.bf16.gmra.mrb[56].mxu1 %v5574_v20 }
  0x93   :  { %5335 = vmatprep.mubr.bf16.mxu0 %v5525_v50  ;;  %5435 = vmatprep.mubr.bf16.mxu1 %v5575_v23 }
  0x9a   :  { %5336 = vmatmul.mubr.bf16.gmra.mrb[60].mxu0 %v5526_v53  ;;  %5436 = vmatmul.mubr.bf16.gmra.mrb[60].mxu1 %v5576_v24 }
  0x9b   :  { %5339 = vmatprep.mubr.bf16.mxu0 %v5527_v54  ;;  %5439 = vmatprep.mubr.bf16.mxu1 %v5577_v26 }
  0xa2   :  { %5340 = vmatmul.mubr.bf16.gmra.mrb[64].mxu0 %v5528_v57  ;;  %5440 = vmatmul.mubr.bf16.gmra.mrb[64].mxu1 %v5578_v27 }
  0xa3   :  { %5343 = vmatprep.mubr.bf16.mxu0 %v5529_v58  ;;  %5443 = vmatprep.mubr.bf16.mxu1 %v5579_v28  ;;  %v5587_v58 = vld [vmem:[%s9398_s0 + $0x2e0] sm:$0xff]  }
  0xaa   :  { %5344 = vmatmul.mubr.bf16.gmra.mrb[68].mxu0 %v5530_v61  ;;  %5444 = vmatmul.mubr.bf16.gmra.mrb[68].mxu1 %v5580_v29  ;;  %v5588_v61 = vld [vmem:[%s9398_s0 + $0x2e8] sm:$0xff]  }
  0xab   :  { %5347 = vmatprep.mubr.bf16.mxu0 %v5531_v62  ;;  %5447 = vmatprep.mubr.bf16.mxu1 %v5581_v30 }
  0xb2   :  { %5348 = vmatmul.mubr.bf16.gmra.mrb[72].mxu0 %v5532_v1  ;;  %5448 = vmatmul.mubr.bf16.gmra.mrb[72].mxu1 %v5582_v32 }
  0xb3   :  { %5351 = vmatprep.mubr.bf16.mxu0 %v5533_v2  ;;  %5451 = vmatprep.mubr.bf16.mxu1 %v5583_v38 }
  0xba   :  { %5352 = vmatmul.mubr.bf16.gmra.mrb[76].mxu0 %v5534_v5  ;;  %5452 = vmatmul.mubr.bf16.gmra.mrb[76].mxu1 %v5584_v41 }
  0xbb   :  { %5355 = vmatprep.mubr.bf16.mxu0 %v5535_v6  ;;  %5455 = vmatprep.mubr.bf16.mxu1 %v5585_v48 }
  0xc2   :  { %5356 = vmatmul.mubr.bf16.gmra.mrb[80].mxu0 %v5536_v9  ;;  %5456 = vmatmul.mubr.bf16.gmra.mrb[80].mxu1 %v5586_v51 }
  0xc3   :  { %5359 = vmatprep.mubr.bf16.mxu0 %v5537_v10  ;;  %5459 = vmatprep.mubr.bf16.mxu1 %v5587_v58 }
  0xca   :  { %5360 = vmatmul.mubr.bf16.gmra.mrb[84].mxu0 %v5538_v13  ;;  %5460 = vmatmul.mubr.bf16.gmra.mrb[84].mxu1 %v5588_v61 }
  0xcb   :  { %5363 = vmatprep.mubr.bf16.mxu0 %v5539_v14  ;;  %5463 = vmatprep.mubr.bf16.mxu1 %v5589_v4  ;;  %v5591_v14 = vld [vmem:[%s9398_s0 + $0x300] sm:$0xff]  }
  0xd2   :  { %5364 = vmatmul.mubr.bf16.gmra.mrb[88].mxu0 %v5540_v17  ;;  %5464 = vmatmul.mubr.bf16.gmra.mrb[88].mxu1 %v5590_v7  ;;  %v5592_v17 = vld [vmem:[%s9398_s0 + $0x308] sm:$0xff]  }
  0xd3   :  { %5367 = vmatprep.mubr.bf16.mxu0 %v5541_v18  ;;  %5467 = vmatprep.mubr.bf16.mxu1 %v5591_v14 }
  0xda   :  { %5368 = vmatmul.mubr.bf16.gmra.mrb[92].mxu0 %v5542_v21  ;;  %5468 = vmatmul.mubr.bf16.gmra.mrb[92].mxu1 %v5592_v17 }
  0xdb   :  { %5371 = vmatprep.mubr.bf16.mxu0 %v5543_v22 }
  0xe2   :  { %5372 = vmatmul.mubr.bf16.gmra.mrb[96].mxu0 %v5544_v25 }
  0xf5   :  { %v5905_v31 = vpop.f32.mrb[0].mxu0 }
  0xf6   :  { %9907 = vst [vmem:[#allocation2_spill] sm:$0xff] %v5905_v31  ;;  %v5910_v33 = vpop.f32.mrb[1].mxu0 }
  0xf7   :  { %9908 = vst [vmem:[#allocation3_spill] sm:$0xff] %v5910_v33  ;;  %v5912_v34 = vpop.f32.mrb[2].mxu0 }
  0xf8   :  { %9909 = vst [vmem:[#allocation4_spill] sm:$0xff] %v5912_v34  ;;  %v5914_v35 = vpop.f32.mrb[3].mxu0 }
  0xf9   :  { %9910 = vst [vmem:[#allocation5_spill] sm:$0xff] %v5914_v35  ;;  %v1683_v36 = vadd.f32 %v5914_v35, %v5910_v33 }
  0xfb   :  { %v1684_v37 = vadd.f32 %v5905_v31, %v1683_v36 }
  0xfd   :  { %v1685_v39 = vadd.f32 %v5912_v34, %v1684_v37  ;;  %v5923_v40 = vpop.f32.mrb[4].mxu0 }
  0xfe   :  { %9911 = vst [vmem:[#allocation6_spill] sm:$0xff] %v5923_v40  ;;  %v5928_v42 = vpop.f32.mrb[5].mxu0 }
  0xff   :  { %9912 = vst [vmem:[#allocation7_spill] sm:$0xff] %v5928_v42  ;;  %v1686_v43 = vadd.f32 %v1685_v39, %v5928_v42  ;;  %v5931_v44 = vpop.f32.mrb[6].mxu0 }
 0x100   :  { %9913 = vst [vmem:[#allocation8_spill] sm:$0xff] %v5931_v44  ;;  %v5933_v45 = vpop.f32.mrb[7].mxu0 }
 0x101   :  { %9914 = vst [vmem:[#allocation9_spill] sm:$0xff] %v5933_v45  ;;  %v1687_v46 = vadd.f32 %v1686_v43, %v5933_v45 }
 0x103   :  { %v1688_v47 = vadd.f32 %v5923_v40, %v1687_v46 }
 0x105   :  { %v1689_v49 = vadd.f32 %v5931_v44, %v1688_v47  ;;  %v5941_v50 = vpop.f32.mrb[8].mxu0 }
 0x106   :  { %9915 = vst [vmem:[#allocation10_spill] sm:$0xff] %v5941_v50  ;;  %v5946_v52 = vpop.f32.mrb[9].mxu0 }
 0x107   :  { %9916 = vst [vmem:[#allocation11_spill] sm:$0xff] %v5946_v52  ;;  %v1690_v53 = vadd.f32 %v1689_v49, %v5946_v52  ;;  %v5949_v54 = vpop.f32.mrb[10].mxu0 }
 0x108   :  { %9917 = vst [vmem:[#allocation12_spill] sm:$0xff] %v5949_v54  ;;  %v5951_v55 = vpop.f32.mrb[11].mxu0 }
 0x109   :  { %9918 = vst [vmem:[#allocation13_spill] sm:$0xff] %v5951_v55  ;;  %v1691_v56 = vadd.f32 %v1690_v53, %v5951_v55 }
 0x10b   :  { %v1692_v57 = vadd.f32 %v5941_v50, %v1691_v56 }
 0x10d   :  { %v1693_v59 = vadd.f32 %v5949_v54, %v1692_v57  ;;  %v5959_v60 = vpop.f32.mrb[12].mxu0 }
 0x10e   :  { %9919 = vst [vmem:[#allocation14_spill] sm:$0xff] %v5959_v60  ;;  %v5964_v62 = vpop.f32.mrb[13].mxu0 }
 0x10f   :  { %9920 = vst [vmem:[#allocation15_spill] sm:$0xff] %v5964_v62  ;;  %v1694_v63 = vadd.f32 %v1693_v59, %v5964_v62  ;;  %v5967_v0 = vpop.f32.mrb[14].mxu0  ;;  %v6044_v59 = vpop.f32.mrb[0].mxu1 }
 0x110   :  { %9921 = vst [vmem:[#allocation16_spill] sm:$0xff] %v5967_v0  ;;  %v5969_v1 = vpop.f32.mrb[15].mxu0  ;;  %9943 = vst [vmem:[#allocation38_spill] sm:$0xff] %v6044_v59 }
 0x111   :  { %9922 = vst [vmem:[#allocation17_spill] sm:$0xff] %v5969_v1  ;;  %v1695_v2 = vadd.f32 %v1694_v63, %v5969_v1  ;;  %v6047_v63 = vpop.f32.mrb[1].mxu1 }
 0x112   :  { %9944 = vst [vmem:[#allocation39_spill] sm:$0xff] %v6047_v63 }
 0x113   :  { %v1696_v3 = vadd.f32 %v5959_v60, %v1695_v2  ;;  %v6049_v2 = vpop.f32.mrb[2].mxu1 }
 0x114   :  { %9945 = vst [vmem:[#allocation40_spill] sm:$0xff] %v6049_v2 }
 0x115   :  { %v1697_v5 = vadd.f32 %v5967_v0, %v1696_v3  ;;  %v5977_v6 = vpop.f32.mrb[16].mxu0 }
 0x116   :  { %9923 = vst [vmem:[#allocation18_spill] sm:$0xff] %v5977_v6  ;;  %v5982_v8 = vpop.f32.mrb[17].mxu0 }
 0x117   :  { %9924 = vst [vmem:[#allocation19_spill] sm:$0xff] %v5982_v8  ;;  %v1698_v9 = vadd.f32 %v1697_v5, %v5982_v8  ;;  %v5985_v10 = vpop.f32.mrb[18].mxu0  ;;  %v6054_v5 = vpop.f32.mrb[3].mxu1 }
 0x118   :  { %9925 = vst [vmem:[#allocation20_spill] sm:$0xff] %v5985_v10  ;;  %v5987_v11 = vpop.f32.mrb[19].mxu0  ;;  %9947 = vst [vmem:[#allocation42_spill] sm:$0xff] %v6054_v5 }
 0x119   :  { %9926 = vst [vmem:[#allocation21_spill] sm:$0xff] %v5987_v11  ;;  %v1699_v12 = vadd.f32 %v1698_v9, %v5987_v11 }
 0x11b   :  { %v1700_v13 = vadd.f32 %v5977_v6, %v1699_v12 }
 0x11d   :  { %v1701_v15 = vadd.f32 %v5985_v10, %v1700_v13  ;;  %v5995_v16 = vpop.f32.mrb[20].mxu0 }
 0x11e   :  { %9927 = vst [vmem:[#allocation22_spill] sm:$0xff] %v5995_v16  ;;  %v6000_v18 = vpop.f32.mrb[21].mxu0 }
 0x11f   :  { %9928 = vst [vmem:[#allocation23_spill] sm:$0xff] %v6000_v18  ;;  %v1702_v19 = vadd.f32 %v1701_v15, %v6000_v18  ;;  %v6003_v20 = vpop.f32.mrb[22].mxu0  ;;  %v6064_v15 = vpop.f32.mrb[4].mxu1 }
 0x120   :  { %9929 = vst [vmem:[#allocation24_spill] sm:$0xff] %v6003_v20  ;;  %v6005_v21 = vpop.f32.mrb[23].mxu0  ;;  %9951 = vst [vmem:[#allocation46_spill] sm:$0xff] %v6064_v15 }
 0x121   :  { %9930 = vst [vmem:[#allocation25_spill] sm:$0xff] %v6005_v21  ;;  %v1703_v22 = vadd.f32 %v1702_v19, %v6005_v21  ;;  %v6067_v19 = vpop.f32.mrb[5].mxu1 }
 0x122   :  { %9952 = vst [vmem:[#allocation47_spill] sm:$0xff] %v6067_v19 }
 0x123   :  { %v1704_v23 = vadd.f32 %v5995_v16, %v1703_v22  ;;  %v6069_v22 = vpop.f32.mrb[6].mxu1 }
 0x124   :  { %9953 = vst [vmem:[#allocation48_spill] sm:$0xff] %v6069_v22 }
 0x125   :  { %v1705_v24 = vadd.f32 %v6003_v20, %v1704_v23  ;;  %v6010_v25 = vpop.f32.mrb[24].mxu0 }
 0x126   :  { %9931 = vst [vmem:[#allocation26_spill] sm:$0xff] %v6010_v25  ;;  %v6012_v26 = vpop.f32.mrb[25].mxu0 }
 0x127   :  { %9932 = vst [vmem:[#allocation27_spill] sm:$0xff] %v6012_v26  ;;  %v1706_v27 = vadd.f32 %v1705_v24, %v6012_v26  ;;  %v6015_v28 = vpop.f32.mrb[26].mxu0 }
 0x128   :  { %9933 = vst [vmem:[#allocation28_spill] sm:$0xff] %v6015_v28  ;;  %v6017_v29 = vpop.f32.mrb[27].mxu0 }
 0x129   :  { %9934 = vst [vmem:[#allocation29_spill] sm:$0xff] %v6017_v29  ;;  %v1707_v30 = vadd.f32 %v1706_v27, %v6017_v29  ;;  %v6074_v27 = vpop.f32.mrb[7].mxu1 }
 0x12a   :  { %9955 = vst [vmem:[#allocation50_spill] sm:$0xff] %v6074_v27 }
 0x12b   :  { %v1708_v32 = vadd.f32 %v6010_v25, %v1707_v30 }
 0x12d   :  { %v1709_v36 = vadd.f32 %v6015_v28, %v1708_v32  ;;  %v6022_v37 = vpop.f32.mrb[28].mxu0 }
 0x12e   :  { %9935 = vst [vmem:[#allocation30_spill] sm:$0xff] %v6022_v37  ;;  %v6024_v38 = vpop.f32.mrb[29].mxu0 }
 0x12f   :  { %9936 = vst [vmem:[#allocation31_spill] sm:$0xff] %v6024_v38  ;;  %v1710_v39 = vadd.f32 %v1709_v36, %v6024_v38  ;;  %v6027_v41 = vpop.f32.mrb[30].mxu0 }
 0x130   :  { %9937 = vst [vmem:[#allocation32_spill] sm:$0xff] %v6027_v41  ;;  %v6029_v43 = vpop.f32.mrb[31].mxu0 }
 0x131   :  { %9938 = vst [vmem:[#allocation33_spill] sm:$0xff] %v6029_v43  ;;  %v1711_v46 = vadd.f32 %v1710_v39, %v6029_v43 }
 0x133   :  { %v1712_v47 = vadd.f32 %v6022_v37, %v1711_v46 }
 0x135   :  { %v1713_v48 = vadd.f32 %v6027_v41, %v1712_v47  ;;  %v6034_v49 = vpop.f32.mrb[32].mxu0  ;;  %v6084_v47 = vpop.f32.mrb[8].mxu1 }
 0x136   :  { %9939 = vst [vmem:[#allocation34_spill] sm:$0xff] %v6034_v49  ;;  %v6036_v51 = vpop.f32.mrb[33].mxu0  ;;  %9959 = vst [vmem:[#allocation54_spill] sm:$0xff] %v6084_v47 }
 0x137   :  { %9940 = vst [vmem:[#allocation35_spill] sm:$0xff] %v6036_v51  ;;  %v1714_v53 = vadd.f32 %v1713_v48, %v6036_v51  ;;  %v6039_v56 = vpop.f32.mrb[34].mxu0 }
 0x138   :  { %9941 = vst [vmem:[#allocation36_spill] sm:$0xff] %v6039_v56  ;;  %v6041_v57 = vpop.f32.mrb[35].mxu0 }
 0x139   :  { %9942 = vst [vmem:[#allocation37_spill] sm:$0xff] %v6041_v57  ;;  %v1715_v58 = vadd.f32 %v1714_v53, %v6041_v57  ;;  %v6087_v53 = vpop.f32.mrb[9].mxu1 }
 0x13a   :  { %9960 = vst [vmem:[#allocation55_spill] sm:$0xff] %v6087_v53 }
 0x13b   :  { %v1716_v61 = vadd.f32 %v6034_v49, %v1715_v58  ;;  %v6089_v58 = vpop.f32.mrb[10].mxu1 }
 0x13c   :  { %9961 = vst [vmem:[#allocation56_spill] sm:$0xff] %v6089_v58 }
 0x13d   :  { %v1717_v3 = vadd.f32 %v6039_v56, %v1716_v61  ;;  %v6052_v4 = vpop.f32.mrb[36].mxu0 }
 0x13e   :  { %9946 = vst [vmem:[#allocation41_spill] sm:$0xff] %v6052_v4  ;;  %v6056_v7 = vpop.f32.mrb[37].mxu0 }
 0x13f   :  { %9948 = vst [vmem:[#allocation43_spill] sm:$0xff] %v6056_v7  ;;  %v1718_v9 = vadd.f32 %v1717_v3, %v6056_v7  ;;  %v6059_v12 = vpop.f32.mrb[38].mxu0 }
 0x140   :  { %9949 = vst [vmem:[#allocation44_spill] sm:$0xff] %v6059_v12  ;;  %v6061_v13 = vpop.f32.mrb[39].mxu0 }
 0x141   :  { %9950 = vst [vmem:[#allocation45_spill] sm:$0xff] %v6061_v13  ;;  %v1719_v14 = vadd.f32 %v1718_v9, %v6061_v13  ;;  %v6094_v9 = vpop.f32.mrb[11].mxu1 }
 0x142   :  { %9963 = vst [vmem:[#allocation58_spill] sm:$0xff] %v6094_v9 }
 0x143   :  { %v1720_v17 = vadd.f32 %v6052_v4, %v1719_v14 }
 0x145   :  { %v1721_v23 = vadd.f32 %v6059_v12, %v1720_v17  ;;  %v6072_v24 = vpop.f32.mrb[40].mxu0 }
 0x146   :  { %9954 = vst [vmem:[#allocation49_spill] sm:$0xff] %v6072_v24  ;;  %v6076_v30 = vpop.f32.mrb[41].mxu0 }
 0x147   :  { %9956 = vst [vmem:[#allocation51_spill] sm:$0xff] %v6076_v30  ;;  %v1722_v32 = vadd.f32 %v1721_v23, %v6076_v30  ;;  %v6079_v36 = vpop.f32.mrb[42].mxu0 }
 0x148   :  { %9957 = vst [vmem:[#allocation52_spill] sm:$0xff] %v6079_v36  ;;  %v6081_v39 = vpop.f32.mrb[43].mxu0 }
 0x149   :  { %9958 = vst [vmem:[#allocation53_spill] sm:$0xff] %v6081_v39  ;;  %v1723_v46 = vadd.f32 %v1722_v32, %v6081_v39 }
 0x14b   :  { %v1724_v48 = vadd.f32 %v6072_v24, %v1723_v46  ;;  %v6104_v24 = vpop.f32.mrb[12].mxu1 }
 0x14c   :  { %9967 = vst [vmem:[#allocation62_spill] sm:$0xff] %v6104_v24  ;;  %v6107_v30 = vpop.f32.mrb[13].mxu1 }
 0x14d   :  { %v6091_v61 = vpop.f32.mrb[44].mxu0  ;;  %v1725_v3 = vadd.f32 %v6079_v36, %v1724_v48  ;;  %9968 = vst [vmem:[#allocation63_spill] sm:$0xff] %v6107_v30  ;;  %v6109_v12 = vpop.f32.mrb[14].mxu1 }
 0x14e   :  { %9962 = vst [vmem:[#allocation57_spill] sm:$0xff] %v6091_v61  ;;  %v6096_v14 = vpop.f32.mrb[45].mxu0  ;;  %9969 = vst [vmem:[#allocation64_spill] sm:$0xff] %v6109_v12  ;;  %v6114_v4 = vpop.f32.mrb[15].mxu1 }
 0x14f   :  { %9964 = vst [vmem:[#allocation59_spill] sm:$0xff] %v6096_v14  ;;  %v1726_v17 = vadd.f32 %v1725_v3, %v6096_v14  ;;  %v6099_v23 = vpop.f32.mrb[46].mxu0  ;;  %9971 = vst [vmem:[#allocation66_spill] sm:$0xff] %v6114_v4 }
 0x150   :  { %9965 = vst [vmem:[#allocation60_spill] sm:$0xff] %v6099_v23  ;;  %v6101_v32 = vpop.f32.mrb[47].mxu0 }
 0x151   :  { %9966 = vst [vmem:[#allocation61_spill] sm:$0xff] %v6101_v32  ;;  %v1727_v46 = vadd.f32 %v1726_v17, %v6101_v32 }
 0x153   :  { %v1728_v39 = vadd.f32 %v6091_v61, %v1727_v46  ;;  %v6124_v61 = vpop.f32.mrb[16].mxu1 }
 0x154   :  { %9975 = vst [vmem:[#allocation70_spill] sm:$0xff] %v6124_v61  ;;  %v6127_v7 = vpop.f32.mrb[17].mxu1 }
 0x155   :  { %v6111_v48 = vpop.f32.mrb[48].mxu0  ;;  %v1729_v36 = vadd.f32 %v6099_v23, %v1728_v39  ;;  %9976 = vst [vmem:[#allocation71_spill] sm:$0xff] %v6127_v7  ;;  %v6129_v56 = vpop.f32.mrb[18].mxu1 }
 0x156   :  { %9970 = vst [vmem:[#allocation65_spill] sm:$0xff] %v6111_v48  ;;  %v6116_v3 = vpop.f32.mrb[49].mxu0  ;;  %9977 = vst [vmem:[#allocation72_spill] sm:$0xff] %v6129_v56  ;;  %v6134_v49 = vpop.f32.mrb[19].mxu1 }
 0x157   :  { %9972 = vst [vmem:[#allocation67_spill] sm:$0xff] %v6116_v3  ;;  %v1730_v14 = vadd.f32 %v1729_v36, %v6116_v3  ;;  %v6119_v13 = vpop.f32.mrb[50].mxu0  ;;  %9979 = vst [vmem:[#allocation74_spill] sm:$0xff] %v6134_v49 }
 0x158   :  { %9973 = vst [vmem:[#allocation68_spill] sm:$0xff] %v6119_v13  ;;  %v6121_v17 = vpop.f32.mrb[51].mxu0 }
 0x159   :  { %9974 = vst [vmem:[#allocation69_spill] sm:$0xff] %v6121_v17  ;;  %v1731_v46 = vadd.f32 %v1730_v14, %v6121_v17 }
 0x15b   :  { %v1732_v32 = vadd.f32 %v6111_v48, %v1731_v46  ;;  %v6144_v48 = vpop.f32.mrb[20].mxu1 }
 0x15c   :  { %9983 = vst [vmem:[#allocation78_spill] sm:$0xff] %v6144_v48  ;;  %v6147_v51 = vpop.f32.mrb[21].mxu1 }
 0x15d   :  { %v6131_v39 = vpop.f32.mrb[52].mxu0  ;;  %v1733_v23 = vadd.f32 %v6119_v13, %v1732_v32  ;;  %9984 = vst [vmem:[#allocation79_spill] sm:$0xff] %v6147_v51  ;;  %v6149_v41 = vpop.f32.mrb[22].mxu1 }
 0x15e   :  { %9978 = vst [vmem:[#allocation73_spill] sm:$0xff] %v6131_v39  ;;  %v6136_v36 = vpop.f32.mrb[53].mxu0  ;;  %9985 = vst [vmem:[#allocation80_spill] sm:$0xff] %v6149_v41  ;;  %v6154_v37 = vpop.f32.mrb[23].mxu1 }
 0x15f   :  { %9980 = vst [vmem:[#allocation75_spill] sm:$0xff] %v6136_v36  ;;  %v1734_v3 = vadd.f32 %v1733_v23, %v6136_v36  ;;  %v6139_v57 = vpop.f32.mrb[54].mxu0  ;;  %9987 = vst [vmem:[#allocation82_spill] sm:$0xff] %v6154_v37 }
 0x160   :  { %9981 = vst [vmem:[#allocation76_spill] sm:$0xff] %v6139_v57  ;;  %v6141_v14 = vpop.f32.mrb[55].mxu0 }
 0x161   :  { %9982 = vst [vmem:[#allocation77_spill] sm:$0xff] %v6141_v14  ;;  %v1735_v46 = vadd.f32 %v1734_v3, %v6141_v14 }
 0x163   :  { %v1736_v17 = vadd.f32 %v6131_v39, %v1735_v46  ;;  %v6164_v39 = vpop.f32.mrb[24].mxu1 }
 0x164   :  { %9991 = vst [vmem:[#allocation86_spill] sm:$0xff] %v6164_v39  ;;  %v6167_v38 = vpop.f32.mrb[25].mxu1 }
 0x165   :  { %v6151_v32 = vpop.f32.mrb[56].mxu0  ;;  %v1737_v13 = vadd.f32 %v6139_v57, %v1736_v17  ;;  %9992 = vst [vmem:[#allocation87_spill] sm:$0xff] %v6167_v38  ;;  %v6169_v28 = vpop.f32.mrb[26].mxu1 }
 0x166   :  { %9986 = vst [vmem:[#allocation81_spill] sm:$0xff] %v6151_v32  ;;  %v6156_v23 = vpop.f32.mrb[57].mxu0  ;;  %9993 = vst [vmem:[#allocation88_spill] sm:$0xff] %v6169_v28  ;;  %v6174_v25 = vpop.f32.mrb[27].mxu1 }
 0x167   :  { %9988 = vst [vmem:[#allocation83_spill] sm:$0xff] %v6156_v23  ;;  %v1738_v36 = vadd.f32 %v1737_v13, %v6156_v23  ;;  %v6159_v43 = vpop.f32.mrb[58].mxu0  ;;  %9995 = vst [vmem:[#allocation90_spill] sm:$0xff] %v6174_v25 }
 0x168   :  { %9989 = vst [vmem:[#allocation84_spill] sm:$0xff] %v6159_v43  ;;  %v6161_v3 = vpop.f32.mrb[59].mxu0 }
 0x169   :  { %9990 = vst [vmem:[#allocation85_spill] sm:$0xff] %v6161_v3  ;;  %v1739_v46 = vadd.f32 %v1738_v36, %v6161_v3 }
 0x16b   :  { %v1740_v14 = vadd.f32 %v6151_v32, %v1739_v46  ;;  %v6184_v32 = vpop.f32.mrb[28].mxu1 }
 0x16c   :  { %v6187_v26 = vpop.f32.mrb[29].mxu1 }
 0x16d   :  { %v6171_v17 = vpop.f32.mrb[60].mxu0  ;;  %v1741_v57 = vadd.f32 %v6159_v43, %v1740_v14  ;;  %v6189_v20 = vpop.f32.mrb[30].mxu1 }
 0x16e   :  { %9994 = vst [vmem:[#allocation89_spill] sm:$0xff] %v6171_v17  ;;  %v6176_v13 = vpop.f32.mrb[61].mxu0  ;;  %v6194_v16 = vpop.f32.mrb[31].mxu1 }
 0x16f   :  { %9996 = vst [vmem:[#allocation91_spill] sm:$0xff] %v6176_v13  ;;  %v1742_v23 = vadd.f32 %v1741_v57, %v6176_v13  ;;  %v6179_v29 = vpop.f32.mrb[62].mxu0 }
 0x170   :  { %9997 = vst [vmem:[#allocation92_spill] sm:$0xff] %v6179_v29  ;;  %v6181_v36 = vpop.f32.mrb[63].mxu0 }
 0x171   :  { %9998 = vst [vmem:[#allocation93_spill] sm:$0xff] %v6181_v36  ;;  %v1743_v46 = vadd.f32 %v1742_v23, %v6181_v36 }
 0x173   :  { %v1744_v3 = vadd.f32 %v6171_v17, %v1743_v46  ;;  %v6204_v17 = vpop.f32.mrb[32].mxu1 }
 0x174   :  { %10003 = vst [vmem:[#allocation98_spill] sm:$0xff] %v6204_v17  ;;  %v6207_v18 = vpop.f32.mrb[33].mxu1 }
 0x175   :  { %v6191_v14 = vpop.f32.mrb[64].mxu0  ;;  %v1745_v43 = vadd.f32 %v6179_v29, %v1744_v3  ;;  %v6209_v10 = vpop.f32.mrb[34].mxu1 }
 0x176   :  { %9999 = vst [vmem:[#allocation94_spill] sm:$0xff] %v6191_v14  ;;  %v6196_v57 = vpop.f32.mrb[65].mxu0  ;;  %10004 = vst [vmem:[#allocation99_spill] sm:$0xff] %v6209_v10  ;;  %v6214_v6 = vpop.f32.mrb[35].mxu1 }
 0x177   :  { %10000 = vst [vmem:[#allocation95_spill] sm:$0xff] %v6196_v57  ;;  %v1746_v13 = vadd.f32 %v1745_v43, %v6196_v57  ;;  %v6199_v21 = vpop.f32.mrb[66].mxu0 }
 0x178   :  { %10001 = vst [vmem:[#allocation96_spill] sm:$0xff] %v6199_v21  ;;  %v6201_v23 = vpop.f32.mrb[67].mxu0 }
 0x179   :  { %10002 = vst [vmem:[#allocation97_spill] sm:$0xff] %v6201_v23  ;;  %v1747_v46 = vadd.f32 %v1746_v13, %v6201_v23 }
 0x17b   :  { %v1748_v36 = vadd.f32 %v6191_v14, %v1747_v46  ;;  %v6224_v14 = vpop.f32.mrb[36].mxu1 }
 0x17c   :  { %10009 = vst [vmem:[#allocation104_spill] sm:$0xff] %v6224_v14  ;;  %v6227_v8 = vpop.f32.mrb[37].mxu1 }
 0x17d   :  { %v6211_v3 = vpop.f32.mrb[68].mxu0  ;;  %v1749_v29 = vadd.f32 %v6199_v21, %v1748_v36  ;;  %10010 = vst [vmem:[#allocation105_spill] sm:$0xff] %v6227_v8  ;;  %v6229_v0 = vpop.f32.mrb[38].mxu1 }
 0x17e   :  { %10005 = vst [vmem:[#allocation100_spill] sm:$0xff] %v6211_v3  ;;  %v6216_v43 = vpop.f32.mrb[69].mxu0  ;;  %10011 = vst [vmem:[#allocation106_spill] sm:$0xff] %v6229_v0  ;;  %v6234_v60 = vpop.f32.mrb[39].mxu1 }
 0x17f   :  { %10006 = vst [vmem:[#allocation101_spill] sm:$0xff] %v6216_v43  ;;  %v1750_v57 = vadd.f32 %v1749_v29, %v6216_v43  ;;  %v6219_v11 = vpop.f32.mrb[70].mxu0  ;;  %10013 = vst [vmem:[#allocation108_spill] sm:$0xff] %v6234_v60 }
 0x180   :  { %10007 = vst [vmem:[#allocation102_spill] sm:$0xff] %v6219_v11  ;;  %v6221_v13 = vpop.f32.mrb[71].mxu0 }
 0x181   :  { %10008 = vst [vmem:[#allocation103_spill] sm:$0xff] %v6221_v13  ;;  %v1751_v46 = vadd.f32 %v1750_v57, %v6221_v13 }
 0x183   :  { %v1752_v23 = vadd.f32 %v6211_v3, %v1751_v46  ;;  %v6244_v3 = vpop.f32.mrb[40].mxu1 }
 0x184   :  { %10017 = vst [vmem:[#allocation112_spill] sm:$0xff] %v6244_v3  ;;  %v6247_v62 = vpop.f32.mrb[41].mxu1 }
 0x185   :  { %v6231_v36 = vpop.f32.mrb[72].mxu0  ;;  %v1753_v21 = vadd.f32 %v6219_v11, %v1752_v23  ;;  %10018 = vst [vmem:[#allocation113_spill] sm:$0xff] %v6247_v62  ;;  %v6249_v54 = vpop.f32.mrb[42].mxu1 }
 0x186   :  { %10012 = vst [vmem:[#allocation107_spill] sm:$0xff] %v6231_v36  ;;  %v6236_v29 = vpop.f32.mrb[73].mxu0  ;;  %10019 = vst [vmem:[#allocation114_spill] sm:$0xff] %v6249_v54  ;;  %v6254_v50 = vpop.f32.mrb[43].mxu1 }
 0x187   :  { %10014 = vst [vmem:[#allocation109_spill] sm:$0xff] %v6236_v29  ;;  %v1754_v43 = vadd.f32 %v1753_v21, %v6236_v29  ;;  %v6239_v1 = vpop.f32.mrb[74].mxu0  ;;  %10021 = vst [vmem:[#allocation116_spill] sm:$0xff] %v6254_v50 }
 0x188   :  { %10015 = vst [vmem:[#allocation110_spill] sm:$0xff] %v6239_v1  ;;  %v6241_v57 = vpop.f32.mrb[75].mxu0 }
 0x189   :  { %10016 = vst [vmem:[#allocation111_spill] sm:$0xff] %v6241_v57  ;;  %v1755_v46 = vadd.f32 %v1754_v43, %v6241_v57 }
 0x18b   :  { %v1756_v13 = vadd.f32 %v6231_v36, %v1755_v46  ;;  %v6264_v36 = vpop.f32.mrb[44].mxu1 }
 0x18c   :  { %10025 = vst [vmem:[#allocation120_spill] sm:$0xff] %v6264_v36  ;;  %v6267_v52 = vpop.f32.mrb[45].mxu1 }
 0x18d   :  { %v6251_v23 = vpop.f32.mrb[76].mxu0  ;;  %v1757_v11 = vadd.f32 %v6239_v1, %v1756_v13  ;;  %10026 = vst [vmem:[#allocation121_spill] sm:$0xff] %v6267_v52  ;;  %v6269_v44 = vpop.f32.mrb[46].mxu1 }
 0x18e   :  { %10020 = vst [vmem:[#allocation115_spill] sm:$0xff] %v6251_v23  ;;  %v6256_v21 = vpop.f32.mrb[77].mxu0  ;;  %10027 = vst [vmem:[#allocation122_spill] sm:$0xff] %v6269_v44  ;;  %v6274_v40 = vpop.f32.mrb[47].mxu1 }
 0x18f   :  { %10022 = vst [vmem:[#allocation117_spill] sm:$0xff] %v6256_v21  ;;  %v1758_v29 = vadd.f32 %v1757_v11, %v6256_v21  ;;  %v6259_v55 = vpop.f32.mrb[78].mxu0  ;;  %10029 = vst [vmem:[#allocation124_spill] sm:$0xff] %v6274_v40 }
 0x190   :  { %10023 = vst [vmem:[#allocation118_spill] sm:$0xff] %v6259_v55  ;;  %v6261_v43 = vpop.f32.mrb[79].mxu0 }
 0x191   :  { %10024 = vst [vmem:[#allocation119_spill] sm:$0xff] %v6261_v43  ;;  %v1759_v46 = vadd.f32 %v1758_v29, %v6261_v43 }
 0x193   :  { %v1760_v57 = vadd.f32 %v6251_v23, %v1759_v46  ;;  %v6284_v23 = vpop.f32.mrb[48].mxu1 }
 0x194   :  { %10033 = vst [vmem:[#allocation128_spill] sm:$0xff] %v6284_v23  ;;  %v6287_v42 = vpop.f32.mrb[49].mxu1 }
 0x195   :  { %v6271_v13 = vpop.f32.mrb[80].mxu0  ;;  %v1761_v1 = vadd.f32 %v6259_v55, %v1760_v57  ;;  %10034 = vst [vmem:[#allocation129_spill] sm:$0xff] %v6287_v42  ;;  %v6289_v34 = vpop.f32.mrb[50].mxu1 }
 0x196   :  { %10028 = vst [vmem:[#allocation123_spill] sm:$0xff] %v6271_v13  ;;  %v6276_v11 = vpop.f32.mrb[81].mxu0  ;;  %10035 = vst [vmem:[#allocation130_spill] sm:$0xff] %v6289_v34  ;;  %v6294_v31 = vpop.f32.mrb[51].mxu1 }
 0x197   :  { %10030 = vst [vmem:[#allocation125_spill] sm:$0xff] %v6276_v11  ;;  %v1762_v21 = vadd.f32 %v1761_v1, %v6276_v11  ;;  %v6279_v45 = vpop.f32.mrb[82].mxu0  ;;  %10037 = vst [vmem:[#allocation132_spill] sm:$0xff] %v6294_v31 }
 0x198   :  { %10031 = vst [vmem:[#allocation126_spill] sm:$0xff] %v6279_v45  ;;  %v6281_v29 = vpop.f32.mrb[83].mxu0 }
 0x199   :  { %10032 = vst [vmem:[#allocation127_spill] sm:$0xff] %v6281_v29  ;;  %v1763_v46 = vadd.f32 %v1762_v21, %v6281_v29 }
 0x19b   :  { %v1764_v43 = vadd.f32 %v6271_v13, %v1763_v46  ;;  %v6304_v13 = vpop.f32.mrb[52].mxu1 }
 0x19c   :  { %10041 = vst [vmem:[#allocation136_spill] sm:$0xff] %v6304_v13  ;;  %v6307_v33 = vpop.f32.mrb[53].mxu1 }
 0x19d   :  { %v6291_v57 = vpop.f32.mrb[84].mxu0  ;;  %v1765_v55 = vadd.f32 %v6279_v45, %v1764_v43  ;;  %10042 = vst [vmem:[#allocation137_spill] sm:$0xff] %v6307_v33  ;;  %v6309_v34 = vpop.f32.mrb[54].mxu1 }
 0x19e   :  { %10036 = vst [vmem:[#allocation131_spill] sm:$0xff] %v6291_v57  ;;  %v6296_v1 = vpop.f32.mrb[85].mxu0  ;;  %10043 = vst [vmem:[#allocation138_spill] sm:$0xff] %v6309_v34  ;;  %v6314_v23 = vpop.f32.mrb[55].mxu1 }
 0x19f   :  { %10038 = vst [vmem:[#allocation133_spill] sm:$0xff] %v6296_v1  ;;  %v1766_v11 = vadd.f32 %v1765_v55, %v6296_v1  ;;  %v6299_v35 = vpop.f32.mrb[86].mxu0  ;;  %10045 = vst [vmem:[#allocation140_spill] sm:$0xff] %v6314_v23 }
 0x1a0   :  { %10039 = vst [vmem:[#allocation134_spill] sm:$0xff] %v6299_v35  ;;  %v6301_v21 = vpop.f32.mrb[87].mxu0 }
 0x1a1   :  { %10040 = vst [vmem:[#allocation135_spill] sm:$0xff] %v6301_v21  ;;  %v1767_v46 = vadd.f32 %v1766_v11, %v6301_v21 }
 0x1a3   :  { %v1768_v29 = vadd.f32 %v6291_v57, %v1767_v46  ;;  %v6324_v57 = vpop.f32.mrb[56].mxu1 }
 0x1a4   :  { %10049 = vst [vmem:[#allocation144_spill] sm:$0xff] %v6324_v57  ;;  %v6327_v34 = vpop.f32.mrb[57].mxu1 }
 0x1a5   :  { %v6311_v43 = vpop.f32.mrb[88].mxu0  ;;  %v1769_v45 = vadd.f32 %v6299_v35, %v1768_v29  ;;  %10050 = vst [vmem:[#allocation145_spill] sm:$0xff] %v6327_v34  ;;  %v6329_v13 = vpop.f32.mrb[58].mxu1 }
 0x1a6   :  { %10044 = vst [vmem:[#allocation139_spill] sm:$0xff] %v6311_v43  ;;  %v6316_v55 = vpop.f32.mrb[89].mxu0  ;;  %10051 = vst [vmem:[#allocation146_spill] sm:$0xff] %v6329_v13  ;;  %v6334_v23 = vpop.f32.mrb[59].mxu1 }
 0x1a7   :  { %10046 = vst [vmem:[#allocation141_spill] sm:$0xff] %v6316_v55  ;;  %v1770_v1 = vadd.f32 %v1769_v45, %v6316_v55  ;;  %v6319_v31 = vpop.f32.mrb[90].mxu0  ;;  %10053 = vst [vmem:[#allocation148_spill] sm:$0xff] %v6334_v23 }
 0x1a8   :  { %10047 = vst [vmem:[#allocation142_spill] sm:$0xff] %v6319_v31  ;;  %v6321_v11 = vpop.f32.mrb[91].mxu0 }
 0x1a9   :  { %10048 = vst [vmem:[#allocation143_spill] sm:$0xff] %v6321_v11  ;;  %v1771_v46 = vadd.f32 %v1770_v1, %v6321_v11 }
 0x1ab   :  { %v1772_v21 = vadd.f32 %v6311_v43, %v1771_v46  ;;  %v6344_v43 = vpop.f32.mrb[60].mxu1 }
 0x1ac   :  { %10057 = vst [vmem:[#allocation152_spill] sm:$0xff] %v6344_v43  ;;  %v6347_v13 = vpop.f32.mrb[61].mxu1 }
 0x1ad   :  { %v6331_v29 = vpop.f32.mrb[92].mxu0  ;;  %v1773_v35 = vadd.f32 %v6319_v31, %v1772_v21  ;;  %v6349_v57 = vpop.f32.mrb[62].mxu1 }
 0x1ae   :  { %10052 = vst [vmem:[#allocation147_spill] sm:$0xff] %v6331_v29  ;;  %v6336_v45 = vpop.f32.mrb[93].mxu0  ;;  %10058 = vst [vmem:[#allocation153_spill] sm:$0xff] %v6349_v57  ;;  %v6354_v23 = vpop.f32.mrb[63].mxu1 }
 0x1af   :  { %10054 = vst [vmem:[#allocation149_spill] sm:$0xff] %v6336_v45  ;;  %v1774_v55 = vadd.f32 %v1773_v35, %v6336_v45  ;;  %v6339_v33 = vpop.f32.mrb[94].mxu0  ;;  %10060 = vst [vmem:[#allocation155_spill] sm:$0xff] %v6354_v23 }
 0x1b0   :  { %10055 = vst [vmem:[#allocation150_spill] sm:$0xff] %v6339_v33  ;;  %v6341_v1 = vpop.f32.mrb[95].mxu0 }
 0x1b1   :  { %10056 = vst [vmem:[#allocation151_spill] sm:$0xff] %v6341_v1  ;;  %v1775_v46 = vadd.f32 %v1774_v55, %v6341_v1 }
 0x1b3   :  { %v1776_v11 = vadd.f32 %v6331_v29, %v1775_v46  ;;  %v6364_v29 = vpop.f32.mrb[64].mxu1 }
 0x1b4   :  { %10064 = vst [vmem:[#allocation159_spill] sm:$0xff] %v6364_v29  ;;  %v6367_v57 = vpop.f32.mrb[65].mxu1 }
 0x1b5   :  { %v6351_v21 = vpop.f32.mrb[96].mxu0  ;;  %v1777_v31 = vadd.f32 %v6339_v33, %v1776_v11  ;;  %v6369_v43 = vpop.f32.mrb[66].mxu1 }
 0x1b6   :  { %10059 = vst [vmem:[#allocation154_spill] sm:$0xff] %v6351_v21  ;;  %v6356_v35 = vpop.f32.mrb[97].mxu0  ;;  %10065 = vst [vmem:[#allocation160_spill] sm:$0xff] %v6369_v43  ;;  %v6372_v33 = vpop.f32.mrb[67].mxu1 }
 0x1b7   :  { %10061 = vst [vmem:[#allocation156_spill] sm:$0xff] %v6356_v35  ;;  %v1778_v45 = vadd.f32 %v1777_v31, %v6356_v35  ;;  %v6359_v34 = vpop.f32.mrb[98].mxu0  ;;  %v6376_v23 = vpop.f32.mrb[68].mxu1 }
 0x1b8   :  { %10062 = vst [vmem:[#allocation157_spill] sm:$0xff] %v6359_v34  ;;  %v6361_v55 = vpop.f32.mrb[99].mxu0 }
 0x1b9   :  { %10063 = vst [vmem:[#allocation158_spill] sm:$0xff] %v6361_v55  ;;  %v1779_v46 = vadd.f32 %v1778_v45, %v6361_v55  ;;  %v6379_v55 = vpop.f32.mrb[69].mxu1 }
 0x1ba   :  { %v6381_v29 = vpop.f32.mrb[70].mxu1 }
 0x1bb   :  { %v1780_v1 = vadd.f32 %v6351_v21, %v1779_v46  ;;  %v6384_v21 = vpop.f32.mrb[71].mxu1 }
 0x1bc   :  { %v6388_v43 = vpop.f32.mrb[72].mxu1 }
 0x1bd   :  { %v1781_v11 = vadd.f32 %v6359_v34, %v1780_v1 }
 0x1bf   :  { %v1782_v31 = vadd.f32 %v1781_v11, %v6047_v63 }
 0x1c1   :  { %v1783_v35 = vadd.f32 %v1782_v31, %v6054_v5  ;;  %v6391_v31 = vpop.f32.mrb[73].mxu1 }
 0x1c2   :  { %v6393_v5 = vpop.f32.mrb[74].mxu1 }
 0x1c3   :  { %v1784_v45 = vadd.f32 %v6044_v59, %v1783_v35  ;;  %v6396_v59 = vpop.f32.mrb[75].mxu1 }
 0x1c4   :  { %v6400_v63 = vpop.f32.mrb[76].mxu1 }
 0x1c5   :  { %v1785_v46 = vadd.f32 %v6049_v2, %v1784_v45  ;;  %10066 = vst [vmem:[#allocation161_spill] sm:$0xff] %v6400_v63 }
 0x1c7   :  { %v1786_v1 = vadd.f32 %v1785_v46, %v6067_v19 }
 0x1c9   :  { %v1787_v34 = vadd.f32 %v1786_v1, %v6074_v27  ;;  %v6403_v1 = vpop.f32.mrb[77].mxu1 }
 0x1ca   :  { %v6405_v27 = vpop.f32.mrb[78].mxu1 }
 0x1cb   :  { %v1788_v11 = vadd.f32 %v6064_v15, %v1787_v34  ;;  %10067 = vst [vmem:[#allocation162_spill] sm:$0xff] %v6405_v27  ;;  %v6408_v15 = vpop.f32.mrb[79].mxu1 }
 0x1cc   :  { %v6412_v19 = vpop.f32.mrb[80].mxu1 }
 0x1cd   :  { %v1789_v35 = vadd.f32 %v6069_v22, %v1788_v11  ;;  %10068 = vst [vmem:[#allocation163_spill] sm:$0xff] %v6412_v19 }
 0x1cf   :  { %v1790_v45 = vadd.f32 %v1789_v35, %v6087_v53 }
 0x1d1   :  { %v1791_v2 = vadd.f32 %v1790_v45, %v6094_v9  ;;  %v6415_v45 = vpop.f32.mrb[81].mxu1 }
 0x1d2   :  { %10069 = vst [vmem:[#allocation164_spill] sm:$0xff] %v6415_v45  ;;  %v6417_v9 = vpop.f32.mrb[82].mxu1 }
 0x1d3   :  { %v1792_v46 = vadd.f32 %v6084_v47, %v1791_v2  ;;  %10070 = vst [vmem:[#allocation165_spill] sm:$0xff] %v6417_v9  ;;  %v6420_v47 = vpop.f32.mrb[83].mxu1 }
 0x1d4   :  { %10071 = vst [vmem:[#allocation166_spill] sm:$0xff] %v6420_v47  ;;  %v6424_v53 = vpop.f32.mrb[84].mxu1 }
 0x1d5   :  { %v1793_v34 = vadd.f32 %v6089_v58, %v1792_v46  ;;  %10072 = vst [vmem:[#allocation167_spill] sm:$0xff] %v6424_v53 }
 0x1d7   :  { %v1794_v11 = vadd.f32 %v1793_v34, %v6107_v30 }
 0x1d9   :  { %v1795_v22 = vadd.f32 %v1794_v11, %v6114_v4  ;;  %v6427_v11 = vpop.f32.mrb[85].mxu1 }
 0x1da   :  { %10073 = vst [vmem:[#allocation168_spill] sm:$0xff] %v6427_v11  ;;  %v6429_v4 = vpop.f32.mrb[86].mxu1 }
 0x1db   :  { %v1796_v35 = vadd.f32 %v6104_v24, %v1795_v22  ;;  %10074 = vst [vmem:[#allocation169_spill] sm:$0xff] %v6429_v4  ;;  %v6432_v24 = vpop.f32.mrb[87].mxu1 }
 0x1dc   :  { %10075 = vst [vmem:[#allocation170_spill] sm:$0xff] %v6432_v24  ;;  %v6436_v30 = vpop.f32.mrb[88].mxu1 }
 0x1dd   :  { %v1797_v2 = vadd.f32 %v6109_v12, %v1796_v35  ;;  %10076 = vst [vmem:[#allocation171_spill] sm:$0xff] %v6436_v30 }
 0x1df   :  { %v1798_v46 = vadd.f32 %v1797_v2, %v6127_v7 }
 0x1e1   :  { %v1799_v58 = vadd.f32 %v1798_v46, %v6134_v49  ;;  %v6439_v46 = vpop.f32.mrb[89].mxu1 }
 0x1e2   :  { %10077 = vst [vmem:[#allocation172_spill] sm:$0xff] %v6439_v46  ;;  %v6441_v49 = vpop.f32.mrb[90].mxu1 }
 0x1e3   :  { %v1800_v34 = vadd.f32 %v6124_v61, %v1799_v58  ;;  %10078 = vst [vmem:[#allocation173_spill] sm:$0xff] %v6441_v49  ;;  %v6444_v61 = vpop.f32.mrb[91].mxu1 }
 0x1e4   :  { %10079 = vst [vmem:[#allocation174_spill] sm:$0xff] %v6444_v61  ;;  %v6448_v7 = vpop.f32.mrb[92].mxu1 }
 0x1e5   :  { %v1801_v22 = vadd.f32 %v6129_v56, %v1800_v34  ;;  %10080 = vst [vmem:[#allocation175_spill] sm:$0xff] %v6448_v7 }
 0x1e7   :  { %v1802_v35 = vadd.f32 %v1801_v22, %v6147_v51 }
 0x1e9   :  { %v1803_v12 = vadd.f32 %v1802_v35, %v6154_v37  ;;  %v6451_v35 = vpop.f32.mrb[93].mxu1 }
 0x1ea   :  { %10081 = vst [vmem:[#allocation176_spill] sm:$0xff] %v6451_v35  ;;  %v6453_v37 = vpop.f32.mrb[94].mxu1 }
 0x1eb   :  { %v1804_v2 = vadd.f32 %v6144_v48, %v1803_v12  ;;  %10082 = vst [vmem:[#allocation177_spill] sm:$0xff] %v6453_v37  ;;  %v6456_v48 = vpop.f32.mrb[95].mxu1 }
 0x1ec   :  { %10083 = vst [vmem:[#allocation178_spill] sm:$0xff] %v6456_v48 }
 0x1ed   :  { %v1805_v58 = vadd.f32 %v6149_v41, %v1804_v2 }
 0x1ef   :  { %v1806_v34 = vadd.f32 %v1805_v58, %v6167_v38 }
 0x1f1   :  { %v1807_v56 = vadd.f32 %v1806_v34, %v6174_v25 }
 0x1f3   :  { %v1808_v22 = vadd.f32 %v6164_v39, %v1807_v56 }
 0x1f5   :  { %v1809_v12 = vadd.f32 %v6169_v28, %v1808_v22 }
 0x1f7   :  { %v1810_v2 = vadd.f32 %v1809_v12, %v6187_v26 }
 0x1f9   :  { %v1811_v41 = vadd.f32 %v1810_v2, %v6194_v16 }
 0x1fb   :  { %v1812_v58 = vadd.f32 %v6184_v32, %v1811_v41 }
 0x1fd   :  { %v1813_v34 = vadd.f32 %v6189_v20, %v1812_v58 }
 0x1ff   :  { %v1814_v25 = vadd.f32 %v1813_v34, %v6207_v18 }
 0x201   :  { %v1815_v56 = vadd.f32 %v1814_v25, %v6214_v6 }
 0x203   :  { %v1816_v39 = vadd.f32 %v6204_v17, %v1815_v56 }
 0x205   :  { %v1817_v38 = vadd.f32 %v6209_v10, %v1816_v39 }
 0x207   :  { %v1818_v22 = vadd.f32 %v1817_v38, %v6227_v8 }
 0x209   :  { %v1819_v28 = vadd.f32 %v1818_v22, %v6234_v60 }
 0x20b   :  { %v1820_v12 = vadd.f32 %v6224_v14, %v1819_v28  ;;  %v10084_v14 = vld [vmem:[#allocation132_spill] sm:$0xff] }
 0x20d   :  { %v1821_v2 = vadd.f32 %v6229_v0, %v1820_v12  ;;  %v10085_v0 = vld [vmem:[#allocation128_spill] sm:$0xff] }
 0x20f   :  { %v1822_v41 = vadd.f32 %v1821_v2, %v6247_v62  ;;  %v10086_v62 = vld [vmem:[#allocation130_spill] sm:$0xff] }
 0x211   :  { %v1823_v58 = vadd.f32 %v1822_v41, %v6254_v50  ;;  %v10087_v50 = vld [vmem:[#allocation137_spill] sm:$0xff] }
 0x213   :  { %v1824_v34 = vadd.f32 %v6244_v3, %v1823_v58  ;;  %v10088_v3 = vld [vmem:[#allocation140_spill] sm:$0xff] }
 0x215   :  { %v1825_v25 = vadd.f32 %v6249_v54, %v1824_v34  ;;  %v10089_v54 = vld [vmem:[#allocation136_spill] sm:$0xff] }
 0x217   :  { %v1826_v56 = vadd.f32 %v1825_v25, %v6267_v52  ;;  %v10090_v52 = vld [vmem:[#allocation138_spill] sm:$0xff] }
 0x219   :  { %v1827_v39 = vadd.f32 %v1826_v56, %v6274_v40  ;;  %v10091_v40 = vld [vmem:[#allocation145_spill] sm:$0xff] }
 0x21b   :  { %v1828_v38 = vadd.f32 %v6264_v36, %v1827_v39  ;;  %v10092_v36 = vld [vmem:[#allocation148_spill] sm:$0xff] }
 0x21d   :  { %v1829_v22 = vadd.f32 %v6269_v44, %v1828_v38  ;;  %v10093_v44 = vld [vmem:[#allocation144_spill] sm:$0xff] }
 0x21f   :  { %v1830_v28 = vadd.f32 %v1829_v22, %v6287_v42  ;;  %v10094_v42 = vld [vmem:[#allocation146_spill] sm:$0xff] }
 0x221   :  { %v1831_v12 = vadd.f32 %v1830_v28, %v10084_v14 }
 0x223   :  { %v1832_v2 = vadd.f32 %v10085_v0, %v1831_v12  ;;  %v10095_v0 = vld [vmem:[#allocation155_spill] sm:$0xff] }
 0x225   :  { %v1833_v41 = vadd.f32 %v10086_v62, %v1832_v2  ;;  %v10096_v62 = vld [vmem:[#allocation152_spill] sm:$0xff] }
 0x227   :  { %v1834_v58 = vadd.f32 %v1833_v41, %v10087_v50  ;;  %v10097_v50 = vld [vmem:[#allocation153_spill] sm:$0xff] }
 0x229   :  { %v1835_v34 = vadd.f32 %v1834_v58, %v10088_v3 }
 0x22b   :  { %v1836_v25 = vadd.f32 %v10089_v54, %v1835_v34 }
 0x22d   :  { %v1837_v56 = vadd.f32 %v10090_v52, %v1836_v25  ;;  %v10098_v52 = vld [vmem:[#allocation159_spill] sm:$0xff] }
 0x22f   :  { %v1838_v39 = vadd.f32 %v1837_v56, %v10091_v40  ;;  %v10099_v40 = vld [vmem:[#allocation160_spill] sm:$0xff] }
 0x231   :  { %v1839_v38 = vadd.f32 %v1838_v39, %v10092_v36 }
 0x233   :  { %v1840_v22 = vadd.f32 %v10093_v44, %v1839_v38 }
 0x235   :  { %v1841_v28 = vadd.f32 %v10094_v42, %v1840_v22 }
 0x237   :  { %v1842_v12 = vadd.f32 %v1841_v28, %v6347_v13 }
 0x239   :  { %v1843_v2 = vadd.f32 %v1842_v12, %v10095_v0 }
 0x23b   :  { %v1844_v41 = vadd.f32 %v10096_v62, %v1843_v2 }
 0x23d   :  { %v1845_v58 = vadd.f32 %v10097_v50, %v1844_v41 }
 0x23f   :  { %v1846_v34 = vadd.f32 %v1845_v58, %v6367_v57 }
 0x241   :  { %v1847_v25 = vadd.f32 %v1846_v34, %v6372_v33 }
 0x243   :  { %v1848_v56 = vadd.f32 %v10098_v52, %v1847_v25 }
 0x245   :  { %v1849_v39 = vadd.f32 %v10099_v40, %v1848_v56 }
 0x247   :  { %v1850_v38 = vadd.f32 %v1849_v39, %v6379_v55 }
 0x249   :  { %v1851_v22 = vadd.f32 %v1850_v38, %v6384_v21 }
 0x24b   :  { %v1852_v28 = vadd.f32 %v6376_v23, %v1851_v22 }
 0x24d   :  { %v1853_v12 = vadd.f32 %v6381_v29, %v1852_v28 }
 0x24f   :  { %v1854_v2 = vadd.f32 %v1853_v12, %v6391_v31 }
 0x251   :  { %v1855_v41 = vadd.f32 %v1854_v2, %v6396_v59 }
 0x253   :  { %v1856_v58 = vadd.f32 %v6388_v43, %v1855_v41 }
 0x255   :  { %v1857_v34 = vadd.f32 %v6393_v5, %v1856_v58 }
 0x257   :  { %v1858_v25 = vadd.f32 %v1857_v34, %v6403_v1 }
 0x259   :  { %v1859_v56 = vadd.f32 %v1858_v25, %v6408_v15 }
 0x25b   :  { %v1860_v39 = vadd.f32 %v6400_v63, %v1859_v56 }
 0x25d   :  { %v1861_v38 = vadd.f32 %v6405_v27, %v1860_v39 }
 0x25f   :  { %v1862_v22 = vadd.f32 %v1861_v38, %v6415_v45 }
 0x261   :  { %v1863_v28 = vadd.f32 %v1862_v22, %v6420_v47 }
 0x263   :  { %v1864_v12 = vadd.f32 %v6412_v19, %v1863_v28 }
 0x265   :  { %v1865_v2 = vadd.f32 %v6417_v9, %v1864_v12 }
 0x267   :  { %v1866_v41 = vadd.f32 %v1865_v2, %v6427_v11 }
 0x269   :  { %v1867_v58 = vadd.f32 %v1866_v41, %v6432_v24 }
 0x26b   :  { %v1868_v34 = vadd.f32 %v6424_v53, %v1867_v58 }
 0x26d   :  { %v1869_v25 = vadd.f32 %v6429_v4, %v1868_v34 }
 0x26f   :  { %v1870_v56 = vadd.f32 %v1869_v25, %v6439_v46 }
 0x271   :  { %v1871_v39 = vadd.f32 %v1870_v56, %v6444_v61  ;;  %v10100_v56 = vld [vmem:[#allocation3_spill] sm:$0xff] }
 0x272   :  { %v10108_v61 = vld [vmem:[#allocation11_spill] sm:$0xff] }
 0x273   :  { %v1872_v38 = vadd.f32 %v6436_v30, %v1871_v39 }
 0x275   :  { %v1873_v22 = vadd.f32 %v6441_v49, %v1872_v38  ;;  %v10101_v38 = vld [vmem:[#allocation5_spill] sm:$0xff] }
 0x277   :  { %v1874_v28 = vadd.f32 %v1873_v22, %v6451_v35 }
 0x279   :  { %v1875_v12 = vadd.f32 %v1874_v28, %v6456_v48  ;;  %v10102_v28 = vld [vmem:[#allocation2_spill] sm:$0xff] }
 0x27b   :  { %v1876_v2 = vadd.f32 %v6448_v7, %v1875_v12 }
 0x27d   :  { %v1877_v41 = vadd.f32 %v6453_v37, %v1876_v2  ;;  %v10103_v2 = vld [vmem:[#allocation4_spill] sm:$0xff] }
 0x27f   :  { %v1878_v24 = vrot.slane %v1877_v41, 4 }
 0x281   :  { %v1879_v58 = vadd.f32 %v1878_v24, %v1877_v41 }
 0x283   :  { %v1880_v53 = vrot.slane %v1879_v58, 2 }
 0x285   :  { %v1881_v34 = vadd.f32 %v1880_v53, %v1879_v58  ;;  %v10104_v53 = vld [vmem:[#allocation7_spill] sm:$0xff] }
 0x287   :  { %v1882_v4 = vrot.slane %v1881_v34, 1 }
 0x289   :  { %v1883_v25 = vadd.f32 %v1882_v4, %v1881_v34  ;;  %v10105_v34 = vld [vmem:[#allocation9_spill] sm:$0xff] }
 0x28b   :  { %v6526_v46 = vmul.f32 0.0006377551, %v1883_v25 }
 0x28d   :  { %v1885_v39 = vsub.f32 %v10100_v56, %v6526_v46  ;;  %v1886_v22 = vsub.f32 %v10101_v38, %v6526_v46  ;;  %v1887_v48 = vsub.f32 %v10102_v28, %v6526_v46  ;;  %v1888_v24 = vsub.f32 %v10103_v2, %v6526_v46  ;;  %v10106_v38 = vld [vmem:[#allocation6_spill] sm:$0xff] }
 0x28e   :  { %v1889_v41 = vsub.f32 %v10104_v53, %v6526_v46  ;;  %v1890_v25 = vsub.f32 %v10105_v34, %v6526_v46  ;;  %v1891_v35 = vsub.f32 %v10106_v38, %v6526_v46  ;;  %v1893_v53 = vsub.f32 %v10108_v61, %v6526_v46 }
 0x28f   :  { %v2081_v12 = vmul.f32 %v1885_v39, %v1885_v39  ;;  %v2082_v7 = vmul.f32 %v1886_v22, %v1886_v22  ;;  %v2083_v4 = vmul.f32 %v1887_v48, %v1887_v48  ;;  %v2084_v56 = vmul.f32 %v1888_v24, %v1888_v24  ;;  %v10107_v39 = vld [vmem:[#allocation8_spill] sm:$0xff] }
 0x290   :  { %v2085_v49 = vmul.f32 %v1889_v41, %v1889_v41  ;;  %v1892_v22 = vsub.f32 %v10107_v39, %v6526_v46  ;;  %v2086_v30 = vmul.f32 %v1890_v25, %v1890_v25  ;;  %v2087_v48 = vmul.f32 %v1891_v35, %v1891_v35 }
 0x291   :  { %v2277_v58 = vadd.f32 %v2082_v7, %v2081_v12  ;;  %v10109_v12 = vld [vmem:[#allocation13_spill] sm:$0xff]  ;;  %v2089_v41 = vmul.f32 %v1893_v53, %v1893_v53 }
 0x292   :  { %v1894_v34 = vsub.f32 %v10109_v12, %v6526_v46  ;;  %v2088_v24 = vmul.f32 %v1892_v22, %v1892_v22 }
 0x293   :  { %v2278_v37 = vadd.f32 %v2277_v58, %v2083_v4  ;;  %v10110_v58 = vld [vmem:[#allocation10_spill] sm:$0xff] }
 0x294   :  { %v1895_v38 = vsub.f32 %v10110_v58, %v6526_v46  ;;  %v2090_v25 = vmul.f32 %v1894_v34, %v1894_v34 }
 0x295   :  { %v2279_v28 = vadd.f32 %v2278_v37, %v2084_v56  ;;  %v10111_v56 = vld [vmem:[#allocation12_spill] sm:$0xff] }
 0x296   :  { %v1896_v39 = vsub.f32 %v10111_v56, %v6526_v46  ;;  %v2091_v35 = vmul.f32 %v1895_v38, %v1895_v38 }
 0x297   :  { %v2280_v2 = vadd.f32 %v2279_v28, %v2085_v49  ;;  %v10112_v28 = vld [vmem:[#allocation15_spill] sm:$0xff] }
 0x298   :  { %v1897_v61 = vsub.f32 %v10112_v28, %v6526_v46  ;;  %v2092_v22 = vmul.f32 %v1896_v39, %v1896_v39 }
 0x299   :  { %v2281_v7 = vadd.f32 %v2280_v2, %v2086_v30  ;;  %v10113_v2 = vld [vmem:[#allocation17_spill] sm:$0xff] }
 0x29a   :  { %v1898_v12 = vsub.f32 %v10113_v2, %v6526_v46  ;;  %v2093_v53 = vmul.f32 %v1897_v61, %v1897_v61 }
 0x29b   :  { %v2282_v4 = vadd.f32 %v2281_v7, %v2087_v48  ;;  %v10114_v7 = vld [vmem:[#allocation14_spill] sm:$0xff] }
 0x29c   :  { %v1899_v58 = vsub.f32 %v10114_v7, %v6526_v46  ;;  %v2094_v34 = vmul.f32 %v1898_v12, %v1898_v12 }
 0x29d   :  { %v2283_v37 = vadd.f32 %v2282_v4, %v2088_v24  ;;  %v10115_v4 = vld [vmem:[#allocation16_spill] sm:$0xff] }
 0x29e   :  { %v1900_v56 = vsub.f32 %v10115_v4, %v6526_v46  ;;  %v2095_v38 = vmul.f32 %v1899_v58, %v1899_v58 }
 0x29f   :  { %v2284_v49 = vadd.f32 %v2283_v37, %v2089_v41  ;;  %v10116_v37 = vld [vmem:[#allocation19_spill] sm:$0xff] }
 0x2a0   :  { %v1901_v28 = vsub.f32 %v10116_v37, %v6526_v46  ;;  %v2096_v39 = vmul.f32 %v1900_v56, %v1900_v56 }
 0x2a1   :  { %v2285_v30 = vadd.f32 %v2284_v49, %v2090_v25  ;;  %v10117_v49 = vld [vmem:[#allocation21_spill] sm:$0xff] }
 0x2a2   :  { %v1902_v2 = vsub.f32 %v10117_v49, %v6526_v46  ;;  %v2097_v61 = vmul.f32 %v1901_v28, %v1901_v28 }
 0x2a3   :  { %v2286_v48 = vadd.f32 %v2285_v30, %v2091_v35  ;;  %v10118_v30 = vld [vmem:[#allocation18_spill] sm:$0xff] }
 0x2a4   :  { %v1903_v7 = vsub.f32 %v10118_v30, %v6526_v46  ;;  %v2098_v12 = vmul.f32 %v1902_v2, %v1902_v2 }
 0x2a5   :  { %v2287_v24 = vadd.f32 %v2286_v48, %v2092_v22  ;;  %v10119_v48 = vld [vmem:[#allocation20_spill] sm:$0xff] }
 0x2a6   :  { %v1904_v4 = vsub.f32 %v10119_v48, %v6526_v46  ;;  %v2099_v58 = vmul.f32 %v1903_v7, %v1903_v7 }
 0x2a7   :  { %v2288_v41 = vadd.f32 %v2287_v24, %v2093_v53  ;;  %v10120_v24 = vld [vmem:[#allocation23_spill] sm:$0xff] }
 0x2a8   :  { %v1905_v37 = vsub.f32 %v10120_v24, %v6526_v46  ;;  %v2100_v56 = vmul.f32 %v1904_v4, %v1904_v4 }
 0x2a9   :  { %v2289_v25 = vadd.f32 %v2288_v41, %v2094_v34  ;;  %v10121_v41 = vld [vmem:[#allocation25_spill] sm:$0xff] }
 0x2aa   :  { %v1906_v49 = vsub.f32 %v10121_v41, %v6526_v46  ;;  %v2101_v28 = vmul.f32 %v1905_v37, %v1905_v37 }
 0x2ab   :  { %v2290_v35 = vadd.f32 %v2289_v25, %v2095_v38  ;;  %v10122_v25 = vld [vmem:[#allocation22_spill] sm:$0xff] }
 0x2ac   :  { %v1907_v30 = vsub.f32 %v10122_v25, %v6526_v46  ;;  %v2102_v2 = vmul.f32 %v1906_v49, %v1906_v49 }
 0x2ad   :  { %v2291_v22 = vadd.f32 %v2290_v35, %v2096_v39  ;;  %v10123_v35 = vld [vmem:[#allocation24_spill] sm:$0xff] }
 0x2ae   :  { %v1908_v48 = vsub.f32 %v10123_v35, %v6526_v46  ;;  %v2103_v7 = vmul.f32 %v1907_v30, %v1907_v30 }
 0x2af   :  { %v2292_v53 = vadd.f32 %v2291_v22, %v2097_v61  ;;  %v10124_v22 = vld [vmem:[#allocation27_spill] sm:$0xff] }
 0x2b0   :  { %v1909_v24 = vsub.f32 %v10124_v22, %v6526_v46  ;;  %v2104_v4 = vmul.f32 %v1908_v48, %v1908_v48 }
 0x2b1   :  { %v2293_v34 = vadd.f32 %v2292_v53, %v2098_v12  ;;  %v10125_v53 = vld [vmem:[#allocation29_spill] sm:$0xff] }
 0x2b2   :  { %v1910_v41 = vsub.f32 %v10125_v53, %v6526_v46  ;;  %v2105_v37 = vmul.f32 %v1909_v24, %v1909_v24 }
 0x2b3   :  { %v2294_v38 = vadd.f32 %v2293_v34, %v2099_v58  ;;  %v10126_v34 = vld [vmem:[#allocation26_spill] sm:$0xff] }
 0x2b4   :  { %v1911_v25 = vsub.f32 %v10126_v34, %v6526_v46  ;;  %v2106_v49 = vmul.f32 %v1910_v41, %v1910_v41 }
 0x2b5   :  { %v2295_v39 = vadd.f32 %v2294_v38, %v2100_v56  ;;  %v10127_v38 = vld [vmem:[#allocation28_spill] sm:$0xff] }
 0x2b6   :  { %v1912_v35 = vsub.f32 %v10127_v38, %v6526_v46  ;;  %v2107_v30 = vmul.f32 %v1911_v25, %v1911_v25 }
 0x2b7   :  { %v2296_v61 = vadd.f32 %v2295_v39, %v2101_v28  ;;  %v10128_v39 = vld [vmem:[#allocation31_spill] sm:$0xff] }
 0x2b8   :  { %v1913_v22 = vsub.f32 %v10128_v39, %v6526_v46  ;;  %v2108_v48 = vmul.f32 %v1912_v35, %v1912_v35 }
 0x2b9   :  { %v2297_v12 = vadd.f32 %v2296_v61, %v2102_v2  ;;  %v10129_v61 = vld [vmem:[#allocation33_spill] sm:$0xff] }
 0x2ba   :  { %v1914_v53 = vsub.f32 %v10129_v61, %v6526_v46  ;;  %v2109_v24 = vmul.f32 %v1913_v22, %v1913_v22 }
 0x2bb   :  { %v2298_v58 = vadd.f32 %v2297_v12, %v2103_v7  ;;  %v10130_v12 = vld [vmem:[#allocation30_spill] sm:$0xff] }
 0x2bc   :  { %v1915_v34 = vsub.f32 %v10130_v12, %v6526_v46  ;;  %v2110_v41 = vmul.f32 %v1914_v53, %v1914_v53 }
 0x2bd   :  { %v2299_v56 = vadd.f32 %v2298_v58, %v2104_v4  ;;  %v10131_v58 = vld [vmem:[#allocation32_spill] sm:$0xff] }
 0x2be   :  { %v1916_v38 = vsub.f32 %v10131_v58, %v6526_v46  ;;  %v2111_v25 = vmul.f32 %v1915_v34, %v1915_v34 }
 0x2bf   :  { %v2300_v28 = vadd.f32 %v2299_v56, %v2105_v37  ;;  %v10132_v56 = vld [vmem:[#allocation35_spill] sm:$0xff] }
 0x2c0   :  { %v1917_v39 = vsub.f32 %v10132_v56, %v6526_v46  ;;  %v2112_v35 = vmul.f32 %v1916_v38, %v1916_v38 }
 0x2c1   :  { %v2301_v2 = vadd.f32 %v2300_v28, %v2106_v49  ;;  %v10133_v28 = vld [vmem:[#allocation37_spill] sm:$0xff] }
 0x2c2   :  { %v1918_v61 = vsub.f32 %v10133_v28, %v6526_v46  ;;  %v2113_v22 = vmul.f32 %v1917_v39, %v1917_v39 }
 0x2c3   :  { %v2302_v7 = vadd.f32 %v2301_v2, %v2107_v30  ;;  %v10134_v2 = vld [vmem:[#allocation34_spill] sm:$0xff] }
 0x2c4   :  { %v1919_v12 = vsub.f32 %v10134_v2, %v6526_v46  ;;  %v2114_v53 = vmul.f32 %v1918_v61, %v1918_v61 }
 0x2c5   :  { %v2303_v4 = vadd.f32 %v2302_v7, %v2108_v48  ;;  %v10135_v7 = vld [vmem:[#allocation36_spill] sm:$0xff] }
 0x2c6   :  { %v1920_v58 = vsub.f32 %v10135_v7, %v6526_v46  ;;  %v2115_v34 = vmul.f32 %v1919_v12, %v1919_v12 }
 0x2c7   :  { %v2304_v37 = vadd.f32 %v2303_v4, %v2109_v24  ;;  %v10136_v4 = vld [vmem:[#allocation43_spill] sm:$0xff] }
 0x2c8   :  { %v1921_v56 = vsub.f32 %v10136_v4, %v6526_v46  ;;  %v2116_v38 = vmul.f32 %v1920_v58, %v1920_v58 }
 0x2c9   :  { %v2305_v49 = vadd.f32 %v2304_v37, %v2110_v41  ;;  %v10137_v37 = vld [vmem:[#allocation45_spill] sm:$0xff] }
 0x2ca   :  { %v1922_v28 = vsub.f32 %v10137_v37, %v6526_v46  ;;  %v2117_v39 = vmul.f32 %v1921_v56, %v1921_v56 }
 0x2cb   :  { %v2306_v30 = vadd.f32 %v2305_v49, %v2111_v25  ;;  %v10138_v49 = vld [vmem:[#allocation41_spill] sm:$0xff] }
 0x2cc   :  { %v1923_v2 = vsub.f32 %v10138_v49, %v6526_v46  ;;  %v2118_v61 = vmul.f32 %v1922_v28, %v1922_v28 }
 0x2cd   :  { %v2307_v48 = vadd.f32 %v2306_v30, %v2112_v35  ;;  %v10139_v30 = vld [vmem:[#allocation44_spill] sm:$0xff] }
 0x2ce   :  { %v1924_v7 = vsub.f32 %v10139_v30, %v6526_v46  ;;  %v2119_v12 = vmul.f32 %v1923_v2, %v1923_v2 }
 0x2cf   :  { %v2308_v24 = vadd.f32 %v2307_v48, %v2113_v22  ;;  %v10140_v48 = vld [vmem:[#allocation51_spill] sm:$0xff] }
 0x2d0   :  { %v1925_v4 = vsub.f32 %v10140_v48, %v6526_v46  ;;  %v2120_v58 = vmul.f32 %v1924_v7, %v1924_v7 }
 0x2d1   :  { %v2309_v41 = vadd.f32 %v2308_v24, %v2114_v53  ;;  %v10141_v24 = vld [vmem:[#allocation53_spill] sm:$0xff] }
 0x2d2   :  { %v1926_v37 = vsub.f32 %v10141_v24, %v6526_v46  ;;  %v2121_v56 = vmul.f32 %v1925_v4, %v1925_v4 }
 0x2d3   :  { %v2310_v25 = vadd.f32 %v2309_v41, %v2115_v34  ;;  %v10142_v41 = vld [vmem:[#allocation49_spill] sm:$0xff] }
 0x2d4   :  { %v1927_v49 = vsub.f32 %v10142_v41, %v6526_v46  ;;  %v2122_v28 = vmul.f32 %v1926_v37, %v1926_v37 }
 0x2d5   :  { %v2311_v35 = vadd.f32 %v2310_v25, %v2116_v38  ;;  %v10143_v25 = vld [vmem:[#allocation52_spill] sm:$0xff] }
 0x2d6   :  { %v1928_v30 = vsub.f32 %v10143_v25, %v6526_v46  ;;  %v2123_v2 = vmul.f32 %v1927_v49, %v1927_v49 }
 0x2d7   :  { %v2312_v22 = vadd.f32 %v2311_v35, %v2117_v39  ;;  %v10144_v35 = vld [vmem:[#allocation59_spill] sm:$0xff] }
 0x2d8   :  { %v1929_v48 = vsub.f32 %v10144_v35, %v6526_v46  ;;  %v2124_v7 = vmul.f32 %v1928_v30, %v1928_v30 }
 0x2d9   :  { %v2313_v53 = vadd.f32 %v2312_v22, %v2118_v61  ;;  %v10145_v22 = vld [vmem:[#allocation61_spill] sm:$0xff] }
 0x2da   :  { %v1930_v24 = vsub.f32 %v10145_v22, %v6526_v46  ;;  %v2125_v4 = vmul.f32 %v1929_v48, %v1929_v48 }
 0x2db   :  { %v2314_v34 = vadd.f32 %v2313_v53, %v2119_v12  ;;  %v10146_v53 = vld [vmem:[#allocation57_spill] sm:$0xff] }
 0x2dc   :  { %v1931_v41 = vsub.f32 %v10146_v53, %v6526_v46  ;;  %v2126_v37 = vmul.f32 %v1930_v24, %v1930_v24 }
 0x2dd   :  { %v2315_v38 = vadd.f32 %v2314_v34, %v2120_v58  ;;  %v10147_v34 = vld [vmem:[#allocation60_spill] sm:$0xff] }
 0x2de   :  { %v1932_v25 = vsub.f32 %v10147_v34, %v6526_v46  ;;  %v2127_v49 = vmul.f32 %v1931_v41, %v1931_v41 }
 0x2df   :  { %v2316_v39 = vadd.f32 %v2315_v38, %v2121_v56  ;;  %v10148_v38 = vld [vmem:[#allocation67_spill] sm:$0xff] }
 0x2e0   :  { %v1933_v35 = vsub.f32 %v10148_v38, %v6526_v46  ;;  %v2128_v30 = vmul.f32 %v1932_v25, %v1932_v25 }
 0x2e1   :  { %v2317_v61 = vadd.f32 %v2316_v39, %v2122_v28  ;;  %v10149_v39 = vld [vmem:[#allocation69_spill] sm:$0xff] }
 0x2e2   :  { %v1934_v22 = vsub.f32 %v10149_v39, %v6526_v46  ;;  %v2129_v48 = vmul.f32 %v1933_v35, %v1933_v35 }
 0x2e3   :  { %v2318_v12 = vadd.f32 %v2317_v61, %v2123_v2  ;;  %v10150_v61 = vld [vmem:[#allocation65_spill] sm:$0xff] }
 0x2e4   :  { %v1935_v53 = vsub.f32 %v10150_v61, %v6526_v46  ;;  %v2130_v24 = vmul.f32 %v1934_v22, %v1934_v22 }
 0x2e5   :  { %v2319_v58 = vadd.f32 %v2318_v12, %v2124_v7  ;;  %v10151_v12 = vld [vmem:[#allocation68_spill] sm:$0xff] }
 0x2e6   :  { %v1936_v34 = vsub.f32 %v10151_v12, %v6526_v46  ;;  %v2131_v41 = vmul.f32 %v1935_v53, %v1935_v53 }
 0x2e7   :  { %v2320_v56 = vadd.f32 %v2319_v58, %v2125_v4  ;;  %v10152_v58 = vld [vmem:[#allocation75_spill] sm:$0xff] }
 0x2e8   :  { %v1937_v38 = vsub.f32 %v10152_v58, %v6526_v46  ;;  %v2132_v25 = vmul.f32 %v1936_v34, %v1936_v34 }
 0x2e9   :  { %v2321_v28 = vadd.f32 %v2320_v56, %v2126_v37  ;;  %v10153_v56 = vld [vmem:[#allocation77_spill] sm:$0xff] }
 0x2ea   :  { %v1938_v39 = vsub.f32 %v10153_v56, %v6526_v46  ;;  %v2133_v35 = vmul.f32 %v1937_v38, %v1937_v38 }
 0x2eb   :  { %v2322_v2 = vadd.f32 %v2321_v28, %v2127_v49  ;;  %v10154_v28 = vld [vmem:[#allocation73_spill] sm:$0xff] }
 0x2ec   :  { %v1939_v61 = vsub.f32 %v10154_v28, %v6526_v46  ;;  %v2134_v22 = vmul.f32 %v1938_v39, %v1938_v39 }
 0x2ed   :  { %v2323_v7 = vadd.f32 %v2322_v2, %v2128_v30  ;;  %v10155_v2 = vld [vmem:[#allocation76_spill] sm:$0xff] }
 0x2ee   :  { %v1940_v12 = vsub.f32 %v10155_v2, %v6526_v46  ;;  %v2135_v53 = vmul.f32 %v1939_v61, %v1939_v61 }
 0x2ef   :  { %v2324_v4 = vadd.f32 %v2323_v7, %v2129_v48  ;;  %v10156_v7 = vld [vmem:[#allocation83_spill] sm:$0xff] }
 0x2f0   :  { %v1941_v58 = vsub.f32 %v10156_v7, %v6526_v46  ;;  %v2136_v34 = vmul.f32 %v1940_v12, %v1940_v12 }
 0x2f1   :  { %v2325_v37 = vadd.f32 %v2324_v4, %v2130_v24  ;;  %v10157_v4 = vld [vmem:[#allocation85_spill] sm:$0xff] }
 0x2f2   :  { %v1942_v56 = vsub.f32 %v10157_v4, %v6526_v46  ;;  %v2137_v38 = vmul.f32 %v1941_v58, %v1941_v58 }
 0x2f3   :  { %v2326_v49 = vadd.f32 %v2325_v37, %v2131_v41  ;;  %v10158_v37 = vld [vmem:[#allocation81_spill] sm:$0xff] }
 0x2f4   :  { %v1943_v28 = vsub.f32 %v10158_v37, %v6526_v46  ;;  %v2138_v39 = vmul.f32 %v1942_v56, %v1942_v56 }
 0x2f5   :  { %v2327_v30 = vadd.f32 %v2326_v49, %v2132_v25  ;;  %v10159_v49 = vld [vmem:[#allocation84_spill] sm:$0xff] }
 0x2f6   :  { %v1944_v2 = vsub.f32 %v10159_v49, %v6526_v46  ;;  %v2139_v61 = vmul.f32 %v1943_v28, %v1943_v28 }
 0x2f7   :  { %v2328_v48 = vadd.f32 %v2327_v30, %v2133_v35  ;;  %v10160_v30 = vld [vmem:[#allocation91_spill] sm:$0xff] }
 0x2f8   :  { %v1945_v7 = vsub.f32 %v10160_v30, %v6526_v46  ;;  %v2140_v12 = vmul.f32 %v1944_v2, %v1944_v2 }
 0x2f9   :  { %v2329_v24 = vadd.f32 %v2328_v48, %v2134_v22  ;;  %v10161_v48 = vld [vmem:[#allocation93_spill] sm:$0xff] }
 0x2fa   :  { %v1946_v4 = vsub.f32 %v10161_v48, %v6526_v46  ;;  %v2141_v58 = vmul.f32 %v1945_v7, %v1945_v7 }
 0x2fb   :  { %v2330_v41 = vadd.f32 %v2329_v24, %v2135_v53  ;;  %v10162_v24 = vld [vmem:[#allocation89_spill] sm:$0xff] }
 0x2fc   :  { %v1947_v37 = vsub.f32 %v10162_v24, %v6526_v46  ;;  %v2142_v56 = vmul.f32 %v1946_v4, %v1946_v4 }
 0x2fd   :  { %v2331_v25 = vadd.f32 %v2330_v41, %v2136_v34  ;;  %v10163_v41 = vld [vmem:[#allocation92_spill] sm:$0xff] }
 0x2fe   :  { %v1948_v49 = vsub.f32 %v10163_v41, %v6526_v46  ;;  %v2143_v28 = vmul.f32 %v1947_v37, %v1947_v37 }
 0x2ff   :  { %v2332_v35 = vadd.f32 %v2331_v25, %v2137_v38  ;;  %v10164_v25 = vld [vmem:[#allocation95_spill] sm:$0xff] }
 0x300   :  { %v1949_v30 = vsub.f32 %v10164_v25, %v6526_v46  ;;  %v2144_v2 = vmul.f32 %v1948_v49, %v1948_v49 }
 0x301   :  { %v2333_v22 = vadd.f32 %v2332_v35, %v2138_v39  ;;  %v10165_v35 = vld [vmem:[#allocation97_spill] sm:$0xff] }
 0x302   :  { %v1950_v48 = vsub.f32 %v10165_v35, %v6526_v46  ;;  %v2145_v7 = vmul.f32 %v1949_v30, %v1949_v30 }
 0x303   :  { %v2334_v53 = vadd.f32 %v2333_v22, %v2139_v61  ;;  %v10166_v22 = vld [vmem:[#allocation94_spill] sm:$0xff] }
 0x304   :  { %v1951_v24 = vsub.f32 %v10166_v22, %v6526_v46  ;;  %v2146_v4 = vmul.f32 %v1950_v48, %v1950_v48 }
 0x305   :  { %v2335_v34 = vadd.f32 %v2334_v53, %v2140_v12  ;;  %v10167_v53 = vld [vmem:[#allocation96_spill] sm:$0xff] }
 0x306   :  { %v1952_v41 = vsub.f32 %v10167_v53, %v6526_v46  ;;  %v2147_v37 = vmul.f32 %v1951_v24, %v1951_v24 }
 0x307   :  { %v2336_v38 = vadd.f32 %v2335_v34, %v2141_v58  ;;  %v10168_v34 = vld [vmem:[#allocation101_spill] sm:$0xff] }
 0x308   :  { %v1953_v25 = vsub.f32 %v10168_v34, %v6526_v46  ;;  %v2148_v49 = vmul.f32 %v1952_v41, %v1952_v41 }
 0x309   :  { %v2337_v39 = vadd.f32 %v2336_v38, %v2142_v56  ;;  %v10169_v38 = vld [vmem:[#allocation103_spill] sm:$0xff] }
 0x30a   :  { %v1954_v35 = vsub.f32 %v10169_v38, %v6526_v46  ;;  %v2149_v30 = vmul.f32 %v1953_v25, %v1953_v25 }
 0x30b   :  { %v2338_v61 = vadd.f32 %v2337_v39, %v2143_v28  ;;  %v10170_v39 = vld [vmem:[#allocation100_spill] sm:$0xff] }
 0x30c   :  { %v1955_v22 = vsub.f32 %v10170_v39, %v6526_v46  ;;  %v2150_v48 = vmul.f32 %v1954_v35, %v1954_v35 }
 0x30d   :  { %v2339_v12 = vadd.f32 %v2338_v61, %v2144_v2  ;;  %v10171_v61 = vld [vmem:[#allocation102_spill] sm:$0xff] }
 0x30e   :  { %v1956_v53 = vsub.f32 %v10171_v61, %v6526_v46  ;;  %v2151_v24 = vmul.f32 %v1955_v22, %v1955_v22 }
 0x30f   :  { %v2340_v58 = vadd.f32 %v2339_v12, %v2145_v7  ;;  %v10172_v12 = vld [vmem:[#allocation109_spill] sm:$0xff] }
 0x310   :  { %v1957_v34 = vsub.f32 %v10172_v12, %v6526_v46  ;;  %v2152_v41 = vmul.f32 %v1956_v53, %v1956_v53 }
 0x311   :  { %v2341_v56 = vadd.f32 %v2340_v58, %v2146_v4  ;;  %v10173_v58 = vld [vmem:[#allocation111_spill] sm:$0xff] }
 0x312   :  { %v1958_v38 = vsub.f32 %v10173_v58, %v6526_v46  ;;  %v2153_v25 = vmul.f32 %v1957_v34, %v1957_v34 }
 0x313   :  { %v2342_v28 = vadd.f32 %v2341_v56, %v2147_v37  ;;  %v10174_v56 = vld [vmem:[#allocation107_spill] sm:$0xff] }
 0x314   :  { %v1959_v39 = vsub.f32 %v10174_v56, %v6526_v46  ;;  %v2154_v35 = vmul.f32 %v1958_v38, %v1958_v38 }
 0x315   :  { %v2343_v2 = vadd.f32 %v2342_v28, %v2148_v49  ;;  %v10175_v28 = vld [vmem:[#allocation110_spill] sm:$0xff] }
 0x316   :  { %v1960_v61 = vsub.f32 %v10175_v28, %v6526_v46  ;;  %v2155_v22 = vmul.f32 %v1959_v39, %v1959_v39 }
 0x317   :  { %v2344_v7 = vadd.f32 %v2343_v2, %v2149_v30  ;;  %v10176_v2 = vld [vmem:[#allocation117_spill] sm:$0xff] }
 0x318   :  { %v1961_v12 = vsub.f32 %v10176_v2, %v6526_v46  ;;  %v2156_v53 = vmul.f32 %v1960_v61, %v1960_v61 }
 0x319   :  { %v2345_v4 = vadd.f32 %v2344_v7, %v2150_v48  ;;  %v10177_v7 = vld [vmem:[#allocation119_spill] sm:$0xff] }
 0x31a   :  { %v1962_v58 = vsub.f32 %v10177_v7, %v6526_v46  ;;  %v2157_v34 = vmul.f32 %v1961_v12, %v1961_v12 }
 0x31b   :  { %v2346_v37 = vadd.f32 %v2345_v4, %v2151_v24  ;;  %v10178_v4 = vld [vmem:[#allocation115_spill] sm:$0xff] }
 0x31c   :  { %v1963_v56 = vsub.f32 %v10178_v4, %v6526_v46  ;;  %v2158_v38 = vmul.f32 %v1962_v58, %v1962_v58 }
 0x31d   :  { %v2347_v49 = vadd.f32 %v2346_v37, %v2152_v41  ;;  %v10179_v37 = vld [vmem:[#allocation118_spill] sm:$0xff] }
 0x31e   :  { %v1964_v28 = vsub.f32 %v10179_v37, %v6526_v46  ;;  %v2159_v39 = vmul.f32 %v1963_v56, %v1963_v56 }
 0x31f   :  { %v2348_v30 = vadd.f32 %v2347_v49, %v2153_v25  ;;  %v10180_v49 = vld [vmem:[#allocation125_spill] sm:$0xff] }
 0x320   :  { %v1965_v2 = vsub.f32 %v10180_v49, %v6526_v46  ;;  %v2160_v61 = vmul.f32 %v1964_v28, %v1964_v28 }
 0x321   :  { %v2349_v48 = vadd.f32 %v2348_v30, %v2154_v35  ;;  %v10181_v30 = vld [vmem:[#allocation127_spill] sm:$0xff] }
 0x322   :  { %v1966_v7 = vsub.f32 %v10181_v30, %v6526_v46  ;;  %v2161_v12 = vmul.f32 %v1965_v2, %v1965_v2 }
 0x323   :  { %v2350_v24 = vadd.f32 %v2349_v48, %v2155_v22  ;;  %v10182_v48 = vld [vmem:[#allocation123_spill] sm:$0xff] }
 0x324   :  { %v1967_v4 = vsub.f32 %v10182_v48, %v6526_v46  ;;  %v2162_v58 = vmul.f32 %v1966_v7, %v1966_v7 }
 0x325   :  { %v2351_v41 = vadd.f32 %v2350_v24, %v2156_v53  ;;  %v10183_v24 = vld [vmem:[#allocation126_spill] sm:$0xff] }
 0x326   :  { %v1968_v37 = vsub.f32 %v10183_v24, %v6526_v46  ;;  %v2163_v56 = vmul.f32 %v1967_v4, %v1967_v4 }
 0x327   :  { %v2352_v25 = vadd.f32 %v2351_v41, %v2157_v34  ;;  %v10184_v41 = vld [vmem:[#allocation133_spill] sm:$0xff] }
 0x328   :  { %v1969_v49 = vsub.f32 %v10184_v41, %v6526_v46  ;;  %v2164_v28 = vmul.f32 %v1968_v37, %v1968_v37 }
 0x329   :  { %v2353_v35 = vadd.f32 %v2352_v25, %v2158_v38  ;;  %v10185_v25 = vld [vmem:[#allocation135_spill] sm:$0xff] }
 0x32a   :  { %v1970_v30 = vsub.f32 %v10185_v25, %v6526_v46  ;;  %v2165_v2 = vmul.f32 %v1969_v49, %v1969_v49 }
 0x32b   :  { %v2354_v22 = vadd.f32 %v2353_v35, %v2159_v39  ;;  %v10186_v35 = vld [vmem:[#allocation131_spill] sm:$0xff] }
 0x32c   :  { %v1971_v48 = vsub.f32 %v10186_v35, %v6526_v46  ;;  %v2166_v7 = vmul.f32 %v1970_v30, %v1970_v30 }
 0x32d   :  { %v2355_v53 = vadd.f32 %v2354_v22, %v2160_v61  ;;  %v10187_v22 = vld [vmem:[#allocation134_spill] sm:$0xff] }
 0x32e   :  { %v1972_v24 = vsub.f32 %v10187_v22, %v6526_v46  ;;  %v2167_v4 = vmul.f32 %v1971_v48, %v1971_v48 }
 0x32f   :  { %v2356_v34 = vadd.f32 %v2355_v53, %v2161_v12  ;;  %v10188_v53 = vld [vmem:[#allocation141_spill] sm:$0xff] }
 0x330   :  { %v1973_v41 = vsub.f32 %v10188_v53, %v6526_v46  ;;  %v2168_v37 = vmul.f32 %v1972_v24, %v1972_v24 }
 0x331   :  { %v2357_v38 = vadd.f32 %v2356_v34, %v2162_v58  ;;  %v10189_v34 = vld [vmem:[#allocation143_spill] sm:$0xff] }
 0x332   :  { %v1974_v25 = vsub.f32 %v10189_v34, %v6526_v46  ;;  %v2169_v49 = vmul.f32 %v1973_v41, %v1973_v41 }
 0x333   :  { %v2358_v39 = vadd.f32 %v2357_v38, %v2163_v56  ;;  %v10190_v38 = vld [vmem:[#allocation139_spill] sm:$0xff] }
 0x334   :  { %v1975_v35 = vsub.f32 %v10190_v38, %v6526_v46  ;;  %v2170_v30 = vmul.f32 %v1974_v25, %v1974_v25 }
 0x335   :  { %v2359_v61 = vadd.f32 %v2358_v39, %v2164_v28  ;;  %v10191_v39 = vld [vmem:[#allocation142_spill] sm:$0xff] }
 0x336   :  { %v1976_v22 = vsub.f32 %v10191_v39, %v6526_v46  ;;  %v2171_v48 = vmul.f32 %v1975_v35, %v1975_v35 }
 0x337   :  { %v2360_v12 = vadd.f32 %v2359_v61, %v2165_v2  ;;  %v10192_v61 = vld [vmem:[#allocation149_spill] sm:$0xff] }
 0x338   :  { %v1977_v53 = vsub.f32 %v10192_v61, %v6526_v46  ;;  %v2172_v24 = vmul.f32 %v1976_v22, %v1976_v22 }
 0x339   :  { %v2361_v58 = vadd.f32 %v2360_v12, %v2166_v7  ;;  %v10193_v12 = vld [vmem:[#allocation151_spill] sm:$0xff] }
 0x33a   :  { %v1978_v34 = vsub.f32 %v10193_v12, %v6526_v46  ;;  %v2173_v41 = vmul.f32 %v1977_v53, %v1977_v53 }
 0x33b   :  { %v2362_v56 = vadd.f32 %v2361_v58, %v2167_v4  ;;  %v10194_v58 = vld [vmem:[#allocation147_spill] sm:$0xff] }
 0x33c   :  { %v1979_v38 = vsub.f32 %v10194_v58, %v6526_v46  ;;  %v2174_v25 = vmul.f32 %v1978_v34, %v1978_v34 }
 0x33d   :  { %v2363_v28 = vadd.f32 %v2362_v56, %v2168_v37  ;;  %v10195_v56 = vld [vmem:[#allocation150_spill] sm:$0xff] }
 0x33e   :  { %v1980_v39 = vsub.f32 %v10195_v56, %v6526_v46  ;;  %v2175_v35 = vmul.f32 %v1979_v38, %v1979_v38 }
 0x33f   :  { %v2364_v2 = vadd.f32 %v2363_v28, %v2169_v49  ;;  %v10196_v28 = vld [vmem:[#allocation156_spill] sm:$0xff] }
 0x340   :  { %v1981_v61 = vsub.f32 %v10196_v28, %v6526_v46  ;;  %v2176_v22 = vmul.f32 %v1980_v39, %v1980_v39 }
 0x341   :  { %v2365_v7 = vadd.f32 %v2364_v2, %v2170_v30  ;;  %v10197_v2 = vld [vmem:[#allocation158_spill] sm:$0xff] }
 0x342   :  { %v1982_v12 = vsub.f32 %v10197_v2, %v6526_v46  ;;  %v2177_v53 = vmul.f32 %v1981_v61, %v1981_v61 }
 0x343   :  { %v2366_v4 = vadd.f32 %v2365_v7, %v2171_v48  ;;  %v10198_v7 = vld [vmem:[#allocation154_spill] sm:$0xff] }
 0x344   :  { %v1983_v58 = vsub.f32 %v10198_v7, %v6526_v46  ;;  %v2178_v34 = vmul.f32 %v1982_v12, %v1982_v12 }
 0x345   :  { %v2367_v37 = vadd.f32 %v2366_v4, %v2172_v24  ;;  %v10199_v4 = vld [vmem:[#allocation157_spill] sm:$0xff] }
 0x346   :  { %v1984_v56 = vsub.f32 %v10199_v4, %v6526_v46  ;;  %v2179_v38 = vmul.f32 %v1983_v58, %v1983_v58 }
 0x347   :  { %v2368_v49 = vadd.f32 %v2367_v37, %v2173_v41  ;;  %v10200_v37 = vld [vmem:[#allocation39_spill] sm:$0xff] }
 0x348   :  { %v1985_v28 = vsub.f32 %v10200_v37, %v6526_v46  ;;  %v2180_v39 = vmul.f32 %v1984_v56, %v1984_v56 }
 0x349   :  { %v2369_v30 = vadd.f32 %v2368_v49, %v2174_v25  ;;  %v10201_v49 = vld [vmem:[#allocation42_spill] sm:$0xff] }
 0x34a   :  { %v1986_v2 = vsub.f32 %v10201_v49, %v6526_v46  ;;  %v2181_v61 = vmul.f32 %v1985_v28, %v1985_v28 }
 0x34b   :  { %v2370_v48 = vadd.f32 %v2369_v30, %v2175_v35  ;;  %v10202_v30 = vld [vmem:[#allocation38_spill] sm:$0xff] }
 0x34c   :  { %v1987_v7 = vsub.f32 %v10202_v30, %v6526_v46  ;;  %v2182_v12 = vmul.f32 %v1986_v2, %v1986_v2 }
 0x34d   :  { %v2371_v24 = vadd.f32 %v2370_v48, %v2176_v22  ;;  %v10203_v48 = vld [vmem:[#allocation40_spill] sm:$0xff] }
 0x34e   :  { %v1988_v4 = vsub.f32 %v10203_v48, %v6526_v46  ;;  %v2183_v58 = vmul.f32 %v1987_v7, %v1987_v7 }
 0x34f   :  { %v2372_v41 = vadd.f32 %v2371_v24, %v2177_v53  ;;  %v10204_v24 = vld [vmem:[#allocation47_spill] sm:$0xff] }
 0x350   :  { %v1989_v37 = vsub.f32 %v10204_v24, %v6526_v46  ;;  %v2184_v56 = vmul.f32 %v1988_v4, %v1988_v4 }
 0x351   :  { %v2373_v25 = vadd.f32 %v2372_v41, %v2178_v34  ;;  %v10205_v41 = vld [vmem:[#allocation50_spill] sm:$0xff] }
 0x352   :  { %v1990_v49 = vsub.f32 %v10205_v41, %v6526_v46  ;;  %v2185_v28 = vmul.f32 %v1989_v37, %v1989_v37 }
 0x353   :  { %v2374_v35 = vadd.f32 %v2373_v25, %v2179_v38  ;;  %v10206_v25 = vld [vmem:[#allocation46_spill] sm:$0xff] }
 0x354   :  { %v1991_v30 = vsub.f32 %v10206_v25, %v6526_v46  ;;  %v2186_v2 = vmul.f32 %v1990_v49, %v1990_v49 }
 0x355   :  { %v2375_v22 = vadd.f32 %v2374_v35, %v2180_v39  ;;  %v10207_v35 = vld [vmem:[#allocation48_spill] sm:$0xff] }
 0x356   :  { %v1992_v48 = vsub.f32 %v10207_v35, %v6526_v46  ;;  %v2187_v7 = vmul.f32 %v1991_v30, %v1991_v30 }
 0x357   :  { %v2376_v53 = vadd.f32 %v2375_v22, %v2181_v61  ;;  %v10208_v22 = vld [vmem:[#allocation55_spill] sm:$0xff] }
 0x358   :  { %v1993_v24 = vsub.f32 %v10208_v22, %v6526_v46  ;;  %v2188_v4 = vmul.f32 %v1992_v48, %v1992_v48 }
 0x359   :  { %v2377_v34 = vadd.f32 %v2376_v53, %v2182_v12  ;;  %v10209_v53 = vld [vmem:[#allocation58_spill] sm:$0xff] }
 0x35a   :  { %v1994_v41 = vsub.f32 %v10209_v53, %v6526_v46  ;;  %v2189_v37 = vmul.f32 %v1993_v24, %v1993_v24 }
 0x35b   :  { %v2378_v38 = vadd.f32 %v2377_v34, %v2183_v58  ;;  %v10210_v34 = vld [vmem:[#allocation54_spill] sm:$0xff] }
 0x35c   :  { %v1995_v25 = vsub.f32 %v10210_v34, %v6526_v46  ;;  %v2190_v49 = vmul.f32 %v1994_v41, %v1994_v41 }
 0x35d   :  { %v2379_v39 = vadd.f32 %v2378_v38, %v2184_v56  ;;  %v10211_v38 = vld [vmem:[#allocation56_spill] sm:$0xff] }
 0x35e   :  { %v1996_v35 = vsub.f32 %v10211_v38, %v6526_v46  ;;  %v2191_v30 = vmul.f32 %v1995_v25, %v1995_v25 }
 0x35f   :  { %v2380_v61 = vadd.f32 %v2379_v39, %v2185_v28  ;;  %v10212_v39 = vld [vmem:[#allocation63_spill] sm:$0xff] }
 0x360   :  { %v1997_v22 = vsub.f32 %v10212_v39, %v6526_v46  ;;  %v2192_v48 = vmul.f32 %v1996_v35, %v1996_v35 }
 0x361   :  { %v2381_v12 = vadd.f32 %v2380_v61, %v2186_v2  ;;  %v10213_v61 = vld [vmem:[#allocation66_spill] sm:$0xff] }
 0x362   :  { %v1998_v53 = vsub.f32 %v10213_v61, %v6526_v46  ;;  %v2193_v24 = vmul.f32 %v1997_v22, %v1997_v22 }
 0x363   :  { %v2382_v58 = vadd.f32 %v2381_v12, %v2187_v7  ;;  %v10214_v12 = vld [vmem:[#allocation62_spill] sm:$0xff] }
 0x364   :  { %v1999_v34 = vsub.f32 %v10214_v12, %v6526_v46  ;;  %v2194_v41 = vmul.f32 %v1998_v53, %v1998_v53 }
 0x365   :  { %v2383_v56 = vadd.f32 %v2382_v58, %v2188_v4  ;;  %v10215_v58 = vld [vmem:[#allocation64_spill] sm:$0xff] }
 0x366   :  { %v2000_v38 = vsub.f32 %v10215_v58, %v6526_v46  ;;  %v2195_v25 = vmul.f32 %v1999_v34, %v1999_v34 }
 0x367   :  { %v2384_v28 = vadd.f32 %v2383_v56, %v2189_v37  ;;  %v10216_v56 = vld [vmem:[#allocation71_spill] sm:$0xff] }
 0x368   :  { %v2001_v39 = vsub.f32 %v10216_v56, %v6526_v46  ;;  %v2196_v35 = vmul.f32 %v2000_v38, %v2000_v38 }
 0x369   :  { %v2385_v2 = vadd.f32 %v2384_v28, %v2190_v49  ;;  %v10217_v28 = vld [vmem:[#allocation74_spill] sm:$0xff] }
 0x36a   :  { %v2002_v61 = vsub.f32 %v10217_v28, %v6526_v46  ;;  %v2197_v22 = vmul.f32 %v2001_v39, %v2001_v39 }
 0x36b   :  { %v2386_v7 = vadd.f32 %v2385_v2, %v2191_v30  ;;  %v10218_v2 = vld [vmem:[#allocation70_spill] sm:$0xff] }
 0x36c   :  { %v2003_v12 = vsub.f32 %v10218_v2, %v6526_v46  ;;  %v2198_v53 = vmul.f32 %v2002_v61, %v2002_v61 }
 0x36d   :  { %v2387_v4 = vadd.f32 %v2386_v7, %v2192_v48  ;;  %v10219_v7 = vld [vmem:[#allocation72_spill] sm:$0xff] }
 0x36e   :  { %v2004_v58 = vsub.f32 %v10219_v7, %v6526_v46  ;;  %v2199_v34 = vmul.f32 %v2003_v12, %v2003_v12 }
 0x36f   :  { %v2388_v37 = vadd.f32 %v2387_v4, %v2193_v24  ;;  %v2005_v4 = vsub.f32 %v6147_v51, %v6526_v46 }
 0x370   :  { %v2200_v38 = vmul.f32 %v2004_v58, %v2004_v58 }
 0x371   :  { %v2389_v49 = vadd.f32 %v2388_v37, %v2194_v41  ;;  %v10220_v37 = vld [vmem:[#allocation82_spill] sm:$0xff]  ;;  %v2201_v39 = vmul.f32 %v2005_v4, %v2005_v4 }
 0x372   :  { %v2006_v28 = vsub.f32 %v10220_v37, %v6526_v46 }
 0x373   :  { %v2390_v30 = vadd.f32 %v2389_v49, %v2195_v25  ;;  %v10221_v49 = vld [vmem:[#allocation78_spill] sm:$0xff] }
 0x374   :  { %v2007_v2 = vsub.f32 %v10221_v49, %v6526_v46  ;;  %v2202_v61 = vmul.f32 %v2006_v28, %v2006_v28 }
 0x375   :  { %v2391_v48 = vadd.f32 %v2390_v30, %v2196_v35  ;;  %v10222_v30 = vld [vmem:[#allocation80_spill] sm:$0xff] }
 0x376   :  { %v2008_v7 = vsub.f32 %v10222_v30, %v6526_v46  ;;  %v2203_v12 = vmul.f32 %v2007_v2, %v2007_v2 }
 0x377   :  { %v2392_v24 = vadd.f32 %v2391_v48, %v2197_v22  ;;  %v10223_v48 = vld [vmem:[#allocation87_spill] sm:$0xff] }
 0x378   :  { %v2009_v51 = vsub.f32 %v10223_v48, %v6526_v46  ;;  %v2204_v58 = vmul.f32 %v2008_v7, %v2008_v7 }
 0x379   :  { %v2393_v41 = vadd.f32 %v2392_v24, %v2198_v53  ;;  %v10224_v24 = vld [vmem:[#allocation90_spill] sm:$0xff] }
 0x37a   :  { %v2010_v37 = vsub.f32 %v10224_v24, %v6526_v46  ;;  %v2205_v4 = vmul.f32 %v2009_v51, %v2009_v51 }
 0x37b   :  { %v2394_v25 = vadd.f32 %v2393_v41, %v2199_v34  ;;  %v10225_v41 = vld [vmem:[#allocation86_spill] sm:$0xff] }
 0x37c   :  { %v2011_v49 = vsub.f32 %v10225_v41, %v6526_v46  ;;  %v2206_v28 = vmul.f32 %v2010_v37, %v2010_v37 }
 0x37d   :  { %v2395_v35 = vadd.f32 %v2394_v25, %v2200_v38  ;;  %v10226_v25 = vld [vmem:[#allocation88_spill] sm:$0xff] }
 0x37e   :  { %v2012_v30 = vsub.f32 %v10226_v25, %v6526_v46  ;;  %v2207_v2 = vmul.f32 %v2011_v49, %v2011_v49 }
 0x37f   :  { %v2396_v22 = vadd.f32 %v2395_v35, %v2201_v39  ;;  %v2013_v35 = vsub.f32 %v6187_v26, %v6526_v46 }
 0x380   :  { %v2208_v7 = vmul.f32 %v2012_v30, %v2012_v30 }
 0x381   :  { %v2397_v53 = vadd.f32 %v2396_v22, %v2202_v61  ;;  %v2014_v22 = vsub.f32 %v6194_v16, %v6526_v46  ;;  %v2209_v51 = vmul.f32 %v2013_v35, %v2013_v35 }
 0x383   :  { %v2398_v34 = vadd.f32 %v2397_v53, %v2203_v12  ;;  %v2015_v53 = vsub.f32 %v6184_v32, %v6526_v46  ;;  %v2210_v37 = vmul.f32 %v2014_v22, %v2014_v22 }
 0x385   :  { %v2399_v38 = vadd.f32 %v2398_v34, %v2204_v58  ;;  %v2016_v34 = vsub.f32 %v6189_v20, %v6526_v46  ;;  %v2211_v49 = vmul.f32 %v2015_v53, %v2015_v53 }
 0x387   :  { %v2400_v39 = vadd.f32 %v2399_v38, %v2205_v4  ;;  %v2017_v38 = vsub.f32 %v6207_v18, %v6526_v46  ;;  %v2212_v30 = vmul.f32 %v2016_v34, %v2016_v34 }
 0x389   :  { %v2401_v61 = vadd.f32 %v2400_v39, %v2206_v28  ;;  %v2018_v39 = vsub.f32 %v6214_v6, %v6526_v46  ;;  %v2213_v35 = vmul.f32 %v2017_v38, %v2017_v38 }
 0x38b   :  { %v2402_v12 = vadd.f32 %v2401_v61, %v2207_v2  ;;  %v2019_v61 = vsub.f32 %v6204_v17, %v6526_v46  ;;  %v2214_v22 = vmul.f32 %v2018_v39, %v2018_v39 }
 0x38d   :  { %v2403_v58 = vadd.f32 %v2402_v12, %v2208_v7  ;;  %v2020_v12 = vsub.f32 %v6209_v10, %v6526_v46  ;;  %v2215_v53 = vmul.f32 %v2019_v61, %v2019_v61 }
 0x38f   :  { %v2404_v4 = vadd.f32 %v2403_v58, %v2209_v51  ;;  %v2021_v58 = vsub.f32 %v6227_v8, %v6526_v46  ;;  %v2216_v34 = vmul.f32 %v2020_v12, %v2020_v12 }
 0x391   :  { %v2405_v28 = vadd.f32 %v2404_v4, %v2210_v37  ;;  %v2022_v4 = vsub.f32 %v6234_v60, %v6526_v46  ;;  %v2217_v38 = vmul.f32 %v2021_v58, %v2021_v58 }
 0x393   :  { %v2406_v2 = vadd.f32 %v2405_v28, %v2211_v49  ;;  %v10227_v28 = vld [vmem:[#allocation104_spill] sm:$0xff]  ;;  %v2218_v39 = vmul.f32 %v2022_v4, %v2022_v4 }
 0x394   :  { %v2023_v17 = vsub.f32 %v10227_v28, %v6526_v46 }
 0x395   :  { %v2407_v7 = vadd.f32 %v2406_v2, %v2212_v30  ;;  %v10228_v2 = vld [vmem:[#allocation106_spill] sm:$0xff] }
 0x396   :  { %v2024_v10 = vsub.f32 %v10228_v2, %v6526_v46  ;;  %v2219_v61 = vmul.f32 %v2023_v17, %v2023_v17 }
 0x397   :  { %v2408_v51 = vadd.f32 %v2407_v7, %v2213_v35  ;;  %v10229_v7 = vld [vmem:[#allocation113_spill] sm:$0xff] }
 0x398   :  { %v2025_v8 = vsub.f32 %v10229_v7, %v6526_v46  ;;  %v2220_v12 = vmul.f32 %v2024_v10, %v2024_v10 }
 0x399   :  { %v2409_v37 = vadd.f32 %v2408_v51, %v2214_v22  ;;  %v10230_v51 = vld [vmem:[#allocation116_spill] sm:$0xff] }
 0x39a   :  { %v2026_v60 = vsub.f32 %v10230_v51, %v6526_v46  ;;  %v2221_v58 = vmul.f32 %v2025_v8, %v2025_v8 }
 0x39b   :  { %v2410_v49 = vadd.f32 %v2409_v37, %v2215_v53  ;;  %v10231_v37 = vld [vmem:[#allocation112_spill] sm:$0xff] }
 0x39c   :  { %v2027_v28 = vsub.f32 %v10231_v37, %v6526_v46  ;;  %v2222_v4 = vmul.f32 %v2026_v60, %v2026_v60 }
 0x39d   :  { %v2411_v30 = vadd.f32 %v2410_v49, %v2216_v34  ;;  %v10232_v49 = vld [vmem:[#allocation114_spill] sm:$0xff] }
 0x39e   :  { %v2028_v2 = vsub.f32 %v10232_v49, %v6526_v46  ;;  %v2223_v17 = vmul.f32 %v2027_v28, %v2027_v28 }
 0x39f   :  { %v2412_v35 = vadd.f32 %v2411_v30, %v2217_v38  ;;  %v10233_v30 = vld [vmem:[#allocation121_spill] sm:$0xff] }
 0x3a0   :  { %v2029_v7 = vsub.f32 %v10233_v30, %v6526_v46  ;;  %v2224_v10 = vmul.f32 %v2028_v2, %v2028_v2 }
 0x3a1   :  { %v2413_v22 = vadd.f32 %v2412_v35, %v2218_v39  ;;  %v10234_v35 = vld [vmem:[#allocation124_spill] sm:$0xff] }
 0x3a2   :  { %v2030_v51 = vsub.f32 %v10234_v35, %v6526_v46  ;;  %v2225_v8 = vmul.f32 %v2029_v7, %v2029_v7 }
 0x3a3   :  { %v2414_v53 = vadd.f32 %v2413_v22, %v2219_v61  ;;  %v10235_v22 = vld [vmem:[#allocation120_spill] sm:$0xff] }
 0x3a4   :  { %v2031_v37 = vsub.f32 %v10235_v22, %v6526_v46  ;;  %v2226_v60 = vmul.f32 %v2030_v51, %v2030_v51 }
 0x3a5   :  { %v2415_v34 = vadd.f32 %v2414_v53, %v2220_v12  ;;  %v10236_v53 = vld [vmem:[#allocation122_spill] sm:$0xff] }
 0x3a6   :  { %v2032_v49 = vsub.f32 %v10236_v53, %v6526_v46  ;;  %v2227_v28 = vmul.f32 %v2031_v37, %v2031_v37 }
 0x3a7   :  { %v2416_v38 = vadd.f32 %v2415_v34, %v2221_v58  ;;  %v10237_v34 = vld [vmem:[#allocation129_spill] sm:$0xff] }
 0x3a8   :  { %v2033_v30 = vsub.f32 %v10237_v34, %v6526_v46  ;;  %v2228_v2 = vmul.f32 %v2032_v49, %v2032_v49 }
 0x3a9   :  { %v2417_v39 = vadd.f32 %v2416_v38, %v2222_v4  ;;  %v2034_v38 = vsub.f32 %v10084_v14, %v6526_v46 }
 0x3aa   :  { %v2229_v7 = vmul.f32 %v2033_v30, %v2033_v30 }
 0x3ab   :  { %v2418_v61 = vadd.f32 %v2417_v39, %v2223_v17  ;;  %v10238_v39 = vld [vmem:[#allocation128_spill] sm:$0xff]  ;;  %v2230_v51 = vmul.f32 %v2034_v38, %v2034_v38 }
 0x3ac   :  { %v2035_v22 = vsub.f32 %v10238_v39, %v6526_v46 }
 0x3ad   :  { %v2419_v12 = vadd.f32 %v2418_v61, %v2224_v10  ;;  %v10239_v61 = vld [vmem:[#allocation130_spill] sm:$0xff] }
 0x3ae   :  { %v2036_v53 = vsub.f32 %v10239_v61, %v6526_v46  ;;  %v2231_v37 = vmul.f32 %v2035_v22, %v2035_v22 }
 0x3af   :  { %v2420_v58 = vadd.f32 %v2419_v12, %v2225_v8  ;;  %v10240_v12 = vld [vmem:[#allocation137_spill] sm:$0xff] }
 0x3b0   :  { %v2037_v34 = vsub.f32 %v10240_v12, %v6526_v46  ;;  %v2232_v49 = vmul.f32 %v2036_v53, %v2036_v53 }
 0x3b1   :  { %v2421_v4 = vadd.f32 %v2420_v58, %v2226_v60  ;;  %v2038_v58 = vsub.f32 %v10088_v3, %v6526_v46 }
 0x3b2   :  { %v2233_v30 = vmul.f32 %v2037_v34, %v2037_v34 }
 0x3b3   :  { %v2422_v17 = vadd.f32 %v2421_v4, %v2227_v28  ;;  %v2039_v4 = vsub.f32 %v10089_v54, %v6526_v46  ;;  %v2234_v38 = vmul.f32 %v2038_v58, %v2038_v58 }
 0x3b5   :  { %v2423_v10 = vadd.f32 %v2422_v17, %v2228_v2  ;;  %v10241_v17 = vld [vmem:[#allocation138_spill] sm:$0xff]  ;;  %v2235_v22 = vmul.f32 %v2039_v4, %v2039_v4 }
 0x3b6   :  { %v2040_v61 = vsub.f32 %v10241_v17, %v6526_v46 }
 0x3b7   :  { %v2424_v8 = vadd.f32 %v2423_v10, %v2229_v7  ;;  %v10242_v10 = vld [vmem:[#allocation145_spill] sm:$0xff] }
 0x3b8   :  { %v2041_v12 = vsub.f32 %v10242_v10, %v6526_v46  ;;  %v2236_v53 = vmul.f32 %v2040_v61, %v2040_v61 }
 0x3b9   :  { %v2425_v60 = vadd.f32 %v2424_v8, %v2230_v51  ;;  %v2042_v8 = vsub.f32 %v10092_v36, %v6526_v46 }
 0x3ba   :  { %v2237_v34 = vmul.f32 %v2041_v12, %v2041_v12 }
 0x3bb   :  { %v2426_v28 = vadd.f32 %v2425_v60, %v2231_v37  ;;  %v2043_v60 = vsub.f32 %v10093_v44, %v6526_v46  ;;  %v2238_v58 = vmul.f32 %v2042_v8, %v2042_v8 }
 0x3bd   :  { %v2427_v2 = vadd.f32 %v2426_v28, %v2232_v49  ;;  %v2044_v28 = vsub.f32 %v10094_v42, %v6526_v46  ;;  %v2239_v4 = vmul.f32 %v2043_v60, %v2043_v60 }
 0x3bf   :  { %v2428_v7 = vadd.f32 %v2427_v2, %v2233_v30  ;;  %v2045_v2 = vsub.f32 %v6347_v13, %v6526_v46  ;;  %v2240_v61 = vmul.f32 %v2044_v28, %v2044_v28 }
 0x3c1   :  { %v2429_v51 = vadd.f32 %v2428_v7, %v2234_v38  ;;  %v2046_v7 = vsub.f32 %v10095_v0, %v6526_v46  ;;  %v2241_v12 = vmul.f32 %v2045_v2, %v2045_v2 }
 0x3c3   :  { %v2430_v37 = vadd.f32 %v2429_v51, %v2235_v22  ;;  %v2047_v51 = vsub.f32 %v10096_v62, %v6526_v46  ;;  %v2242_v8 = vmul.f32 %v2046_v7, %v2046_v7 }
 0x3c5   :  { %v2431_v49 = vadd.f32 %v2430_v37, %v2236_v53  ;;  %v2048_v37 = vsub.f32 %v10097_v50, %v6526_v46  ;;  %v2243_v60 = vmul.f32 %v2047_v51, %v2047_v51 }
 0x3c7   :  { %v2432_v30 = vadd.f32 %v2431_v49, %v2237_v34  ;;  %v2049_v49 = vsub.f32 %v6367_v57, %v6526_v46  ;;  %v2244_v28 = vmul.f32 %v2048_v37, %v2048_v37 }
 0x3c9   :  { %v2433_v38 = vadd.f32 %v2432_v30, %v2238_v58  ;;  %v2050_v30 = vsub.f32 %v6372_v33, %v6526_v46  ;;  %v2245_v2 = vmul.f32 %v2049_v49, %v2049_v49 }
 0x3cb   :  { %v2434_v22 = vadd.f32 %v2433_v38, %v2239_v4  ;;  %v2051_v38 = vsub.f32 %v10098_v52, %v6526_v46  ;;  %v2246_v7 = vmul.f32 %v2050_v30, %v2050_v30 }
 0x3cd   :  { %v2435_v53 = vadd.f32 %v2434_v22, %v2240_v61  ;;  %v2052_v22 = vsub.f32 %v10099_v40, %v6526_v46  ;;  %v2247_v51 = vmul.f32 %v2051_v38, %v2051_v38 }
 0x3cf   :  { %v2436_v34 = vadd.f32 %v2435_v53, %v2241_v12  ;;  %v2053_v53 = vsub.f32 %v6379_v55, %v6526_v46  ;;  %v2248_v37 = vmul.f32 %v2052_v22, %v2052_v22 }
 0x3d1   :  { %v2437_v58 = vadd.f32 %v2436_v34, %v2242_v8  ;;  %v2054_v34 = vsub.f32 %v6384_v21, %v6526_v46  ;;  %v2249_v49 = vmul.f32 %v2053_v53, %v2053_v53 }
 0x3d3   :  { %v2438_v4 = vadd.f32 %v2437_v58, %v2243_v60  ;;  %v2055_v58 = vsub.f32 %v6376_v23, %v6526_v46  ;;  %v2250_v30 = vmul.f32 %v2054_v34, %v2054_v34 }
 0x3d5   :  { %v2439_v61 = vadd.f32 %v2438_v4, %v2244_v28  ;;  %v2056_v4 = vsub.f32 %v6381_v29, %v6526_v46  ;;  %v2251_v38 = vmul.f32 %v2055_v58, %v2055_v58 }
 0x3d7   :  { %v2440_v12 = vadd.f32 %v2439_v61, %v2245_v2  ;;  %v2057_v61 = vsub.f32 %v6391_v31, %v6526_v46  ;;  %v2252_v22 = vmul.f32 %v2056_v4, %v2056_v4 }
 0x3d9   :  { %v2441_v8 = vadd.f32 %v2440_v12, %v2246_v7  ;;  %v2058_v12 = vsub.f32 %v6396_v59, %v6526_v46  ;;  %v2253_v53 = vmul.f32 %v2057_v61, %v2057_v61 }
 0x3db   :  { %v2442_v60 = vadd.f32 %v2441_v8, %v2247_v51  ;;  %v2059_v8 = vsub.f32 %v6388_v43, %v6526_v46  ;;  %v2254_v34 = vmul.f32 %v2058_v12, %v2058_v12 }
 0x3dd   :  { %v2443_v28 = vadd.f32 %v2442_v60, %v2248_v37  ;;  %v2060_v60 = vsub.f32 %v6393_v5, %v6526_v46  ;;  %v2255_v58 = vmul.f32 %v2059_v8, %v2059_v8 }
 0x3df   :  { %v2444_v2 = vadd.f32 %v2443_v28, %v2249_v49  ;;  %v2061_v28 = vsub.f32 %v6403_v1, %v6526_v46  ;;  %v2256_v4 = vmul.f32 %v2060_v60, %v2060_v60 }
 0x3e1   :  { %v2445_v7 = vadd.f32 %v2444_v2, %v2250_v30  ;;  %v2062_v2 = vsub.f32 %v6408_v15, %v6526_v46  ;;  %v2257_v61 = vmul.f32 %v2061_v28, %v2061_v28 }
 0x3e3   :  { %v2446_v51 = vadd.f32 %v2445_v7, %v2251_v38  ;;  %v2063_v7 = vsub.f32 %v6400_v63, %v6526_v46  ;;  %v2258_v12 = vmul.f32 %v2062_v2, %v2062_v2 }
 0x3e5   :  { %v2447_v37 = vadd.f32 %v2446_v51, %v2252_v22  ;;  %v2064_v51 = vsub.f32 %v6405_v27, %v6526_v46  ;;  %v2259_v8 = vmul.f32 %v2063_v7, %v2063_v7 }
 0x3e7   :  { %v2448_v49 = vadd.f32 %v2447_v37, %v2253_v53  ;;  %v2065_v37 = vsub.f32 %v6415_v45, %v6526_v46  ;;  %v2260_v60 = vmul.f32 %v2064_v51, %v2064_v51 }
 0x3e9   :  { %v2449_v30 = vadd.f32 %v2448_v49, %v2254_v34  ;;  %v2066_v49 = vsub.f32 %v6420_v47, %v6526_v46  ;;  %v2261_v28 = vmul.f32 %v2065_v37, %v2065_v37 }
 0x3eb   :  { %v2450_v38 = vadd.f32 %v2449_v30, %v2255_v58  ;;  %v2067_v30 = vsub.f32 %v6412_v19, %v6526_v46  ;;  %v2262_v2 = vmul.f32 %v2066_v49, %v2066_v49 }
 0x3ed   :  { %v2451_v22 = vadd.f32 %v2450_v38, %v2256_v4  ;;  %v2068_v38 = vsub.f32 %v6417_v9, %v6526_v46  ;;  %v2263_v7 = vmul.f32 %v2067_v30, %v2067_v30 }
 0x3ef   :  { %v2452_v53 = vadd.f32 %v2451_v22, %v2257_v61  ;;  %v2069_v22 = vsub.f32 %v6427_v11, %v6526_v46  ;;  %v2264_v51 = vmul.f32 %v2068_v38, %v2068_v38 }
 0x3f1   :  { %v2453_v34 = vadd.f32 %v2452_v53, %v2258_v12  ;;  %v10243_v53 = vld [vmem:[#allocation170_spill] sm:$0xff]  ;;  %v2265_v37 = vmul.f32 %v2069_v22, %v2069_v22 }
 0x3f2   :  { %v2070_v47 = vsub.f32 %v10243_v53, %v6526_v46 }
 0x3f3   :  { %v2454_v58 = vadd.f32 %v2453_v34, %v2259_v8  ;;  %v10244_v34 = vld [vmem:[#allocation167_spill] sm:$0xff] }
 0x3f4   :  { %v2071_v19 = vsub.f32 %v10244_v34, %v6526_v46  ;;  %v2266_v49 = vmul.f32 %v2070_v47, %v2070_v47 }
 0x3f5   :  { %v2455_v4 = vadd.f32 %v2454_v58, %v2260_v60  ;;  %v10245_v58 = vld [vmem:[#allocation169_spill] sm:$0xff] }
 0x3f6   :  { %v2072_v9 = vsub.f32 %v10245_v58, %v6526_v46  ;;  %v2267_v30 = vmul.f32 %v2071_v19, %v2071_v19 }
 0x3f7   :  { %v2456_v61 = vadd.f32 %v2455_v4, %v2261_v28  ;;  %v10246_v4 = vld [vmem:[#allocation172_spill] sm:$0xff] }
 0x3f8   :  { %v2073_v11 = vsub.f32 %v10246_v4, %v6526_v46  ;;  %v2268_v38 = vmul.f32 %v2072_v9, %v2072_v9 }
 0x3f9   :  { %v2457_v12 = vadd.f32 %v2456_v61, %v2262_v2  ;;  %v10247_v61 = vld [vmem:[#allocation174_spill] sm:$0xff] }
 0x3fa   :  { %v2074_v53 = vsub.f32 %v10247_v61, %v6526_v46  ;;  %v2269_v22 = vmul.f32 %v2073_v11, %v2073_v11 }
 0x3fb   :  { %v2458_v8 = vadd.f32 %v2457_v12, %v2263_v7  ;;  %v10248_v12 = vld [vmem:[#allocation171_spill] sm:$0xff] }
 0x3fc   :  { %v2075_v34 = vsub.f32 %v10248_v12, %v6526_v46  ;;  %v2270_v47 = vmul.f32 %v2074_v53, %v2074_v53 }
 0x3fd   :  { %v2459_v60 = vadd.f32 %v2458_v8, %v2264_v51  ;;  %v10249_v8 = vld [vmem:[#allocation173_spill] sm:$0xff] }
 0x3fe   :  { %v2076_v58 = vsub.f32 %v10249_v8, %v6526_v46  ;;  %v2271_v19 = vmul.f32 %v2075_v34, %v2075_v34 }
 0x3ff   :  { %v2460_v28 = vadd.f32 %v2459_v60, %v2265_v37  ;;  %v10250_v60 = vld [vmem:[#allocation176_spill] sm:$0xff] }
 0x400   :  { %v2077_v4 = vsub.f32 %v10250_v60, %v6526_v46  ;;  %v2272_v9 = vmul.f32 %v2076_v58, %v2076_v58 }
 0x401   :  { %v2461_v2 = vadd.f32 %v2460_v28, %v2266_v49  ;;  %v10251_v28 = vld [vmem:[#allocation178_spill] sm:$0xff] }
 0x402   :  { %v2078_v61 = vsub.f32 %v10251_v28, %v6526_v46  ;;  %v2273_v11 = vmul.f32 %v2077_v4, %v2077_v4  ;;  %v2486_v4 = vlaneseq }
 0x403   :  { %v2462_v7 = vadd.f32 %v2461_v2, %v2267_v30  ;;  %v10252_v2 = vld [vmem:[#allocation175_spill] sm:$0xff] }
 0x404   :  { %v2079_v12 = vsub.f32 %v10252_v2, %v6526_v46  ;;  %v2274_v53 = vmul.f32 %v2078_v61, %v2078_v61  ;;  %v2481_v61 = vld [vmem:[%s9399_s2] sm:$0x1] }
 0x405   :  { %v2463_v51 = vadd.f32 %v2462_v7, %v2268_v38  ;;  %v10253_v7 = vld [vmem:[#allocation177_spill] sm:$0xff] }
 0x406   :  { %v2080_v8 = vsub.f32 %v10253_v7, %v6526_v46 }
 0x407   :  { %v2464_v37 = vadd.f32 %v2463_v51, %v2269_v22  ;;  %v2275_v51 = vmul.f32 %v2079_v12, %v2079_v12 }
 0x408   :  { %v2276_v60 = vmul.f32 %v2080_v8, %v2080_v8 }
 0x409   :  { %v2465_v49 = vadd.f32 %v2464_v37, %v2270_v47 }
 0x40b   :  { %v2466_v30 = vadd.f32 %v2465_v49, %v2271_v19 }
 0x40d   :  { %v2467_v38 = vadd.f32 %v2466_v30, %v2272_v9  ;;  %v6920_v9 = vshrl.u32 %v2486_v4, 7  ;;  %v10254_v30 = vld [vmem:[#allocation3_spill] sm:$0xff]  ;;  %v10261_v4 = vld [vmem:[#allocation8_spill] sm:$0xff] }
 0x40f   :  { %v2468_v22 = vadd.f32 %v2467_v38, %v2273_v11  ;;  %v9728_v12 = vsub.s32 0, %v6920_v9  ;;  %v10255_v11 = vld [vmem:[#allocation5_spill] sm:$0xff] }
 0x411   :  { %v2469_v45 = vadd.f32 %v2468_v22, %v2274_v53  ;;  %v10256_v53 = vld [vmem:[#allocation2_spill] sm:$0xff] }
 0x413   :  { %v2470_v34 = vadd.f32 %v2469_v45, %v2275_v51 }
 0x415   :  { %v2471_v47 = vadd.f32 %v2470_v34, %v2276_v60  ;;  %v10258_v34 = vld [vmem:[#allocation7_spill] sm:$0xff] }
 0x417   :  { %v2472_v37 = vrot.slane %v2471_v47, 4 }
 0x419   :  { %v2473_v27 = vadd.f32 %v2472_v37, %v2471_v47  ;;  %v10259_v37 = vld [vmem:[#allocation9_spill] sm:$0xff] }
 0x41b   :  { %v2474_v28 = vrot.slane %v2473_v27, 2 }
 0x41d   :  { %v2475_v58 = vadd.f32 %v2474_v28, %v2473_v27  ;;  %v6929_v27 = vld [vmem:[%s9400_s3] sm:$0x1]  ;;  %v10271_v28 = vld [vmem:[#allocation17_spill] sm:$0xff] }
 0x41f   :  { %v2476_v19 = vrot.slane %v2475_v58, 1 }
 0x421   :  { %v2477_v49 = vadd.f32 %v2476_v19, %v2475_v58  ;;  %v10260_v19 = vld [vmem:[#allocation6_spill] sm:$0xff] }
 0x423   :  { %v2478_v63 = vmul.f32 0.0006377551, %v2477_v49 }
 0x425   :  { %v2479_v2 = vadd.f32 1e-05, %v2478_v63 }
 0x427   :  { %5593 = vrsqrt.f32 %v2479_v2 }
 0x431   :  { %v5594_v45 = vpop.eup %5593 }
 0x432   :  { %v2482_v8 = vmul.f32 %v5594_v45, %v2481_v61  ;;  %v10262_v45 = vld [vmem:[#allocation11_spill] sm:$0xff] }
 0x434   :  { %v6932_v60 = vmul.f32 %v2482_v8, %v6526_v46  ;;  %v6936_v63 = vrot.slane %v2482_v8, %v9728_v12  ;;  %v10257_v46 = vld [vmem:[#allocation4_spill] sm:$0xff]  ;;  %v10273_v12 = vld [vmem:[#allocation14_spill] sm:$0xff] }
 0x436   :  { %v6942_v2 = vmul.f32 %v6936_v63, %v10254_v30  ;;  %v6946_v38 = vmul.f32 %v6936_v63, %v10255_v11  ;;  %v6950_v22 = vmul.f32 %v10256_v53, %v6936_v63  ;;  %v6954_v51 = vmul.f32 %v10257_v46, %v6936_v63  ;;  %v10263_v30 = vld [vmem:[#allocation13_spill] sm:$0xff]  ;;  %v10265_v53 = vld [vmem:[#allocation10_spill] sm:$0xff] }
 0x437   :  { %v6958_v47 = vmul.f32 %v6936_v63, %v10258_v34  ;;  %v6962_v58 = vmul.f32 %v6936_v63, %v10259_v37  ;;  %v6966_v49 = vmul.f32 %v10260_v19, %v6936_v63  ;;  %v6970_v61 = vmul.f32 %v10261_v4, %v6936_v63  ;;  %v10267_v34 = vld [vmem:[#allocation12_spill] sm:$0xff]  ;;  %v10269_v19 = vld [vmem:[#allocation15_spill] sm:$0xff] }
 0x438   :  { %v6974_v8 = vmul.f32 %v6936_v63, %v10262_v45  ;;  %v6978_v11 = vmul.f32 %v6936_v63, %v10263_v30  ;;  %v6982_v46 = vmul.f32 %v10265_v53, %v6936_v63  ;;  %v6986_v37 = vmul.f32 %v10267_v34, %v6936_v63 }
 0x439   :  { %v6990_v4 = vmul.f32 %v6936_v63, %v10269_v19  ;;  %v6994_v45 = vmul.f32 %v6936_v63, %v10271_v28  ;;  %v6998_v30 = vmul.f32 %v10273_v12, %v6936_v63 }
 0x43a   :  { %10264 = vst [vmem:[#allocation132_spill] sm:$0xff] %v6978_v11  ;;  %10266 = vst [vmem:[#allocation140_spill] sm:$0xff] %v6982_v46  ;;  %v10275_v11 = vld [vmem:[#allocation16_spill] sm:$0xff]  ;;  %v10277_v46 = vld [vmem:[#allocation19_spill] sm:$0xff] }
 0x43b   :  { %10268 = vst [vmem:[#allocation136_spill] sm:$0xff] %v6986_v37  ;;  %10270 = vst [vmem:[#allocation148_spill] sm:$0xff] %v6990_v4  ;;  %v7002_v53 = vmul.f32 %v10275_v11, %v6936_v63  ;;  %v7006_v34 = vmul.f32 %v6936_v63, %v10277_v46  ;;  %v10279_v37 = vld [vmem:[#allocation21_spill] sm:$0xff]  ;;  %v10281_v4 = vld [vmem:[#allocation18_spill] sm:$0xff] }
 0x43c   :  { %10272 = vst [vmem:[#allocation144_spill] sm:$0xff] %v6994_v45  ;;  %10274 = vst [vmem:[#allocation146_spill] sm:$0xff] %v6998_v30  ;;  %v7010_v19 = vmul.f32 %v6936_v63, %v10279_v37  ;;  %v7014_v28 = vmul.f32 %v10281_v4, %v6936_v63  ;;  %v10283_v45 = vld [vmem:[#allocation20_spill] sm:$0xff]  ;;  %v10285_v30 = vld [vmem:[#allocation23_spill] sm:$0xff] }
 0x43d   :  { %10276 = vst [vmem:[#allocation155_spill] sm:$0xff] %v7002_v53  ;;  %10278 = vst [vmem:[#allocation152_spill] sm:$0xff] %v7006_v34  ;;  %v7018_v12 = vmul.f32 %v10283_v45, %v6936_v63  ;;  %v7022_v11 = vmul.f32 %v6936_v63, %v10285_v30  ;;  %v10287_v53 = vld [vmem:[#allocation25_spill] sm:$0xff]  ;;  %v10289_v34 = vld [vmem:[#allocation22_spill] sm:$0xff] }
 0x43e   :  { %10280 = vst [vmem:[#allocation153_spill] sm:$0xff] %v7010_v19  ;;  %10282 = vst [vmem:[#allocation159_spill] sm:$0xff] %v7014_v28  ;;  %v7026_v46 = vmul.f32 %v6936_v63, %v10287_v53  ;;  %v7030_v37 = vmul.f32 %v10289_v34, %v6936_v63  ;;  %v10291_v19 = vld [vmem:[#allocation24_spill] sm:$0xff]  ;;  %v10293_v28 = vld [vmem:[#allocation27_spill] sm:$0xff] }
 0x43f   :  { %10284 = vst [vmem:[#allocation160_spill] sm:$0xff] %v7018_v12  ;;  %10286 = vst [vmem:[#allocation71_spill] sm:$0xff] %v7022_v11  ;;  %v7034_v4 = vmul.f32 %v10291_v19, %v6936_v63  ;;  %v7038_v45 = vmul.f32 %v6936_v63, %v10293_v28  ;;  %v10295_v12 = vld [vmem:[#allocation29_spill] sm:$0xff]  ;;  %v10297_v11 = vld [vmem:[#allocation26_spill] sm:$0xff] }
 0x440   :  { %10288 = vst [vmem:[#allocation87_spill] sm:$0xff] %v7026_v46  ;;  %10290 = vst [vmem:[#allocation90_spill] sm:$0xff] %v7030_v37  ;;  %v7042_v30 = vmul.f32 %v6936_v63, %v10295_v12  ;;  %v7046_v53 = vmul.f32 %v10297_v11, %v6936_v63  ;;  %v10299_v46 = vld [vmem:[#allocation28_spill] sm:$0xff]  ;;  %v10301_v37 = vld [vmem:[#allocation31_spill] sm:$0xff] }
 0x441   :  { %10292 = vst [vmem:[#allocation86_spill] sm:$0xff] %v7034_v4  ;;  %10294 = vst [vmem:[#allocation88_spill] sm:$0xff] %v7038_v45  ;;  %v7050_v34 = vmul.f32 %v10299_v46, %v6936_v63  ;;  %v7054_v19 = vmul.f32 %v6936_v63, %v10301_v37  ;;  %v10303_v4 = vld [vmem:[#allocation33_spill] sm:$0xff]  ;;  %v10305_v45 = vld [vmem:[#allocation30_spill] sm:$0xff] }
 0x442   :  { %10296 = vst [vmem:[#allocation124_spill] sm:$0xff] %v7042_v30  ;;  %10298 = vst [vmem:[#allocation128_spill] sm:$0xff] %v7046_v53  ;;  %v7058_v28 = vmul.f32 %v6936_v63, %v10303_v4  ;;  %v7062_v12 = vmul.f32 %v10305_v45, %v6936_v63  ;;  %v10307_v30 = vld [vmem:[#allocation32_spill] sm:$0xff]  ;;  %v10309_v53 = vld [vmem:[#allocation35_spill] sm:$0xff] }
 0x443   :  { %10300 = vst [vmem:[#allocation138_spill] sm:$0xff] %v7050_v34  ;;  %10302 = vst [vmem:[#allocation145_spill] sm:$0xff] %v7054_v19  ;;  %v7066_v11 = vmul.f32 %v10307_v30, %v6936_v63  ;;  %v7070_v46 = vmul.f32 %v6936_v63, %v10309_v53  ;;  %v10311_v34 = vld [vmem:[#allocation37_spill] sm:$0xff]  ;;  %v10313_v19 = vld [vmem:[#allocation34_spill] sm:$0xff] }
 0x444   :  { %10304 = vst [vmem:[#allocation177_spill] sm:$0xff] %v7058_v28  ;;  %10306 = vst [vmem:[#allocation3_spill] sm:$0xff] %v7062_v12  ;;  %v7074_v37 = vmul.f32 %v6936_v63, %v10311_v34  ;;  %v7078_v4 = vmul.f32 %v10313_v19, %v6936_v63  ;;  %v10315_v28 = vld [vmem:[#allocation36_spill] sm:$0xff]  ;;  %v10317_v12 = vld [vmem:[#allocation43_spill] sm:$0xff] }
 0x445   :  { %10308 = vst [vmem:[#allocation5_spill] sm:$0xff] %v7066_v11  ;;  %10310 = vst [vmem:[#allocation2_spill] sm:$0xff] %v7070_v46  ;;  %v7082_v45 = vmul.f32 %v10315_v28, %v6936_v63  ;;  %v7086_v30 = vmul.f32 %v6936_v63, %v10317_v12  ;;  %v10319_v11 = vld [vmem:[#allocation45_spill] sm:$0xff] }
 0x446   :  { %10312 = vst [vmem:[#allocation4_spill] sm:$0xff] %v7074_v37  ;;  %10314 = vst [vmem:[#allocation7_spill] sm:$0xff] %v7078_v4  ;;  %v7090_v53 = vmul.f32 %v6936_v63, %v10319_v11  ;;  %v10321_v46 = vld [vmem:[#allocation41_spill] sm:$0xff]  ;;  %v10323_v37 = vld [vmem:[#allocation44_spill] sm:$0xff] }
 0x447   :  { %10316 = vst [vmem:[#allocation9_spill] sm:$0xff] %v7082_v45  ;;  %10318 = vst [vmem:[#allocation6_spill] sm:$0xff] %v7086_v30  ;;  %v7094_v34 = vmul.f32 %v10321_v46, %v6936_v63  ;;  %v7098_v19 = vmul.f32 %v10323_v37, %v6936_v63  ;;  %v10325_v4 = vld [vmem:[#allocation51_spill] sm:$0xff]  ;;  %v10327_v45 = vld [vmem:[#allocation53_spill] sm:$0xff] }
 0x448   :  { %10320 = vst [vmem:[#allocation8_spill] sm:$0xff] %v7090_v53  ;;  %v7102_v28 = vmul.f32 %v6936_v63, %v10325_v4  ;;  %v7106_v12 = vmul.f32 %v6936_v63, %v10327_v45  ;;  %v10329_v30 = vld [vmem:[#allocation49_spill] sm:$0xff]  ;;  %v10331_v53 = vld [vmem:[#allocation52_spill] sm:$0xff] }
 0x449   :  { %10322 = vst [vmem:[#allocation11_spill] sm:$0xff] %v7094_v34  ;;  %10324 = vst [vmem:[#allocation13_spill] sm:$0xff] %v7098_v19  ;;  %v7110_v11 = vmul.f32 %v10329_v30, %v6936_v63  ;;  %v7114_v46 = vmul.f32 %v10331_v53, %v6936_v63  ;;  %v10333_v34 = vld [vmem:[#allocation59_spill] sm:$0xff]  ;;  %v10335_v19 = vld [vmem:[#allocation61_spill] sm:$0xff] }
 0x44a   :  { %10326 = vst [vmem:[#allocation10_spill] sm:$0xff] %v7102_v28  ;;  %10328 = vst [vmem:[#allocation12_spill] sm:$0xff] %v7106_v12  ;;  %v7118_v37 = vmul.f32 %v6936_v63, %v10333_v34  ;;  %v7122_v4 = vmul.f32 %v6936_v63, %v10335_v19  ;;  %v10337_v28 = vld [vmem:[#allocation57_spill] sm:$0xff]  ;;  %v10339_v12 = vld [vmem:[#allocation60_spill] sm:$0xff] }
 0x44b   :  { %10330 = vst [vmem:[#allocation15_spill] sm:$0xff] %v7110_v11  ;;  %10332 = vst [vmem:[#allocation17_spill] sm:$0xff] %v7114_v46  ;;  %v7126_v45 = vmul.f32 %v10337_v28, %v6936_v63  ;;  %v7130_v30 = vmul.f32 %v10339_v12, %v6936_v63  ;;  %v10341_v11 = vld [vmem:[#allocation67_spill] sm:$0xff]  ;;  %v10343_v46 = vld [vmem:[#allocation69_spill] sm:$0xff] }
 0x44c   :  { %10334 = vst [vmem:[#allocation14_spill] sm:$0xff] %v7118_v37  ;;  %10336 = vst [vmem:[#allocation16_spill] sm:$0xff] %v7122_v4  ;;  %v7134_v53 = vmul.f32 %v6936_v63, %v10341_v11  ;;  %v7138_v34 = vmul.f32 %v6936_v63, %v10343_v46  ;;  %v10345_v37 = vld [vmem:[#allocation65_spill] sm:$0xff]  ;;  %v10347_v4 = vld [vmem:[#allocation68_spill] sm:$0xff] }
 0x44d   :  { %10338 = vst [vmem:[#allocation19_spill] sm:$0xff] %v7126_v45  ;;  %10340 = vst [vmem:[#allocation21_spill] sm:$0xff] %v7130_v30  ;;  %v7142_v19 = vmul.f32 %v10345_v37, %v6936_v63  ;;  %v7146_v28 = vmul.f32 %v10347_v4, %v6936_v63  ;;  %v10349_v45 = vld [vmem:[#allocation75_spill] sm:$0xff]  ;;  %v10351_v30 = vld [vmem:[#allocation77_spill] sm:$0xff] }
 0x44e   :  { %10342 = vst [vmem:[#allocation18_spill] sm:$0xff] %v7134_v53  ;;  %10344 = vst [vmem:[#allocation20_spill] sm:$0xff] %v7138_v34  ;;  %v7150_v12 = vmul.f32 %v6936_v63, %v10349_v45  ;;  %v7154_v11 = vmul.f32 %v6936_v63, %v10351_v30  ;;  %v10353_v53 = vld [vmem:[#allocation73_spill] sm:$0xff]  ;;  %v10355_v34 = vld [vmem:[#allocation76_spill] sm:$0xff] }
 0x44f   :  { %10346 = vst [vmem:[#allocation23_spill] sm:$0xff] %v7142_v19  ;;  %10348 = vst [vmem:[#allocation25_spill] sm:$0xff] %v7146_v28  ;;  %v7158_v46 = vmul.f32 %v10353_v53, %v6936_v63  ;;  %v7162_v37 = vmul.f32 %v10355_v34, %v6936_v63  ;;  %v10357_v19 = vld [vmem:[#allocation83_spill] sm:$0xff]  ;;  %v10359_v28 = vld [vmem:[#allocation85_spill] sm:$0xff] }
 0x450   :  { %10350 = vst [vmem:[#allocation22_spill] sm:$0xff] %v7150_v12  ;;  %10352 = vst [vmem:[#allocation24_spill] sm:$0xff] %v7154_v11  ;;  %v7166_v4 = vmul.f32 %v6936_v63, %v10357_v19  ;;  %v7170_v45 = vmul.f32 %v6936_v63, %v10359_v28  ;;  %v10361_v12 = vld [vmem:[#allocation81_spill] sm:$0xff]  ;;  %v10363_v11 = vld [vmem:[#allocation84_spill] sm:$0xff] }
 0x451   :  { %10354 = vst [vmem:[#allocation27_spill] sm:$0xff] %v7158_v46  ;;  %10356 = vst [vmem:[#allocation29_spill] sm:$0xff] %v7162_v37  ;;  %v7174_v30 = vmul.f32 %v10361_v12, %v6936_v63  ;;  %v7178_v53 = vmul.f32 %v10363_v11, %v6936_v63  ;;  %v10365_v46 = vld [vmem:[#allocation91_spill] sm:$0xff]  ;;  %v10367_v37 = vld [vmem:[#allocation93_spill] sm:$0xff] }
 0x452   :  { %10358 = vst [vmem:[#allocation26_spill] sm:$0xff] %v7166_v4  ;;  %10360 = vst [vmem:[#allocation28_spill] sm:$0xff] %v7170_v45  ;;  %v7182_v34 = vmul.f32 %v6936_v63, %v10365_v46  ;;  %v7186_v19 = vmul.f32 %v6936_v63, %v10367_v37  ;;  %v10369_v4 = vld [vmem:[#allocation89_spill] sm:$0xff]  ;;  %v10371_v45 = vld [vmem:[#allocation92_spill] sm:$0xff] }
 0x453   :  { %10362 = vst [vmem:[#allocation31_spill] sm:$0xff] %v7174_v30  ;;  %10364 = vst [vmem:[#allocation33_spill] sm:$0xff] %v7178_v53  ;;  %v7190_v28 = vmul.f32 %v10369_v4, %v6936_v63  ;;  %v7194_v12 = vmul.f32 %v10371_v45, %v6936_v63  ;;  %v10373_v30 = vld [vmem:[#allocation95_spill] sm:$0xff]  ;;  %v10375_v53 = vld [vmem:[#allocation97_spill] sm:$0xff] }
 0x454   :  { %10366 = vst [vmem:[#allocation30_spill] sm:$0xff] %v7182_v34  ;;  %10368 = vst [vmem:[#allocation32_spill] sm:$0xff] %v7186_v19  ;;  %v7198_v11 = vmul.f32 %v6936_v63, %v10373_v30  ;;  %v7202_v46 = vmul.f32 %v6936_v63, %v10375_v53  ;;  %v10377_v34 = vld [vmem:[#allocation94_spill] sm:$0xff]  ;;  %v10379_v19 = vld [vmem:[#allocation96_spill] sm:$0xff] }
 0x455   :  { %10370 = vst [vmem:[#allocation35_spill] sm:$0xff] %v7190_v28  ;;  %10372 = vst [vmem:[#allocation37_spill] sm:$0xff] %v7194_v12  ;;  %v7206_v37 = vmul.f32 %v10377_v34, %v6936_v63  ;;  %v7210_v4 = vmul.f32 %v10379_v19, %v6936_v63  ;;  %v10381_v28 = vld [vmem:[#allocation101_spill] sm:$0xff]  ;;  %v10383_v12 = vld [vmem:[#allocation103_spill] sm:$0xff] }
 0x456   :  { %10374 = vst [vmem:[#allocation34_spill] sm:$0xff] %v7198_v11  ;;  %10376 = vst [vmem:[#allocation36_spill] sm:$0xff] %v7202_v46  ;;  %v7214_v45 = vmul.f32 %v6936_v63, %v10381_v28  ;;  %v7218_v30 = vmul.f32 %v6936_v63, %v10383_v12  ;;  %v10385_v11 = vld [vmem:[#allocation100_spill] sm:$0xff]  ;;  %v10387_v46 = vld [vmem:[#allocation102_spill] sm:$0xff] }
 0x457   :  { %10378 = vst [vmem:[#allocation43_spill] sm:$0xff] %v7206_v37  ;;  %10380 = vst [vmem:[#allocation45_spill] sm:$0xff] %v7210_v4  ;;  %v7222_v53 = vmul.f32 %v10385_v11, %v6936_v63  ;;  %v7226_v34 = vmul.f32 %v10387_v46, %v6936_v63  ;;  %v10389_v37 = vld [vmem:[#allocation109_spill] sm:$0xff]  ;;  %v10391_v4 = vld [vmem:[#allocation111_spill] sm:$0xff] }
 0x458   :  { %10382 = vst [vmem:[#allocation41_spill] sm:$0xff] %v7214_v45  ;;  %10384 = vst [vmem:[#allocation44_spill] sm:$0xff] %v7218_v30  ;;  %v7230_v19 = vmul.f32 %v6936_v63, %v10389_v37  ;;  %v7234_v28 = vmul.f32 %v6936_v63, %v10391_v4  ;;  %v10393_v45 = vld [vmem:[#allocation107_spill] sm:$0xff]  ;;  %v10395_v30 = vld [vmem:[#allocation110_spill] sm:$0xff] }
 0x459   :  { %10386 = vst [vmem:[#allocation51_spill] sm:$0xff] %v7222_v53  ;;  %10388 = vst [vmem:[#allocation53_spill] sm:$0xff] %v7226_v34  ;;  %v7238_v12 = vmul.f32 %v10393_v45, %v6936_v63  ;;  %v7242_v11 = vmul.f32 %v10395_v30, %v6936_v63  ;;  %v10397_v53 = vld [vmem:[#allocation117_spill] sm:$0xff]  ;;  %v10399_v34 = vld [vmem:[#allocation119_spill] sm:$0xff] }
 0x45a   :  { %10390 = vst [vmem:[#allocation49_spill] sm:$0xff] %v7230_v19  ;;  %10392 = vst [vmem:[#allocation52_spill] sm:$0xff] %v7234_v28  ;;  %v7246_v46 = vmul.f32 %v6936_v63, %v10397_v53  ;;  %v7250_v37 = vmul.f32 %v6936_v63, %v10399_v34  ;;  %v10401_v19 = vld [vmem:[#allocation115_spill] sm:$0xff]  ;;  %v10403_v28 = vld [vmem:[#allocation118_spill] sm:$0xff] }
 0x45b   :  { %10394 = vst [vmem:[#allocation59_spill] sm:$0xff] %v7238_v12  ;;  %10396 = vst [vmem:[#allocation61_spill] sm:$0xff] %v7242_v11  ;;  %v7254_v4 = vmul.f32 %v10401_v19, %v6936_v63  ;;  %v7258_v45 = vmul.f32 %v10403_v28, %v6936_v63  ;;  %v10405_v12 = vld [vmem:[#allocation125_spill] sm:$0xff]  ;;  %v10407_v11 = vld [vmem:[#allocation127_spill] sm:$0xff] }
 0x45c   :  { %10398 = vst [vmem:[#allocation57_spill] sm:$0xff] %v7246_v46  ;;  %10400 = vst [vmem:[#allocation60_spill] sm:$0xff] %v7250_v37  ;;  %v7262_v30 = vmul.f32 %v6936_v63, %v10405_v12  ;;  %v7266_v53 = vmul.f32 %v6936_v63, %v10407_v11  ;;  %v10409_v46 = vld [vmem:[#allocation123_spill] sm:$0xff]  ;;  %v10411_v37 = vld [vmem:[#allocation126_spill] sm:$0xff] }
 0x45d   :  { %10402 = vst [vmem:[#allocation67_spill] sm:$0xff] %v7254_v4  ;;  %10404 = vst [vmem:[#allocation69_spill] sm:$0xff] %v7258_v45  ;;  %v7270_v34 = vmul.f32 %v10409_v46, %v6936_v63  ;;  %v7274_v19 = vmul.f32 %v10411_v37, %v6936_v63  ;;  %v10413_v4 = vld [vmem:[#allocation133_spill] sm:$0xff]  ;;  %v10415_v45 = vld [vmem:[#allocation135_spill] sm:$0xff] }
 0x45e   :  { %10406 = vst [vmem:[#allocation65_spill] sm:$0xff] %v7262_v30  ;;  %10408 = vst [vmem:[#allocation68_spill] sm:$0xff] %v7266_v53  ;;  %v7278_v28 = vmul.f32 %v6936_v63, %v10413_v4  ;;  %v7282_v12 = vmul.f32 %v6936_v63, %v10415_v45  ;;  %v10417_v30 = vld [vmem:[#allocation131_spill] sm:$0xff]  ;;  %v10419_v53 = vld [vmem:[#allocation134_spill] sm:$0xff] }
 0x45f   :  { %10410 = vst [vmem:[#allocation75_spill] sm:$0xff] %v7270_v34  ;;  %10412 = vst [vmem:[#allocation77_spill] sm:$0xff] %v7274_v19  ;;  %v7286_v11 = vmul.f32 %v10417_v30, %v6936_v63  ;;  %v7290_v46 = vmul.f32 %v10419_v53, %v6936_v63  ;;  %v10421_v34 = vld [vmem:[#allocation141_spill] sm:$0xff]  ;;  %v10423_v19 = vld [vmem:[#allocation143_spill] sm:$0xff] }
 0x460   :  { %10414 = vst [vmem:[#allocation73_spill] sm:$0xff] %v7278_v28  ;;  %10416 = vst [vmem:[#allocation76_spill] sm:$0xff] %v7282_v12  ;;  %v7294_v37 = vmul.f32 %v6936_v63, %v10421_v34  ;;  %v7298_v4 = vmul.f32 %v6936_v63, %v10423_v19  ;;  %v10425_v28 = vld [vmem:[#allocation139_spill] sm:$0xff]  ;;  %v10427_v12 = vld [vmem:[#allocation142_spill] sm:$0xff] }
 0x461   :  { %10418 = vst [vmem:[#allocation83_spill] sm:$0xff] %v7286_v11  ;;  %10420 = vst [vmem:[#allocation85_spill] sm:$0xff] %v7290_v46  ;;  %v7302_v45 = vmul.f32 %v10425_v28, %v6936_v63  ;;  %v7306_v30 = vmul.f32 %v10427_v12, %v6936_v63  ;;  %v10429_v11 = vld [vmem:[#allocation149_spill] sm:$0xff]  ;;  %v10431_v46 = vld [vmem:[#allocation151_spill] sm:$0xff] }
 0x462   :  { %10422 = vst [vmem:[#allocation81_spill] sm:$0xff] %v7294_v37  ;;  %10424 = vst [vmem:[#allocation84_spill] sm:$0xff] %v7298_v4  ;;  %v7310_v53 = vmul.f32 %v6936_v63, %v10429_v11  ;;  %v7314_v34 = vmul.f32 %v6936_v63, %v10431_v46  ;;  %v10433_v37 = vld [vmem:[#allocation147_spill] sm:$0xff]  ;;  %v10435_v4 = vld [vmem:[#allocation150_spill] sm:$0xff] }
 0x463   :  { %10426 = vst [vmem:[#allocation91_spill] sm:$0xff] %v7302_v45  ;;  %10428 = vst [vmem:[#allocation93_spill] sm:$0xff] %v7306_v30  ;;  %v7318_v19 = vmul.f32 %v10433_v37, %v6936_v63  ;;  %v7322_v28 = vmul.f32 %v10435_v4, %v6936_v63  ;;  %v10437_v45 = vld [vmem:[#allocation156_spill] sm:$0xff]  ;;  %v10439_v30 = vld [vmem:[#allocation158_spill] sm:$0xff] }
 0x464   :  { %10430 = vst [vmem:[#allocation89_spill] sm:$0xff] %v7310_v53  ;;  %10432 = vst [vmem:[#allocation92_spill] sm:$0xff] %v7314_v34  ;;  %v7326_v12 = vmul.f32 %v6936_v63, %v10437_v45  ;;  %v7330_v11 = vmul.f32 %v6936_v63, %v10439_v30  ;;  %v10441_v53 = vld [vmem:[#allocation154_spill] sm:$0xff]  ;;  %v10443_v34 = vld [vmem:[#allocation157_spill] sm:$0xff] }
 0x465   :  { %10434 = vst [vmem:[#allocation95_spill] sm:$0xff] %v7318_v19  ;;  %10436 = vst [vmem:[#allocation97_spill] sm:$0xff] %v7322_v28  ;;  %v7334_v46 = vmul.f32 %v10441_v53, %v6936_v63  ;;  %v7338_v37 = vmul.f32 %v10443_v34, %v6936_v63  ;;  %v10445_v19 = vld [vmem:[#allocation39_spill] sm:$0xff]  ;;  %v10447_v28 = vld [vmem:[#allocation42_spill] sm:$0xff] }
 0x466   :  { %10438 = vst [vmem:[#allocation94_spill] sm:$0xff] %v7326_v12  ;;  %10440 = vst [vmem:[#allocation96_spill] sm:$0xff] %v7330_v11  ;;  %v7342_v4 = vmul.f32 %v6936_v63, %v10445_v19  ;;  %v7346_v45 = vmul.f32 %v6936_v63, %v10447_v28  ;;  %v10449_v12 = vld [vmem:[#allocation38_spill] sm:$0xff]  ;;  %v10451_v11 = vld [vmem:[#allocation40_spill] sm:$0xff] }
 0x467   :  { %10442 = vst [vmem:[#allocation101_spill] sm:$0xff] %v7334_v46  ;;  %10444 = vst [vmem:[#allocation103_spill] sm:$0xff] %v7338_v37  ;;  %v7350_v30 = vmul.f32 %v10449_v12, %v6936_v63  ;;  %v7354_v53 = vmul.f32 %v10451_v11, %v6936_v63  ;;  %v10453_v46 = vld [vmem:[#allocation47_spill] sm:$0xff]  ;;  %v10455_v37 = vld [vmem:[#allocation50_spill] sm:$0xff] }
 0x468   :  { %10446 = vst [vmem:[#allocation100_spill] sm:$0xff] %v7342_v4  ;;  %10448 = vst [vmem:[#allocation102_spill] sm:$0xff] %v7346_v45  ;;  %v7358_v34 = vmul.f32 %v6936_v63, %v10453_v46  ;;  %v7362_v19 = vmul.f32 %v6936_v63, %v10455_v37  ;;  %v10457_v4 = vld [vmem:[#allocation46_spill] sm:$0xff]  ;;  %v10459_v45 = vld [vmem:[#allocation48_spill] sm:$0xff] }
 0x469   :  { %10450 = vst [vmem:[#allocation109_spill] sm:$0xff] %v7350_v30  ;;  %10452 = vst [vmem:[#allocation111_spill] sm:$0xff] %v7354_v53  ;;  %v7366_v28 = vmul.f32 %v10457_v4, %v6936_v63  ;;  %v7370_v12 = vmul.f32 %v10459_v45, %v6936_v63  ;;  %v10461_v30 = vld [vmem:[#allocation55_spill] sm:$0xff]  ;;  %v10463_v53 = vld [vmem:[#allocation58_spill] sm:$0xff] }
 0x46a   :  { %10454 = vst [vmem:[#allocation107_spill] sm:$0xff] %v7358_v34  ;;  %10456 = vst [vmem:[#allocation110_spill] sm:$0xff] %v7362_v19  ;;  %v7374_v11 = vmul.f32 %v6936_v63, %v10461_v30  ;;  %v7378_v46 = vmul.f32 %v6936_v63, %v10463_v53  ;;  %v10465_v34 = vld [vmem:[#allocation54_spill] sm:$0xff]  ;;  %v10466_v19 = vld [vmem:[#allocation56_spill] sm:$0xff] }
 0x46b   :  { %10458 = vst [vmem:[#allocation117_spill] sm:$0xff] %v7366_v28  ;;  %10460 = vst [vmem:[#allocation119_spill] sm:$0xff] %v7370_v12  ;;  %v7382_v37 = vmul.f32 %v10465_v34, %v6936_v63  ;;  %v7386_v4 = vmul.f32 %v10466_v19, %v6936_v63  ;;  %v10468_v28 = vld [vmem:[#allocation63_spill] sm:$0xff]  ;;  %v10470_v12 = vld [vmem:[#allocation66_spill] sm:$0xff]  ;;  %v7406_v19 = vmul.f32 %v6936_v63, %v10216_v56 }
 0x46c   :  { %10462 = vst [vmem:[#allocation115_spill] sm:$0xff] %v7374_v11  ;;  %10464 = vst [vmem:[#allocation118_spill] sm:$0xff] %v7378_v46  ;;  %v7390_v45 = vmul.f32 %v6936_v63, %v10468_v28  ;;  %v7394_v30 = vmul.f32 %v6936_v63, %v10470_v12  ;;  %v10472_v11 = vld [vmem:[#allocation62_spill] sm:$0xff]  ;;  %v10474_v46 = vld [vmem:[#allocation64_spill] sm:$0xff] }
 0x46d   :  { %10467 = vst [vmem:[#allocation125_spill] sm:$0xff] %v7386_v4  ;;  %v7398_v53 = vmul.f32 %v10472_v11, %v6936_v63  ;;  %v7402_v34 = vmul.f32 %v10474_v46, %v6936_v63  ;;  %10476 = vst [vmem:[#allocation135_spill] sm:$0xff] %v7406_v19  ;;  %v10477_v4 = vld [vmem:[#allocation74_spill] sm:$0xff] }
 0x46e   :  { %10469 = vst [vmem:[#allocation127_spill] sm:$0xff] %v7390_v45  ;;  %10471 = vst [vmem:[#allocation123_spill] sm:$0xff] %v7394_v30  ;;  %v7410_v28 = vmul.f32 %v6936_v63, %v10477_v4  ;;  %v10479_v45 = vld [vmem:[#allocation70_spill] sm:$0xff]  ;;  %v10480_v30 = vld [vmem:[#allocation72_spill] sm:$0xff] }
 0x46f   :  { %10473 = vst [vmem:[#allocation126_spill] sm:$0xff] %v7398_v53  ;;  %10475 = vst [vmem:[#allocation133_spill] sm:$0xff] %v7402_v34  ;;  %v7414_v12 = vmul.f32 %v10479_v45, %v6936_v63  ;;  %v7418_v11 = vmul.f32 %v10480_v30, %v6936_v63  ;;  %v10481_v53 = vld [vmem:[#allocation79_spill] sm:$0xff]  ;;  %v10482_v34 = vld [vmem:[#allocation82_spill] sm:$0xff]  ;;  %v7438_v30 = vmul.f32 %v6936_v63, %v10223_v48 }
 0x470   :  { %10478 = vst [vmem:[#allocation131_spill] sm:$0xff] %v7410_v28  ;;  %v7422_v46 = vmul.f32 %v6936_v63, %v10481_v53  ;;  %v7426_v56 = vmul.f32 %v6936_v63, %v10482_v34  ;;  %v10483_v19 = vld [vmem:[#allocation78_spill] sm:$0xff]  ;;  %v10484_v28 = vld [vmem:[#allocation80_spill] sm:$0xff]  ;;  %v7442_v53 = vmul.f32 %v6936_v63, %v10224_v24  ;;  %v7446_v34 = vmul.f32 %v10225_v41, %v6936_v63 }
 0x471   :  { %v7430_v4 = vmul.f32 %v10483_v19, %v6936_v63  ;;  %v7434_v45 = vmul.f32 %v10484_v28, %v6936_v63  ;;  %v7450_v19 = vmul.f32 %v10226_v25, %v6936_v63  ;;  %v7454_v28 = vmul.f32 %v6936_v63, %v6187_v26 }
 0x472   :  { %v7458_v48 = vmul.f32 %v6936_v63, %v6194_v16  ;;  %v7462_v24 = vmul.f32 %v6184_v32, %v6936_v63  ;;  %v7466_v41 = vmul.f32 %v6189_v20, %v6936_v63  ;;  %v7470_v25 = vmul.f32 %v6936_v63, %v6207_v18 }
 0x473   :  { %10485 = vst [vmem:[#allocation134_spill] sm:$0xff] %v7454_v28  ;;  %v7474_v26 = vmul.f32 %v6936_v63, %v6214_v6  ;;  %v10491_v28 = vld [vmem:[#allocation98_spill] sm:$0xff] }
 0x474   :  { %10486 = vst [vmem:[#allocation141_spill] sm:$0xff] %v7458_v48  ;;  %10487 = vst [vmem:[#allocation143_spill] sm:$0xff] %v7462_v24  ;;  %v7478_v16 = vmul.f32 %v10491_v28, %v6936_v63  ;;  %v10493_v48 = vld [vmem:[#allocation99_spill] sm:$0xff]  ;;  %v10495_v24 = vld [vmem:[#allocation105_spill] sm:$0xff] }
 0x475   :  { %10488 = vst [vmem:[#allocation139_spill] sm:$0xff] %v7466_v41  ;;  %10489 = vst [vmem:[#allocation142_spill] sm:$0xff] %v7470_v25  ;;  %v7482_v32 = vmul.f32 %v10493_v48, %v6936_v63  ;;  %v7486_v20 = vmul.f32 %v6936_v63, %v10495_v24  ;;  %v10497_v41 = vld [vmem:[#allocation108_spill] sm:$0xff] }
 0x476   :  { %10490 = vst [vmem:[#allocation149_spill] sm:$0xff] %v7474_v26  ;;  %10492 = vst [vmem:[#allocation151_spill] sm:$0xff] %v7478_v16  ;;  %v7490_v18 = vmul.f32 %v6936_v63, %v10497_v41  ;;  %v10499_v25 = vld [vmem:[#allocation104_spill] sm:$0xff]  ;;  %v10501_v26 = vld [vmem:[#allocation106_spill] sm:$0xff] }
 0x477   :  { %10494 = vst [vmem:[#allocation147_spill] sm:$0xff] %v7482_v32  ;;  %10496 = vst [vmem:[#allocation150_spill] sm:$0xff] %v7486_v20  ;;  %v7494_v6 = vmul.f32 %v10499_v25, %v6936_v63  ;;  %v7498_v28 = vmul.f32 %v10501_v26, %v6936_v63  ;;  %v10502_v16 = vld [vmem:[#allocation113_spill] sm:$0xff]  ;;  %v10504_v32 = vld [vmem:[#allocation116_spill] sm:$0xff] }
 0x478   :  { %10498 = vst [vmem:[#allocation156_spill] sm:$0xff] %v7490_v18  ;;  %v7502_v48 = vmul.f32 %v6936_v63, %v10502_v16  ;;  %v7506_v24 = vmul.f32 %v6936_v63, %v10504_v32  ;;  %v10506_v20 = vld [vmem:[#allocation112_spill] sm:$0xff]  ;;  %v10508_v18 = vld [vmem:[#allocation114_spill] sm:$0xff]  ;;  %v7522_v16 = vmul.f32 %v6936_v63, %v10234_v35  ;;  %v7542_v35 = vmul.f32 %v10238_v39, %v6936_v63 }
 0x479   :  { %10500 = vst [vmem:[#allocation158_spill] sm:$0xff] %v7494_v6  ;;  %v7510_v41 = vmul.f32 %v10506_v20, %v6936_v63  ;;  %v7514_v25 = vmul.f32 %v10508_v18, %v6936_v63  ;;  %v10509_v6 = vld [vmem:[#allocation121_spill] sm:$0xff]  ;;  %v7562_v39 = vmul.f32 %v10241_v17, %v6936_v63  ;;  %v7582_v17 = vmul.f32 %v6936_v63, %v6347_v13 }
 0x47a   :  { %10503 = vst [vmem:[#allocation154_spill] sm:$0xff] %v7502_v48  ;;  %10505 = vst [vmem:[#allocation157_spill] sm:$0xff] %v7506_v24  ;;  %v7518_v26 = vmul.f32 %v6936_v63, %v10509_v6  ;;  %v10511_v48 = vld [vmem:[#allocation120_spill] sm:$0xff]  ;;  %v10513_v24 = vld [vmem:[#allocation122_spill] sm:$0xff]  ;;  %v7538_v6 = vmul.f32 %v6936_v63, %v10084_v14  ;;  %v7558_v14 = vmul.f32 %v10089_v54, %v6936_v63 }
 0x47b   :  { %10507 = vst [vmem:[#allocation39_spill] sm:$0xff] %v7510_v41  ;;  %10510 = vst [vmem:[#allocation42_spill] sm:$0xff] %v7522_v16  ;;  %v7526_v32 = vmul.f32 %v10511_v48, %v6936_v63  ;;  %v7530_v20 = vmul.f32 %v10513_v24, %v6936_v63  ;;  %v10514_v41 = vld [vmem:[#allocation129_spill] sm:$0xff]  ;;  %v10515_v16 = vld [vmem:[#allocation130_spill] sm:$0xff]  ;;  %v7578_v54 = vmul.f32 %v10094_v42, %v6936_v63 }
 0x47c   :  { %v7534_v18 = vmul.f32 %v6936_v63, %v10514_v41  ;;  %v7546_v48 = vmul.f32 %v10515_v16, %v6936_v63  ;;  %v7554_v41 = vmul.f32 %v6936_v63, %v10088_v3  ;;  %v7566_v16 = vmul.f32 %v6936_v63, %v10242_v10 }
 0x47d   :  { %10512 = vst [vmem:[#allocation38_spill] sm:$0xff] %v7526_v32  ;;  %v10516_v32 = vld [vmem:[#allocation137_spill] sm:$0xff]  ;;  %v7574_v3 = vmul.f32 %v10093_v44, %v6936_v63  ;;  %v7586_v10 = vmul.f32 %v6936_v63, %v10095_v0  ;;  %v7594_v44 = vmul.f32 %v10097_v50, %v6936_v63  ;;  %v7598_v42 = vmul.f32 %v6936_v63, %v6367_v57 }
 0x47e   :  { %v7550_v24 = vmul.f32 %v6936_v63, %v10516_v32  ;;  %v7570_v32 = vmul.f32 %v6936_v63, %v10092_v36  ;;  %v7590_v36 = vmul.f32 %v10096_v62, %v6936_v63  ;;  %v7602_v13 = vmul.f32 %v6936_v63, %v6372_v33 }
 0x47f   :  { %v7606_v0 = vmul.f32 %v10098_v52, %v6936_v63  ;;  %v7610_v62 = vmul.f32 %v10099_v40, %v6936_v63  ;;  %v7614_v50 = vmul.f32 %v6936_v63, %v6379_v55  ;;  %v7618_v57 = vmul.f32 %v6936_v63, %v6384_v21 }
 0x480   :  { %v7622_v33 = vmul.f32 %v6376_v23, %v6936_v63  ;;  %v7626_v52 = vmul.f32 %v6381_v29, %v6936_v63  ;;  %v7630_v40 = vmul.f32 %v6936_v63, %v6391_v31  ;;  %v7634_v55 = vmul.f32 %v6936_v63, %v6396_v59 }
 0x481   :  { %v7638_v21 = vmul.f32 %v6388_v43, %v6936_v63  ;;  %v7642_v23 = vmul.f32 %v6393_v5, %v6936_v63  ;;  %v7646_v29 = vmul.f32 %v6936_v63, %v6403_v1  ;;  %v7650_v31 = vmul.f32 %v6936_v63, %v6408_v15 }
 0x482   :  { %10517 = vst [vmem:[#allocation40_spill] sm:$0xff] %v7630_v40  ;;  %10518 = vst [vmem:[#allocation47_spill] sm:$0xff] %v7634_v55  ;;  %v10523_v40 = vld [vmem:[#allocation161_spill] sm:$0xff]  ;;  %v10525_v55 = vld [vmem:[#allocation162_spill] sm:$0xff] }
 0x483   :  { %10519 = vst [vmem:[#allocation50_spill] sm:$0xff] %v7638_v21  ;;  %10520 = vst [vmem:[#allocation46_spill] sm:$0xff] %v7642_v23  ;;  %v7654_v59 = vmul.f32 %v10523_v40, %v6936_v63  ;;  %v7658_v43 = vmul.f32 %v10525_v55, %v6936_v63  ;;  %v10527_v21 = vld [vmem:[#allocation164_spill] sm:$0xff]  ;;  %v10529_v23 = vld [vmem:[#allocation166_spill] sm:$0xff] }
 0x484   :  { %10521 = vst [vmem:[#allocation48_spill] sm:$0xff] %v7646_v29  ;;  %10522 = vst [vmem:[#allocation55_spill] sm:$0xff] %v7650_v31  ;;  %v7662_v5 = vmul.f32 %v6936_v63, %v10527_v21  ;;  %v7666_v1 = vmul.f32 %v6936_v63, %v10529_v23  ;;  %v10531_v29 = vld [vmem:[#allocation163_spill] sm:$0xff]  ;;  %v10533_v31 = vld [vmem:[#allocation165_spill] sm:$0xff] }
 0x485   :  { %10524 = vst [vmem:[#allocation58_spill] sm:$0xff] %v7654_v59  ;;  %10526 = vst [vmem:[#allocation54_spill] sm:$0xff] %v7658_v43  ;;  %v7670_v15 = vmul.f32 %v10531_v29, %v6936_v63  ;;  %v7674_v40 = vmul.f32 %v10533_v31, %v6936_v63  ;;  %v10535_v59 = vld [vmem:[#allocation168_spill] sm:$0xff]  ;;  %v10537_v43 = vld [vmem:[#allocation170_spill] sm:$0xff] }
 0x486   :  { %10528 = vst [vmem:[#allocation56_spill] sm:$0xff] %v7662_v5  ;;  %10530 = vst [vmem:[#allocation63_spill] sm:$0xff] %v7666_v1  ;;  %v7678_v55 = vmul.f32 %v6936_v63, %v10535_v59  ;;  %v7682_v21 = vmul.f32 %v6936_v63, %v10537_v43  ;;  %v10539_v5 = vld [vmem:[#allocation167_spill] sm:$0xff]  ;;  %v10541_v1 = vld [vmem:[#allocation169_spill] sm:$0xff] }
 0x487   :  { %10532 = vst [vmem:[#allocation66_spill] sm:$0xff] %v7670_v15  ;;  %10534 = vst [vmem:[#allocation62_spill] sm:$0xff] %v7674_v40  ;;  %v7686_v23 = vmul.f32 %v10539_v5, %v6936_v63  ;;  %v7690_v29 = vmul.f32 %v10541_v1, %v6936_v63  ;;  %v10543_v15 = vld [vmem:[#allocation172_spill] sm:$0xff]  ;;  %v10545_v40 = vld [vmem:[#allocation174_spill] sm:$0xff] }
 0x488   :  { %10536 = vst [vmem:[#allocation64_spill] sm:$0xff] %v7678_v55  ;;  %10538 = vst [vmem:[#allocation74_spill] sm:$0xff] %v7682_v21  ;;  %v7694_v31 = vmul.f32 %v6936_v63, %v10543_v15  ;;  %v7698_v59 = vmul.f32 %v6936_v63, %v10545_v40  ;;  %v10546_v55 = vld [vmem:[#allocation171_spill] sm:$0xff]  ;;  %v10548_v21 = vld [vmem:[#allocation173_spill] sm:$0xff] }
 0x489   :  { %10540 = vst [vmem:[#allocation70_spill] sm:$0xff] %v7686_v23  ;;  %10542 = vst [vmem:[#allocation72_spill] sm:$0xff] %v7690_v29  ;;  %v7702_v43 = vmul.f32 %v10546_v55, %v6936_v63  ;;  %v7706_v5 = vmul.f32 %v10548_v21, %v6936_v63  ;;  %v10550_v23 = vld [vmem:[#allocation176_spill] sm:$0xff]  ;;  %v10551_v29 = vld [vmem:[#allocation178_spill] sm:$0xff]  ;;  %v7722_v55 = vmul.f32 %v10253_v7, %v6936_v63 }
 0x48a   :  { %10544 = vst [vmem:[#allocation79_spill] sm:$0xff] %v7694_v31  ;;  %v7710_v1 = vmul.f32 %v6936_v63, %v10550_v23  ;;  %v7714_v15 = vmul.f32 %v6936_v63, %v10551_v29  ;;  %v10552_v31 = vld [vmem:[#allocation175_spill] sm:$0xff]  ;;  %v10554_v21 = vsub.f32 %v6929_v27, %v6932_v60 }
 0x48b   :  { %10547 = vst [vmem:[#allocation82_spill] sm:$0xff] %v7702_v43  ;;  %10549 = vst [vmem:[#allocation78_spill] sm:$0xff] %v7706_v5  ;;  %v7718_v40 = vmul.f32 %v10552_v31, %v6936_v63  ;;  %v10553_v43 = vsub.s32 0, %v6920_v9 }
 0x48d   :  { %v7729_v5 = vrot.slane %v10554_v21, %v10553_v43  ;;  %v10570_v43 = vld [vmem:[#allocation148_spill] sm:$0xff] }
 0x48e   :  { %v10572_v21 = vld [vmem:[#allocation144_spill] sm:$0xff] }
 0x48f   :  { %v7733_v23 = vadd.f32 %v7729_v5, %v6942_v2  ;;  %v7737_v29 = vadd.f32 %v7729_v5, %v6946_v38  ;;  %v7741_v31 = vadd.f32 %v7729_v5, %v6950_v22  ;;  %v7745_v7 = vadd.f32 %v7729_v5, %v6954_v51  ;;  %v10564_v38 = vld [vmem:[#allocation132_spill] sm:$0xff] }
 0x490   :  { %v7749_v9 = vadd.f32 %v7729_v5, %v6958_v47  ;;  %v7753_v27 = vadd.f32 %v7729_v5, %v6962_v58  ;;  %v7757_v60 = vadd.f32 %v7729_v5, %v6966_v49  ;;  %v7761_v63 = vadd.f32 %v7729_v5, %v6970_v61  ;;  %v10566_v51 = vld [vmem:[#allocation140_spill] sm:$0xff] }
 0x491   :  { %10555 = vst [vmem:[#allocation80_spill] sm:$0xff] %v7733_v23  ;;  %10556 = vst [vmem:[#allocation98_spill] sm:$0xff] %v7737_v29  ;;  %v7765_v2 = vadd.f32 %v7729_v5, %v6974_v8  ;;  %v7769_v22 = vadd.f32 %v7729_v5, %v10564_v38  ;;  %v7773_v47 = vadd.f32 %v7729_v5, %v10566_v51  ;;  %v10568_v58 = vld [vmem:[#allocation136_spill] sm:$0xff] }
 0x492   :  { %10557 = vst [vmem:[#allocation99_spill] sm:$0xff] %v7741_v31  ;;  %10558 = vst [vmem:[#allocation105_spill] sm:$0xff] %v7745_v7  ;;  %v7777_v49 = vadd.f32 %v7729_v5, %v10568_v58  ;;  %v7781_v61 = vadd.f32 %v7729_v5, %v10570_v43  ;;  %v7785_v8 = vadd.f32 %v7729_v5, %v10572_v21 }
 0x493   :  { %10559 = vst [vmem:[#allocation108_spill] sm:$0xff] %v7749_v9  ;;  %10560 = vst [vmem:[#allocation104_spill] sm:$0xff] %v7753_v27 }
 0x494   :  { %10561 = vst [vmem:[#allocation106_spill] sm:$0xff] %v7757_v60  ;;  %10562 = vst [vmem:[#allocation113_spill] sm:$0xff] %v7761_v63 }
 0x495   :  { %10563 = vst [vmem:[#allocation116_spill] sm:$0xff] %v7765_v2  ;;  %10565 = vst [vmem:[#allocation112_spill] sm:$0xff] %v7769_v22  ;;  %v10574_v2 = vld [vmem:[#allocation146_spill] sm:$0xff]  ;;  %v10576_v22 = vld [vmem:[#allocation155_spill] sm:$0xff] }
 0x496   :  { %10567 = vst [vmem:[#allocation114_spill] sm:$0xff] %v7773_v47  ;;  %10569 = vst [vmem:[#allocation121_spill] sm:$0xff] %v7777_v49  ;;  %v7789_v38 = vadd.f32 %v7729_v5, %v10574_v2  ;;  %v7793_v51 = vadd.f32 %v7729_v5, %v10576_v22  ;;  %v10578_v47 = vld [vmem:[#allocation152_spill] sm:$0xff]  ;;  %v10580_v49 = vld [vmem:[#allocation153_spill] sm:$0xff] }
 0x497   :  { %10571 = vst [vmem:[#allocation120_spill] sm:$0xff] %v7781_v61  ;;  %10573 = vst [vmem:[#allocation122_spill] sm:$0xff] %v7785_v8  ;;  %v7797_v58 = vadd.f32 %v7729_v5, %v10578_v47  ;;  %v7801_v43 = vadd.f32 %v7729_v5, %v10580_v49  ;;  %v10582_v61 = vld [vmem:[#allocation159_spill] sm:$0xff]  ;;  %v10584_v8 = vld [vmem:[#allocation160_spill] sm:$0xff] }
 0x498   :  { %10575 = vst [vmem:[#allocation129_spill] sm:$0xff] %v7789_v38  ;;  %10577 = vst [vmem:[#allocation130_spill] sm:$0xff] %v7793_v51  ;;  %v7805_v21 = vadd.f32 %v7729_v5, %v10582_v61  ;;  %v7809_v2 = vadd.f32 %v7729_v5, %v10584_v8  ;;  %v10586_v38 = vld [vmem:[#allocation71_spill] sm:$0xff] }
 0x499   :  { %10579 = vst [vmem:[#allocation137_spill] sm:$0xff] %v7797_v58  ;;  %10581 = vst [vmem:[#allocation161_spill] sm:$0xff] %v7801_v43  ;;  %v7813_v22 = vadd.f32 %v7729_v5, %v10586_v38  ;;  %v10588_v51 = vld [vmem:[#allocation87_spill] sm:$0xff]  ;;  %v10590_v58 = vld [vmem:[#allocation90_spill] sm:$0xff] }
 0x49a   :  { %10583 = vst [vmem:[#allocation162_spill] sm:$0xff] %v7805_v21  ;;  %10585 = vst [vmem:[#allocation164_spill] sm:$0xff] %v7809_v2  ;;  %v7817_v47 = vadd.f32 %v7729_v5, %v10588_v51  ;;  %v7821_v49 = vadd.f32 %v7729_v5, %v10590_v58  ;;  %v10592_v43 = vld [vmem:[#allocation86_spill] sm:$0xff]  ;;  %v10594_v21 = vld [vmem:[#allocation88_spill] sm:$0xff] }
 0x49b   :  { %10587 = vst [vmem:[#allocation166_spill] sm:$0xff] %v7813_v22  ;;  %v7825_v61 = vadd.f32 %v7729_v5, %v10592_v43  ;;  %v7829_v8 = vadd.f32 %v7729_v5, %v10594_v21  ;;  %v10596_v2 = vld [vmem:[#allocation124_spill] sm:$0xff] }
 0x49c   :  { %10589 = vst [vmem:[#allocation163_spill] sm:$0xff] %v7817_v47  ;;  %10591 = vst [vmem:[#allocation165_spill] sm:$0xff] %v7821_v49  ;;  %v7833_v38 = vadd.f32 %v7729_v5, %v10596_v2  ;;  %v10598_v22 = vld [vmem:[#allocation128_spill] sm:$0xff]  ;;  %v10600_v47 = vld [vmem:[#allocation138_spill] sm:$0xff] }
 0x49d   :  { %10593 = vst [vmem:[#allocation168_spill] sm:$0xff] %v7825_v61  ;;  %10595 = vst [vmem:[#allocation170_spill] sm:$0xff] %v7829_v8  ;;  %v7837_v51 = vadd.f32 %v7729_v5, %v10598_v22  ;;  %v7841_v58 = vadd.f32 %v7729_v5, %v10600_v47  ;;  %v10602_v49 = vld [vmem:[#allocation145_spill] sm:$0xff]  ;;  %v10606_v8 = vld [vmem:[#allocation3_spill] sm:$0xff] }
 0x49e   :  { %10597 = vst [vmem:[#allocation167_spill] sm:$0xff] %v7833_v38  ;;  %v7845_v43 = vadd.f32 %v7729_v5, %v10602_v49  ;;  %v10604_v61 = vld [vmem:[#allocation177_spill] sm:$0xff]  ;;  %v7853_v2 = vadd.f32 %v7729_v5, %v10606_v8 }
 0x49f   :  { %10599 = vst [vmem:[#allocation169_spill] sm:$0xff] %v7837_v51  ;;  %10601 = vst [vmem:[#allocation172_spill] sm:$0xff] %v7841_v58  ;;  %v7849_v21 = vadd.f32 %v7729_v5, %v10604_v61  ;;  %v10608_v38 = vld [vmem:[#allocation5_spill] sm:$0xff]  ;;  %v10610_v51 = vld [vmem:[#allocation2_spill] sm:$0xff] }
 0x4a0   :  { %10603 = vst [vmem:[#allocation174_spill] sm:$0xff] %v7845_v43  ;;  %10607 = vst [vmem:[#allocation173_spill] sm:$0xff] %v7853_v2  ;;  %v7857_v22 = vadd.f32 %v7729_v5, %v10608_v38  ;;  %v7861_v47 = vadd.f32 %v7729_v5, %v10610_v51  ;;  %v10612_v58 = vld [vmem:[#allocation4_spill] sm:$0xff]  ;;  %v10614_v43 = vld [vmem:[#allocation7_spill] sm:$0xff] }
 0x4a1   :  { %10605 = vst [vmem:[#allocation171_spill] sm:$0xff] %v7849_v21  ;;  %v7865_v49 = vadd.f32 %v7729_v5, %v10612_v58  ;;  %v7869_v61 = vadd.f32 %v7729_v5, %v10614_v43  ;;  %v10616_v21 = vld [vmem:[#allocation9_spill] sm:$0xff]  ;;  %v10618_v2 = vld [vmem:[#allocation6_spill] sm:$0xff] }
 0x4a2   :  { %10609 = vst [vmem:[#allocation176_spill] sm:$0xff] %v7857_v22  ;;  %10611 = vst [vmem:[#allocation178_spill] sm:$0xff] %v7861_v47  ;;  %v7873_v8 = vadd.f32 %v7729_v5, %v10616_v21  ;;  %v7877_v38 = vadd.f32 %v7729_v5, %v10618_v2  ;;  %v10620_v22 = vld [vmem:[#allocation8_spill] sm:$0xff]  ;;  %v10622_v47 = vld [vmem:[#allocation11_spill] sm:$0xff] }
 0x4a3   :  { %10613 = vst [vmem:[#allocation175_spill] sm:$0xff] %v7865_v49  ;;  %10615 = vst [vmem:[#allocation132_spill] sm:$0xff] %v7869_v61  ;;  %v7881_v51 = vadd.f32 %v7729_v5, %v10620_v22  ;;  %v7885_v58 = vadd.f32 %v7729_v5, %v10622_v47  ;;  %v10624_v49 = vld [vmem:[#allocation13_spill] sm:$0xff]  ;;  %v10626_v61 = vld [vmem:[#allocation10_spill] sm:$0xff] }
 0x4a4   :  { %10617 = vst [vmem:[#allocation140_spill] sm:$0xff] %v7873_v8  ;;  %10619 = vst [vmem:[#allocation136_spill] sm:$0xff] %v7877_v38  ;;  %v7889_v43 = vadd.f32 %v7729_v5, %v10624_v49  ;;  %v7893_v21 = vadd.f32 %v7729_v5, %v10626_v61  ;;  %v10628_v8 = vld [vmem:[#allocation12_spill] sm:$0xff]  ;;  %v10630_v38 = vld [vmem:[#allocation15_spill] sm:$0xff] }
 0x4a5   :  { %10621 = vst [vmem:[#allocation148_spill] sm:$0xff] %v7881_v51  ;;  %10623 = vst [vmem:[#allocation144_spill] sm:$0xff] %v7885_v58  ;;  %v7897_v2 = vadd.f32 %v7729_v5, %v10628_v8  ;;  %v7901_v22 = vadd.f32 %v7729_v5, %v10630_v38  ;;  %v10632_v51 = vld [vmem:[#allocation17_spill] sm:$0xff]  ;;  %v10634_v58 = vld [vmem:[#allocation14_spill] sm:$0xff] }
 0x4a6   :  { %10625 = vst [vmem:[#allocation146_spill] sm:$0xff] %v7889_v43  ;;  %10627 = vst [vmem:[#allocation155_spill] sm:$0xff] %v7893_v21  ;;  %v7905_v47 = vadd.f32 %v7729_v5, %v10632_v51  ;;  %v7909_v49 = vadd.f32 %v7729_v5, %v10634_v58  ;;  %v10636_v43 = vld [vmem:[#allocation16_spill] sm:$0xff]  ;;  %v10638_v21 = vld [vmem:[#allocation19_spill] sm:$0xff] }
 0x4a7   :  { %10629 = vst [vmem:[#allocation152_spill] sm:$0xff] %v7897_v2  ;;  %10631 = vst [vmem:[#allocation153_spill] sm:$0xff] %v7901_v22  ;;  %v7913_v61 = vadd.f32 %v7729_v5, %v10636_v43  ;;  %v7917_v8 = vadd.f32 %v7729_v5, %v10638_v21  ;;  %v10640_v2 = vld [vmem:[#allocation21_spill] sm:$0xff]  ;;  %v10642_v22 = vld [vmem:[#allocation18_spill] sm:$0xff] }
 0x4a8   :  { %10633 = vst [vmem:[#allocation159_spill] sm:$0xff] %v7905_v47  ;;  %10635 = vst [vmem:[#allocation160_spill] sm:$0xff] %v7909_v49  ;;  %v7921_v38 = vadd.f32 %v7729_v5, %v10640_v2  ;;  %v7925_v51 = vadd.f32 %v7729_v5, %v10642_v22  ;;  %v10644_v47 = vld [vmem:[#allocation20_spill] sm:$0xff]  ;;  %v10646_v49 = vld [vmem:[#allocation23_spill] sm:$0xff] }
 0x4a9   :  { %10637 = vst [vmem:[#allocation71_spill] sm:$0xff] %v7913_v61  ;;  %10639 = vst [vmem:[#allocation87_spill] sm:$0xff] %v7917_v8  ;;  %v7929_v58 = vadd.f32 %v7729_v5, %v10644_v47  ;;  %v7933_v43 = vadd.f32 %v7729_v5, %v10646_v49  ;;  %v10648_v61 = vld [vmem:[#allocation25_spill] sm:$0xff]  ;;  %v10650_v8 = vld [vmem:[#allocation22_spill] sm:$0xff] }
 0x4aa   :  { %10641 = vst [vmem:[#allocation90_spill] sm:$0xff] %v7921_v38  ;;  %10643 = vst [vmem:[#allocation86_spill] sm:$0xff] %v7925_v51  ;;  %v7937_v21 = vadd.f32 %v7729_v5, %v10648_v61  ;;  %v7941_v2 = vadd.f32 %v7729_v5, %v10650_v8  ;;  %v10652_v38 = vld [vmem:[#allocation24_spill] sm:$0xff]  ;;  %v10654_v51 = vld [vmem:[#allocation27_spill] sm:$0xff] }
 0x4ab   :  { %10645 = vst [vmem:[#allocation88_spill] sm:$0xff] %v7929_v58  ;;  %10647 = vst [vmem:[#allocation124_spill] sm:$0xff] %v7933_v43  ;;  %v7945_v22 = vadd.f32 %v7729_v5, %v10652_v38  ;;  %v7949_v47 = vadd.f32 %v7729_v5, %v10654_v51  ;;  %v10656_v58 = vld [vmem:[#allocation29_spill] sm:$0xff]  ;;  %v10658_v43 = vld [vmem:[#allocation26_spill] sm:$0xff] }
 0x4ac   :  { %10649 = vst [vmem:[#allocation128_spill] sm:$0xff] %v7937_v21  ;;  %10651 = vst [vmem:[#allocation138_spill] sm:$0xff] %v7941_v2  ;;  %v7953_v49 = vadd.f32 %v7729_v5, %v10656_v58  ;;  %v7957_v61 = vadd.f32 %v7729_v5, %v10658_v43  ;;  %v10660_v21 = vld [vmem:[#allocation28_spill] sm:$0xff]  ;;  %v10662_v2 = vld [vmem:[#allocation31_spill] sm:$0xff] }
 0x4ad   :  { %10653 = vst [vmem:[#allocation145_spill] sm:$0xff] %v7945_v22  ;;  %10655 = vst [vmem:[#allocation177_spill] sm:$0xff] %v7949_v47  ;;  %v7961_v8 = vadd.f32 %v7729_v5, %v10660_v21  ;;  %v7965_v38 = vadd.f32 %v7729_v5, %v10662_v2  ;;  %v10664_v22 = vld [vmem:[#allocation33_spill] sm:$0xff]  ;;  %v10666_v47 = vld [vmem:[#allocation30_spill] sm:$0xff] }
 0x4ae   :  { %10657 = vst [vmem:[#allocation3_spill] sm:$0xff] %v7953_v49  ;;  %10659 = vst [vmem:[#allocation5_spill] sm:$0xff] %v7957_v61  ;;  %v7969_v51 = vadd.f32 %v7729_v5, %v10664_v22  ;;  %v7973_v58 = vadd.f32 %v7729_v5, %v10666_v47  ;;  %v10668_v49 = vld [vmem:[#allocation32_spill] sm:$0xff]  ;;  %v10670_v61 = vld [vmem:[#allocation35_spill] sm:$0xff] }
 0x4af   :  { %10661 = vst [vmem:[#allocation2_spill] sm:$0xff] %v7961_v8  ;;  %10663 = vst [vmem:[#allocation4_spill] sm:$0xff] %v7965_v38  ;;  %v7977_v43 = vadd.f32 %v7729_v5, %v10668_v49  ;;  %v7981_v21 = vadd.f32 %v7729_v5, %v10670_v61  ;;  %v10672_v8 = vld [vmem:[#allocation37_spill] sm:$0xff]  ;;  %v10674_v38 = vld [vmem:[#allocation34_spill] sm:$0xff] }
 0x4b0   :  { %10665 = vst [vmem:[#allocation7_spill] sm:$0xff] %v7969_v51  ;;  %10667 = vst [vmem:[#allocation9_spill] sm:$0xff] %v7973_v58  ;;  %v7985_v2 = vadd.f32 %v7729_v5, %v10672_v8  ;;  %v7989_v22 = vadd.f32 %v7729_v5, %v10674_v38  ;;  %v10676_v51 = vld [vmem:[#allocation36_spill] sm:$0xff]  ;;  %v10678_v58 = vld [vmem:[#allocation43_spill] sm:$0xff] }
 0x4b1   :  { %10669 = vst [vmem:[#allocation6_spill] sm:$0xff] %v7977_v43  ;;  %10671 = vst [vmem:[#allocation8_spill] sm:$0xff] %v7981_v21  ;;  %v7993_v47 = vadd.f32 %v7729_v5, %v10676_v51  ;;  %v7997_v49 = vadd.f32 %v7729_v5, %v10678_v58  ;;  %v10680_v43 = vld [vmem:[#allocation45_spill] sm:$0xff] }
 0x4b2   :  { %10673 = vst [vmem:[#allocation11_spill] sm:$0xff] %v7985_v2  ;;  %10675 = vst [vmem:[#allocation13_spill] sm:$0xff] %v7989_v22  ;;  %v8001_v61 = vadd.f32 %v7729_v5, %v10680_v43  ;;  %v10682_v21 = vld [vmem:[#allocation41_spill] sm:$0xff]  ;;  %v10684_v2 = vld [vmem:[#allocation44_spill] sm:$0xff] }
 0x4b3   :  { %10677 = vst [vmem:[#allocation10_spill] sm:$0xff] %v7993_v47  ;;  %10679 = vst [vmem:[#allocation12_spill] sm:$0xff] %v7997_v49  ;;  %v8005_v8 = vadd.f32 %v7729_v5, %v10682_v21  ;;  %v8009_v38 = vadd.f32 %v7729_v5, %v10684_v2  ;;  %v10686_v22 = vld [vmem:[#allocation51_spill] sm:$0xff]  ;;  %v10688_v47 = vld [vmem:[#allocation53_spill] sm:$0xff] }
 0x4b4   :  { %10681 = vst [vmem:[#allocation15_spill] sm:$0xff] %v8001_v61  ;;  %v8013_v51 = vadd.f32 %v7729_v5, %v10686_v22  ;;  %v8017_v58 = vadd.f32 %v7729_v5, %v10688_v47  ;;  %v10690_v49 = vld [vmem:[#allocation49_spill] sm:$0xff]  ;;  %v10692_v61 = vld [vmem:[#allocation52_spill] sm:$0xff] }
 0x4b5   :  { %10683 = vst [vmem:[#allocation17_spill] sm:$0xff] %v8005_v8  ;;  %10685 = vst [vmem:[#allocation14_spill] sm:$0xff] %v8009_v38  ;;  %v8021_v43 = vadd.f32 %v7729_v5, %v10690_v49  ;;  %v8025_v21 = vadd.f32 %v7729_v5, %v10692_v61  ;;  %v10694_v8 = vld [vmem:[#allocation59_spill] sm:$0xff]  ;;  %v10696_v38 = vld [vmem:[#allocation61_spill] sm:$0xff] }
 0x4b6   :  { %10687 = vst [vmem:[#allocation16_spill] sm:$0xff] %v8013_v51  ;;  %10689 = vst [vmem:[#allocation19_spill] sm:$0xff] %v8017_v58  ;;  %v8029_v2 = vadd.f32 %v7729_v5, %v10694_v8  ;;  %v8033_v22 = vadd.f32 %v7729_v5, %v10696_v38  ;;  %v10698_v51 = vld [vmem:[#allocation57_spill] sm:$0xff]  ;;  %v10700_v58 = vld [vmem:[#allocation60_spill] sm:$0xff] }
 0x4b7   :  { %10691 = vst [vmem:[#allocation21_spill] sm:$0xff] %v8021_v43  ;;  %10693 = vst [vmem:[#allocation18_spill] sm:$0xff] %v8025_v21  ;;  %v8037_v47 = vadd.f32 %v7729_v5, %v10698_v51  ;;  %v8041_v49 = vadd.f32 %v7729_v5, %v10700_v58  ;;  %v10702_v43 = vld [vmem:[#allocation67_spill] sm:$0xff]  ;;  %v10704_v21 = vld [vmem:[#allocation69_spill] sm:$0xff] }
 0x4b8   :  { %10695 = vst [vmem:[#allocation20_spill] sm:$0xff] %v8029_v2  ;;  %10697 = vst [vmem:[#allocation23_spill] sm:$0xff] %v8033_v22  ;;  %v8045_v61 = vadd.f32 %v7729_v5, %v10702_v43  ;;  %v8049_v8 = vadd.f32 %v7729_v5, %v10704_v21  ;;  %v10706_v2 = vld [vmem:[#allocation65_spill] sm:$0xff]  ;;  %v10708_v22 = vld [vmem:[#allocation68_spill] sm:$0xff] }
 0x4b9   :  { %10699 = vst [vmem:[#allocation25_spill] sm:$0xff] %v8037_v47  ;;  %10701 = vst [vmem:[#allocation22_spill] sm:$0xff] %v8041_v49  ;;  %v8053_v38 = vadd.f32 %v7729_v5, %v10706_v2  ;;  %v8057_v51 = vadd.f32 %v7729_v5, %v10708_v22  ;;  %v10710_v47 = vld [vmem:[#allocation75_spill] sm:$0xff]  ;;  %v10712_v49 = vld [vmem:[#allocation77_spill] sm:$0xff] }
 0x4ba   :  { %10703 = vst [vmem:[#allocation24_spill] sm:$0xff] %v8045_v61  ;;  %10705 = vst [vmem:[#allocation27_spill] sm:$0xff] %v8049_v8  ;;  %v8061_v58 = vadd.f32 %v7729_v5, %v10710_v47  ;;  %v8065_v43 = vadd.f32 %v7729_v5, %v10712_v49  ;;  %v10714_v61 = vld [vmem:[#allocation73_spill] sm:$0xff]  ;;  %v10716_v8 = vld [vmem:[#allocation76_spill] sm:$0xff] }
 0x4bb   :  { %10707 = vst [vmem:[#allocation29_spill] sm:$0xff] %v8053_v38  ;;  %10709 = vst [vmem:[#allocation26_spill] sm:$0xff] %v8057_v51  ;;  %v8069_v21 = vadd.f32 %v7729_v5, %v10714_v61  ;;  %v8073_v2 = vadd.f32 %v7729_v5, %v10716_v8  ;;  %v10718_v38 = vld [vmem:[#allocation83_spill] sm:$0xff]  ;;  %v10720_v51 = vld [vmem:[#allocation85_spill] sm:$0xff] }
 0x4bc   :  { %10711 = vst [vmem:[#allocation28_spill] sm:$0xff] %v8061_v58  ;;  %10713 = vst [vmem:[#allocation31_spill] sm:$0xff] %v8065_v43  ;;  %v8077_v22 = vadd.f32 %v7729_v5, %v10718_v38  ;;  %v8081_v47 = vadd.f32 %v7729_v5, %v10720_v51  ;;  %v10722_v58 = vld [vmem:[#allocation81_spill] sm:$0xff]  ;;  %v10724_v43 = vld [vmem:[#allocation84_spill] sm:$0xff] }
 0x4bd   :  { %10715 = vst [vmem:[#allocation33_spill] sm:$0xff] %v8069_v21  ;;  %10717 = vst [vmem:[#allocation30_spill] sm:$0xff] %v8073_v2  ;;  %v8085_v49 = vadd.f32 %v7729_v5, %v10722_v58  ;;  %v8089_v61 = vadd.f32 %v7729_v5, %v10724_v43  ;;  %v10726_v21 = vld [vmem:[#allocation91_spill] sm:$0xff]  ;;  %v10728_v2 = vld [vmem:[#allocation93_spill] sm:$0xff] }
 0x4be   :  { %10719 = vst [vmem:[#allocation32_spill] sm:$0xff] %v8077_v22  ;;  %10721 = vst [vmem:[#allocation35_spill] sm:$0xff] %v8081_v47  ;;  %v8093_v8 = vadd.f32 %v7729_v5, %v10726_v21  ;;  %v8097_v38 = vadd.f32 %v7729_v5, %v10728_v2  ;;  %v10730_v22 = vld [vmem:[#allocation89_spill] sm:$0xff]  ;;  %v10732_v47 = vld [vmem:[#allocation92_spill] sm:$0xff] }
 0x4bf   :  { %10723 = vst [vmem:[#allocation37_spill] sm:$0xff] %v8085_v49  ;;  %10725 = vst [vmem:[#allocation34_spill] sm:$0xff] %v8089_v61  ;;  %v8101_v51 = vadd.f32 %v7729_v5, %v10730_v22  ;;  %v8105_v58 = vadd.f32 %v7729_v5, %v10732_v47  ;;  %v10734_v49 = vld [vmem:[#allocation95_spill] sm:$0xff]  ;;  %v10736_v61 = vld [vmem:[#allocation97_spill] sm:$0xff] }
 0x4c0   :  { %10727 = vst [vmem:[#allocation36_spill] sm:$0xff] %v8093_v8  ;;  %10729 = vst [vmem:[#allocation43_spill] sm:$0xff] %v8097_v38  ;;  %v8109_v43 = vadd.f32 %v7729_v5, %v10734_v49  ;;  %v8113_v21 = vadd.f32 %v7729_v5, %v10736_v61  ;;  %v10738_v8 = vld [vmem:[#allocation94_spill] sm:$0xff]  ;;  %v10740_v38 = vld [vmem:[#allocation96_spill] sm:$0xff] }
 0x4c1   :  { %10731 = vst [vmem:[#allocation45_spill] sm:$0xff] %v8101_v51  ;;  %10733 = vst [vmem:[#allocation41_spill] sm:$0xff] %v8105_v58  ;;  %v8117_v2 = vadd.f32 %v7729_v5, %v10738_v8  ;;  %v8121_v22 = vadd.f32 %v7729_v5, %v10740_v38  ;;  %v10742_v51 = vld [vmem:[#allocation101_spill] sm:$0xff]  ;;  %v10744_v58 = vld [vmem:[#allocation103_spill] sm:$0xff] }
 0x4c2   :  { %10735 = vst [vmem:[#allocation44_spill] sm:$0xff] %v8109_v43  ;;  %10737 = vst [vmem:[#allocation51_spill] sm:$0xff] %v8113_v21  ;;  %v8125_v47 = vadd.f32 %v7729_v5, %v10742_v51  ;;  %v8129_v49 = vadd.f32 %v7729_v5, %v10744_v58  ;;  %v10746_v43 = vld [vmem:[#allocation100_spill] sm:$0xff]  ;;  %v10748_v21 = vld [vmem:[#allocation102_spill] sm:$0xff] }
 0x4c3   :  { %10739 = vst [vmem:[#allocation53_spill] sm:$0xff] %v8117_v2  ;;  %10741 = vst [vmem:[#allocation49_spill] sm:$0xff] %v8121_v22  ;;  %v8133_v61 = vadd.f32 %v7729_v5, %v10746_v43  ;;  %v8137_v8 = vadd.f32 %v7729_v5, %v10748_v21  ;;  %v10750_v2 = vld [vmem:[#allocation109_spill] sm:$0xff]  ;;  %v10752_v22 = vld [vmem:[#allocation111_spill] sm:$0xff] }
 0x4c4   :  { %10743 = vst [vmem:[#allocation52_spill] sm:$0xff] %v8125_v47  ;;  %10745 = vst [vmem:[#allocation59_spill] sm:$0xff] %v8129_v49  ;;  %v8141_v38 = vadd.f32 %v7729_v5, %v10750_v2  ;;  %v8145_v51 = vadd.f32 %v7729_v5, %v10752_v22  ;;  %v10754_v47 = vld [vmem:[#allocation107_spill] sm:$0xff]  ;;  %v10755_v49 = vld [vmem:[#allocation110_spill] sm:$0xff] }
 0x4c5   :  { %10747 = vst [vmem:[#allocation61_spill] sm:$0xff] %v8133_v61  ;;  %10749 = vst [vmem:[#allocation57_spill] sm:$0xff] %v8137_v8  ;;  %v8149_v58 = vadd.f32 %v7729_v5, %v10754_v47  ;;  %v8153_v43 = vadd.f32 %v7729_v5, %v10755_v49  ;;  %v10757_v61 = vld [vmem:[#allocation117_spill] sm:$0xff]  ;;  %v10759_v8 = vld [vmem:[#allocation119_spill] sm:$0xff]  ;;  %v8173_v49 = vadd.f32 %v7729_v5, %v7382_v37 }
 0x4c6   :  { %10751 = vst [vmem:[#allocation60_spill] sm:$0xff] %v8141_v38  ;;  %10753 = vst [vmem:[#allocation67_spill] sm:$0xff] %v8145_v51  ;;  %v8157_v21 = vadd.f32 %v7729_v5, %v10757_v61  ;;  %v8161_v2 = vadd.f32 %v7729_v5, %v10759_v8  ;;  %v10761_v38 = vld [vmem:[#allocation115_spill] sm:$0xff]  ;;  %v10763_v51 = vld [vmem:[#allocation118_spill] sm:$0xff] }
 0x4c7   :  { %10756 = vst [vmem:[#allocation69_spill] sm:$0xff] %v8153_v43  ;;  %v8165_v22 = vadd.f32 %v7729_v5, %v10761_v38  ;;  %v8169_v47 = vadd.f32 %v7729_v5, %v10763_v51  ;;  %10765 = vst [vmem:[#allocation73_spill] sm:$0xff] %v8173_v49  ;;  %v10766_v43 = vld [vmem:[#allocation125_spill] sm:$0xff]  ;;  %v10776_v49 = vld [vmem:[#allocation135_spill] sm:$0xff] }
 0x4c8   :  { %10758 = vst [vmem:[#allocation65_spill] sm:$0xff] %v8157_v21  ;;  %10760 = vst [vmem:[#allocation68_spill] sm:$0xff] %v8161_v2  ;;  %v8177_v61 = vadd.f32 %v7729_v5, %v10766_v43  ;;  %v10768_v21 = vld [vmem:[#allocation127_spill] sm:$0xff]  ;;  %v8197_v43 = vadd.f32 %v7729_v5, %v10776_v49  ;;  %v8217_v49 = vadd.f32 %v7729_v5, %v7426_v56  ;;  %v10961_v27 = vld [vmem:[#allocation41_spill] sm:$0xff] }
 0x4c9   :  { %10762 = vst [vmem:[#allocation75_spill] sm:$0xff] %v8165_v22  ;;  %10764 = vst [vmem:[#allocation77_spill] sm:$0xff] %v8169_v47  ;;  %v8181_v8 = vadd.f32 %v7729_v5, %v10768_v21  ;;  %v10770_v2 = vld [vmem:[#allocation123_spill] sm:$0xff]  ;;  %v10772_v22 = vld [vmem:[#allocation126_spill] sm:$0xff]  ;;  %v8237_v56 = vadd.f32 %v7729_v5, %v7446_v34 }
 0x4ca   :  { %10767 = vst [vmem:[#allocation76_spill] sm:$0xff] %v8177_v61  ;;  %v8185_v38 = vadd.f32 %v7729_v5, %v10770_v2  ;;  %v8189_v51 = vadd.f32 %v7729_v5, %v10772_v22  ;;  %v10774_v47 = vld [vmem:[#allocation133_spill] sm:$0xff]  ;;  %10777 = vst [vmem:[#allocation91_spill] sm:$0xff] %v8197_v43  ;;  %v10778_v61 = vld [vmem:[#allocation131_spill] sm:$0xff]  ;;  %v8205_v2 = vadd.f32 %v7729_v5, %v7414_v12 }
 0x4cb   :  { %10769 = vst [vmem:[#allocation83_spill] sm:$0xff] %v8181_v8  ;;  %v8193_v37 = vadd.f32 %v7729_v5, %v10774_v47  ;;  %v8201_v21 = vadd.f32 %v7729_v5, %v10778_v61  ;;  %v8209_v22 = vadd.f32 %v7729_v5, %v7418_v11  ;;  %v8213_v47 = vadd.f32 %v7729_v5, %v7422_v46 }
 0x4cc   :  { %10771 = vst [vmem:[#allocation85_spill] sm:$0xff] %v8185_v38  ;;  %10773 = vst [vmem:[#allocation81_spill] sm:$0xff] %v8189_v51  ;;  %v8221_v61 = vadd.f32 %v7729_v5, %v7430_v4  ;;  %v8225_v12 = vadd.f32 %v7729_v5, %v7434_v45  ;;  %v8229_v11 = vadd.f32 %v7729_v5, %v7438_v30  ;;  %v10969_v31 = vld [vmem:[#allocation57_spill] sm:$0xff] }
 0x4cd   :  { %10775 = vst [vmem:[#allocation84_spill] sm:$0xff] %v8193_v37  ;;  %10779 = vst [vmem:[#allocation93_spill] sm:$0xff] %v8201_v21  ;;  %v8233_v46 = vadd.f32 %v7729_v5, %v7442_v53  ;;  %v8241_v4 = vadd.f32 %v7729_v5, %v7450_v19  ;;  %v10970_v7 = vld [vmem:[#allocation60_spill] sm:$0xff]  ;;  %v10971_v9 = vld [vmem:[#allocation67_spill] sm:$0xff] }
 0x4ce   :  { %10780 = vst [vmem:[#allocation89_spill] sm:$0xff] %v8205_v2  ;;  %10781 = vst [vmem:[#allocation92_spill] sm:$0xff] %v8209_v22  ;;  %v10972_v60 = vld [vmem:[#allocation69_spill] sm:$0xff] }
 0x4cf   :  { %10782 = vst [vmem:[#allocation95_spill] sm:$0xff] %v8213_v47  ;;  %10783 = vst [vmem:[#allocation97_spill] sm:$0xff] %v8217_v49  ;;  %v10973_v63 = vld [vmem:[#allocation65_spill] sm:$0xff] }
 0x4d0   :  { %10784 = vst [vmem:[#allocation94_spill] sm:$0xff] %v8221_v61  ;;  %10785 = vst [vmem:[#allocation96_spill] sm:$0xff] %v8225_v12  ;;  %v10790_v61 = vld [vmem:[#allocation134_spill] sm:$0xff]  ;;  %v10792_v12 = vld [vmem:[#allocation141_spill] sm:$0xff] }
 0x4d1   :  { %10786 = vst [vmem:[#allocation101_spill] sm:$0xff] %v8229_v11  ;;  %10787 = vst [vmem:[#allocation103_spill] sm:$0xff] %v8233_v46  ;;  %v8245_v45 = vadd.f32 %v7729_v5, %v10790_v61  ;;  %v8249_v30 = vadd.f32 %v7729_v5, %v10792_v12  ;;  %v10794_v11 = vld [vmem:[#allocation143_spill] sm:$0xff]  ;;  %v10977_v23 = vld [vmem:[#allocation73_spill] sm:$0xff] }
 0x4d2   :  { %10788 = vst [vmem:[#allocation100_spill] sm:$0xff] %v8237_v56  ;;  %10789 = vst [vmem:[#allocation102_spill] sm:$0xff] %v8241_v4  ;;  %v8253_v53 = vadd.f32 %v7729_v5, %v10794_v11  ;;  %v10796_v46 = vld [vmem:[#allocation139_spill] sm:$0xff]  ;;  %v10798_v56 = vld [vmem:[#allocation142_spill] sm:$0xff] }
 0x4d3   :  { %10791 = vst [vmem:[#allocation109_spill] sm:$0xff] %v8245_v45  ;;  %10793 = vst [vmem:[#allocation111_spill] sm:$0xff] %v8249_v30  ;;  %v8257_v34 = vadd.f32 %v7729_v5, %v10796_v46  ;;  %v8261_v19 = vadd.f32 %v7729_v5, %v10798_v56  ;;  %v10800_v4 = vld [vmem:[#allocation149_spill] sm:$0xff]  ;;  %v10801_v45 = vld [vmem:[#allocation151_spill] sm:$0xff] }
 0x4d4   :  { %10795 = vst [vmem:[#allocation107_spill] sm:$0xff] %v8253_v53  ;;  %v8265_v61 = vadd.f32 %v7729_v5, %v10800_v4  ;;  %v8269_v12 = vadd.f32 %v7729_v5, %v10801_v45  ;;  %v10803_v30 = vld [vmem:[#allocation147_spill] sm:$0xff]  ;;  %v10805_v53 = vld [vmem:[#allocation150_spill] sm:$0xff]  ;;  %v8289_v45 = vadd.f32 %v7729_v5, %v7498_v28  ;;  %v8309_v28 = vadd.f32 %v7729_v5, %v7518_v26 }
 0x4d5   :  { %10797 = vst [vmem:[#allocation110_spill] sm:$0xff] %v8257_v34  ;;  %10799 = vst [vmem:[#allocation117_spill] sm:$0xff] %v8261_v19  ;;  %v8273_v11 = vadd.f32 %v7729_v5, %v10803_v30  ;;  %v8277_v46 = vadd.f32 %v7729_v5, %v10805_v53  ;;  %v10807_v34 = vld [vmem:[#allocation156_spill] sm:$0xff]  ;;  %v10808_v19 = vld [vmem:[#allocation158_spill] sm:$0xff]  ;;  %v8329_v26 = vadd.f32 %v7729_v5, %v7538_v6 }
 0x4d6   :  { %10802 = vst [vmem:[#allocation119_spill] sm:$0xff] %v8269_v12  ;;  %v8281_v56 = vadd.f32 %v7729_v5, %v10807_v34  ;;  %v8285_v4 = vadd.f32 %v7729_v5, %v10808_v19  ;;  %10809 = vst [vmem:[#allocation125_spill] sm:$0xff] %v8289_v45  ;;  %v10810_v12 = vld [vmem:[#allocation154_spill] sm:$0xff]  ;;  %v8305_v19 = vadd.f32 %v7729_v5, %v7514_v25 }
 0x4d7   :  { %10804 = vst [vmem:[#allocation115_spill] sm:$0xff] %v8273_v11  ;;  %10806 = vst [vmem:[#allocation118_spill] sm:$0xff] %v8277_v46  ;;  %v8293_v30 = vadd.f32 %v7729_v5, %v10810_v12  ;;  %v10812_v11 = vld [vmem:[#allocation157_spill] sm:$0xff]  ;;  %v10813_v46 = vld [vmem:[#allocation39_spill] sm:$0xff]  ;;  %v8325_v25 = vadd.f32 %v7729_v5, %v7534_v18  ;;  %v8345_v18 = vadd.f32 %v7729_v5, %v7554_v41 }
 0x4d8   :  { %v8297_v53 = vadd.f32 %v7729_v5, %v10812_v11  ;;  %v8301_v34 = vadd.f32 %v7729_v5, %v10813_v46  ;;  %v10814_v45 = vld [vmem:[#allocation42_spill] sm:$0xff]  ;;  %v8321_v46 = vadd.f32 %v7729_v5, %v7530_v20  ;;  %v8341_v20 = vadd.f32 %v7729_v5, %v7550_v24 }
 0x4d9   :  { %10811 = vst [vmem:[#allocation127_spill] sm:$0xff] %v8293_v30  ;;  %v8313_v12 = vadd.f32 %v7729_v5, %v10814_v45  ;;  %v10815_v30 = vld [vmem:[#allocation38_spill] sm:$0xff]  ;;  %v8333_v45 = vadd.f32 %v7729_v5, %v7542_v35  ;;  %v8349_v6 = vadd.f32 %v7729_v5, %v7558_v14  ;;  %v8353_v35 = vadd.f32 %v7729_v5, %v7562_v39  ;;  %v10983_v37 = vld [vmem:[#allocation100_spill] sm:$0xff] }
 0x4da   :  { %v8317_v11 = vadd.f32 %v7729_v5, %v10815_v30  ;;  %v8337_v30 = vadd.f32 %v7729_v5, %v7546_v48  ;;  %v8357_v48 = vadd.f32 %v7729_v5, %v7566_v16  ;;  %v8361_v24 = vadd.f32 %v7729_v5, %v7570_v32  ;;  %v10979_v29 = vld [vmem:[#allocation94_spill] sm:$0xff] }
 0x4db   :  { %10816 = vst [vmem:[#allocation123_spill] sm:$0xff] %v8353_v35  ;;  %v8365_v41 = vadd.f32 %v7729_v5, %v7574_v3  ;;  %v8369_v14 = vadd.f32 %v7729_v5, %v7578_v54  ;;  %v8373_v39 = vadd.f32 %v7729_v5, %v7582_v17  ;;  %v8377_v16 = vadd.f32 %v7729_v5, %v7586_v10  ;;  %v10984_v43 = vld [vmem:[#allocation102_spill] sm:$0xff]  ;;  %v10987_v22 = vld [vmem:[#allocation107_spill] sm:$0xff]  ;;  %v11039_v35 = vld [vmem:[#allocation112_spill] sm:$0xff] }
 0x4dc   :  { %10817 = vst [vmem:[#allocation126_spill] sm:$0xff] %v8357_v48  ;;  %10818 = vst [vmem:[#allocation133_spill] sm:$0xff] %v8361_v24  ;;  %v8381_v32 = vadd.f32 %v7729_v5, %v7590_v36  ;;  %v8385_v3 = vadd.f32 %v7729_v5, %v7594_v44  ;;  %v8389_v54 = vadd.f32 %v7729_v5, %v7598_v42  ;;  %v10988_v47 = vld [vmem:[#allocation110_spill] sm:$0xff]  ;;  %v10989_v49 = vld [vmem:[#allocation117_spill] sm:$0xff] }
 0x4dd   :  { %10819 = vst [vmem:[#allocation135_spill] sm:$0xff] %v8365_v41  ;;  %10820 = vst [vmem:[#allocation131_spill] sm:$0xff] %v8369_v14  ;;  %v8393_v17 = vadd.f32 %v7729_v5, %v7602_v13  ;;  %v8397_v10 = vadd.f32 %v7729_v5, %v7606_v0  ;;  %v8401_v36 = vadd.f32 %v7729_v5, %v7610_v62  ;;  %v10990_v8 = vld [vmem:[#allocation119_spill] sm:$0xff]  ;;  %v10993_v21 = vld [vmem:[#allocation125_spill] sm:$0xff] }
 0x4de   :  { %10821 = vst [vmem:[#allocation134_spill] sm:$0xff] %v8373_v39  ;;  %10822 = vst [vmem:[#allocation141_spill] sm:$0xff] %v8377_v16  ;;  %v8405_v44 = vadd.f32 %v7729_v5, %v7614_v50  ;;  %v8409_v42 = vadd.f32 %v7729_v5, %v7618_v57  ;;  %v8413_v13 = vadd.f32 %v7729_v5, %v7622_v33  ;;  %v10991_v38 = vld [vmem:[#allocation115_spill] sm:$0xff]  ;;  %v10992_v51 = vld [vmem:[#allocation118_spill] sm:$0xff] }
 0x4df   :  { %10823 = vst [vmem:[#allocation143_spill] sm:$0xff] %v8381_v32  ;;  %10824 = vst [vmem:[#allocation139_spill] sm:$0xff] %v8385_v3  ;;  %v8417_v0 = vadd.f32 %v7729_v5, %v7626_v52  ;;  %v11021_v3 = vld [vmem:[#allocation80_spill] sm:$0xff]  ;;  %v11051_v16 = vld [vmem:[#allocation130_spill] sm:$0xff] }
 0x4e0   :  { %10825 = vst [vmem:[#allocation142_spill] sm:$0xff] %v8389_v54  ;;  %10826 = vst [vmem:[#allocation149_spill] sm:$0xff] %v8393_v17  ;;  %v10994_v2 = vld [vmem:[#allocation127_spill] sm:$0xff]  ;;  %v11029_v24 = vld [vmem:[#allocation108_spill] sm:$0xff] }
 0x4e1   :  { %10827 = vst [vmem:[#allocation151_spill] sm:$0xff] %v8397_v10  ;;  %10828 = vst [vmem:[#allocation147_spill] sm:$0xff] %v8401_v36  ;;  %v10833_v10 = vld [vmem:[#allocation40_spill] sm:$0xff]  ;;  %v10835_v36 = vld [vmem:[#allocation47_spill] sm:$0xff] }
 0x4e2   :  { %10829 = vst [vmem:[#allocation150_spill] sm:$0xff] %v8405_v44  ;;  %10830 = vst [vmem:[#allocation156_spill] sm:$0xff] %v8409_v42  ;;  %v8421_v62 = vadd.f32 %v7729_v5, %v10833_v10  ;;  %v8425_v50 = vadd.f32 %v7729_v5, %v10835_v36  ;;  %v10837_v44 = vld [vmem:[#allocation50_spill] sm:$0xff]  ;;  %v11031_v41 = vld [vmem:[#allocation104_spill] sm:$0xff] }
 0x4e3   :  { %10831 = vst [vmem:[#allocation158_spill] sm:$0xff] %v8413_v13  ;;  %10832 = vst [vmem:[#allocation154_spill] sm:$0xff] %v8417_v0  ;;  %v8429_v57 = vadd.f32 %v7729_v5, %v10837_v44  ;;  %v10839_v42 = vld [vmem:[#allocation46_spill] sm:$0xff]  ;;  %v10841_v13 = vld [vmem:[#allocation48_spill] sm:$0xff] }
 0x4e4   :  { %10834 = vst [vmem:[#allocation157_spill] sm:$0xff] %v8421_v62  ;;  %10836 = vst [vmem:[#allocation39_spill] sm:$0xff] %v8425_v50  ;;  %v8433_v33 = vadd.f32 %v7729_v5, %v10839_v42  ;;  %v8437_v52 = vadd.f32 %v7729_v5, %v10841_v13  ;;  %v10843_v0 = vld [vmem:[#allocation55_spill] sm:$0xff]  ;;  %v10845_v62 = vld [vmem:[#allocation58_spill] sm:$0xff] }
 0x4e5   :  { %10838 = vst [vmem:[#allocation42_spill] sm:$0xff] %v8429_v57  ;;  %v8441_v10 = vadd.f32 %v7729_v5, %v10843_v0  ;;  %v8445_v36 = vadd.f32 %v7729_v5, %v10845_v62  ;;  %v10847_v50 = vld [vmem:[#allocation54_spill] sm:$0xff]  ;;  %v10849_v57 = vld [vmem:[#allocation56_spill] sm:$0xff]  ;;  %v11043_v17 = vld [vmem:[#allocation121_spill] sm:$0xff] }
 0x4e6   :  { %10840 = vst [vmem:[#allocation38_spill] sm:$0xff] %v8433_v33  ;;  %10842 = vst [vmem:[#allocation40_spill] sm:$0xff] %v8437_v52  ;;  %v8449_v44 = vadd.f32 %v7729_v5, %v10847_v50  ;;  %v8453_v42 = vadd.f32 %v7729_v5, %v10849_v57  ;;  %v10851_v33 = vld [vmem:[#allocation63_spill] sm:$0xff]  ;;  %v10853_v52 = vld [vmem:[#allocation66_spill] sm:$0xff] }
 0x4e7   :  { %10844 = vst [vmem:[#allocation47_spill] sm:$0xff] %v8441_v10  ;;  %10846 = vst [vmem:[#allocation50_spill] sm:$0xff] %v8445_v36  ;;  %v8457_v13 = vadd.f32 %v7729_v5, %v10851_v33  ;;  %v8461_v0 = vadd.f32 %v7729_v5, %v10853_v52  ;;  %v10855_v10 = vld [vmem:[#allocation62_spill] sm:$0xff]  ;;  %v10857_v36 = vld [vmem:[#allocation64_spill] sm:$0xff] }
 0x4e8   :  { %10848 = vst [vmem:[#allocation46_spill] sm:$0xff] %v8449_v44  ;;  %10850 = vst [vmem:[#allocation48_spill] sm:$0xff] %v8453_v42  ;;  %v8465_v62 = vadd.f32 %v7729_v5, %v10855_v10  ;;  %v8469_v50 = vadd.f32 %v7729_v5, %v10857_v36  ;;  %v10859_v44 = vld [vmem:[#allocation74_spill] sm:$0xff]  ;;  %v8489_v36 = vadd.f32 %v7729_v5, %v7698_v59  ;;  %v11037_v32 = vld [vmem:[#allocation116_spill] sm:$0xff] }
 0x4e9   :  { %10852 = vst [vmem:[#allocation55_spill] sm:$0xff] %v8457_v13  ;;  %10854 = vst [vmem:[#allocation58_spill] sm:$0xff] %v8461_v0  ;;  %v8473_v57 = vadd.f32 %v7729_v5, %v10859_v44  ;;  %v10861_v42 = vld [vmem:[#allocation70_spill] sm:$0xff]  ;;  %v10863_v13 = vld [vmem:[#allocation72_spill] sm:$0xff]  ;;  %v8509_v59 = vadd.f32 %v7729_v5, %v7718_v40 }
 0x4ea   :  { %10856 = vst [vmem:[#allocation54_spill] sm:$0xff] %v8465_v62  ;;  %10858 = vst [vmem:[#allocation56_spill] sm:$0xff] %v8469_v50  ;;  %v8477_v33 = vadd.f32 %v7729_v5, %v10861_v42  ;;  %v8481_v52 = vadd.f32 %v7729_v5, %v10863_v13  ;;  %v10865_v0 = vld [vmem:[#allocation79_spill] sm:$0xff]  ;;  %v10868_v50 = vld [vmem:[#allocation82_spill] sm:$0xff]  ;;  %v8501_v13 = vadd.f32 %v7729_v5, %v7710_v1 }
 0x4eb   :  { %10860 = vst [vmem:[#allocation63_spill] sm:$0xff] %v8473_v57  ;;  %v8485_v10 = vadd.f32 %v7729_v5, %v10865_v0  ;;  %10867 = vst [vmem:[#allocation74_spill] sm:$0xff] %v8489_v36  ;;  %v8493_v44 = vadd.f32 %v7729_v5, %v10868_v50  ;;  %v10870_v57 = vld [vmem:[#allocation78_spill] sm:$0xff]  ;;  %v8505_v0 = vadd.f32 %v7729_v5, %v7714_v15  ;;  %v11025_v36 = vld [vmem:[#allocation99_spill] sm:$0xff] }
 0x4ec   :  { %10862 = vst [vmem:[#allocation66_spill] sm:$0xff] %v8477_v33  ;;  %10864 = vst [vmem:[#allocation62_spill] sm:$0xff] %v8481_v52  ;;  %v8497_v42 = vadd.f32 %v7729_v5, %v10870_v57  ;;  %v8513_v50 = vadd.f32 %v7729_v5, %v7722_v55  ;;  %v10975_v5 = vld [vmem:[#allocation75_spill] sm:$0xff]  ;;  %v11023_v33 = vld [vmem:[#allocation98_spill] sm:$0xff]  ;;  %v11030_v57 = vmax.f32 %v11029_v24, 0.0 }
 0x4ed   :  { %10866 = vst [vmem:[#allocation64_spill] sm:$0xff] %v8485_v10  ;;  %10869 = vst [vmem:[#allocation70_spill] sm:$0xff] %v8493_v44  ;;  %v11024_v40 = vmax.f32 %v11023_v33, 0.0  ;;  %v11026_v10 = vmax.f32 %v11025_v36, 0.0  ;;  %v11027_v55 = vld [vmem:[#allocation105_spill] sm:$0xff]  ;;  %v11033_v1 = vld [vmem:[#allocation106_spill] sm:$0xff] }
 0x4ee   :  { %10871 = vst [vmem:[#allocation72_spill] sm:$0xff] %v8497_v42  ;;  %10872 = vst [vmem:[#allocation79_spill] sm:$0xff] %v8501_v13  ;;  %v11028_v48 = vmax.f32 %v11027_v55, 0.0  ;;  %v11032_v42 = vmax.f32 %v11031_v41, 0.0  ;;  %v11034_v39 = vmax.f32 %v11033_v1, 0.0  ;;  %v11035_v13 = vld [vmem:[#allocation113_spill] sm:$0xff] }
 0x4ef   :  { %10873 = vst [vmem:[#allocation82_spill] sm:$0xff] %v8505_v0  ;;  %10874 = vst [vmem:[#allocation78_spill] sm:$0xff] %v8509_v59  ;;  %v10974_v59 = vld [vmem:[#allocation68_spill] sm:$0xff]  ;;  %v11022_v0 = vmax.f32 %v11021_v3, 0.0  ;;  %v11036_v62 = vmax.f32 %v11035_v13, 0.0  ;;  %v11038_v3 = vmax.f32 %v11037_v32, 0.0 }
 0x4f0   :  { %10875 = vst [vmem:[#allocation179_spill] sm:$0xff] %v8513_v50  ;;  %v10976_v50 = vld [vmem:[#allocation77_spill] sm:$0xff]  ;;  %v4574_v44 = vpack.c.bf16 %v11028_v48, %v11026_v10  ;;  %v4579_v14 = vpack.c.bf16 %v11032_v42, %v11030_v57  ;;  %v11040_v33 = vmax.f32 %v11039_v35, 0.0  ;;  %v11044_v55 = vmax.f32 %v11043_v17, 0.0  ;;  %v11045_v10 = vld [vmem:[#allocation120_spill] sm:$0xff]  ;;  %v11047_v54 = vld [vmem:[#allocation122_spill] sm:$0xff] }
 0x4f1   :  { %v4569_v52 = vpack.c.bf16 %v11024_v40, %v11022_v0  ;;  %v4584_v15 = vpack.c.bf16 %v11036_v62, %v11034_v39  ;;  %v11041_v40 = vld [vmem:[#allocation114_spill] sm:$0xff]  ;;  %v11046_v24 = vmax.f32 %v11045_v10, 0.0  ;;  %v11048_v41 = vmax.f32 %v11047_v54, 0.0  ;;  %v11049_v57 = vld [vmem:[#allocation129_spill] sm:$0xff] }
 0x4f2   :  { %v4589_v0 = vpack.c.bf16 %v11040_v33, %v11038_v3  ;;  %v11042_v36 = vmax.f32 %v11041_v40, 0.0  ;;  %v11050_v1 = vmax.f32 %v11049_v57, 0.0  ;;  %v11052_v13 = vmax.f32 %v11051_v16, 0.0  ;;  %5056 = vst [vmem:[%s9401_s4 + $0x8] sm:$0xff] %v4574_v44   ;;  %5057 = vst [vmem:[%s9401_s4 + $0x10] sm:$0xff] %v4579_v14   ;;  %v11053_v35 = vld [vmem:[#allocation137_spill] sm:$0xff] }
 0x4f3   :  { %v4599_v42 = vpack.c.bf16 %v11048_v41, %v11046_v24  ;;  %4570 = vst [vmem:[%s9401_s4] sm:$0xff] %v4569_v52   ;;  %5058 = vst [vmem:[%s9401_s4 + $0x18] sm:$0xff] %v4584_v15   ;;  %v11054_v32 = vmax.f32 %v11053_v35, 0.0  ;;  %v11055_v16 = vld [vmem:[#allocation161_spill] sm:$0xff]  ;;  %v11057_v62 = vld [vmem:[#allocation162_spill] sm:$0xff] }
 0x4f4   :  { %v4594_v48 = vpack.c.bf16 %v11044_v55, %v11042_v36  ;;  %v4604_v39 = vpack.c.bf16 %v11052_v13, %v11050_v1  ;;  %v11056_v54 = vmax.f32 %v11055_v16, 0.0  ;;  %v11058_v3 = vmax.f32 %v11057_v62, 0.0  ;;  %v11059_v52 = vld [vmem:[#allocation164_spill] sm:$0xff]  ;;  %v11061_v36 = vld [vmem:[#allocation166_spill] sm:$0xff]  ;;  %v11063_v55 = vld [vmem:[#allocation163_spill] sm:$0xff]  ;;  %5059 = vst [vmem:[%s9401_s4 + $0x20] sm:$0xff] %v4589_v0  }
 0x4f5   :  { %v11060_v33 = vmax.f32 %v11059_v52, 0.0  ;;  %v11062_v44 = vmax.f32 %v11061_v36, 0.0  ;;  %v11064_v10 = vmax.f32 %v11063_v55, 0.0  ;;  %v11065_v14 = vld [vmem:[#allocation165_spill] sm:$0xff]  ;;  %v11067_v57 = vld [vmem:[#allocation168_spill] sm:$0xff]  ;;  %5061 = vst [vmem:[%s9401_s4 + $0x30] sm:$0xff] %v4599_v42  }
 0x4f6   :  { %v4609_v17 = vpack.c.bf16 %v11056_v54, %v11054_v32  ;;  %v11066_v41 = vmax.f32 %v11065_v14, 0.0  ;;  %v11068_v1 = vmax.f32 %v11067_v57, 0.0  ;;  %5060 = vst [vmem:[%s9401_s4 + $0x28] sm:$0xff] %v4594_v48   ;;  %5062 = vst [vmem:[%s9401_s4 + $0x38] sm:$0xff] %v4604_v39   ;;  %v11069_v13 = vld [vmem:[#allocation170_spill] sm:$0xff]  ;;  %v11071_v32 = vld [vmem:[#allocation167_spill] sm:$0xff] }
 0x4f7   :  { %v4614_v40 = vpack.c.bf16 %v11060_v33, %v11058_v3  ;;  %v4619_v24 = vpack.c.bf16 %v11064_v10, %v11062_v44  ;;  %v11070_v35 = vmax.f32 %v11069_v13, 0.0  ;;  %v11072_v16 = vmax.f32 %v11071_v32, 0.0  ;;  %v11073_v62 = vld [vmem:[#allocation169_spill] sm:$0xff]  ;;  %v11075_v0 = vld [vmem:[#allocation172_spill] sm:$0xff]  ;;  %v11077_v36 = vld [vmem:[#allocation174_spill] sm:$0xff] }
 0x4f8   :  { %v4624_v15 = vpack.c.bf16 %v11068_v1, %v11066_v41  ;;  %v11074_v3 = vmax.f32 %v11073_v62, 0.0  ;;  %v11076_v52 = vmax.f32 %v11075_v0, 0.0  ;;  %v11078_v48 = vmax.f32 %v11077_v36, 0.0  ;;  %v11079_v44 = vld [vmem:[#allocation171_spill] sm:$0xff]  ;;  %v11081_v42 = vld [vmem:[#allocation173_spill] sm:$0xff]  ;;  %v11083_v41 = vld [vmem:[#allocation176_spill] sm:$0xff] }
 0x4f9   :  { %v4629_v54 = vpack.c.bf16 %v11072_v16, %v11070_v35  ;;  %v11080_v55 = vmax.f32 %v11079_v44, 0.0  ;;  %v11082_v14 = vmax.f32 %v11081_v42, 0.0  ;;  %v11084_v57 = vmax.f32 %v11083_v41, 0.0  ;;  %5063 = vst [vmem:[%s9401_s4 + $0x40] sm:$0xff] %v4609_v17   ;;  %5064 = vst [vmem:[%s9401_s4 + $0x48] sm:$0xff] %v4614_v40   ;;  %v11085_v1 = vld [vmem:[#allocation178_spill] sm:$0xff] }
 0x4fa   :  { %v4634_v33 = vpack.c.bf16 %v11076_v52, %v11074_v3  ;;  %5065 = vst [vmem:[%s9401_s4 + $0x50] sm:$0xff] %v4619_v24   ;;  %5066 = vst [vmem:[%s9401_s4 + $0x58] sm:$0xff] %v4624_v15   ;;  %v11086_v13 = vmax.f32 %v11085_v1, 0.0  ;;  %v11087_v35 = vld [vmem:[#allocation175_spill] sm:$0xff]  ;;  %v11089_v62 = vld [vmem:[#allocation132_spill] sm:$0xff] }
 0x4fb   :  { %v4639_v10 = vpack.c.bf16 %v11080_v55, %v11078_v48  ;;  %v4644_v39 = vpack.c.bf16 %v11084_v57, %v11082_v14  ;;  %v11088_v32 = vmax.f32 %v11087_v35, 0.0  ;;  %v11090_v3 = vmax.f32 %v11089_v62, 0.0  ;;  %v11091_v17 = vld [vmem:[#allocation140_spill] sm:$0xff]  ;;  %v11099_v14 = vld [vmem:[#allocation146_spill] sm:$0xff]  ;;  %5067 = vst [vmem:[%s9401_s4 + $0x60] sm:$0xff] %v4629_v54   ;;  %v11101_v57 = vld [vmem:[#allocation155_spill] sm:$0xff] }
 0x4fc   :  { %v11092_v0 = vmax.f32 %v11091_v17, 0.0  ;;  %v11093_v36 = vld [vmem:[#allocation136_spill] sm:$0xff]  ;;  %v11100_v41 = vmax.f32 %v11099_v14, 0.0  ;;  %5068 = vst [vmem:[%s9401_s4 + $0x68] sm:$0xff] %v4634_v33   ;;  %v11102_v1 = vmax.f32 %v11101_v57, 0.0  ;;  %v11105_v62 = vld [vmem:[#allocation153_spill] sm:$0xff] }
 0x4fd   :  { %v4649_v16 = vpack.c.bf16 %v11088_v32, %v11086_v13  ;;  %v11094_v40 = vmax.f32 %v11093_v36, 0.0  ;;  %v11095_v48 = vld [vmem:[#allocation148_spill] sm:$0xff]  ;;  %5069 = vst [vmem:[%s9401_s4 + $0x70] sm:$0xff] %v4639_v10   ;;  %5070 = vst [vmem:[%s9401_s4 + $0x78] sm:$0xff] %v4644_v39   ;;  %v11107_v54 = vld [vmem:[#allocation159_spill] sm:$0xff] }
 0x4fe   :  { %v4654_v52 = vpack.c.bf16 %v11092_v0, %v11090_v3  ;;  %v11096_v44 = vmax.f32 %v11095_v48, 0.0  ;;  %v11097_v24 = vld [vmem:[#allocation144_spill] sm:$0xff]  ;;  %v11106_v3 = vmax.f32 %v11105_v62, 0.0  ;;  %v11108_v17 = vmax.f32 %v11107_v54, 0.0  ;;  %v11113_v10 = vld [vmem:[#allocation87_spill] sm:$0xff] }
 0x4ff   :  { %v11098_v42 = vmax.f32 %v11097_v24, 0.0  ;;  %v11103_v13 = vld [vmem:[#allocation152_spill] sm:$0xff]  ;;  %v11114_v24 = vmax.f32 %v11113_v10, 0.0  ;;  %5071 = vst [vmem:[%s9401_s4 + $0x80] sm:$0xff] %v4649_v16  }
 0x500   :  { %v4659_v55 = vpack.c.bf16 %v11096_v44, %v11094_v40  ;;  %v11104_v35 = vmax.f32 %v11103_v13, 0.0  ;;  %v4674_v0 = vpack.c.bf16 %v11108_v17, %v11106_v3  ;;  %v11109_v36 = vld [vmem:[#allocation160_spill] sm:$0xff]  ;;  %v11111_v40 = vld [vmem:[#allocation71_spill] sm:$0xff]  ;;  %5072 = vst [vmem:[%s9401_s4 + $0x88] sm:$0xff] %v4654_v52  }
 0x501   :  { %v4664_v15 = vpack.c.bf16 %v11100_v41, %v11098_v42  ;;  %v11110_v33 = vmax.f32 %v11109_v36, 0.0  ;;  %v11112_v48 = vmax.f32 %v11111_v40, 0.0  ;;  %v11115_v42 = vld [vmem:[#allocation90_spill] sm:$0xff]  ;;  %v11121_v62 = vld [vmem:[#allocation124_spill] sm:$0xff] }
 0x502   :  { %v4669_v32 = vpack.c.bf16 %v11104_v35, %v11102_v1  ;;  %v11116_v14 = vmax.f32 %v11115_v42, 0.0  ;;  %5073 = vst [vmem:[%s9401_s4 + $0x90] sm:$0xff] %v4659_v55   ;;  %v11117_v41 = vld [vmem:[#allocation86_spill] sm:$0xff]  ;;  %v11119_v1 = vld [vmem:[#allocation88_spill] sm:$0xff]  ;;  %v11122_v3 = vmax.f32 %v11121_v62, 0.0  ;;  %v11129_v55 = vld [vmem:[#allocation177_spill] sm:$0xff] }
 0x503   :  { %v4679_v44 = vpack.c.bf16 %v11112_v48, %v11110_v33  ;;  %5074 = vst [vmem:[%s9401_s4 + $0x98] sm:$0xff] %v4664_v15   ;;  %v11118_v57 = vmax.f32 %v11117_v41, 0.0  ;;  %v11120_v13 = vmax.f32 %v11119_v1, 0.0  ;;  %v11123_v16 = vld [vmem:[#allocation128_spill] sm:$0xff]  ;;  %v11125_v36 = vld [vmem:[#allocation138_spill] sm:$0xff]  ;;  %v11127_v33 = vld [vmem:[#allocation145_spill] sm:$0xff] }
 0x504   :  { %v4684_v39 = vpack.c.bf16 %v11116_v14, %v11114_v24  ;;  %v11124_v54 = vmax.f32 %v11123_v16, 0.0  ;;  %v11126_v52 = vmax.f32 %v11125_v36, 0.0  ;;  %v11128_v40 = vmax.f32 %v11127_v33, 0.0  ;;  %v11131_v24 = vld [vmem:[#allocation3_spill] sm:$0xff]  ;;  %5075 = vst [vmem:[%s9401_s4 + $0xa0] sm:$0xff] %v4669_v32   ;;  %5076 = vst [vmem:[%s9401_s4 + $0xa8] sm:$0xff] %v4674_v0  }
 0x505   :  { %v4689_v35 = vpack.c.bf16 %v11120_v13, %v11118_v57  ;;  %v11130_v10 = vmax.f32 %v11129_v55, 0.0  ;;  %v11132_v42 = vmax.f32 %v11131_v24, 0.0  ;;  %5077 = vst [vmem:[%s9401_s4 + $0xb0] sm:$0xff] %v4679_v44   ;;  %v11133_v14 = vld [vmem:[#allocation5_spill] sm:$0xff]  ;;  %v11135_v57 = vld [vmem:[#allocation2_spill] sm:$0xff]  ;;  %v11137_v62 = vld [vmem:[#allocation4_spill] sm:$0xff] }
 0x506   :  { %v4694_v17 = vpack.c.bf16 %v11124_v54, %v11122_v3  ;;  %v4699_v48 = vpack.c.bf16 %v11128_v40, %v11126_v52  ;;  %5078 = vst [vmem:[%s9401_s4 + $0xb8] sm:$0xff] %v4684_v39   ;;  %v11134_v41 = vmax.f32 %v11133_v14, 0.0  ;;  %v11136_v1 = vmax.f32 %v11135_v57, 0.0  ;;  %v11139_v32 = vld [vmem:[#allocation7_spill] sm:$0xff]  ;;  %v11141_v36 = vld [vmem:[#allocation9_spill] sm:$0xff]  ;;  %v11143_v52 = vld [vmem:[#allocation6_spill] sm:$0xff] }
 0x507   :  { %v4704_v15 = vpack.c.bf16 %v11132_v42, %v11130_v10  ;;  %v11138_v3 = vmax.f32 %v11137_v62, 0.0  ;;  %v11140_v16 = vmax.f32 %v11139_v32, 0.0  ;;  %v11142_v0 = vmax.f32 %v11141_v36, 0.0  ;;  %v11145_v44 = vld [vmem:[#allocation8_spill] sm:$0xff]  ;;  %v11147_v10 = vld [vmem:[#allocation11_spill] sm:$0xff]  ;;  %5079 = vst [vmem:[%s9401_s4 + $0xc0] sm:$0xff] %v4689_v35  }
 0x508   :  { %v4709_v13 = vpack.c.bf16 %v11136_v1, %v11134_v41  ;;  %v11144_v33 = vmax.f32 %v11143_v52, 0.0  ;;  %v11146_v55 = vmax.f32 %v11145_v44, 0.0  ;;  %v11148_v24 = vmax.f32 %v11147_v10, 0.0  ;;  %5080 = vst [vmem:[%s9401_s4 + $0xc8] sm:$0xff] %v4694_v17   ;;  %5081 = vst [vmem:[%s9401_s4 + $0xd0] sm:$0xff] %v4699_v48   ;;  %v11149_v42 = vld [vmem:[#allocation13_spill] sm:$0xff] }
 0x509   :  { %v4714_v54 = vpack.c.bf16 %v11140_v16, %v11138_v3  ;;  %5082 = vst [vmem:[%s9401_s4 + $0xd8] sm:$0xff] %v4704_v15   ;;  %v11150_v14 = vmax.f32 %v11149_v42, 0.0  ;;  %v11151_v41 = vld [vmem:[#allocation10_spill] sm:$0xff]  ;;  %v11153_v62 = vld [vmem:[#allocation12_spill] sm:$0xff]  ;;  %v11155_v35 = vld [vmem:[#allocation15_spill] sm:$0xff] }
 0x50a   :  { %v4719_v40 = vpack.c.bf16 %v11144_v33, %v11142_v0  ;;  %v4724_v39 = vpack.c.bf16 %v11148_v24, %v11146_v55  ;;  %v11152_v57 = vmax.f32 %v11151_v41, 0.0  ;;  %v11154_v3 = vmax.f32 %v11153_v62, 0.0  ;;  %v11157_v36 = vld [vmem:[#allocation17_spill] sm:$0xff]  ;;  %v11159_v0 = vld [vmem:[#allocation14_spill] sm:$0xff]  ;;  %v11161_v48 = vld [vmem:[#allocation16_spill] sm:$0xff]  ;;  %5083 = vst [vmem:[%s9401_s4 + $0xe0] sm:$0xff] %v4709_v13  }
 0x50b   :  { %v11156_v32 = vmax.f32 %v11155_v35, 0.0  ;;  %v11158_v17 = vmax.f32 %v11157_v36, 0.0  ;;  %v11160_v52 = vmax.f32 %v11159_v0, 0.0  ;;  %v11162_v44 = vmax.f32 %v11161_v48, 0.0  ;;  %v11163_v55 = vld [vmem:[#allocation19_spill] sm:$0xff]  ;;  %5084 = vst [vmem:[%s9401_s4 + $0xe8] sm:$0xff] %v4714_v54  }
 0x50c   :  { %v4729_v1 = vpack.c.bf16 %v11152_v57, %v11150_v14  ;;  %v11164_v10 = vmax.f32 %v11163_v55, 0.0  ;;  %5085 = vst [vmem:[%s9401_s4 + $0xf0] sm:$0xff] %v4719_v40   ;;  %5086 = vst [vmem:[%s9401_s4 + $0xf8] sm:$0xff] %v4724_v39   ;;  %v11165_v24 = vld [vmem:[#allocation21_spill] sm:$0xff]  ;;  %v11167_v14 = vld [vmem:[#allocation18_spill] sm:$0xff] }
 0x50d   :  { %v4734_v16 = vpack.c.bf16 %v11156_v32, %v11154_v3  ;;  %v4739_v33 = vpack.c.bf16 %v11160_v52, %v11158_v17  ;;  %v11166_v42 = vmax.f32 %v11165_v24, 0.0  ;;  %v11168_v41 = vmax.f32 %v11167_v14, 0.0  ;;  %v11169_v62 = vld [vmem:[#allocation20_spill] sm:$0xff]  ;;  %v11171_v13 = vld [vmem:[#allocation23_spill] sm:$0xff]  ;;  %v11173_v36 = vld [vmem:[#allocation25_spill] sm:$0xff] }
 0x50e   :  { %v4744_v15 = vpack.c.bf16 %v11164_v10, %v11162_v44  ;;  %v11170_v3 = vmax.f32 %v11169_v62, 0.0  ;;  %v11172_v35 = vmax.f32 %v11171_v13, 0.0  ;;  %v11174_v54 = vmax.f32 %v11173_v36, 0.0  ;;  %v11175_v17 = vld [vmem:[#allocation22_spill] sm:$0xff]  ;;  %v11177_v40 = vld [vmem:[#allocation24_spill] sm:$0xff]  ;;  %v11179_v44 = vld [vmem:[#allocation27_spill] sm:$0xff] }
 0x50f   :  { %v4749_v57 = vpack.c.bf16 %v11168_v41, %v11166_v42  ;;  %v11176_v0 = vmax.f32 %v11175_v17, 0.0  ;;  %v11178_v48 = vmax.f32 %v11177_v40, 0.0  ;;  %v11180_v55 = vmax.f32 %v11179_v44, 0.0  ;;  %5087 = vst [vmem:[%s9401_s4 + $0x100] sm:$0xff] %v4729_v1   ;;  %5088 = vst [vmem:[%s9401_s4 + $0x108] sm:$0xff] %v4734_v16   ;;  %v11181_v10 = vld [vmem:[#allocation29_spill] sm:$0xff] }
 0x510   :  { %v4754_v32 = vpack.c.bf16 %v11172_v35, %v11170_v3  ;;  %5089 = vst [vmem:[%s9401_s4 + $0x110] sm:$0xff] %v4739_v33   ;;  %5090 = vst [vmem:[%s9401_s4 + $0x118] sm:$0xff] %v4744_v15   ;;  %v11182_v24 = vmax.f32 %v11181_v10, 0.0  ;;  %v11183_v42 = vld [vmem:[#allocation26_spill] sm:$0xff]  ;;  %v11185_v62 = vld [vmem:[#allocation28_spill] sm:$0xff] }
 0x511   :  { %v4759_v52 = vpack.c.bf16 %v11176_v0, %v11174_v54  ;;  %v4764_v39 = vpack.c.bf16 %v11180_v55, %v11178_v48  ;;  %v11184_v14 = vmax.f32 %v11183_v42, 0.0  ;;  %v11186_v3 = vmax.f32 %v11185_v62, 0.0  ;;  %v11187_v1 = vld [vmem:[#allocation31_spill] sm:$0xff]  ;;  %v11189_v36 = vld [vmem:[#allocation33_spill] sm:$0xff]  ;;  %v11191_v54 = vld [vmem:[#allocation30_spill] sm:$0xff]  ;;  %5091 = vst [vmem:[%s9401_s4 + $0x120] sm:$0xff] %v4749_v57  }
 0x512   :  { %v11188_v13 = vmax.f32 %v11187_v1, 0.0  ;;  %v11190_v16 = vmax.f32 %v11189_v36, 0.0  ;;  %v11192_v17 = vmax.f32 %v11191_v54, 0.0  ;;  %v11193_v33 = vld [vmem:[#allocation32_spill] sm:$0xff]  ;;  %v11195_v48 = vld [vmem:[#allocation35_spill] sm:$0xff]  ;;  %5092 = vst [vmem:[%s9401_s4 + $0x128] sm:$0xff] %v4754_v32  }
 0x513   :  { %v4769_v41 = vpack.c.bf16 %v11184_v14, %v11182_v24  ;;  %v11194_v40 = vmax.f32 %v11193_v33, 0.0  ;;  %v11196_v44 = vmax.f32 %v11195_v48, 0.0  ;;  %5093 = vst [vmem:[%s9401_s4 + $0x130] sm:$0xff] %v4759_v52   ;;  %5094 = vst [vmem:[%s9401_s4 + $0x138] sm:$0xff] %v4764_v39   ;;  %v11197_v55 = vld [vmem:[#allocation37_spill] sm:$0xff]  ;;  %v11199_v24 = vld [vmem:[#allocation34_spill] sm:$0xff] }
 0x514   :  { %v4774_v35 = vpack.c.bf16 %v11188_v13, %v11186_v3  ;;  %v4779_v0 = vpack.c.bf16 %v11192_v17, %v11190_v16  ;;  %v11198_v10 = vmax.f32 %v11197_v55, 0.0  ;;  %v11200_v42 = vmax.f32 %v11199_v24, 0.0  ;;  %v11201_v62 = vld [vmem:[#allocation36_spill] sm:$0xff]  ;;  %v11203_v57 = vld [vmem:[#allocation43_spill] sm:$0xff]  ;;  %v11205_v36 = vld [vmem:[#allocation45_spill] sm:$0xff] }
 0x515   :  { %v4784_v15 = vpack.c.bf16 %v11196_v44, %v11194_v40  ;;  %v11202_v3 = vmax.f32 %v11201_v62, 0.0  ;;  %v11204_v1 = vmax.f32 %v11203_v57, 0.0  ;;  %v11206_v32 = vmax.f32 %v11205_v36, 0.0  ;;  %v11208_v52 = vld [vmem:[#allocation44_spill] sm:$0xff]  ;;  %v11210_v33 = vld [vmem:[#allocation51_spill] sm:$0xff]  ;;  %5095 = vst [vmem:[%s9401_s4 + $0x140] sm:$0xff] %v4769_v41  }
 0x516   :  { %v4789_v14 = vpack.c.bf16 %v11200_v42, %v11198_v10  ;;  %v11207_v16 = vmax.f32 %v10961_v27, 0.0  ;;  %v11209_v17 = vmax.f32 %v11208_v52, 0.0  ;;  %v11211_v40 = vmax.f32 %v11210_v33, 0.0  ;;  %5096 = vst [vmem:[%s9401_s4 + $0x148] sm:$0xff] %v4774_v35   ;;  %5097 = vst [vmem:[%s9401_s4 + $0x150] sm:$0xff] %v4779_v0   ;;  %v11212_v27 = vld [vmem:[#allocation53_spill] sm:$0xff] }
 0x517   :  { %v4794_v13 = vpack.c.bf16 %v11204_v1, %v11202_v3  ;;  %5098 = vst [vmem:[%s9401_s4 + $0x158] sm:$0xff] %v4784_v15   ;;  %v11213_v48 = vmax.f32 %v11212_v27, 0.0  ;;  %v11214_v44 = vld [vmem:[#allocation49_spill] sm:$0xff]  ;;  %v11216_v24 = vld [vmem:[#allocation52_spill] sm:$0xff]  ;;  %v11218_v41 = vld [vmem:[#allocation59_spill] sm:$0xff]  ;;  %v11222_v1 = vmax.f32 %v10969_v31, 0.0 }
 0x518   :  { %v4799_v54 = vpack.c.bf16 %v11207_v16, %v11206_v32  ;;  %v4804_v39 = vpack.c.bf16 %v11211_v40, %v11209_v17  ;;  %v11215_v55 = vmax.f32 %v11214_v44, 0.0  ;;  %v11217_v42 = vmax.f32 %v11216_v24, 0.0  ;;  %v11220_v57 = vld [vmem:[#allocation61_spill] sm:$0xff]  ;;  %5099 = vst [vmem:[%s9401_s4 + $0x160] sm:$0xff] %v4789_v14   ;;  %v11232_v40 = vld [vmem:[#allocation76_spill] sm:$0xff] }
 0x519   :  { %v11219_v62 = vmax.f32 %v11218_v41, 0.0  ;;  %v11221_v35 = vmax.f32 %v11220_v57, 0.0  ;;  %v11223_v0 = vmax.f32 %v10970_v7, 0.0  ;;  %v11224_v32 = vmax.f32 %v10971_v9, 0.0  ;;  %5100 = vst [vmem:[%s9401_s4 + $0x168] sm:$0xff] %v4794_v13  }
 0x51a   :  { %v4809_v10 = vpack.c.bf16 %v11215_v55, %v11213_v48  ;;  %5101 = vst [vmem:[%s9401_s4 + $0x170] sm:$0xff] %v4799_v54   ;;  %5102 = vst [vmem:[%s9401_s4 + $0x178] sm:$0xff] %v4804_v39   ;;  %v11225_v31 = vmax.f32 %v8149_v58, 0.0  ;;  %v11226_v7 = vmax.f32 %v10972_v60, 0.0  ;;  %v11227_v16 = vmax.f32 %v10973_v63, 0.0  ;;  %v11236_v63 = vld [vmem:[#allocation85_spill] sm:$0xff] }
 0x51b   :  { %v4814_v3 = vpack.c.bf16 %v11219_v62, %v11217_v42  ;;  %v4819_v36 = vpack.c.bf16 %v11222_v1, %v11221_v35  ;;  %v4824_v15 = vpack.c.bf16 %v11224_v32, %v11223_v0  ;;  %v11228_v14 = vmax.f32 %v10974_v59, 0.0  ;;  %v11240_v48 = vld [vmem:[#allocation84_spill] sm:$0xff]  ;;  %v11244_v42 = vld [vmem:[#allocation93_spill] sm:$0xff]  ;;  %v11250_v0 = vld [vmem:[#allocation95_spill] sm:$0xff] }
 0x51c   :  { %v4829_v9 = vpack.c.bf16 %v11226_v7, %v11225_v31  ;;  %v11229_v13 = vmax.f32 %v10975_v5, 0.0  ;;  %v11230_v17 = vmax.f32 %v10976_v50, 0.0  ;;  %v11231_v54 = vmax.f32 %v10977_v23, 0.0  ;;  %5103 = vst [vmem:[%s9401_s4 + $0x180] sm:$0xff] %v4809_v10   ;;  %v11234_v23 = vld [vmem:[#allocation83_spill] sm:$0xff]  ;;  %v11238_v50 = vld [vmem:[#allocation81_spill] sm:$0xff] }
 0x51d   :  { %v4834_v52 = vpack.c.bf16 %v11228_v14, %v11227_v16  ;;  %v11233_v27 = vmax.f32 %v11232_v40, 0.0  ;;  %5104 = vst [vmem:[%s9401_s4 + $0x188] sm:$0xff] %v4814_v3   ;;  %5105 = vst [vmem:[%s9401_s4 + $0x190] sm:$0xff] %v4819_v36   ;;  %v11235_v60 = vmax.f32 %v11234_v23, 0.0  ;;  %v11237_v58 = vmax.f32 %v11236_v63, 0.0  ;;  %v11242_v10 = vld [vmem:[#allocation91_spill] sm:$0xff] }
 0x51e   :  { %v4839_v33 = vpack.c.bf16 %v11230_v17, %v11229_v13  ;;  %5106 = vst [vmem:[%s9401_s4 + $0x198] sm:$0xff] %v4824_v15   ;;  %v11239_v5 = vmax.f32 %v11238_v50, 0.0  ;;  %v11241_v44 = vmax.f32 %v11240_v48, 0.0  ;;  %v11243_v24 = vmax.f32 %v11242_v10, 0.0  ;;  %v11246_v3 = vld [vmem:[#allocation89_spill] sm:$0xff]  ;;  %v11248_v35 = vld [vmem:[#allocation92_spill] sm:$0xff] }
 0x51f   :  { %v4844_v39 = vpack.c.bf16 %v11233_v27, %v11231_v54  ;;  %v4849_v59 = vpack.c.bf16 %v11237_v58, %v11235_v60  ;;  %v11245_v41 = vmax.f32 %v11244_v42, 0.0  ;;  %v11247_v57 = vmax.f32 %v11246_v3, 0.0  ;;  %5107 = vst [vmem:[%s9401_s4 + $0x1a0] sm:$0xff] %v4829_v9   ;;  %5108 = vst [vmem:[%s9401_s4 + $0x1a8] sm:$0xff] %v4834_v52   ;;  %v11252_v15 = vld [vmem:[#allocation97_spill] sm:$0xff]  ;;  %v11255_v9 = vld [vmem:[#allocation96_spill] sm:$0xff] }
 0x520   :  { %v4854_v55 = vpack.c.bf16 %v11241_v44, %v11239_v5  ;;  %v11249_v1 = vmax.f32 %v11248_v35, 0.0  ;;  %5109 = vst [vmem:[%s9401_s4 + $0x1b0] sm:$0xff] %v4839_v33   ;;  %v11251_v32 = vmax.f32 %v11250_v0, 0.0  ;;  %v11253_v31 = vmax.f32 %v11252_v15, 0.0  ;;  %v11257_v17 = vld [vmem:[#allocation101_spill] sm:$0xff]  ;;  %v11259_v54 = vld [vmem:[#allocation103_spill] sm:$0xff] }
 0x521   :  { %v4859_v62 = vpack.c.bf16 %v11245_v41, %v11243_v24  ;;  %5110 = vst [vmem:[%s9401_s4 + $0x1b8] sm:$0xff] %v4844_v39   ;;  %v11254_v16 = vmax.f32 %v10979_v29, 0.0  ;;  %v11256_v14 = vmax.f32 %v11255_v9, 0.0  ;;  %v11258_v52 = vmax.f32 %v11257_v17, 0.0  ;;  %5111 = vst [vmem:[%s9401_s4 + $0x1c0] sm:$0xff] %v4849_v59   ;;  %v11263_v29 = vld [vmem:[#allocation109_spill] sm:$0xff] }
 0x522   :  { %v4864_v36 = vpack.c.bf16 %v11249_v1, %v11247_v57  ;;  %v4869_v7 = vpack.c.bf16 %v11253_v31, %v11251_v32  ;;  %v11260_v40 = vmax.f32 %v11259_v54, 0.0  ;;  %v11261_v33 = vmax.f32 %v10983_v37, 0.0  ;;  %5112 = vst [vmem:[%s9401_s4 + $0x1c8] sm:$0xff] %v4854_v55   ;;  %v11296_v31 = vld [vmem:[#allocation133_spill] sm:$0xff]  ;;  %v11298_v9 = vld [vmem:[#allocation135_spill] sm:$0xff] }
 0x523   :  { %v4874_v13 = vpack.c.bf16 %v11256_v14, %v11254_v16  ;;  %v11262_v23 = vmax.f32 %v10984_v43, 0.0  ;;  %5113 = vst [vmem:[%s9401_s4 + $0x1d0] sm:$0xff] %v4859_v62   ;;  %v11264_v37 = vmax.f32 %v11263_v29, 0.0  ;;  %v11265_v43 = vld [vmem:[#allocation111_spill] sm:$0xff]  ;;  %v11267_v58 = vmax.f32 %v10987_v22, 0.0 }
 0x524   :  { %v4879_v27 = vpack.c.bf16 %v11260_v40, %v11258_v52  ;;  %5114 = vst [vmem:[%s9401_s4 + $0x1d8] sm:$0xff] %v4864_v36   ;;  %v11266_v60 = vmax.f32 %v11265_v43, 0.0  ;;  %v11268_v59 = vmax.f32 %v10988_v47, 0.0  ;;  %v11269_v5 = vmax.f32 %v10989_v49, 0.0  ;;  %5115 = vst [vmem:[%s9401_s4 + $0x1e0] sm:$0xff] %v4869_v7  }
 0x525   :  { %v4884_v39 = vpack.c.bf16 %v11262_v23, %v11261_v33  ;;  %v11270_v48 = vmax.f32 %v8265_v61, 0.0  ;;  %v11271_v55 = vmax.f32 %v10990_v8, 0.0  ;;  %v11272_v10 = vmax.f32 %v10991_v38, 0.0  ;;  %5116 = vst [vmem:[%s9401_s4 + $0x1e8] sm:$0xff] %v4874_v13   ;;  %v11300_v13 = vld [vmem:[#allocation131_spill] sm:$0xff] }
 0x526   :  { %v4889_v63 = vpack.c.bf16 %v11266_v60, %v11264_v37  ;;  %v4894_v50 = vpack.c.bf16 %v11268_v59, %v11267_v58  ;;  %5117 = vst [vmem:[%s9401_s4 + $0x1f0] sm:$0xff] %v4879_v27   ;;  %v11273_v8 = vmax.f32 %v10992_v51, 0.0  ;;  %v11274_v38 = vmax.f32 %v8281_v56, 0.0  ;;  %v11306_v27 = vld [vmem:[#allocation143_spill] sm:$0xff]  ;;  %v11310_v37 = vld [vmem:[#allocation142_spill] sm:$0xff]  ;;  %v11312_v60 = vld [vmem:[#allocation149_spill] sm:$0xff] }
 0x527   :  { %v4899_v44 = vpack.c.bf16 %v11270_v48, %v11269_v5  ;;  %v4904_v24 = vpack.c.bf16 %v11272_v10, %v11271_v55  ;;  %5118 = vst [vmem:[%s9401_s4 + $0x1f8] sm:$0xff] %v4884_v39   ;;  %v11275_v47 = vmax.f32 %v8285_v4, 0.0  ;;  %v11276_v49 = vmax.f32 %v10993_v21, 0.0  ;;  %v11308_v23 = vld [vmem:[#allocation139_spill] sm:$0xff]  ;;  %v11318_v55 = vld [vmem:[#allocation150_spill] sm:$0xff] }
 0x528   :  { %v4909_v22 = vpack.c.bf16 %v11274_v38, %v11273_v8  ;;  %v11277_v42 = vmax.f32 %v10994_v2, 0.0  ;;  %v11278_v41 = vmax.f32 %v8297_v53, 0.0  ;;  %v11279_v3 = vmax.f32 %v8301_v34, 0.0  ;;  %5119 = vst [vmem:[%s9401_s4 + $0x200] sm:$0xff] %v4889_v63   ;;  %5120 = vst [vmem:[%s9401_s4 + $0x208] sm:$0xff] %v4894_v50   ;;  %v11314_v59 = vld [vmem:[#allocation151_spill] sm:$0xff] }
 0x529   :  { %v4914_v61 = vpack.c.bf16 %v11276_v49, %v11275_v47  ;;  %v11280_v57 = vmax.f32 %v8305_v19, 0.0  ;;  %5121 = vst [vmem:[%s9401_s4 + $0x210] sm:$0xff] %v4899_v44   ;;  %5122 = vst [vmem:[%s9401_s4 + $0x218] sm:$0xff] %v4904_v24   ;;  %v11281_v51 = vmax.f32 %v8309_v28, 0.0  ;;  %v11282_v21 = vmax.f32 %v8313_v12, 0.0  ;;  %v11316_v5 = vld [vmem:[#allocation147_spill] sm:$0xff] }
 0x52a   :  { %v4919_v62 = vpack.c.bf16 %v11278_v41, %v11277_v42  ;;  %v11283_v56 = vmax.f32 %v8317_v11, 0.0  ;;  %v11284_v4 = vmax.f32 %v8321_v46, 0.0  ;;  %v11285_v34 = vmax.f32 %v8325_v25, 0.0  ;;  %5123 = vst [vmem:[%s9401_s4 + $0x220] sm:$0xff] %v4909_v22   ;;  %v11292_v25 = vld [vmem:[#allocation123_spill] sm:$0xff]  ;;  %v11320_v24 = vld [vmem:[#allocation156_spill] sm:$0xff] }
 0x52b   :  { %v4924_v35 = vpack.c.bf16 %v11280_v57, %v11279_v3  ;;  %v4929_v2 = vpack.c.bf16 %v11282_v21, %v11281_v51  ;;  %v11286_v19 = vmax.f32 %v8329_v26, 0.0  ;;  %v11287_v36 = vmax.f32 %v8333_v45, 0.0  ;;  %5124 = vst [vmem:[%s9401_s4 + $0x228] sm:$0xff] %v4914_v61   ;;  %v11322_v22 = vld [vmem:[#allocation158_spill] sm:$0xff]  ;;  %v11326_v41 = vld [vmem:[#allocation157_spill] sm:$0xff]  ;;  %v11328_v3 = vld [vmem:[#allocation39_spill] sm:$0xff] }
 0x52c   :  { %v4934_v53 = vpack.c.bf16 %v11284_v4, %v11283_v56  ;;  %v11288_v0 = vmax.f32 %v8337_v30, 0.0  ;;  %5125 = vst [vmem:[%s9401_s4 + $0x230] sm:$0xff] %v4919_v62   ;;  %v11289_v28 = vmax.f32 %v8341_v20, 0.0  ;;  %v11290_v12 = vmax.f32 %v8345_v18, 0.0  ;;  %v11294_v30 = vld [vmem:[#allocation126_spill] sm:$0xff] }
 0x52d   :  { %v4939_v1 = vpack.c.bf16 %v11286_v19, %v11285_v34  ;;  %5126 = vst [vmem:[%s9401_s4 + $0x238] sm:$0xff] %v4924_v35   ;;  %v11291_v46 = vmax.f32 %v8349_v6, 0.0  ;;  %v11293_v26 = vmax.f32 %v11292_v25, 0.0  ;;  %v11295_v15 = vmax.f32 %v11294_v30, 0.0  ;;  %5127 = vst [vmem:[%s9401_s4 + $0x240] sm:$0xff] %v4929_v2   ;;  %v11302_v20 = vld [vmem:[#allocation134_spill] sm:$0xff] }
 0x52e   :  { %v4944_v32 = vpack.c.bf16 %v11288_v0, %v11287_v36  ;;  %v4949_v11 = vpack.c.bf16 %v11290_v12, %v11289_v28  ;;  %v11297_v7 = vmax.f32 %v11296_v31, 0.0  ;;  %v11299_v14 = vmax.f32 %v11298_v9, 0.0  ;;  %5128 = vst [vmem:[%s9401_s4 + $0x248] sm:$0xff] %v4934_v53   ;;  %v11304_v6 = vld [vmem:[#allocation141_spill] sm:$0xff]  ;;  %v11324_v49 = vld [vmem:[#allocation154_spill] sm:$0xff]  ;;  %v11334_v53 = vld [vmem:[#allocation40_spill] sm:$0xff] }
 0x52f   :  { %v4954_v45 = vpack.c.bf16 %v11293_v26, %v11291_v46  ;;  %v11301_v17 = vmax.f32 %v11300_v13, 0.0  ;;  %5129 = vst [vmem:[%s9401_s4 + $0x250] sm:$0xff] %v4939_v1   ;;  %v11303_v18 = vmax.f32 %v11302_v20, 0.0  ;;  %v11305_v54 = vmax.f32 %v11304_v6, 0.0  ;;  %v11330_v51 = vld [vmem:[#allocation42_spill] sm:$0xff]  ;;  %v11336_v19 = vld [vmem:[#allocation47_spill] sm:$0xff] }
 0x530   :  { %v4959_v16 = vpack.c.bf16 %v11297_v7, %v11295_v15  ;;  %5130 = vst [vmem:[%s9401_s4 + $0x258] sm:$0xff] %v4944_v32   ;;  %v11307_v33 = vmax.f32 %v11306_v27, 0.0  ;;  %v11309_v39 = vmax.f32 %v11308_v23, 0.0  ;;  %v11311_v43 = vmax.f32 %v11310_v37, 0.0  ;;  %5131 = vst [vmem:[%s9401_s4 + $0x260] sm:$0xff] %v4949_v11   ;;  %v11332_v2 = vld [vmem:[#allocation38_spill] sm:$0xff] }
 0x531   :  { %v4964_v52 = vpack.c.bf16 %v11301_v17, %v11299_v14  ;;  %v4969_v40 = vpack.c.bf16 %v11305_v54, %v11303_v18  ;;  %v11313_v63 = vmax.f32 %v11312_v60, 0.0  ;;  %v11315_v50 = vmax.f32 %v11314_v59, 0.0  ;;  %5132 = vst [vmem:[%s9401_s4 + $0x268] sm:$0xff] %v4954_v45   ;;  %v11338_v0 = vld [vmem:[#allocation50_spill] sm:$0xff]  ;;  %v11342_v46 = vld [vmem:[#allocation48_spill] sm:$0xff]  ;;  %v11344_v26 = vld [vmem:[#allocation55_spill] sm:$0xff] }
 0x532   :  { %v4974_v29 = vpack.c.bf16 %v11309_v39, %v11307_v33  ;;  %v11317_v48 = vmax.f32 %v11316_v5, 0.0  ;;  %5133 = vst [vmem:[%s9401_s4 + $0x270] sm:$0xff] %v4959_v16   ;;  %v11319_v10 = vmax.f32 %v11318_v55, 0.0  ;;  %v11321_v8 = vmax.f32 %v11320_v24, 0.0  ;;  %v11340_v28 = vld [vmem:[#allocation46_spill] sm:$0xff]  ;;  %v11350_v14 = vld [vmem:[#allocation56_spill] sm:$0xff] }
 0x533   :  { %v4979_v58 = vpack.c.bf16 %v11313_v63, %v11311_v43  ;;  %5134 = vst [vmem:[%s9401_s4 + $0x278] sm:$0xff] %v4964_v52   ;;  %v11323_v47 = vmax.f32 %v11322_v22, 0.0  ;;  %v11325_v61 = vmax.f32 %v11324_v49, 0.0  ;;  %v11327_v62 = vmax.f32 %v11326_v41, 0.0  ;;  %5135 = vst [vmem:[%s9401_s4 + $0x280] sm:$0xff] %v4969_v40   ;;  %v11346_v15 = vld [vmem:[#allocation58_spill] sm:$0xff] }
 0x534   :  { %v4984_v44 = vpack.c.bf16 %v11317_v48, %v11315_v50  ;;  %v4989_v38 = vpack.c.bf16 %v11321_v8, %v11319_v10  ;;  %v11329_v57 = vmax.f32 %v11328_v3, 0.0  ;;  %v11331_v21 = vmax.f32 %v11330_v51, 0.0  ;;  %5136 = vst [vmem:[%s9401_s4 + $0x288] sm:$0xff] %v4974_v29   ;;  %v11348_v7 = vld [vmem:[#allocation54_spill] sm:$0xff]  ;;  %v11352_v17 = vld [vmem:[#allocation63_spill] sm:$0xff]  ;;  %v11358_v33 = vld [vmem:[#allocation64_spill] sm:$0xff] }
 0x535   :  { %v4994_v42 = vpack.c.bf16 %v11325_v61, %v11323_v47  ;;  %v11333_v56 = vmax.f32 %v11332_v2, 0.0  ;;  %5137 = vst [vmem:[%s9401_s4 + $0x290] sm:$0xff] %v4979_v58   ;;  %v11335_v34 = vmax.f32 %v11334_v53, 0.0  ;;  %v11337_v1 = vmax.f32 %v11336_v19, 0.0  ;;  %v11354_v18 = vld [vmem:[#allocation66_spill] sm:$0xff]  ;;  %v11364_v63 = vld [vmem:[#allocation72_spill] sm:$0xff] }
 0x536   :  { %v4999_v35 = vpack.c.bf16 %v11329_v57, %v11327_v62  ;;  %5138 = vst [vmem:[%s9401_s4 + $0x298] sm:$0xff] %v4984_v44   ;;  %v11339_v32 = vmax.f32 %v11338_v0, 0.0  ;;  %v11341_v12 = vmax.f32 %v11340_v28, 0.0  ;;  %v11343_v25 = vmax.f32 %v11342_v46, 0.0  ;;  %5139 = vst [vmem:[%s9401_s4 + $0x2a0] sm:$0xff] %v4989_v38   ;;  %v11356_v54 = vld [vmem:[#allocation62_spill] sm:$0xff] }
 0x537   :  { %v5004_v4 = vpack.c.bf16 %v11333_v56, %v11331_v21  ;;  %v5009_v36 = vpack.c.bf16 %v11337_v1, %v11335_v34  ;;  %v11345_v45 = vmax.f32 %v11344_v26, 0.0  ;;  %v11347_v31 = vmax.f32 %v11346_v15, 0.0  ;;  %5140 = vst [vmem:[%s9401_s4 + $0x2a8] sm:$0xff] %v4994_v42   ;;  %v11360_v39 = vld [vmem:[#allocation74_spill] sm:$0xff]  ;;  %v11366_v50 = vld [vmem:[#allocation79_spill] sm:$0xff] }
 0x538   :  { %v5014_v11 = vpack.c.bf16 %v11341_v12, %v11339_v32  ;;  %v11349_v16 = vmax.f32 %v11348_v7, 0.0  ;;  %5141 = vst [vmem:[%s9401_s4 + $0x2b0] sm:$0xff] %v4999_v35   ;;  %v11351_v13 = vmax.f32 %v11350_v14, 0.0  ;;  %v11353_v52 = vmax.f32 %v11352_v17, 0.0  ;;  %v11362_v43 = vld [vmem:[#allocation70_spill] sm:$0xff]  ;;  %v11372_v8 = vld [vmem:[#allocation179_spill] sm:$0xff] }
 0x539   :  { %v5019_v30 = vpack.c.bf16 %v11345_v45, %v11343_v25  ;;  %5142 = vst [vmem:[%s9401_s4 + $0x2b8] sm:$0xff] %v5004_v4   ;;  %v11355_v6 = vmax.f32 %v11354_v18, 0.0  ;;  %v11357_v40 = vmax.f32 %v11356_v54, 0.0  ;;  %v11359_v23 = vmax.f32 %v11358_v33, 0.0  ;;  %5143 = vst [vmem:[%s9401_s4 + $0x2c0] sm:$0xff] %v5009_v36   ;;  %v11368_v48 = vld [vmem:[#allocation82_spill] sm:$0xff] }
 0x53a   :  { %v5024_v9 = vpack.c.bf16 %v11349_v16, %v11347_v31  ;;  %v5029_v20 = vpack.c.bf16 %v11353_v52, %v11351_v13  ;;  %v11361_v29 = vmax.f32 %v11360_v39, 0.0  ;;  %v11363_v60 = vmax.f32 %v11362_v43, 0.0  ;;  %5144 = vst [vmem:[%s9401_s4 + $0x2c8] sm:$0xff] %v5014_v11   ;;  %v11370_v10 = vld [vmem:[#allocation78_spill] sm:$0xff] }
 0x53b   :  { %v5034_v27 = vpack.c.bf16 %v11357_v40, %v11355_v6  ;;  %v11365_v58 = vmax.f32 %v11364_v63, 0.0  ;;  %5145 = vst [vmem:[%s9401_s4 + $0x2d0] sm:$0xff] %v5019_v30   ;;  %v11367_v5 = vmax.f32 %v11366_v50, 0.0  ;;  %v11369_v44 = vmax.f32 %v11368_v48, 0.0 }
 0x53c   :  { %v5039_v37 = vpack.c.bf16 %v11361_v29, %v11359_v23  ;;  %5146 = vst [vmem:[%s9401_s4 + $0x2d8] sm:$0xff] %v5024_v9   ;;  %v11371_v24 = vmax.f32 %v11370_v10, 0.0  ;;  %v11373_v38 = vmax.f32 %v11372_v8, 0.0  ;;  %5147 = vst [vmem:[%s9401_s4 + $0x2e0] sm:$0xff] %v5029_v20  }
 0x53d   :  { %v5044_v59 = vpack.c.bf16 %v11365_v58, %v11363_v60  ;;  %v5049_v55 = vpack.c.bf16 %v11369_v44, %v11367_v5  ;;  %5148 = vst [vmem:[%s9401_s4 + $0x2e8] sm:$0xff] %v5034_v27  }
 0x53e   :  { %v5054_v22 = vpack.c.bf16 %v11373_v38, %v11371_v24  ;;  %5149 = vst [vmem:[%s9401_s4 + $0x2f0] sm:$0xff] %v5039_v37  }
 0x53f   :  { %5150 = vst [vmem:[%s9401_s4 + $0x2f8] sm:$0xff] %v5044_v59   ;;  %5151 = vst [vmem:[%s9401_s4 + $0x300] sm:$0xff] %v5049_v55  }
 0x540   :  { %5152 = vst [vmem:[%s9401_s4 + $0x308] sm:$0xff] %v5054_v22  }

// kernel: net_forward.4
= control target key start
LH: loop header
LB: loop body
LE: loop exit
PB: predicated region body
PF: predicated region fallthrough
CT: control target
= control target key end

     0   :  { %s1443_s1 = inlined_call_operand.vmem [shape: bf16[256,128], index: 1, kind: input, shape index: {}]   ;;  %s1444_s0 = inlined_call_operand.vmem [shape: bf16[200,256], index: 0, kind: input, shape index: {}]   ;;  %s1445_s2 = inlined_call_operand.vmem [shape: f32[1,128], index: 2, kind: input, shape index: {}]   ;;  %s1446_s3 = inlined_call_operand.vmem [shape: f32[1,128], index: 3, kind: input, shape index: {}]   ;;  %s1447_s4 = inlined_call_operand.vmem [shape: bf16[200,128], index: 4, kind: output, shape index: {}]  }
   0x1   :  { %v1041_v0 = vld [vmem:[%s1443_s1 + $0x40] sm:$0xff]   ;;  %v1043_v2 = vld [vmem:[%s1443_s1 + $0x48] sm:$0xff]   ;;  %v1045_v4 = vld [vmem:[%s1443_s1 + $0x50] sm:$0xff]  }
   0x2   :  { %v1042_v1 = vld [vmem:[%s1443_s1] sm:$0xff]   ;;  %931 = vmatprep.subr.bf16.mxu0 %v1041_v0  ;;  %1025 = vmatprep.subr.bf16.mxu1 %v1041_v0  ;;  %v1044_v3 = vld [vmem:[%s1443_s1 + $0x8] sm:$0xff]   ;;  %v1046_v5 = vld [vmem:[%s1443_s1 + $0x10] sm:$0xff]  }
   0x3   :  { %932 = vmatpush3.bf16.msra.mxu0 %v1042_v1  ;;  %1033 = vmatpush3.bf16.msra.mxu1 %v1042_v1  ;;  %v1047_v6 = vld [vmem:[%s1443_s1 + $0x58] sm:$0xff]   ;;  %v1049_v8 = vld [vmem:[%s1443_s1 + $0x60] sm:$0xff]   ;;  %v1051_v10 = vld [vmem:[%s1443_s1 + $0x68] sm:$0xff]  }
   0x4   :  { %933 = vmatprep.subr.bf16.mxu0 %v1043_v2  ;;  %1026 = vmatprep.subr.bf16.mxu1 %v1043_v2  ;;  %v1048_v7 = vld [vmem:[%s1443_s1 + $0x18] sm:$0xff]   ;;  %v1050_v9 = vld [vmem:[%s1443_s1 + $0x20] sm:$0xff]   ;;  %v1052_v12 = vld [vmem:[%s1443_s1 + $0x28] sm:$0xff]  }
   0x5   :  { %v1059_v11 = vld [vmem:[%s1444_s0 + $0x4] ss:$8 sps:$4 sm:$0xff]   ;;  %v1053_v13 = vld [vmem:[%s1443_s1 + $0x70] sm:$0xff]   ;;  %v1055_v16 = vld [vmem:[%s1443_s1 + $0x78] sm:$0xff]  }
   0x6   :  { %330 = vmatprep.mubr.bf16.mxu0 %v1059_v11  ;;  %v1071_v14 = vld [vmem:[%s1444_s0 + $0x74] ss:$8 sps:$4 sm:$0xff]   ;;  %v1057_v18 = vld [vmem:[%s1444_s0] ss:$8 sps:$4 sm:$0xff]   ;;  %v1069_v20 = vld [vmem:[%s1444_s0 + $0x70] ss:$8 sps:$4 sm:$0xff]  }
   0x7   :  { %934 = vmatpush3.bf16.msra.mxu0 %v1044_v3  ;;  %1034 = vmatpush3.bf16.msra.mxu1 %v1044_v3  ;;  %v1054_v15 = vld [vmem:[%s1443_s1 + $0x30] sm:$0xff]   ;;  %v1056_v17 = vld [vmem:[%s1443_s1 + $0x38] sm:$0xff]   ;;  %v1075_v21 = vld [vmem:[%s1444_s0 + $0x84] ss:$8 sps:$4 sm:$0xff]  }
   0x8   :  { %935 = vmatprep.subr.bf16.mxu0 %v1045_v4  ;;  %1027 = vmatprep.subr.bf16.mxu1 %v1045_v4  ;;  %v1060_v19 = vld [vmem:[%s1444_s0 + $0x14] ss:$8 sps:$4 sm:$0xff]   ;;  %v1062_v22 = vld [vmem:[%s1444_s0 + $0x10] ss:$8 sps:$4 sm:$0xff]   ;;  %v1063_v23 = vld [vmem:[%s1444_s0 + $0x24] ss:$8 sps:$4 sm:$0xff]  }
   0x9   :  { %386 = vmatprep.mubr.bf16.mxu1 %v1071_v14  ;;  %v1077_v24 = vld [vmem:[%s1444_s0 + $0x80] ss:$8 sps:$4 sm:$0xff]   ;;  %v1081_v25 = vld [vmem:[%s1444_s0 + $0x94] ss:$8 sps:$4 sm:$0xff]   ;;  %v1083_v28 = vld [vmem:[%s1444_s0 + $0x90] ss:$8 sps:$4 sm:$0xff]  }
   0xa   :  { %v1065_v26 = vld [vmem:[%s1444_s0 + $0x20] ss:$8 sps:$4 sm:$0xff]   ;;  %v1066_v27 = vld [vmem:[%s1444_s0 + $0x34] ss:$8 sps:$4 sm:$0xff]   ;;  %v1087_v29 = vld [vmem:[%s1444_s0 + $0xa4] ss:$8 sps:$4 sm:$0xff]  }
   0xb   :  { %936 = vmatpush3.bf16.msra.mxu0 %v1046_v5  ;;  %1035 = vmatpush3.bf16.msra.mxu1 %v1046_v5  ;;  %v1068_v30 = vld [vmem:[%s1444_s0 + $0x30] ss:$8 sps:$4 sm:$0xff]   ;;  %v1072_v31 = vld [vmem:[%s1444_s0 + $0x44] ss:$8 sps:$4 sm:$0xff]   ;;  %v1089_v32 = vld [vmem:[%s1444_s0 + $0xa0] ss:$8 sps:$4 sm:$0xff]  }
   0xc   :  { %937 = vmatprep.subr.bf16.mxu0 %v1047_v6  ;;  %1028 = vmatprep.subr.bf16.mxu1 %v1047_v6  ;;  %v1090_v33 = vld [vmem:[%s1444_s0 + $0xb4] ss:$8 sps:$4 sm:$0xff]   ;;  %v42_v34 = vld [vmem:[%s1444_s0 + $0xc0] sm:$0xff]  ;;  %v1092_v37 = vld [vmem:[%s1444_s0 + $0xb0] ss:$8 sps:$4 sm:$0xff]  }
   0xd   :  { %v1074_v35 = vld [vmem:[%s1444_s0 + $0x40] ss:$8 sps:$4 sm:$0xff]   ;;  %v1078_v36 = vld [vmem:[%s1444_s0 + $0x54] ss:$8 sps:$4 sm:$0xff]   ;;  %v793_v38 = vcombine.high %v42_v34, %v42_v34  ;;  %v1080_v39 = vld [vmem:[%s1444_s0 + $0x50] ss:$8 sps:$4 sm:$0xff]   ;;  %v792_v41 = vcombine.low %v42_v34, %v42_v34 }
   0xe   :  { %v1084_v40 = vld [vmem:[%s1444_s0 + $0x64] ss:$8 sps:$4 sm:$0xff]   ;;  %v1086_v42 = vld [vmem:[%s1444_s0 + $0x60] ss:$8 sps:$4 sm:$0xff]  }
   0xf   :  { %938 = vmatpush3.bf16.msra.mxu0 %v1048_v7  ;;  %1036 = vmatpush3.bf16.msra.mxu1 %v1048_v7 }
  0x10   :  { %939 = vmatprep.subr.bf16.mxu0 %v1049_v8  ;;  %1029 = vmatprep.subr.bf16.mxu1 %v1049_v8 }
  0x13   :  { %940 = vmatpush3.bf16.msra.mxu0 %v1050_v9  ;;  %1037 = vmatpush3.bf16.msra.mxu1 %v1050_v9 }
  0x14   :  { %941 = vmatprep.subr.bf16.mxu0 %v1051_v10  ;;  %1030 = vmatprep.subr.bf16.mxu1 %v1051_v10 }
  0x17   :  { %942 = vmatpush3.bf16.msra.mxu0 %v1052_v12  ;;  %1038 = vmatpush3.bf16.msra.mxu1 %v1052_v12 }
  0x18   :  { %943 = vmatprep.subr.bf16.mxu0 %v1053_v13  ;;  %1031 = vmatprep.subr.bf16.mxu1 %v1053_v13 }
  0x1b   :  { %944 = vmatpush3.bf16.msra.mxu0 %v1054_v15  ;;  %1039 = vmatpush3.bf16.msra.mxu1 %v1054_v15 }
  0x1c   :  { %945 = vmatprep.subr.bf16.mxu0 %v1055_v16  ;;  %1032 = vmatprep.subr.bf16.mxu1 %v1055_v16 }
  0x1f   :  { %946 = vmatpush3.bf16.msra.mxu0 %v1056_v17  ;;  %1040 = vmatpush3.bf16.msra.mxu1 %v1056_v17 }
  0x22   :  { %331 = vmatmul.mubr.bf16.vlgmr.msra.gmra.mrb[0].mxu0 %v1057_v18  ;;  %387 = vmatmul.mubr.bf16.vlgmr.msra.gmra.mrb[0].mxu1 %v1069_v20 }
  0x23   :  { %338 = vmatprep.mubr.bf16.mxu0 %v1060_v19  ;;  %394 = vmatprep.mubr.bf16.mxu1 %v1075_v21 }
  0x2a   :  { %339 = vmatmul.mubr.bf16.gmra.mrb[4].mxu0 %v1062_v22  ;;  %395 = vmatmul.mubr.bf16.gmra.mrb[4].mxu1 %v1077_v24 }
  0x2b   :  { %346 = vmatprep.mubr.bf16.mxu0 %v1063_v23  ;;  %402 = vmatprep.mubr.bf16.mxu1 %v1081_v25 }
  0x32   :  { %347 = vmatmul.mubr.bf16.gmra.mrb[8].mxu0 %v1065_v26  ;;  %403 = vmatmul.mubr.bf16.gmra.mrb[8].mxu1 %v1083_v28 }
  0x33   :  { %354 = vmatprep.mubr.bf16.mxu0 %v1066_v27  ;;  %410 = vmatprep.mubr.bf16.mxu1 %v1087_v29 }
  0x3a   :  { %355 = vmatmul.mubr.bf16.gmra.mrb[12].mxu0 %v1068_v30  ;;  %411 = vmatmul.mubr.bf16.gmra.mrb[12].mxu1 %v1089_v32 }
  0x3b   :  { %362 = vmatprep.mubr.bf16.mxu0 %v1072_v31  ;;  %418 = vmatprep.mubr.bf16.mxu1 %v1090_v33 }
  0x42   :  { %363 = vmatmul.mubr.bf16.gmra.mrb[16].mxu0 %v1074_v35  ;;  %419 = vmatmul.mubr.bf16.gmra.mrb[16].mxu1 %v1092_v37 }
  0x43   :  { %370 = vmatprep.mubr.bf16.mxu0 %v1078_v36  ;;  %426 = vmatprep.mubr.bf16.mxu1 %v793_v38 }
  0x4a   :  { %371 = vmatmul.mubr.bf16.gmra.mrb[20].mxu0 %v1080_v39  ;;  %427 = vmatmul.mubr.bf16.gmra.mrb[20].mxu1 %v792_v41 }
  0x4b   :  { %378 = vmatprep.mubr.bf16.mxu0 %v1084_v40 }
  0x52   :  { %379 = vmatmul.mubr.bf16.gmra.mrb[24].mxu0 %v1086_v42 }
  0xf5   :  { %v947_v43 = vpop.f32.mrb[0].mxu0  ;;  %v989_v45 = vpop.f32.mrb[0].mxu1 }
  0xf6   :  { %v948_v44 = vpop.f32.mrb[1].mxu0  ;;  %v990_v48 = vpop.f32.mrb[1].mxu1 }
  0xf7   :  { %v1245_v46 = vadd.f32 %v948_v44, %v947_v43  ;;  %v950_v47 = vpop.f32.mrb[2].mxu0  ;;  %v1247_v50 = vadd.f32 %v990_v48, %v989_v45  ;;  %v992_v51 = vpop.f32.mrb[2].mxu1 }
  0xf8   :  { %v951_v49 = vpop.f32.mrb[3].mxu0  ;;  %v993_v53 = vpop.f32.mrb[3].mxu1 }
  0xf9   :  { %v1249_v52 = vadd.f32 %v951_v49, %v950_v47  ;;  %v1251_v54 = vadd.f32 %v993_v53, %v992_v51 }
  0xfb   :  { %v434_v12 = vadd.f32 %v1249_v52, %v1245_v46 }
  0xfd   :  { %v953_v55 = vpop.f32.mrb[4].mxu0  ;;  %v995_v57 = vpop.f32.mrb[4].mxu1 }
  0xfe   :  { %v954_v56 = vpop.f32.mrb[5].mxu0  ;;  %v996_v60 = vpop.f32.mrb[5].mxu1 }
  0xff   :  { %v1253_v58 = vadd.f32 %v954_v56, %v953_v55  ;;  %v956_v59 = vpop.f32.mrb[6].mxu0  ;;  %v1255_v62 = vadd.f32 %v996_v60, %v995_v57  ;;  %v998_v63 = vpop.f32.mrb[6].mxu1 }
 0x100   :  { %v957_v61 = vpop.f32.mrb[7].mxu0  ;;  %v999_v1 = vpop.f32.mrb[7].mxu1 }
 0x101   :  { %v1257_v0 = vadd.f32 %v957_v61, %v956_v59  ;;  %v1259_v2 = vadd.f32 %v999_v1, %v998_v63  ;;  %v435_v16 = vadd.f32 %v1253_v58, %v434_v12 }
 0x103   :  { %v436_v20 = vadd.f32 %v1257_v0, %v435_v16 }
 0x105   :  { %v959_v3 = vpop.f32.mrb[8].mxu0  ;;  %v1001_v5 = vpop.f32.mrb[8].mxu1 }
 0x106   :  { %v960_v4 = vpop.f32.mrb[9].mxu0  ;;  %v1002_v8 = vpop.f32.mrb[9].mxu1 }
 0x107   :  { %v1261_v6 = vadd.f32 %v960_v4, %v959_v3  ;;  %v962_v7 = vpop.f32.mrb[10].mxu0  ;;  %v1263_v10 = vadd.f32 %v1002_v8, %v1001_v5  ;;  %v1004_v11 = vpop.f32.mrb[10].mxu1 }
 0x108   :  { %v963_v9 = vpop.f32.mrb[11].mxu0  ;;  %v1005_v14 = vpop.f32.mrb[11].mxu1 }
 0x109   :  { %v1267_v13 = vadd.f32 %v963_v9, %v962_v7  ;;  %v1269_v15 = vadd.f32 %v1005_v14, %v1004_v11  ;;  %v437_v27 = vadd.f32 %v1261_v6, %v436_v20 }
 0x10b   :  { %v438_v31 = vadd.f32 %v1267_v13, %v437_v27 }
 0x10d   :  { %v965_v17 = vpop.f32.mrb[12].mxu0  ;;  %v1007_v19 = vpop.f32.mrb[12].mxu1 }
 0x10e   :  { %v966_v18 = vpop.f32.mrb[13].mxu0  ;;  %v1008_v23 = vpop.f32.mrb[13].mxu1 }
 0x10f   :  { %v1273_v21 = vadd.f32 %v966_v18, %v965_v17  ;;  %v968_v22 = vpop.f32.mrb[14].mxu0  ;;  %v1275_v25 = vadd.f32 %v1008_v23, %v1007_v19  ;;  %v1010_v26 = vpop.f32.mrb[14].mxu1 }
 0x110   :  { %v969_v24 = vpop.f32.mrb[15].mxu0  ;;  %v1011_v29 = vpop.f32.mrb[15].mxu1 }
 0x111   :  { %v1278_v28 = vadd.f32 %v969_v24, %v968_v22  ;;  %v1280_v30 = vadd.f32 %v1011_v29, %v1010_v26  ;;  %v439_v35 = vadd.f32 %v1273_v21, %v438_v31 }
 0x113   :  { %v440_v45 = vadd.f32 %v1278_v28, %v439_v35 }
 0x115   :  { %v971_v32 = vpop.f32.mrb[16].mxu0  ;;  %v1013_v34 = vpop.f32.mrb[16].mxu1 }
 0x116   :  { %v972_v33 = vpop.f32.mrb[17].mxu0  ;;  %v1014_v38 = vpop.f32.mrb[17].mxu1 }
 0x117   :  { %v1284_v36 = vadd.f32 %v972_v33, %v971_v32  ;;  %v974_v37 = vpop.f32.mrb[18].mxu0  ;;  %v1286_v40 = vadd.f32 %v1014_v38, %v1013_v34  ;;  %v1016_v41 = vpop.f32.mrb[18].mxu1 }
 0x118   :  { %v975_v39 = vpop.f32.mrb[19].mxu0  ;;  %v1017_v43 = vpop.f32.mrb[19].mxu1 }
 0x119   :  { %v1288_v42 = vadd.f32 %v975_v39, %v974_v37  ;;  %v1290_v44 = vadd.f32 %v1017_v43, %v1016_v41  ;;  %v441_v47 = vadd.f32 %v1284_v36, %v440_v45 }
 0x11b   :  { %v442_v61 = vadd.f32 %v1288_v42, %v441_v47 }
 0x11d   :  { %v977_v48 = vpop.f32.mrb[20].mxu0  ;;  %v1019_v51 = vpop.f32.mrb[20].mxu1 }
 0x11e   :  { %v978_v49 = vpop.f32.mrb[21].mxu0  ;;  %v1020_v56 = vpop.f32.mrb[21].mxu1 }
 0x11f   :  { %v1294_v53 = vadd.f32 %v978_v49, %v977_v48  ;;  %v980_v55 = vpop.f32.mrb[22].mxu0  ;;  %v1296_v59 = vadd.f32 %v1020_v56, %v1019_v51  ;;  %v1022_v60 = vpop.f32.mrb[22].mxu1 }
 0x120   :  { %v981_v57 = vpop.f32.mrb[23].mxu0  ;;  %v1023_v1 = vpop.f32.mrb[23].mxu1 }
 0x121   :  { %v1299_v63 = vadd.f32 %v981_v57, %v980_v55  ;;  %v443_v3 = vadd.f32 %v1294_v53, %v442_v61 }
 0x123   :  { %v444_v7 = vadd.f32 %v1299_v63, %v443_v3 }
 0x125   :  { %v983_v4 = vpop.f32.mrb[24].mxu0 }
 0x126   :  { %v984_v5 = vpop.f32.mrb[25].mxu0 }
 0x127   :  { %v1303_v8 = vadd.f32 %v984_v5, %v983_v4  ;;  %v986_v9 = vpop.f32.mrb[26].mxu0 }
 0x128   :  { %v987_v11 = vpop.f32.mrb[27].mxu0 }
 0x129   :  { %v445_v12 = vadd.f32 %v1303_v8, %v444_v7  ;;  %v1306_v14 = vadd.f32 %v987_v11, %v986_v9 }
 0x12b   :  { %v446_v16 = vadd.f32 %v1306_v14, %v445_v12 }
 0x12d   :  { %v447_v17 = vadd.f32 %v1247_v50, %v446_v16 }
 0x12f   :  { %v448_v18 = vadd.f32 %v1251_v54, %v447_v17 }
 0x131   :  { %v449_v19 = vadd.f32 %v1255_v62, %v448_v18 }
 0x133   :  { %v450_v20 = vadd.f32 %v1259_v2, %v449_v19 }
 0x135   :  { %v451_v22 = vadd.f32 %v1263_v10, %v450_v20 }
 0x137   :  { %v452_v23 = vadd.f32 %v1269_v15, %v451_v22 }
 0x139   :  { %v453_v24 = vadd.f32 %v1275_v25, %v452_v23 }
 0x13b   :  { %v454_v26 = vadd.f32 %v1280_v30, %v453_v24 }
 0x13d   :  { %v455_v27 = vadd.f32 %v1286_v40, %v454_v26 }
 0x13f   :  { %v456_v29 = vadd.f32 %v1290_v44, %v455_v27 }
 0x141   :  { %v457_v31 = vadd.f32 %v1296_v59, %v456_v29 }
 0x143   :  { %v458_v32 = vrot.slane %v457_v31, 4 }
 0x145   :  { %v459_v33 = vadd.f32 %v458_v32, %v457_v31 }
 0x147   :  { %v460_v34 = vrot.slane %v459_v33, 2 }
 0x149   :  { %v461_v35 = vadd.f32 %v460_v34, %v459_v33 }
 0x14b   :  { %v462_v37 = vrot.slane %v461_v35, 1 }
 0x14d   :  { %v463_v38 = vadd.f32 %v462_v37, %v461_v35 }
 0x14f   :  { %v1320_v39 = vmul.f32 0.005, %v463_v38 }
 0x151   :  { %v465_v41 = vsub.f32 %v1245_v46, %v1320_v39  ;;  %v466_v43 = vsub.f32 %v1249_v52, %v1320_v39  ;;  %v467_v45 = vsub.f32 %v1253_v58, %v1320_v39  ;;  %v468_v49 = vsub.f32 %v1257_v0, %v1320_v39 }
 0x152   :  { %v469_v51 = vsub.f32 %v1261_v6, %v1320_v39  ;;  %v470_v57 = vsub.f32 %v1267_v13, %v1320_v39  ;;  %v471_v1 = vsub.f32 %v1273_v21, %v1320_v39  ;;  %v472_v5 = vsub.f32 %v1278_v28, %v1320_v39 }
 0x153   :  { %v490_v47 = vmul.f32 %v465_v41, %v465_v41  ;;  %v491_v48 = vmul.f32 %v466_v43, %v466_v43  ;;  %v492_v55 = vmul.f32 %v467_v45, %v467_v45  ;;  %v493_v60 = vmul.f32 %v468_v49, %v468_v49 }
 0x154   :  { %v494_v3 = vmul.f32 %v469_v51, %v469_v51  ;;  %v495_v7 = vmul.f32 %v470_v57, %v470_v57  ;;  %v473_v11 = vsub.f32 %v1284_v36, %v1320_v39  ;;  %v496_v12 = vmul.f32 %v471_v1, %v471_v1 }
 0x155   :  { %v515_v56 = vadd.f32 %v491_v48, %v490_v47  ;;  %v474_v17 = vsub.f32 %v1288_v42, %v1320_v39  ;;  %v497_v18 = vmul.f32 %v472_v5, %v472_v5  ;;  %v475_v20 = vsub.f32 %v1294_v53, %v1320_v39 }
 0x156   :  { %v498_v22 = vmul.f32 %v473_v11, %v473_v11  ;;  %v476_v24 = vsub.f32 %v1299_v63, %v1320_v39  ;;  %v477_v29 = vsub.f32 %v1303_v8, %v1320_v39  ;;  %v478_v33 = vsub.f32 %v1306_v14, %v1320_v39 }
 0x157   :  { %v516_v61 = vadd.f32 %v515_v56, %v492_v55  ;;  %v499_v26 = vmul.f32 %v474_v17, %v474_v17  ;;  %v500_v31 = vmul.f32 %v475_v20, %v475_v20  ;;  %v479_v37 = vsub.f32 %v1247_v50, %v1320_v39 }
 0x158   :  { %v501_v34 = vmul.f32 %v476_v24, %v476_v24  ;;  %v502_v38 = vmul.f32 %v477_v29, %v477_v29  ;;  %v480_v43 = vsub.f32 %v1251_v54, %v1320_v39  ;;  %v503_v45 = vmul.f32 %v478_v33, %v478_v33 }
 0x159   :  { %v517_v4 = vadd.f32 %v516_v61, %v493_v60  ;;  %v481_v48 = vsub.f32 %v1255_v62, %v1320_v39  ;;  %v504_v49 = vmul.f32 %v479_v37, %v479_v37  ;;  %v482_v55 = vsub.f32 %v1259_v2, %v1320_v39 }
 0x15a   :  { %v505_v56 = vmul.f32 %v480_v43, %v480_v43  ;;  %v483_v60 = vsub.f32 %v1263_v10, %v1320_v39 }
 0x15b   :  { %v518_v9 = vadd.f32 %v517_v4, %v494_v3  ;;  %v506_v61 = vmul.f32 %v481_v48, %v481_v48  ;;  %v484_v3 = vsub.f32 %v1269_v15, %v1320_v39  ;;  %v507_v4 = vmul.f32 %v482_v55, %v482_v55 }
 0x15d   :  { %v519_v16 = vadd.f32 %v518_v9, %v495_v7  ;;  %v485_v7 = vsub.f32 %v1275_v25, %v1320_v39  ;;  %v508_v9 = vmul.f32 %v483_v60, %v483_v60 }
 0x15f   :  { %v520_v19 = vadd.f32 %v519_v16, %v496_v12  ;;  %v486_v12 = vsub.f32 %v1280_v30, %v1320_v39  ;;  %v509_v16 = vmul.f32 %v484_v3, %v484_v3 }
 0x161   :  { %v521_v23 = vadd.f32 %v520_v19, %v497_v18  ;;  %v487_v18 = vsub.f32 %v1286_v40, %v1320_v39  ;;  %v510_v19 = vmul.f32 %v485_v7, %v485_v7 }
 0x163   :  { %v522_v27 = vadd.f32 %v521_v23, %v498_v22  ;;  %v488_v22 = vsub.f32 %v1290_v44, %v1320_v39  ;;  %v511_v23 = vmul.f32 %v486_v12, %v486_v12 }
 0x165   :  { %v523_v32 = vadd.f32 %v522_v27, %v499_v26  ;;  %v489_v26 = vsub.f32 %v1296_v59, %v1320_v39  ;;  %v512_v27 = vmul.f32 %v487_v18, %v487_v18 }
 0x167   :  { %v524_v35 = vadd.f32 %v523_v32, %v500_v31  ;;  %v513_v31 = vmul.f32 %v488_v22, %v488_v22  ;;  %v514_v33 = vmul.f32 %v489_v26, %v489_v26 }
 0x169   :  { %v525_v41 = vadd.f32 %v524_v35, %v501_v34 }
 0x16b   :  { %v526_v47 = vadd.f32 %v525_v41, %v502_v38 }
 0x16d   :  { %v527_v51 = vadd.f32 %v526_v47, %v503_v45 }
 0x16f   :  { %v528_v57 = vadd.f32 %v527_v51, %v504_v49  ;;  %v553_v51 = vlaneseq }
 0x171   :  { %v529_v1 = vadd.f32 %v528_v57, %v505_v56  ;;  %v554_v55 = vshrl.u32 %v553_v51, 7  ;;  %v548_v56 = vld [vmem:[%s1445_s2] sm:$0x1] }
 0x173   :  { %v530_v5 = vadd.f32 %v529_v1, %v506_v61  ;;  %v555_v57 = vsub.s32 0, %v554_v55  ;;  %v550_v1 = vld [vmem:[%s1446_s3] sm:$0x1] }
 0x175   :  { %v531_v11 = vadd.f32 %v530_v5, %v507_v4 }
 0x177   :  { %v532_v17 = vadd.f32 %v531_v11, %v508_v9 }
 0x179   :  { %v533_v20 = vadd.f32 %v532_v17, %v509_v16 }
 0x17b   :  { %v534_v24 = vadd.f32 %v533_v20, %v510_v19 }
 0x17d   :  { %v535_v29 = vadd.f32 %v534_v24, %v511_v23 }
 0x17f   :  { %v536_v32 = vadd.f32 %v535_v29, %v512_v27 }
 0x181   :  { %v537_v34 = vadd.f32 %v536_v32, %v513_v31 }
 0x183   :  { %v538_v35 = vadd.f32 %v537_v34, %v514_v33 }
 0x185   :  { %v539_v37 = vrot.slane %v538_v35, 4 }
 0x187   :  { %v540_v38 = vadd.f32 %v539_v37, %v538_v35 }
 0x189   :  { %v541_v41 = vrot.slane %v540_v38, 2 }
 0x18b   :  { %v542_v43 = vadd.f32 %v541_v41, %v540_v38 }
 0x18d   :  { %v543_v45 = vrot.slane %v542_v43, 1 }
 0x18f   :  { %v544_v47 = vadd.f32 %v543_v45, %v542_v43 }
 0x191   :  { %v545_v48 = vmul.f32 0.005, %v544_v47 }
 0x193   :  { %v546_v49 = vadd.f32 1e-05, %v545_v48 }
 0x195   :  { %1095 = vrsqrt.f32 %v546_v49 }
 0x19f   :  { %v1096_v60 = vpop.eup %1095 }
 0x1a0   :  { %v549_v61 = vmul.f32 %v1096_v60, %v548_v56 }
 0x1a2   :  { %v551_v3 = vmul.f32 %v549_v61, %v1320_v39  ;;  %v556_v4 = vrot.slane %v549_v61, %v555_v57 }
 0x1a4   :  { %v552_v5 = vsub.f32 %v550_v1, %v551_v3  ;;  %v557_v7 = vmul.f32 %v1245_v46, %v556_v4  ;;  %v558_v9 = vmul.f32 %v1249_v52, %v556_v4  ;;  %v559_v11 = vmul.f32 %v1253_v58, %v556_v4 }
 0x1a5   :  { %v560_v12 = vmul.f32 %v1257_v0, %v556_v4  ;;  %v561_v16 = vmul.f32 %v1261_v6, %v556_v4  ;;  %v562_v17 = vmul.f32 %v1267_v13, %v556_v4  ;;  %v563_v18 = vmul.f32 %v1273_v21, %v556_v4 }
 0x1a6   :  { %v564_v19 = vmul.f32 %v1278_v28, %v556_v4  ;;  %v565_v39 = vmul.f32 %v1284_v36, %v556_v4  ;;  %v566_v20 = vmul.f32 %v1288_v42, %v556_v4  ;;  %v567_v46 = vmul.f32 %v1294_v53, %v556_v4 }
 0x1a7   :  { %v568_v52 = vmul.f32 %v1299_v63, %v556_v4  ;;  %v569_v58 = vmul.f32 %v1303_v8, %v556_v4  ;;  %v570_v0 = vmul.f32 %v1306_v14, %v556_v4  ;;  %v571_v6 = vmul.f32 %v1247_v50, %v556_v4 }
 0x1a8   :  { %v572_v13 = vmul.f32 %v1251_v54, %v556_v4  ;;  %v573_v21 = vmul.f32 %v1255_v62, %v556_v4  ;;  %v574_v28 = vmul.f32 %v1259_v2, %v556_v4  ;;  %v575_v36 = vmul.f32 %v1263_v10, %v556_v4 }
 0x1a9   :  { %v576_v42 = vmul.f32 %v1269_v15, %v556_v4  ;;  %v577_v53 = vmul.f32 %v1275_v25, %v556_v4  ;;  %v586_v22 = vrot.slane %v552_v5, %v555_v57  ;;  %v578_v63 = vmul.f32 %v1280_v30, %v556_v4 }
 0x1aa   :  { %v579_v8 = vmul.f32 %v1286_v40, %v556_v4  ;;  %v580_v14 = vmul.f32 %v1290_v44, %v556_v4  ;;  %v581_v50 = vmul.f32 %v1296_v59, %v556_v4 }
 0x1ab   :  { %v588_v54 = vadd.f32 %v586_v22, %v557_v7  ;;  %v589_v23 = vadd.f32 %v586_v22, %v558_v9  ;;  %v590_v62 = vadd.f32 %v586_v22, %v559_v11  ;;  %v591_v24 = vadd.f32 %v586_v22, %v560_v12 }
 0x1ac   :  { %v592_v2 = vadd.f32 %v586_v22, %v561_v16  ;;  %v593_v26 = vadd.f32 %v586_v22, %v562_v17  ;;  %v594_v10 = vadd.f32 %v586_v22, %v563_v18  ;;  %v595_v27 = vadd.f32 %v586_v22, %v564_v19 }
 0x1ad   :  { %v596_v15 = vadd.f32 %v586_v22, %v565_v39  ;;  %v597_v29 = vadd.f32 %v586_v22, %v566_v20  ;;  %v598_v25 = vadd.f32 %v586_v22, %v567_v46  ;;  %v599_v31 = vadd.f32 %v586_v22, %v568_v52 }
 0x1ae   :  { %v600_v32 = vadd.f32 %v586_v22, %v569_v58  ;;  %v601_v30 = vadd.f32 %v586_v22, %v570_v0  ;;  %v602_v33 = vadd.f32 %v586_v22, %v571_v6  ;;  %v603_v40 = vadd.f32 %v586_v22, %v572_v13 }
 0x1af   :  { %v604_v34 = vadd.f32 %v586_v22, %v573_v21  ;;  %v605_v44 = vadd.f32 %v586_v22, %v574_v28  ;;  %v606_v35 = vadd.f32 %v586_v22, %v575_v36  ;;  %v607_v59 = vadd.f32 %v586_v22, %v576_v42 }
 0x1b0   :  { %v608_v37 = vadd.f32 %v586_v22, %v577_v53  ;;  %v609_v38 = vadd.f32 %v586_v22, %v578_v63  ;;  %v610_v41 = vadd.f32 %v586_v22, %v579_v8  ;;  %v611_v43 = vadd.f32 %v586_v22, %v580_v14 }
 0x1b1   :  { %v612_v45 = vadd.f32 %v586_v22, %v581_v50  ;;  %v613_v47 = vmax.f32 %v588_v54, 0.0  ;;  %v614_v48 = vmax.f32 %v589_v23, 0.0  ;;  %v615_v49 = vmax.f32 %v590_v62, 0.0 }
 0x1b2   :  { %v616_v51 = vmax.f32 %v591_v24, 0.0  ;;  %v617_v55 = vmax.f32 %v592_v2, 0.0  ;;  %v618_v56 = vmax.f32 %v593_v26, 0.0  ;;  %v619_v57 = vmax.f32 %v594_v10, 0.0 }
 0x1b3   :  { %v620_v60 = vmax.f32 %v595_v27, 0.0  ;;  %v621_v61 = vmax.f32 %v596_v15, 0.0  ;;  %v622_v1 = vmax.f32 %v597_v29, 0.0  ;;  %v623_v3 = vmax.f32 %v598_v25, 0.0 }
 0x1b4   :  { %v624_v4 = vmax.f32 %v599_v31, 0.0  ;;  %v625_v5 = vmax.f32 %v600_v32, 0.0  ;;  %v626_v7 = vmax.f32 %v601_v30, 0.0  ;;  %v627_v9 = vmax.f32 %v602_v33, 0.0 }
 0x1b5   :  { %v628_v11 = vmax.f32 %v603_v40, 0.0  ;;  %v629_v12 = vmax.f32 %v604_v34, 0.0  ;;  %v630_v16 = vmax.f32 %v605_v44, 0.0  ;;  %v631_v17 = vmax.f32 %v606_v35, 0.0 }
 0x1b6   :  { %v632_v18 = vmax.f32 %v607_v59, 0.0  ;;  %v633_v19 = vmax.f32 %v608_v37, 0.0  ;;  %v634_v39 = vmax.f32 %v609_v38, 0.0  ;;  %v635_v20 = vmax.f32 %v610_v41, 0.0 }
 0x1b7   :  { %v636_v46 = vmax.f32 %v611_v43, 0.0  ;;  %v637_v52 = vmax.f32 %v612_v45, 0.0  ;;  %v863_v58 = vpack.c.bf16 %v614_v48, %v613_v47  ;;  %v868_v0 = vpack.c.bf16 %v616_v51, %v615_v49 }
 0x1b8   :  { %v873_v6 = vpack.c.bf16 %v618_v56, %v617_v55  ;;  %v878_v13 = vpack.c.bf16 %v620_v60, %v619_v57  ;;  %v883_v21 = vpack.c.bf16 %v622_v1, %v621_v61  ;;  %v888_v28 = vpack.c.bf16 %v624_v4, %v623_v3 }
 0x1b9   :  { %v859_v36 = vpack.c.bf16 %v637_v52, %v637_v52  ;;  %864 = vst [vmem:[%s1447_s4] sm:$0xff] %v863_v58   ;;  %920 = vst [vmem:[%s1447_s4 + $0x8] sm:$0xff] %v868_v0   ;;  %v893_v42 = vpack.c.bf16 %v626_v7, %v625_v5  ;;  %v898_v53 = vpack.c.bf16 %v628_v11, %v627_v9 }
 0x1ba   :  { %v903_v22 = vpack.c.bf16 %v630_v16, %v629_v12  ;;  %921 = vst [vmem:[%s1447_s4 + $0x10] sm:$0xff] %v873_v6   ;;  %922 = vst [vmem:[%s1447_s4 + $0x18] sm:$0xff] %v878_v13   ;;  %v908_v63 = vpack.c.bf16 %v632_v18, %v631_v17  ;;  %v913_v8 = vpack.c.bf16 %v634_v39, %v633_v19 }
 0x1bb   :  { %923 = vst [vmem:[%s1447_s4 + $0x20] sm:$0xff] %v883_v21   ;;  %924 = vst [vmem:[%s1447_s4 + $0x28] sm:$0xff] %v888_v28   ;;  %v918_v14 = vpack.c.bf16 %v636_v46, %v635_v20 }
 0x1bc   :  { %925 = vst [vmem:[%s1447_s4 + $0x30] sm:$0xff] %v893_v42   ;;  %926 = vst [vmem:[%s1447_s4 + $0x38] sm:$0xff] %v898_v53  }
 0x1bd   :  { %927 = vst [vmem:[%s1447_s4 + $0x40] sm:$0xff] %v903_v22   ;;  %763 = vst [vmem:[%s1447_s4 + $0x60] sm:$0xf] %v859_v36 }
 0x1be   :  { %928 = vst [vmem:[%s1447_s4 + $0x48] sm:$0xff] %v908_v63   ;;  %929 = vst [vmem:[%s1447_s4 + $0x50] sm:$0xff] %v913_v8  }
 0x1bf   :  { %930 = vst [vmem:[%s1447_s4 + $0x58] sm:$0xff] %v918_v14  }

// kernel: net_forward.5
= control target key start
LH: loop header
LB: loop body
LE: loop exit
PB: predicated region body
PF: predicated region fallthrough
CT: control target
= control target key end

     0   :  { %v111_v28 = vlaneseq  ;;  %v941_v35 = vmov 1966171168   ;;  %s1201_s0 = inlined_call_operand.vmem [shape: bf16[2,512], index: 0, kind: input, shape index: {}]   ;;  %s1202_s1 = inlined_call_operand.vmem [shape: bf16[512,128], index: 1, kind: input, shape index: {}]   ;;  %s1203_s2 = inlined_call_operand.vmem [shape: f32[1,128], index: 2, kind: input, shape index: {}]   ;;  %s1204_s3 = inlined_call_operand.vmem [shape: f32[1,128], index: 3, kind: input, shape index: {}]   ;;  %s1205_s4 = inlined_call_operand.vmem [shape: bf16[128,128], index: 4, kind: input, shape index: {}]   ;;  %s1206_s5 = inlined_call_operand.vmem [shape: f32[1,128], index: 5, kind: input, shape index: {}]   ;;  %s1207_s6 = inlined_call_operand.vmem [shape: f32[1,128], index: 6, kind: input, shape index: {}]   ;;  %s1208_s7 = inlined_call_operand.vmem [shape: bf16[128,128], index: 7, kind: input, shape index: {}]   ;;  %s1209_s8 = inlined_call_operand.vmem [shape: f32[1,128], index: 8, kind: input, shape index: {}]   ;;  %s1210_s9 = inlined_call_operand.hbm [shape: f32[2,128], index: 9, kind: output, shape index: {}]  }
   0x1   :  { %v865_v0 = vld [vmem:[%s1202_s1 + $0x40] sm:$0xff]   ;;  %v869_v4 = vld [vmem:[%s1202_s1 + $0x48] sm:$0xff]   ;;  %v873_v8 = vld [vmem:[%s1202_s1 + $0x50] sm:$0xff]   ;;  %v109_v36 = vunpack.c.l.s4 %v941_v35 }
   0x2   :  { %v866_v1 = vld [vmem:[%s1202_s1 + $0xc0] sm:$0xff]   ;;  %759 = vmatprep.subr.bf16.mxu0 %v865_v0  ;;  %v870_v5 = vld [vmem:[%s1202_s1 + $0xc8] sm:$0xff]   ;;  %v874_v9 = vld [vmem:[%s1202_s1 + $0xd0] sm:$0xff]   ;;  %v1091_v33 = vshrl.u32 %v111_v28, 7 }
   0x3   :  { %v867_v2 = vld [vmem:[%s1202_s1] sm:$0xff]   ;;  %781 = vmatprep.subr.bf16.mxu1 %v866_v1  ;;  %v871_v6 = vld [vmem:[%s1202_s1 + $0x8] sm:$0xff]   ;;  %v875_v10 = vld [vmem:[%s1202_s1 + $0x10] sm:$0xff]   ;;  %v110_v38 = vunpack.c.0.s8 %v109_v36 }
   0x4   :  { %v868_v3 = vld [vmem:[%s1202_s1 + $0x80] sm:$0xff]   ;;  %760 = vmatpush3.bf16.msra.mxu0 %v867_v2  ;;  %v872_v7 = vld [vmem:[%s1202_s1 + $0x88] sm:$0xff]   ;;  %v876_v11 = vld [vmem:[%s1202_s1 + $0x90] sm:$0xff]  }
   0x5   :  { %782 = vmatpush3.bf16.msra.mxu1 %v868_v3  ;;  %761 = vmatprep.subr.bf16.mxu0 %v869_v4  ;;  %v877_v12 = vld [vmem:[%s1202_s1 + $0x58] sm:$0xff]   ;;  %v881_v16 = vld [vmem:[%s1202_s1 + $0x60] sm:$0xff]   ;;  %v885_v20 = vld [vmem:[%s1202_s1 + $0x68] sm:$0xff]   ;;  %v113_v39 = vsub.s32 %v110_v38, %v1091_v33 }
   0x6   :  { %783 = vmatprep.subr.bf16.mxu1 %v870_v5  ;;  %v878_v13 = vld [vmem:[%s1202_s1 + $0xd8] sm:$0xff]   ;;  %v882_v17 = vld [vmem:[%s1202_s1 + $0xe0] sm:$0xff]   ;;  %v886_v21 = vld [vmem:[%s1202_s1 + $0xe8] sm:$0xff]  }
   0x7   :  { %v879_v14 = vld [vmem:[%s1202_s1 + $0x18] sm:$0xff]   ;;  %v883_v18 = vld [vmem:[%s1202_s1 + $0x20] sm:$0xff]   ;;  %v887_v22 = vld [vmem:[%s1202_s1 + $0x28] sm:$0xff]  }
   0x8   :  { %762 = vmatpush3.bf16.msra.mxu0 %v871_v6  ;;  %v880_v15 = vld [vmem:[%s1202_s1 + $0x98] sm:$0xff]   ;;  %v884_v19 = vld [vmem:[%s1202_s1 + $0xa0] sm:$0xff]   ;;  %v888_v23 = vld [vmem:[%s1202_s1 + $0xa8] sm:$0xff]  }
   0x9   :  { %784 = vmatpush3.bf16.msra.mxu1 %v872_v7  ;;  %763 = vmatprep.subr.bf16.mxu0 %v873_v8  ;;  %v889_v24 = vld [vmem:[%s1202_s1 + $0x70] sm:$0xff]   ;;  %v893_v29 = vld [vmem:[%s1202_s1 + $0x78] sm:$0xff]   ;;  %v709_v34 = vld.sshfl [vmem:[%s1201_s0] sm:$0x33 pattern:$0x75316420] }
   0xa   :  { %785 = vmatprep.subr.bf16.mxu1 %v874_v9  ;;  %v890_v25 = vld [vmem:[%s1202_s1 + $0xf0] sm:$0xff]   ;;  %v894_v30 = vld [vmem:[%s1202_s1 + $0xf8] sm:$0xff]   ;;  %v107_v37 = vcombine.high %v709_v34, %v709_v34  ;;  %v114_v41 = vrot.slane %v709_v34, %v113_v39 }
   0xb   :  { %v891_v26 = vld [vmem:[%s1202_s1 + $0x30] sm:$0xff]   ;;  %v895_v31 = vld [vmem:[%s1202_s1 + $0x38] sm:$0xff]  }
   0xc   :  { %764 = vmatpush3.bf16.msra.mxu0 %v875_v10  ;;  %v892_v27 = vld [vmem:[%s1202_s1 + $0xb0] sm:$0xff]   ;;  %v896_v32 = vld [vmem:[%s1202_s1 + $0xb8] sm:$0xff]   ;;  %v121_v40 = vrot.slane %v107_v37, %v113_v39  ;;  %v122_v43 = vcombine.high %v114_v41, %v114_v41 }
   0xd   :  { %786 = vmatpush3.bf16.msra.mxu1 %v876_v11  ;;  %765 = vmatprep.subr.bf16.mxu0 %v877_v12 }
   0xe   :  { %787 = vmatprep.subr.bf16.mxu1 %v878_v13  ;;  %352 = vmatprep.mubr.bf16.mxu0 %v121_v40  ;;  %v123_v42 = vcombine.high %v121_v40, %v121_v40 }
  0x10   :  { %766 = vmatpush3.bf16.msra.mxu0 %v879_v14  ;;  %392 = vmatprep.mubr.bf16.mxu1 %v123_v42 }
  0x11   :  { %788 = vmatpush3.bf16.msra.mxu1 %v880_v15  ;;  %767 = vmatprep.subr.bf16.mxu0 %v881_v16 }
  0x12   :  { %789 = vmatprep.subr.bf16.mxu1 %v882_v17 }
  0x14   :  { %768 = vmatpush3.bf16.msra.mxu0 %v883_v18 }
  0x15   :  { %790 = vmatpush3.bf16.msra.mxu1 %v884_v19  ;;  %769 = vmatprep.subr.bf16.mxu0 %v885_v20 }
  0x16   :  { %791 = vmatprep.subr.bf16.mxu1 %v886_v21 }
  0x18   :  { %770 = vmatpush3.bf16.msra.mxu0 %v887_v22 }
  0x19   :  { %792 = vmatpush3.bf16.msra.mxu1 %v888_v23  ;;  %771 = vmatprep.subr.bf16.mxu0 %v889_v24 }
  0x1a   :  { %793 = vmatprep.subr.bf16.mxu1 %v890_v25 }
  0x1c   :  { %772 = vmatpush3.bf16.msra.mxu0 %v891_v26 }
  0x1d   :  { %794 = vmatpush3.bf16.msra.mxu1 %v892_v27  ;;  %773 = vmatprep.subr.bf16.mxu0 %v893_v29 }
  0x1e   :  { %795 = vmatprep.subr.bf16.mxu1 %v894_v30 }
  0x20   :  { %774 = vmatpush3.bf16.msra.mxu0 %v895_v31 }
  0x21   :  { %796 = vmatpush3.bf16.msra.mxu1 %v896_v32 }
  0x23   :  { %353 = vmatmul.mubr.bf16.vlgmr.msra.gmra.mrb[0].mxu0 %v114_v41 }
  0x24   :  { %14 = vsyncpa [#allocation3], 0  ;;  %393 = vmatmul.mubr.bf16.vlgmr.msra.gmra.mrb[0].mxu1 %v122_v43  ;;  %v897_v44 = vld [vmem:[%s1205_s4] sm:$0xff]   ;;  %v942_v45 = vmov 0.0   ;;  %v898_v46 = vld [vmem:[%s1205_s4 + $0x8] sm:$0xff]   ;;  %vm943_vm0 = vmmov 0  }
  0x25   :  { %821 = vmatprep.subr.bf16.mxu0 %v942_v45  ;;  %841 = vmatprep.subr.bf16.mxu1 %v942_v45  ;;  %v899_v47 = vld [vmem:[%s1205_s4 + $0x10] sm:$0xff]   ;;  %v900_v48 = vld [vmem:[%s1205_s4 + $0x18] sm:$0xff]   ;;  %v901_v49 = vld [vmem:[%s1205_s4 + $0x20] sm:$0xff]   ;;  %vm402_vm1 = vcmask 1041408   ;;  %v1138_v20 = vsub.s32 0, %v1091_v33 }
  0x26   :  { %822 = vmatpush3.bf16.msra.mxu0 %v897_v44  ;;  %v902_v50 = vld [vmem:[%s1205_s4 + $0x28] sm:$0xff]   ;;  %v903_v51 = vld [vmem:[%s1205_s4 + $0x30] sm:$0xff]   ;;  %837 = vmatprep.mubr.msk.bf16.mxu0 %vm943_vm0, %v942_v45  ;;  %v904_v52 = vld [vmem:[%s1205_s4 + $0x38] sm:$0xff]  }
  0x27   :  { %823 = vmatprep.subr.bf16.mxu0 %v942_v45  ;;  %857 = vmatprep.mubr.msk.bf16.mxu1 %vm943_vm0, %v942_v45  ;;  %v400_v19 = vld [vmem:[%s1203_s2] sm:$0x1]  ;;  %v906_v33 = vld [vmem:[%s1208_s7 + $0x8] sm:$0xff]   ;;  %v907_v34 = vld [vmem:[%s1208_s7 + $0x10] sm:$0xff]  }
  0x28   :  { %v401_v23 = vld [vmem:[%s1204_s3] sm:$0x1]  ;;  %v908_v35 = vld [vmem:[%s1208_s7 + $0x18] sm:$0xff]   ;;  %v910_v37 = vld [vmem:[%s1208_s7 + $0x28] sm:$0xff]  }
  0x29   :  { %v905_v32 = vld [vmem:[%s1208_s7] sm:$0xff]   ;;  %v911_v38 = vld [vmem:[%s1208_s7 + $0x30] sm:$0xff]   ;;  %v912_v39 = vld [vmem:[%s1208_s7 + $0x38] sm:$0xff]  }
  0x2a   :  { %824 = vmatpush3.bf16.msra.mxu0 %v898_v46  ;;  %842 = vmatpush3.bf16.msra.mxu1 %v905_v32  ;;  %v909_v36 = vld [vmem:[%s1208_s7 + $0x20] sm:$0xff]  }
  0x2b   :  { %825 = vmatprep.subr.bf16.mxu0 %v942_v45  ;;  %843 = vmatprep.subr.bf16.mxu1 %v942_v45 }
  0x2e   :  { %826 = vmatpush3.bf16.msra.mxu0 %v899_v47  ;;  %844 = vmatpush3.bf16.msra.mxu1 %v906_v33 }
  0x2f   :  { %827 = vmatprep.subr.bf16.mxu0 %v942_v45  ;;  %845 = vmatprep.subr.bf16.mxu1 %v942_v45 }
  0x32   :  { %828 = vmatpush3.bf16.msra.mxu0 %v900_v48  ;;  %846 = vmatpush3.bf16.msra.mxu1 %v907_v34 }
  0x33   :  { %829 = vmatprep.subr.bf16.mxu0 %v942_v45  ;;  %847 = vmatprep.subr.bf16.mxu1 %v942_v45 }
  0x36   :  { %830 = vmatpush3.bf16.msra.mxu0 %v901_v49  ;;  %848 = vmatpush3.bf16.msra.mxu1 %v908_v35 }
  0x37   :  { %831 = vmatprep.subr.bf16.mxu0 %v942_v45  ;;  %849 = vmatprep.subr.bf16.mxu1 %v942_v45 }
  0x3a   :  { %832 = vmatpush3.bf16.msra.mxu0 %v902_v50  ;;  %850 = vmatpush3.bf16.msra.mxu1 %v909_v36 }
  0x3b   :  { %833 = vmatprep.subr.bf16.mxu0 %v942_v45  ;;  %851 = vmatprep.subr.bf16.mxu1 %v942_v45 }
  0x3e   :  { %834 = vmatpush3.bf16.msra.mxu0 %v903_v51  ;;  %852 = vmatpush3.bf16.msra.mxu1 %v910_v37 }
  0x3f   :  { %835 = vmatprep.subr.bf16.mxu0 %v942_v45  ;;  %853 = vmatprep.subr.bf16.mxu1 %v942_v45 }
  0x42   :  { %836 = vmatpush3.bf16.msra.mxu0 %v904_v52  ;;  %854 = vmatpush3.bf16.msra.mxu1 %v911_v38 }
  0x43   :  { %855 = vmatprep.subr.bf16.mxu1 %v942_v45 }
  0x46   :  { %856 = vmatpush3.bf16.msra.mxu1 %v912_v39 }
  0xf6   :  { %v775_v53 = vpop.f32.mrb[0].mxu0 }
  0xf7   :  { %v776_v54 = vpop.f32.mrb[1].mxu0  ;;  %v797_v55 = vpop.f32.mrb[0].mxu1 }
  0xf8   :  { %v777_v56 = vadd.f32 %v776_v54, %v775_v53  ;;  %v778_v57 = vpop.f32.mrb[2].mxu0  ;;  %v798_v58 = vpop.f32.mrb[1].mxu1 }
  0xf9   :  { %v779_v59 = vpop.f32.mrb[3].mxu0  ;;  %v799_v60 = vadd.f32 %v798_v58, %v797_v55  ;;  %v800_v61 = vpop.f32.mrb[2].mxu1 }
  0xfa   :  { %v801_v62 = vpop.f32.mrb[3].mxu1 }
  0xfb   :  { %v395_v63 = vadd.f32 %v799_v60, %v777_v56 }
  0xfd   :  { %v403_v0 = vsel %vm402_vm1, %v395_v63, 0.0 }
  0xfe   :  { %v404_v1 = vrot.slane %v403_v0, 4 }
 0x100   :  { %v405_v2 = vadd.f32 %v404_v1, %v403_v0 }
 0x102   :  { %v406_v3 = vrot.slane %v405_v2, 2 }
 0x104   :  { %v407_v4 = vadd.f32 %v406_v3, %v405_v2  ;;  %v545_v2 = vld [vmem:[%s1207_s6] sm:$0x1] }
 0x106   :  { %v408_v5 = vrot.slane %v407_v4, 1 }
 0x108   :  { %v409_v6 = vadd.f32 %v408_v5, %v407_v4 }
 0x10a   :  { %v410_v7 = vmul.f32 0.5, %v409_v6 }
 0x10c   :  { %v411_v8 = vsub.f32 %v395_v63, %v410_v7 }
 0x10e   :  { %v412_v9 = vmul.f32 %v411_v8, %v411_v8 }
 0x110   :  { %v413_v10 = vsel %vm402_vm1, %v412_v9, 0.0 }
 0x111   :  { %v414_v11 = vrot.slane %v413_v10, 4 }
 0x113   :  { %v415_v12 = vadd.f32 %v414_v11, %v413_v10  ;;  %v750_v11 = vld [vmem:[%s1209_s8] ss:$0 sm:$0xff] }
 0x115   :  { %v416_v13 = vrot.slane %v415_v12, 2 }
 0x117   :  { %v417_v14 = vadd.f32 %v416_v13, %v415_v12 }
 0x119   :  { %v418_v15 = vrot.slane %v417_v14, 1 }
 0x11b   :  { %v419_v16 = vadd.f32 %v418_v15, %v417_v14 }
 0x11d   :  { %v420_v17 = vmul.f32 0.5, %v419_v16 }
 0x11f   :  { %v421_v18 = vadd.f32 1e-05, %v420_v17 }
 0x121   :  { %913 = vrsqrt.f32 %v421_v18 }
 0x12b   :  { %v914_v21 = vpop.eup %913 }
 0x12c   :  { %v423_v22 = vmul.f32 %v914_v21, %v400_v19 }
 0x12e   :  { %v427_v24 = vrot.slane %v423_v22, %v1138_v20  ;;  %v429_v25 = vmul.f32 %v423_v22, %v410_v7 }
 0x130   :  { %v430_v26 = vsub.f32 %v401_v23, %v429_v25  ;;  %v428_v27 = vmul.f32 %v427_v24, %v395_v63  ;;  %v544_v63 = vld [vmem:[%s1206_s5] sm:$0x1]  ;;  %s944_s5 = smov [#allocation2]  }
 0x131   :  { %s701_s25 = sshll.u32 %s944_s5, 4  ;;  %s702_s25 = int_to_ptr.vmem [resolvable:$true] %s701_s25 }
 0x132   :  { %v435_v28 = vrot.slane %v430_v26, %v1138_v20  ;;  %s917_s6 = scalar_lea.vmem %s702_s25, 32  ;;  %p922_p1 = scmp.lt.s32.totalorder %s702_s25, %s702_s25 }
 0x133   :  { %p918_p0 = scmp.ne.s32.totalorder %s702_s25, %s917_s6  ;;  %p923_p2 = scmp.lt.s32.totalorder %s917_s6, %s917_s6 }
 0x134   :  { %v437_v29 = vadd.f32 %v435_v28, %v428_v27 }
 0x135   :  { %p924_p3 = por %p923_p2, %p922_p1 }
 0x136   :  { %v438_v30 = vmax.f32 %v437_v29, 0.0 }
 0x137   :  { %p925_p4 = pnand %p924_p3, %p918_p0 }
 0x138   :  { %v439_v31 = vpack.c.bf16 %v438_v30, %v438_v30 }
 0x13a   :  { %838 = vmatmul.mubr.bf16.vlgmr.msra.gmra.mrb[4].mxu0 %v439_v31 }
 0x20d   :  { %v538_v40 = vpop.f32.mrb[4].mxu0 }
 0x20e   :  { %v546_v41 = vsel %vm402_vm1, %v538_v40, 0.0  ;;  %v839_v42 = vpop.f32.mrb[5].mxu0 }
 0x20f   :  { %v547_v43 = vrot.slane %v546_v41, 4  ;;  %v541_v44 = vpop.f32.mrb[6].mxu0 }
 0x210   :  { %v840_v46 = vpop.f32.mrb[7].mxu0 }
 0x211   :  { %v548_v47 = vadd.f32 %v547_v43, %v546_v41 }
 0x213   :  { %v549_v48 = vrot.slane %v548_v47, 2 }
 0x215   :  { %v550_v49 = vadd.f32 %v549_v48, %v548_v47 }
 0x217   :  { %v551_v50 = vrot.slane %v550_v49, 1 }
 0x219   :  { %v552_v51 = vadd.f32 %v551_v50, %v550_v49 }
 0x21b   :  { %v553_v52 = vmul.f32 0.5, %v552_v51 }
 0x21d   :  { %v554_v53 = vsub.f32 %v538_v40, %v553_v52 }
 0x21f   :  { %v555_v45 = vmul.f32 %v554_v53, %v554_v53 }
 0x221   :  { %v556_v54 = vsel %vm402_vm1, %v555_v45, 0.0 }
 0x222   :  { %v557_v55 = vrot.slane %v556_v54, 4 }
 0x224   :  { %v558_v56 = vadd.f32 %v557_v55, %v556_v54 }
 0x226   :  { %v559_v57 = vrot.slane %v558_v56, 2 }
 0x228   :  { %v560_v58 = vadd.f32 %v559_v57, %v558_v56 }
 0x22a   :  { %v561_v59 = vrot.slane %v560_v58, 1 }
 0x22c   :  { %v562_v60 = vadd.f32 %v561_v59, %v560_v58 }
 0x22e   :  { %v563_v61 = vmul.f32 0.5, %v562_v60 }
 0x230   :  { %v564_v62 = vadd.f32 1e-05, %v563_v61 }
 0x232   :  { %915 = vrsqrt.f32 %v564_v62 }
 0x23c   :  { %v916_v0 = vpop.eup %915 }
 0x23d   :  { %v566_v1 = vmul.f32 %v916_v0, %v544_v63 }
 0x23f   :  { %v570_v3 = vrot.slane %v566_v1, %v1138_v20  ;;  %v572_v4 = vmul.f32 %v566_v1, %v553_v52 }
 0x241   :  { %v573_v5 = vsub.f32 %v545_v2, %v572_v4  ;;  %v571_v6 = vmul.f32 %v570_v3, %v538_v40 }
 0x243   :  { %v578_v7 = vrot.slane %v573_v5, %v1138_v20 }
 0x245   :  { %v580_v8 = vadd.f32 %v578_v7, %v571_v6 }
 0x247   :  { %v581_v9 = vmax.f32 %v580_v8, 0.0 }
 0x249   :  { %v582_v10 = vpack.c.bf16 %v581_v9, %v581_v9 }
 0x24b   :  { %858 = vmatmul.mubr.bf16.vlgmr.msra.gmra.mrb[4].mxu1 %v582_v10 }
 0x31e   :  { %v688_v12 = vpop.f32.mrb[4].mxu1 }
 0x31f   :  { %v689_v13 = vadd.f32 %v750_v11, %v688_v12  ;;  %v859_v14 = vpop.f32.mrb[5].mxu1 }
 0x320   :  { %v691_v15 = vpop.f32.mrb[6].mxu1 }
 0x321   :  { %694 = vst [vmem:[#allocation2] sm:$0x3] %v689_v13  ;;  %v860_v16 = vpop.f32.mrb[7].mxu1 }
 0x322   :  { %928 = shalt.err (!%p925_p4)
}
 0x323   :  { %s929_s8 = scalar_lea.hbm %s1210_s9, 32 }
 0x324   :  { %p930_p5 = scmp.ne.s32.totalorder %s1210_s9, %s929_s8  ;;  %p933_p6 = scmp.lt.u32.totalorder %s929_s8, %s1210_s9 }
 0x326   :  { %p935_p7 = pnand %p933_p6, %p930_p5 }
 0x328   :  { %938 = shalt.err (!%p935_p7)
}
 0x329   :  { %704 = dma.vmem_to_hbm [thread:$0]  %s702_s25, 32, %s1210_s9, [#allocation3]  }
 0x32a   :  { %939 = dma.done.wait [#allocation3], 32  }
 0x32b   :  { %940 = vsyncadd [#allocation3], 4294967264 }
 0x32c   :  { %708 = vsyncpa [#allocation3], 1 }

</bundles_post_ra>
